<compile_context>
chip_gen: v5e
topology: v5e:2x2
jax: 0.10.0
libtpu: 0.0.40
codegen_flags: <defaults>
</compile_context>

<pallas_src>
import jax
import jax.numpy as jnp
from jax.experimental import pallas as pl
from jax.experimental.pallas import tpu as pltpu

KH = KW = 3
KK = KH * KW          # 9
NCORNER = 4


def _round_up(x, m):
    return (x + m - 1) // m * m


# ----------------------------------------------------------------------------
# Pallas kernel 1: fused offset net = 1x1 conv (channel adjust) + depthwise 3x3
# NCHW layout, W on lanes, zero padding via an in-kernel VMEM scratch.
# ----------------------------------------------------------------------------
def _offset_net_kernel(x_ref, w_adj_ref, b_adj_ref, w_off_ref, b_off_ref,
                       o_ref, xpad_ref):
    # x_ref:    (1, Cin, H, W)  VMEM
    # w_adj:    (Cin, C)        SMEM   (C = 18)
    # b_adj:    (C,)            SMEM
    # w_off:    (C, 9)          SMEM
    # b_off:    (C,)            SMEM
    # o_ref:    (1, C, H, W)    VMEM
    # xpad_ref: (H+2, W+2)      VMEM scratch (border stays zero)
    _, cin, h, w = x_ref.shape
    c_out = o_ref.shape[1]

    xpad_ref[...] = jnp.zeros(xpad_ref.shape, jnp.float32)

    for c in range(c_out):
        # 1x1 conv: Cin scalar-broadcast FMAs on the VPU (no MXU needed).
        xc = x_ref[0, 0] * w_adj_ref[0, c]
        for ci in range(1, cin):
            xc = xc + x_ref[0, ci] * w_adj_ref[ci, c]
        xc = xc + b_adj_ref[c]

        # depthwise 3x3 with zero padding: write channel into padded scratch,
        # read 9 statically-shifted taps.
        xpad_ref[1:h + 1, 1:w + 1] = xc
        acc = xpad_ref[0:h, 0:w] * w_off_ref[c, 0]
        for k in range(1, KK):
            i, j = k // KW, k % KW
            acc = acc + xpad_ref[i:i + h, j:j + w] * w_off_ref[c, k]
        o_ref[0, c] = acc + b_off_ref[c]


def offset_net_pallas(x, w_adj, b_adj, w_off, b_off):
    # x: (B, Cin, H, W) f32; w_adj: (Cin, C); b_adj: (C,); w_off: (C, 9); b_off: (C,)
    B, Cin, H, W = x.shape
    C = w_adj.shape[1]
    smem = pl.BlockSpec(memory_space=pltpu.MemorySpace.SMEM)
    # TODO(synk): for very large H*W, additionally tile H with a 1-row halo.
    return pl.pallas_call(
        _offset_net_kernel,
        out_shape=jax.ShapeDtypeStruct((B, C, H, W), jnp.float32),
        grid=(B,),
        in_specs=[
            pl.BlockSpec((1, Cin, H, W), lambda b: (b, 0, 0, 0)),
            smem, smem, smem, smem,
        ],
        out_specs=pl.BlockSpec((1, C, H, W), lambda b: (b, 0, 0, 0)),
        scratch_shapes=[pltpu.VMEM((H + 2, W + 2), jnp.float32)],
        compiler_params=pltpu.CompilerParams(
            dimension_semantics=("parallel",)),
    )(x, w_adj, b_adj, w_off, b_off)


# ----------------------------------------------------------------------------
# Pallas kernel 2: deformable conv hot path, tiled over P.
#   bilinear combine (masks expanded in-kernel) + grouped matmul on the MXU.
# ----------------------------------------------------------------------------
def _deform_kernel(v_ref, m_ref, wt_ref, o_ref):
    # v_ref:  (1, Cin_g*4, KK, TP)   gathered corner values
    # m_ref:  (1, 4, KK, TP)         bilinear corner weights (shared over Cin_g)
    # wt_ref: (1, Cout_g, Cin_g*KK)  group weights
    # o_ref:  (1, Cout_g, TP)
    cin_g = v_ref.shape[1] // NCORNER
    acc = None
    for c in range(cin_g):
        cols = (m_ref[0, 0] * v_ref[0, c * NCORNER + 0]
                + m_ref[0, 1] * v_ref[0, c * NCORNER + 1]
                + m_ref[0, 2] * v_ref[0, c * NCORNER + 2]
                + m_ref[0, 3] * v_ref[0, c * NCORNER + 3])          # (KK, TP)
        part = jnp.dot(wt_ref[0, :, c * KK:(c + 1) * KK], cols,
                       preferred_element_type=jnp.float32)          # (Cout_g, TP)
        acc = part if acc is None else acc + part
    o_ref[0] = acc


# ----------------------------------------------------------------------------
# Bilinear sampling setup: index math + ONE fused corner gather in plain JAX.
# torchvision.DeformConv2d semantics: offsets (N, 2*KK, Ho, Wo), (dy, dx) pairs
# per kernel tap; zero padding outside the input for the bilinear sample.
# ----------------------------------------------------------------------------
def _bilinear_gather(x, offs, groups, pad, stride, dil):
    B, Cin, H, W = x.shape
    Hout, Wout = offs.shape[2], offs.shape[3]
    P = Hout * Wout
    Cin_g = Cin // groups

    dy = offs[:, 0::2]                                   # (B, KK, Ho, Wo)
    dx = offs[:, 1::2]

    ki = (jnp.arange(KK) // KW).astype(jnp.float32)
    kj = (jnp.arange(KK) % KW).astype(jnp.float32)
    base_y = jnp.arange(Hout, dtype=jnp.float32) * stride - pad
    base_x = jnp.arange(Wout, dtype=jnp.float32) * stride - pad
    py = base_y[None, None, :, None] + (ki * dil)[None, :, None, None] + dy
    px = base_x[None, None, None, :] + (kj * dil)[None, :, None, None] + dx

    y0 = jnp.floor(py)
    x0 = jnp.floor(px)
    ly, lx = py - y0, px - x0
    hy, hx = 1.0 - ly, 1.0 - lx
    y0i = y0.astype(jnp.int32)
    x0i = x0.astype(jnp.int32)
    y1i, x1i = y0i + 1, x0i + 1

    def corner(yi, xi, wgt):
        valid = (yi >= 0) & (yi <= H - 1) & (xi >= 0) & (xi <= W - 1)
        w_ = jnp.where(valid, wgt, 0.0)
        idx = jnp.clip(yi, 0, H - 1) * W + jnp.clip(xi, 0, W - 1)
        return idx, w_

    i00, m00 = corner(y0i, x0i, hy * hx)
    i01, m01 = corner(y0i, x1i, hy * lx)
    i10, m10 = corner(y1i, x0i, ly * hx)
    i11, m11 = corner(y1i, x1i, ly * lx)

    idx_all = jnp.stack([i00, i01, i10, i11], axis=1).reshape(B, NCORNER, KK, P)
    m_all = jnp.stack([m00, m01, m10, m11], axis=1).reshape(B, NCORNER, KK, P)
    m_all = m_all.astype(jnp.float32)

    # TODO(synk): the 4-corner gather is data-dependent indexing; it stays in
    # XLA (one fused gather).  Pulling it into the Pallas kernel would need a
    # manual pl.ANY + make_async_copy pipeline over scalar-prefetched indices.
    x_sp = x.reshape(B, Cin, H * W)
    v = jax.vmap(lambda xs, ii: xs[:, ii])(
        x_sp, idx_all.reshape(B, NCORNER * KK * P))       # (B, Cin, 4*KK*P)
    # adjacent-axis reshape only: (B, groups, Cin_g, 4, KK, P) -> 4D
    v_all = v.reshape(B * groups, Cin_g * NCORNER, KK, P)
    return v_all, m_all, Hout, Wout


def deform_conv_pallas(x, offs, w_def, groups, pad=1, stride=1, dil=1,
                       p_tile=2048):
    B, Cin, H, W = x.shape
    Cout = w_def.shape[0]
    Cin_g = Cin // groups
    Cout_g = Cout // groups
    CK = Cin_g * KK
    G = groups

    v_all, m_all, Hout, Wout = _bilinear_gather(x, offs, groups, pad, stride, dil)
    P = Hout * Wout

    # Lane-dense P tiles (multiple of 128), sized for v7x's 64 MiB VMEM.
    TP = min(p_tile, _round_up(P, 128))
    P_pad = _round_up(P, TP)
    if P_pad != P:
        v_all = jnp.pad(v_all, ((0, 0), (0, 0), (0, 0), (0, P_pad - P)))
        m_all = jnp.pad(m_all, ((0, 0), (0, 0), (0, 0), (0, P_pad - P)))

    wt = w_def.reshape(G, Cout_g, CK).astype(jnp.float32)   # un-broadcast weights

    grid = (B, G, P_pad // TP)
    out = pl.pallas_call(
        _deform_kernel,
        out_shape=jax.ShapeDtypeStruct((B * G, Cout_g, P_pad), jnp.float32),
        grid=grid,
        in_specs=[
            pl.BlockSpec((1, Cin_g * NCORNER, KK, TP),
                         lambda b, g, p: (b * G + g, 0, 0, p)),
            pl.BlockSpec((1, NCORNER, KK, TP),
                         lambda b, g, p: (b, 0, 0, p)),
            pl.BlockSpec((1, Cout_g, CK),
                         lambda b, g, p: (g, 0, 0)),
        ],
        out_specs=pl.BlockSpec((1, Cout_g, TP),
                               lambda b, g, p: (b * G + g, 0, p)),
        compiler_params=pltpu.CompilerParams(
            dimension_semantics=("parallel", "parallel", "parallel"),
            vmem_limit_bytes=48 * 1024 * 1024),
    )(v_all, m_all, wt)

    out = out[:, :, :P].reshape(B, Cout, Hout, Wout)
    return out


# ----------------------------------------------------------------------------
# Full forward (Pallas path)
# ----------------------------------------------------------------------------
def deform_conv_experimental_forward(x, params, groups, pad=1, stride=1, dil=1):
    x = x.astype(jnp.float32)
    # 1+2) fused 1x1 channel adjust + depthwise 3x3 offset net (one kernel)
    offs = offset_net_pallas(x, params["w_adj"], params["b_adj"],
                             params["w_off"], params["b_off"])     # (B,18,H,W)
    # 3) deformable conv (P-tiled bilinear combine + grouped MXU matmul)
    return deform_conv_pallas(x, offs, params["w_def"], groups, pad, stride, dil)


# ----------------------------------------------------------------------------
# Pure-XLA reference (same semantics) for a correctness cross-check.
# ----------------------------------------------------------------------------
def _conv2d_nchw(x, w, b=None, padding=0, stride=1, groups=1):
    out = jax.lax.conv_general_dilated(
        x, w, window_strides=(stride, stride),
        padding=((padding, padding), (padding, padding)),
        dimension_numbers=("NCHW", "OIHW", "NCHW"),
        feature_group_count=groups)
    if b is not None:
        out = out + b[None, :, None, None]
    return out


def reference_forward(x, torch_params, groups, pad=1, stride=1, dil=1):
    x = x.astype(jnp.float32)
    x_chan = _conv2d_nchw(x, torch_params["w_adj_t"], torch_params["b_adj_v"])
    offs = _conv2d_nchw(x_chan, torch_params["w_off_t"], torch_params["b_off_v"],
                        padding=1, groups=2 * KK)

    B, Cin, H, W = x.shape
    Cout = torch_params["w_def"].shape[0]
    Cin_g = Cin // groups
    Cout_g = Cout // groups
    CK = Cin_g * KK
    v_all, m_all, Hout, Wout = _bilinear_gather(x, offs, groups, pad, stride, dil)
    P = Hout * Wout

    v5 = v_all.reshape(B, groups, Cin_g, NCORNER, KK, P)
    cols = jnp.sum(v5 * m_all[:, None, None], axis=3)        # (B, G, Cin_g, KK, P)
    cols = cols.reshape(B, groups, CK, P)
    wt = torch_params["w_def"].reshape(groups, Cout_g, CK)
    out = jnp.einsum("gok,bgkp->bgop", wt, cols)
    return out.reshape(B, Cout, Hout, Wout)


# ----------------------------------------------------------------------------
if __name__ == "__main__":
    B, Cin, H, W = 2, 4, 16, 16
    groups = 2
    Cin_g = Cin // groups

    key = jax.random.PRNGKey(0)
    k1, k2, k3, k4, k5, kx = jax.random.split(key, 6)

    # Deterministic parameter init (PyTorch shapes), small scale.
    w_adj_t = 0.1 * jax.random.normal(k1, (2 * KK, Cin, 1, 1), jnp.float32)
    b_adj_v = 0.1 * jax.random.normal(k2, (2 * KK,), jnp.float32)
    w_off_t = 0.05 * jax.random.normal(k3, (2 * KK, 1, 3, 3), jnp.float32)
    b_off_v = 0.05 * jax.random.normal(k4, (2 * KK,), jnp.float32)
    w_def = 0.1 * jax.random.normal(k5, (Cin, Cin_g, 3, 3), jnp.float32)

    # Repack for the Pallas kernels.
    params = {
        "w_adj": jnp.transpose(w_adj_t[:, :, 0, 0], (1, 0)),   # (Cin, 18)
        "b_adj": b_adj_v,                                      # (18,)
        "w_off": w_off_t.reshape(2 * KK, KK),                  # (18, 9)
        "b_off": b_off_v,                                      # (18,)
        "w_def": w_def,                                        # (4, 2, 3, 3)
    }
    torch_params = {"w_adj_t": w_adj_t, "b_adj_v": b_adj_v,
                    "w_off_t": w_off_t, "b_off_v": b_off_v, "w_def": w_def}

    x = jax.random.normal(kx, (B, Cin, H, W), jnp.float32)

    fwd = jax.jit(lambda xx, pp: deform_conv_experimental_forward(xx, pp, groups))
    ref_fn = jax.jit(lambda xx, pp: reference_forward(xx, pp, groups))

    out = jax.block_until_ready(fwd(x, params))
    ref = jax.block_until_ready(ref_fn(x, torch_params))

    assert out.shape == (B, Cin, H, W), out.shape
    assert bool(jnp.all(jnp.isfinite(out)))
    assert bool(jnp.allclose(out, ref, atol=1e-3, rtol=1e-3)), \
        float(jnp.max(jnp.abs(out - ref)))

    print("KERNEL_OK")
</pallas_src>

<mosaic_0001>
module attributes {stable_mosaic.version = 11 : i64} {
  func.func @_offset_net_kernel(%arg0: i32, %arg1: memref<1x4x16x16xf32, #tpu.memory_space<vmem>>, %arg2: memref<4x18xf32, #tpu.memory_space<smem>>, %arg3: memref<18xf32, #tpu.memory_space<smem>>, %arg4: memref<18x9xf32, #tpu.memory_space<smem>>, %arg5: memref<18xf32, #tpu.memory_space<smem>>, %arg6: memref<1x18x16x16xf32, #tpu.memory_space<vmem>>, %arg7: memref<18x18xf32, #tpu.memory_space<vmem>>) attributes {dimension_semantics = [#tpu.dimension_semantics<parallel>], iteration_bounds = array<i64: 2>, scalar_prefetch = 0 : i64, scratch_operands = 1 : i64, tpu.core_type = #tpu.core_type<tc>, window_params = [{transform_indices = @transform_0, window_bounds = array<i64: 1, 4, 16, 16>}, {transform_indices = @transform_1, window_bounds = array<i64: 4, 18>}, {transform_indices = @transform_2, window_bounds = array<i64: 18>}, {transform_indices = @transform_3, window_bounds = array<i64: 18, 9>}, {transform_indices = @transform_4, window_bounds = array<i64: 18>}, {transform_indices = @transform_5, window_bounds = array<i64: 1, 18, 16, 16>}]} {
    %cst = arith.constant 0.000000e+00 : f32
    %0 = vector.broadcast %cst : f32 to vector<18x18xf32>
    %c0 = arith.constant 0 : index
    %c0_0 = arith.constant 0 : index
    %1 = vector.load %arg7[%c0, %c0_0] : memref<18x18xf32, #tpu.memory_space<vmem>>, vector<18x18xf32>
    tpu.vector_store %arg7[%c0, %c0_0], %0 {strides = array<i32>} : memref<18x18xf32, #tpu.memory_space<vmem>>, vector<18x18xf32>,
    %c0_1 = arith.constant 0 : index
    %c0_2 = arith.constant 0 : index
    %c0_3 = arith.constant 0 : index
    %c0_4 = arith.constant 0 : index
    %2 = vector.load %arg1[%c0_1, %c0_2, %c0_3, %c0_4] : memref<1x4x16x16xf32, #tpu.memory_space<vmem>>, vector<1x1x16x16xf32>
    %3 = vector.shape_cast %2 : vector<1x1x16x16xf32> to vector<16x16xf32>
    %c0_5 = arith.constant 0 : index
    %c0_6 = arith.constant 0 : index
    %4 = memref.load %arg2[%c0_5, %c0_6] : memref<4x18xf32, #tpu.memory_space<smem>>
    %5 = vector.broadcast %4 : f32 to vector<16x16xf32>
    %6 = arith.mulf %3, %5 : vector<16x16xf32>
    %c0_7 = arith.constant 0 : index
    %c1 = arith.constant 1 : index
    %c0_8 = arith.constant 0 : index
    %c0_9 = arith.constant 0 : index
    %7 = vector.load %arg1[%c0_7, %c1, %c0_8, %c0_9] : memref<1x4x16x16xf32, #tpu.memory_space<vmem>>, vector<1x1x16x16xf32>
    %8 = vector.shape_cast %7 : vector<1x1x16x16xf32> to vector<16x16xf32>
    %c1_10 = arith.constant 1 : index
    %c0_11 = arith.constant 0 : index
    %9 = memref.load %arg2[%c1_10, %c0_11] : memref<4x18xf32, #tpu.memory_space<smem>>
    %10 = vector.broadcast %9 : f32 to vector<16x16xf32>
    %11 = arith.mulf %8, %10 : vector<16x16xf32>
    %12 = arith.addf %6, %11 : vector<16x16xf32>
    %c0_12 = arith.constant 0 : index
    %c2 = arith.constant 2 : index
    %c0_13 = arith.constant 0 : index
    %c0_14 = arith.constant 0 : index
    %13 = vector.load %arg1[%c0_12, %c2, %c0_13, %c0_14] : memref<1x4x16x16xf32, #tpu.memory_space<vmem>>, vector<1x1x16x16xf32>
    %14 = vector.shape_cast %13 : vector<1x1x16x16xf32> to vector<16x16xf32>
    %c2_15 = arith.constant 2 : index
    %c0_16 = arith.constant 0 : index
    %15 = memref.load %arg2[%c2_15, %c0_16] : memref<4x18xf32, #tpu.memory_space<smem>>
    %16 = vector.broadcast %15 : f32 to vector<16x16xf32>
    %17 = arith.mulf %14, %16 : vector<16x16xf32>
    %18 = arith.addf %12, %17 : vector<16x16xf32>
    %c0_17 = arith.constant 0 : index
    %c3 = arith.constant 3 : index
    %c0_18 = arith.constant 0 : index
    %c0_19 = arith.constant 0 : index
    %19 = vector.load %arg1[%c0_17, %c3, %c0_18, %c0_19] : memref<1x4x16x16xf32, #tpu.memory_space<vmem>>, vector<1x1x16x16xf32>
    %20 = vector.shape_cast %19 : vector<1x1x16x16xf32> to vector<16x16xf32>
    %c3_20 = arith.constant 3 : index
    %c0_21 = arith.constant 0 : index
    %21 = memref.load %arg2[%c3_20, %c0_21] : memref<4x18xf32, #tpu.memory_space<smem>>
    %22 = vector.broadcast %21 : f32 to vector<16x16xf32>
    %23 = arith.mulf %20, %22 : vector<16x16xf32>
    %24 = arith.addf %18, %23 : vector<16x16xf32>
    %c0_22 = arith.constant 0 : index
    %25 = memref.load %arg3[%c0_22] : memref<18xf32, #tpu.memory_space<smem>>
    %26 = vector.broadcast %25 : f32 to vector<16x16xf32>
    %27 = arith.addf %24, %26 : vector<16x16xf32>
    %c1_23 = arith.constant 1 : index
    %c1_24 = arith.constant 1 : index
    %28 = vector.load %arg7[%c1_23, %c1_24] : memref<18x18xf32, #tpu.memory_space<vmem>>, vector<16x16xf32>
    tpu.vector_store %arg7[%c1_23, %c1_24], %27 {strides = array<i32>} : memref<18x18xf32, #tpu.memory_space<vmem>>, vector<16x16xf32>,
    %c0_25 = arith.constant 0 : index
    %c0_26 = arith.constant 0 : index
    %29 = vector.load %arg7[%c0_25, %c0_26] : memref<18x18xf32, #tpu.memory_space<vmem>>, vector<16x16xf32>
    %c0_27 = arith.constant 0 : index
    %c0_28 = arith.constant 0 : index
    %30 = memref.load %arg4[%c0_27, %c0_28] : memref<18x9xf32, #tpu.memory_space<smem>>
    %31 = vector.broadcast %30 : f32 to vector<16x16xf32>
    %32 = arith.mulf %29, %31 : vector<16x16xf32>
    %c0_29 = arith.constant 0 : index
    %c1_30 = arith.constant 1 : index
    %33 = vector.load %arg7[%c0_29, %c1_30] : memref<18x18xf32, #tpu.memory_space<vmem>>, vector<16x16xf32>
    %c0_31 = arith.constant 0 : index
    %c1_32 = arith.constant 1 : index
    %34 = memref.load %arg4[%c0_31, %c1_32] : memref<18x9xf32, #tpu.memory_space<smem>>
    %35 = vector.broadcast %34 : f32 to vector<16x16xf32>
    %36 = arith.mulf %33, %35 : vector<16x16xf32>
    %37 = arith.addf %32, %36 : vector<16x16xf32>
    %c0_33 = arith.constant 0 : index
    %c2_34 = arith.constant 2 : index
    %38 = vector.load %arg7[%c0_33, %c2_34] : memref<18x18xf32, #tpu.memory_space<vmem>>, vector<16x16xf32>
    %c0_35 = arith.constant 0 : index
    %c2_36 = arith.constant 2 : index
    %39 = memref.load %arg4[%c0_35, %c2_36] : memref<18x9xf32, #tpu.memory_space<smem>>
    %40 = vector.broadcast %39 : f32 to vector<16x16xf32>
    %41 = arith.mulf %38, %40 : vector<16x16xf32>
    %42 = arith.addf %37, %41 : vector<16x16xf32>
    %c1_37 = arith.constant 1 : index
    %c0_38 = arith.constant 0 : index
    %43 = vector.load %arg7[%c1_37, %c0_38] : memref<18x18xf32, #tpu.memory_space<vmem>>, vector<16x16xf32>
    %c0_39 = arith.constant 0 : index
    %c3_40 = arith.constant 3 : index
    %44 = memref.load %arg4[%c0_39, %c3_40] : memref<18x9xf32, #tpu.memory_space<smem>>
    %45 = vector.broadcast %44 : f32 to vector<16x16xf32>
    %46 = arith.mulf %43, %45 : vector<16x16xf32>
    %47 = arith.addf %42, %46 : vector<16x16xf32>
    %c1_41 = arith.constant 1 : index
    %c1_42 = arith.constant 1 : index
    %48 = vector.load %arg7[%c1_41, %c1_42] : memref<18x18xf32, #tpu.memory_space<vmem>>, vector<16x16xf32>
    %c0_43 = arith.constant 0 : index
    %c4 = arith.constant 4 : index
    %49 = memref.load %arg4[%c0_43, %c4] : memref<18x9xf32, #tpu.memory_space<smem>>
    %50 = vector.broadcast %49 : f32 to vector<16x16xf32>
    %51 = arith.mulf %48, %50 : vector<16x16xf32>
    %52 = arith.addf %47, %51 : vector<16x16xf32>
    %c1_44 = arith.constant 1 : index
    %c2_45 = arith.constant 2 : index
    %53 = vector.load %arg7[%c1_44, %c2_45] : memref<18x18xf32, #tpu.memory_space<vmem>>, vector<16x16xf32>
    %c0_46 = arith.constant 0 : index
    %c5 = arith.constant 5 : index
    %54 = memref.load %arg4[%c0_46, %c5] : memref<18x9xf32, #tpu.memory_space<smem>>
    %55 = vector.broadcast %54 : f32 to vector<16x16xf32>
    %56 = arith.mulf %53, %55 : vector<16x16xf32>
    %57 = arith.addf %52, %56 : vector<16x16xf32>
    %c2_47 = arith.constant 2 : index
    %c0_48 = arith.constant 0 : index
    %58 = vector.load %arg7[%c2_47, %c0_48] : memref<18x18xf32, #tpu.memory_space<vmem>>, vector<16x16xf32>
    %c0_49 = arith.constant 0 : index
    %c6 = arith.constant 6 : index
    %59 = memref.load %arg4[%c0_49, %c6] : memref<18x9xf32, #tpu.memory_space<smem>>
    %60 = vector.broadcast %59 : f32 to vector<16x16xf32>
    %61 = arith.mulf %58, %60 : vector<16x16xf32>
    %62 = arith.addf %57, %61 : vector<16x16xf32>
    %c2_50 = arith.constant 2 : index
    %c1_51 = arith.constant 1 : index
    %63 = vector.load %arg7[%c2_50, %c1_51] : memref<18x18xf32, #tpu.memory_space<vmem>>, vector<16x16xf32>
    %c0_52 = arith.constant 0 : index
    %c7 = arith.constant 7 : index
    %64 = memref.load %arg4[%c0_52, %c7] : memref<18x9xf32, #tpu.memory_space<smem>>
    %65 = vector.broadcast %64 : f32 to vector<16x16xf32>
    %66 = arith.mulf %63, %65 : vector<16x16xf32>
    %67 = arith.addf %62, %66 : vector<16x16xf32>
    %c2_53 = arith.constant 2 : index
    %c2_54 = arith.constant 2 : index
    %68 = vector.load %arg7[%c2_53, %c2_54] : memref<18x18xf32, #tpu.memory_space<vmem>>, vector<16x16xf32>
    %c0_55 = arith.constant 0 : index
    %c8 = arith.constant 8 : index
    %69 = memref.load %arg4[%c0_55, %c8] : memref<18x9xf32, #tpu.memory_space<smem>>
    %70 = vector.broadcast %69 : f32 to vector<16x16xf32>
    %71 = arith.mulf %68, %70 : vector<16x16xf32>
    %72 = arith.addf %67, %71 : vector<16x16xf32>
    %c0_56 = arith.constant 0 : index
    %73 = memref.load %arg5[%c0_56] : memref<18xf32, #tpu.memory_space<smem>>
    %74 = vector.broadcast %73 : f32 to vector<16x16xf32>
    %75 = arith.addf %72, %74 : vector<16x16xf32>
    %c0_57 = arith.constant 0 : index
    %c0_58 = arith.constant 0 : index
    %c0_59 = arith.constant 0 : index
    %c0_60 = arith.constant 0 : index
    %76 = vector.load %arg6[%c0_57, %c0_58, %c0_59, %c0_60] : memref<1x18x16x16xf32, #tpu.memory_space<vmem>>, vector<1x1x16x16xf32>
    %77 = vector.shape_cast %76 : vector<1x1x16x16xf32> to vector<16x16xf32>
    %78 = vector.shape_cast %75 : vector<16x16xf32> to vector<1x1x16x16xf32>
    tpu.vector_store %arg6[%c0_57, %c0_58, %c0_59, %c0_60], %78 {strides = array<i32>} : memref<1x18x16x16xf32, #tpu.memory_space<vmem>>, vector<1x1x16x16xf32>,
    %c0_61 = arith.constant 0 : index
    %c0_62 = arith.constant 0 : index
    %c0_63 = arith.constant 0 : index
    %c0_64 = arith.constant 0 : index
    %79 = vector.load %arg1[%c0_61, %c0_62, %c0_63, %c0_64] : memref<1x4x16x16xf32, #tpu.memory_space<vmem>>, vector<1x1x16x16xf32>
    %80 = vector.shape_cast %79 : vector<1x1x16x16xf32> to vector<16x16xf32>
    %c0_65 = arith.constant 0 : index
    %c1_66 = arith.constant 1 : index
    %81 = memref.load %arg2[%c0_65, %c1_66] : memref<4x18xf32, #tpu.memory_space<smem>>
    %82 = vector.broadcast %81 : f32 to vector<16x16xf32>
    %83 = arith.mulf %80, %82 : vector<16x16xf32>
    %c0_67 = arith.constant 0 : index
    %c1_68 = arith.constant 1 : index
    %c0_69 = arith.constant 0 : index
    %c0_70 = arith.constant 0 : index
    %84 = vector.load %arg1[%c0_67, %c1_68, %c0_69, %c0_70] : memref<1x4x16x16xf32, #tpu.memory_space<vmem>>, vector<1x1x16x16xf32>
    %85 = vector.shape_cast %84 : vector<1x1x16x16xf32> to vector<16x16xf32>
    %c1_71 = arith.constant 1 : index
    %c1_72 = arith.constant 1 : index
    %86 = memref.load %arg2[%c1_71, %c1_72] : memref<4x18xf32, #tpu.memory_space<smem>>
    %87 = vector.broadcast %86 : f32 to vector<16x16xf32>
    %88 = arith.mulf %85, %87 : vector<16x16xf32>
    %89 = arith.addf %83, %88 : vector<16x16xf32>
    %c0_73 = arith.constant 0 : index
    %c2_74 = arith.constant 2 : index
    %c0_75 = arith.constant 0 : index
    %c0_76 = arith.constant 0 : index
    %90 = vector.load %arg1[%c0_73, %c2_74, %c0_75, %c0_76] : memref<1x4x16x16xf32, #tpu.memory_space<vmem>>, vector<1x1x16x16xf32>
    %91 = vector.shape_cast %90 : vector<1x1x16x16xf32> to vector<16x16xf32>
    %c2_77 = arith.constant 2 : index
    %c1_78 = arith.constant 1 : index
    %92 = memref.load %arg2[%c2_77, %c1_78] : memref<4x18xf32, #tpu.memory_space<smem>>
    %93 = vector.broadcast %92 : f32 to vector<16x16xf32>
    %94 = arith.mulf %91, %93 : vector<16x16xf32>
    %95 = arith.addf %89, %94 : vector<16x16xf32>
    %c0_79 = arith.constant 0 : index
    %c3_80 = arith.constant 3 : index
    %c0_81 = arith.constant 0 : index
    %c0_82 = arith.constant 0 : index
    %96 = vector.load %arg1[%c0_79, %c3_80, %c0_81, %c0_82] : memref<1x4x16x16xf32, #tpu.memory_space<vmem>>, vector<1x1x16x16xf32>
    %97 = vector.shape_cast %96 : vector<1x1x16x16xf32> to vector<16x16xf32>
    %c3_83 = arith.constant 3 : index
    %c1_84 = arith.constant 1 : index
    %98 = memref.load %arg2[%c3_83, %c1_84] : memref<4x18xf32, #tpu.memory_space<smem>>
    %99 = vector.broadcast %98 : f32 to vector<16x16xf32>
    %100 = arith.mulf %97, %99 : vector<16x16xf32>
    %101 = arith.addf %95, %100 : vector<16x16xf32>
    %c1_85 = arith.constant 1 : index
    %102 = memref.load %arg3[%c1_85] : memref<18xf32, #tpu.memory_space<smem>>
    %103 = vector.broadcast %102 : f32 to vector<16x16xf32>
    %104 = arith.addf %101, %103 : vector<16x16xf32>
    %c1_86 = arith.constant 1 : index
    %c1_87 = arith.constant 1 : index
    %105 = vector.load %arg7[%c1_86, %c1_87] : memref<18x18xf32, #tpu.memory_space<vmem>>, vector<16x16xf32>
    tpu.vector_store %arg7[%c1_86, %c1_87], %104 {strides = array<i32>} : memref<18x18xf32, #tpu.memory_space<vmem>>, vector<16x16xf32>,
    %c0_88 = arith.constant 0 : index
    %c0_89 = arith.constant 0 : index
    %106 = vector.load %arg7[%c0_88, %c0_89] : memref<18x18xf32, #tpu.memory_space<vmem>>, vector<16x16xf32>
    %c1_90 = arith.constant 1 : index
    %c0_91 = arith.constant 0 : index
    %107 = memref.load %arg4[%c1_90, %c0_91] : memref<18x9xf32, #tpu.memory_space<smem>>
    %108 = vector.broadcast %107 : f32 to vector<16x16xf32>
    %109 = arith.mulf %106, %108 : vector<16x16xf32>
    %c0_92 = arith.constant 0 : index
    %c1_93 = arith.constant 1 : index
    %110 = vector.load %arg7[%c0_92, %c1_93] : memref<18x18xf32, #tpu.memory_space<vmem>>, vector<16x16xf32>
    %c1_94 = arith.constant 1 : index
    %c1_95 = arith.constant 1 : index
    %111 = memref.load %arg4[%c1_94, %c1_95] : memref<18x9xf32, #tpu.memory_space<smem>>
    %112 = vector.broadcast %111 : f32 to vector<16x16xf32>
    %113 = arith.mulf %110, %112 : vector<16x16xf32>
    %114 = arith.addf %109, %113 : vector<16x16xf32>
    %c0_96 = arith.constant 0 : index
    %c2_97 = arith.constant 2 : index
    %115 = vector.load %arg7[%c0_96, %c2_97] : memref<18x18xf32, #tpu.memory_space<vmem>>, vector<16x16xf32>
    %c1_98 = arith.constant 1 : index
    %c2_99 = arith.constant 2 : index
    %116 = memref.load %arg4[%c1_98, %c2_99] : memref<18x9xf32, #tpu.memory_space<smem>>
    %117 = vector.broadcast %116 : f32 to vector<16x16xf32>
    %118 = arith.mulf %115, %117 : vector<16x16xf32>
    %119 = arith.addf %114, %118 : vector<16x16xf32>
    %c1_100 = arith.constant 1 : index
    %c0_101 = arith.constant 0 : index
    %120 = vector.load %arg7[%c1_100, %c0_101] : memref<18x18xf32, #tpu.memory_space<vmem>>, vector<16x16xf32>
    %c1_102 = arith.constant 1 : index
    %c3_103 = arith.constant 3 : index
    %121 = memref.load %arg4[%c1_102, %c3_103] : memref<18x9xf32, #tpu.memory_space<smem>>
    %122 = vector.broadcast %121 : f32 to vector<16x16xf32>
    %123 = arith.mulf %120, %122 : vector<16x16xf32>
    %124 = arith.addf %119, %123 : vector<16x16xf32>
    %c1_104 = arith.constant 1 : index
    %c1_105 = arith.constant 1 : index
    %125 = vector.load %arg7[%c1_104, %c1_105] : memref<18x18xf32, #tpu.memory_space<vmem>>, vector<16x16xf32>
    %c1_106 = arith.constant 1 : index
    %c4_107 = arith.constant 4 : index
    %126 = memref.load %arg4[%c1_106, %c4_107] : memref<18x9xf32, #tpu.memory_space<smem>>
    %127 = vector.broadcast %126 : f32 to vector<16x16xf32>
    %128 = arith.mulf %125, %127 : vector<16x16xf32>
    %129 = arith.addf %124, %128 : vector<16x16xf32>
    %c1_108 = arith.constant 1 : index
    %c2_109 = arith.constant 2 : index
    %130 = vector.load %arg7[%c1_108, %c2_109] : memref<18x18xf32, #tpu.memory_space<vmem>>, vector<16x16xf32>
    %c1_110 = arith.constant 1 : index
    %c5_111 = arith.constant 5 : index
    %131 = memref.load %arg4[%c1_110, %c5_111] : memref<18x9xf32, #tpu.memory_space<smem>>
    %132 = vector.broadcast %131 : f32 to vector<16x16xf32>
    %133 = arith.mulf %130, %132 : vector<16x16xf32>
    %134 = arith.addf %129, %133 : vector<16x16xf32>
    %c2_112 = arith.constant 2 : index
    %c0_113 = arith.constant 0 : index
    %135 = vector.load %arg7[%c2_112, %c0_113] : memref<18x18xf32, #tpu.memory_space<vmem>>, vector<16x16xf32>
    %c1_114 = arith.constant 1 : index
    %c6_115 = arith.constant 6 : index
    %136 = memref.load %arg4[%c1_114, %c6_115] : memref<18x9xf32, #tpu.memory_space<smem>>
    %137 = vector.broadcast %136 : f32 to vector<16x16xf32>
    %138 = arith.mulf %135, %137 : vector<16x16xf32>
    %139 = arith.addf %134, %138 : vector<16x16xf32>
    %c2_116 = arith.constant 2 : index
    %c1_117 = arith.constant 1 : index
    %140 = vector.load %arg7[%c2_116, %c1_117] : memref<18x18xf32, #tpu.memory_space<vmem>>, vector<16x16xf32>
    %c1_118 = arith.constant 1 : index
    %c7_119 = arith.constant 7 : index
    %141 = memref.load %arg4[%c1_118, %c7_119] : memref<18x9xf32, #tpu.memory_space<smem>>
    %142 = vector.broadcast %141 : f32 to vector<16x16xf32>
    %143 = arith.mulf %140, %142 : vector<16x16xf32>
    %144 = arith.addf %139, %143 : vector<16x16xf32>
    %c2_120 = arith.constant 2 : index
    %c2_121 = arith.constant 2 : index
    %145 = vector.load %arg7[%c2_120, %c2_121] : memref<18x18xf32, #tpu.memory_space<vmem>>, vector<16x16xf32>
    %c1_122 = arith.constant 1 : index
    %c8_123 = arith.constant 8 : index
    %146 = memref.load %arg4[%c1_122, %c8_123] : memref<18x9xf32, #tpu.memory_space<smem>>
    %147 = vector.broadcast %146 : f32 to vector<16x16xf32>
    %148 = arith.mulf %145, %147 : vector<16x16xf32>
    %149 = arith.addf %144, %148 : vector<16x16xf32>
    %c1_124 = arith.constant 1 : index
    %150 = memref.load %arg5[%c1_124] : memref<18xf32, #tpu.memory_space<smem>>
    %151 = vector.broadcast %150 : f32 to vector<16x16xf32>
    %152 = arith.addf %149, %151 : vector<16x16xf32>
    %c0_125 = arith.constant 0 : index
    %c1_126 = arith.constant 1 : index
    %c0_127 = arith.constant 0 : index
    %c0_128 = arith.constant 0 : index
    %153 = vector.load %arg6[%c0_125, %c1_126, %c0_127, %c0_128] : memref<1x18x16x16xf32, #tpu.memory_space<vmem>>, vector<1x1x16x16xf32>
    %154 = vector.shape_cast %153 : vector<1x1x16x16xf32> to vector<16x16xf32>
    %155 = vector.shape_cast %152 : vector<16x16xf32> to vector<1x1x16x16xf32>
    tpu.vector_store %arg6[%c0_125, %c1_126, %c0_127, %c0_128], %155 {strides = array<i32>} : memref<1x18x16x16xf32, #tpu.memory_space<vmem>>, vector<1x1x16x16xf32>,
    %c0_129 = arith.constant 0 : index
    %c0_130 = arith.constant 0 : index
    %c0_131 = arith.constant 0 : index
    %c0_132 = arith.constant 0 : index
    %156 = vector.load %arg1[%c0_129, %c0_130, %c0_131, %c0_132] : memref<1x4x16x16xf32, #tpu.memory_space<vmem>>, vector<1x1x16x16xf32>
    %157 = vector.shape_cast %156 : vector<1x1x16x16xf32> to vector<16x16xf32>
    %c0_133 = arith.constant 0 : index
    %c2_134 = arith.constant 2 : index
    %158 = memref.load %arg2[%c0_133, %c2_134] : memref<4x18xf32, #tpu.memory_space<smem>>
    %159 = vector.broadcast %158 : f32 to vector<16x16xf32>
    %160 = arith.mulf %157, %159 : vector<16x16xf32>
    %c0_135 = arith.constant 0 : index
    %c1_136 = arith.constant 1 : index
    %c0_137 = arith.constant 0 : index
    %c0_138 = arith.constant 0 : index
    %161 = vector.load %arg1[%c0_135, %c1_136, %c0_137, %c0_138] : memref<1x4x16x16xf32, #tpu.memory_space<vmem>>, vector<1x1x16x16xf32>
    %162 = vector.shape_cast %161 : vector<1x1x16x16xf32> to vector<16x16xf32>
    %c1_139 = arith.constant 1 : index
    %c2_140 = arith.constant 2 : index
    %163 = memref.load %arg2[%c1_139, %c2_140] : memref<4x18xf32, #tpu.memory_space<smem>>
    %164 = vector.broadcast %163 : f32 to vector<16x16xf32>
    %165 = arith.mulf %162, %164 : vector<16x16xf32>
    %166 = arith.addf %160, %165 : vector<16x16xf32>
    %c0_141 = arith.constant 0 : index
    %c2_142 = arith.constant 2 : index
    %c0_143 = arith.constant 0 : index
    %c0_144 = arith.constant 0 : index
    %167 = vector.load %arg1[%c0_141, %c2_142, %c0_143, %c0_144] : memref<1x4x16x16xf32, #tpu.memory_space<vmem>>, vector<1x1x16x16xf32>
    %168 = vector.shape_cast %167 : vector<1x1x16x16xf32> to vector<16x16xf32>
    %c2_145 = arith.constant 2 : index
    %c2_146 = arith.constant 2 : index
    %169 = memref.load %arg2[%c2_145, %c2_146] : memref<4x18xf32, #tpu.memory_space<smem>>
    %170 = vector.broadcast %169 : f32 to vector<16x16xf32>
    %171 = arith.mulf %168, %170 : vector<16x16xf32>
    %172 = arith.addf %166, %171 : vector<16x16xf32>
    %c0_147 = arith.constant 0 : index
    %c3_148 = arith.constant 3 : index
    %c0_149 = arith.constant 0 : index
    %c0_150 = arith.constant 0 : index
    %173 = vector.load %arg1[%c0_147, %c3_148, %c0_149, %c0_150] : memref<1x4x16x16xf32, #tpu.memory_space<vmem>>, vector<1x1x16x16xf32>
    %174 = vector.shape_cast %173 : vector<1x1x16x16xf32> to vector<16x16xf32>
    %c3_151 = arith.constant 3 : index
    %c2_152 = arith.constant 2 : index
    %175 = memref.load %arg2[%c3_151, %c2_152] : memref<4x18xf32, #tpu.memory_space<smem>>
    %176 = vector.broadcast %175 : f32 to vector<16x16xf32>
    %177 = arith.mulf %174, %176 : vector<16x16xf32>
    %178 = arith.addf %172, %177 : vector<16x16xf32>
    %c2_153 = arith.constant 2 : index
    %179 = memref.load %arg3[%c2_153] : memref<18xf32, #tpu.memory_space<smem>>
    %180 = vector.broadcast %179 : f32 to vector<16x16xf32>
    %181 = arith.addf %178, %180 : vector<16x16xf32>
    %c1_154 = arith.constant 1 : index
    %c1_155 = arith.constant 1 : index
    %182 = vector.load %arg7[%c1_154, %c1_155] : memref<18x18xf32, #tpu.memory_space<vmem>>, vector<16x16xf32>
    tpu.vector_store %arg7[%c1_154, %c1_155], %181 {strides = array<i32>} : memref<18x18xf32, #tpu.memory_space<vmem>>, vector<16x16xf32>,
    %c0_156 = arith.constant 0 : index
    %c0_157 = arith.constant 0 : index
    %183 = vector.load %arg7[%c0_156, %c0_157] : memref<18x18xf32, #tpu.memory_space<vmem>>, vector<16x16xf32>
    %c2_158 = arith.constant 2 : index
    %c0_159 = arith.constant 0 : index
    %184 = memref.load %arg4[%c2_158, %c0_159] : memref<18x9xf32, #tpu.memory_space<smem>>
    %185 = vector.broadcast %184 : f32 to vector<16x16xf32>
    %186 = arith.mulf %183, %185 : vector<16x16xf32>
    %c0_160 = arith.constant 0 : index
    %c1_161 = arith.constant 1 : index
    %187 = vector.load %arg7[%c0_160, %c1_161] : memref<18x18xf32, #tpu.memory_space<vmem>>, vector<16x16xf32>
    %c2_162 = arith.constant 2 : index
    %c1_163 = arith.constant 1 : index
    %188 = memref.load %arg4[%c2_162, %c1_163] : memref<18x9xf32, #tpu.memory_space<smem>>
    %189 = vector.broadcast %188 : f32 to vector<16x16xf32>
    %190 = arith.mulf %187, %189 : vector<16x16xf32>
    %191 = arith.addf %186, %190 : vector<16x16xf32>
    %c0_164 = arith.constant 0 : index
    %c2_165 = arith.constant 2 : index
    %192 = vector.load %arg7[%c0_164, %c2_165] : memref<18x18xf32, #tpu.memory_space<vmem>>, vector<16x16xf32>
    %c2_166 = arith.constant 2 : index
    %c2_167 = arith.constant 2 : index
    %193 = memref.load %arg4[%c2_166, %c2_167] : memref<18x9xf32, #tpu.memory_space<smem>>
    %194 = vector.broadcast %193 : f32 to vector<16x16xf32>
    %195 = arith.mulf %192, %194 : vector<16x16xf32>
    %196 = arith.addf %191, %195 : vector<16x16xf32>
    %c1_168 = arith.constant 1 : index
    %c0_169 = arith.constant 0 : index
    %197 = vector.load %arg7[%c1_168, %c0_169] : memref<18x18xf32, #tpu.memory_space<vmem>>, vector<16x16xf32>
    %c2_170 = arith.constant 2 : index
    %c3_171 = arith.constant 3 : index
    %198 = memref.load %arg4[%c2_170, %c3_171] : memref<18x9xf32, #tpu.memory_space<smem>>
    %199 = vector.broadcast %198 : f32 to vector<16x16xf32>
    %200 = arith.mulf %197, %199 : vector<16x16xf32>
    %201 = arith.addf %196, %200 : vector<16x16xf32>
    %c1_172 = arith.constant 1 : index
    %c1_173 = arith.constant 1 : index
    %202 = vector.load %arg7[%c1_172, %c1_173] : memref<18x18xf32, #tpu.memory_space<vmem>>, vector<16x16xf32>
    %c2_174 = arith.constant 2 : index
    %c4_175 = arith.constant 4 : index
    %203 = memref.load %arg4[%c2_174, %c4_175] : memref<18x9xf32, #tpu.memory_space<smem>>
    %204 = vector.broadcast %203 : f32 to vector<16x16xf32>
    %205 = arith.mulf %202, %204 : vector<16x16xf32>
    %206 = arith.addf %201, %205 : vector<16x16xf32>
    %c1_176 = arith.constant 1 : index
    %c2_177 = arith.constant 2 : index
    %207 = vector.load %arg7[%c1_176, %c2_177] : memref<18x18xf32, #tpu.memory_space<vmem>>, vector<16x16xf32>
    %c2_178 = arith.constant 2 : index
    %c5_179 = arith.constant 5 : index
    %208 = memref.load %arg4[%c2_178, %c5_179] : memref<18x9xf32, #tpu.memory_space<smem>>
    %209 = vector.broadcast %208 : f32 to vector<16x16xf32>
    %210 = arith.mulf %207, %209 : vector<16x16xf32>
    %211 = arith.addf %206, %210 : vector<16x16xf32>
    %c2_180 = arith.constant 2 : index
    %c0_181 = arith.constant 0 : index
    %212 = vector.load %arg7[%c2_180, %c0_181] : memref<18x18xf32, #tpu.memory_space<vmem>>, vector<16x16xf32>
    %c2_182 = arith.constant 2 : index
    %c6_183 = arith.constant 6 : index
    %213 = memref.load %arg4[%c2_182, %c6_183] : memref<18x9xf32, #tpu.memory_space<smem>>
    %214 = vector.broadcast %213 : f32 to vector<16x16xf32>
    %215 = arith.mulf %212, %214 : vector<16x16xf32>
    %216 = arith.addf %211, %215 : vector<16x16xf32>
    %c2_184 = arith.constant 2 : index
    %c1_185 = arith.constant 1 : index
    %217 = vector.load %arg7[%c2_184, %c1_185] : memref<18x18xf32, #tpu.memory_space<vmem>>, vector<16x16xf32>
    %c2_186 = arith.constant 2 : index
    %c7_187 = arith.constant 7 : index
    %218 = memref.load %arg4[%c2_186, %c7_187] : memref<18x9xf32, #tpu.memory_space<smem>>
    %219 = vector.broadcast %218 : f32 to vector<16x16xf32>
    %220 = arith.mulf %217, %219 : vector<16x16xf32>
    %221 = arith.addf %216, %220 : vector<16x16xf32>
    %c2_188 = arith.constant 2 : index
    %c2_189 = arith.constant 2 : index
    %222 = vector.load %arg7[%c2_188, %c2_189] : memref<18x18xf32, #tpu.memory_space<vmem>>, vector<16x16xf32>
    %c2_190 = arith.constant 2 : index
    %c8_191 = arith.constant 8 : index
    %223 = memref.load %arg4[%c2_190, %c8_191] : memref<18x9xf32, #tpu.memory_space<smem>>
    %224 = vector.broadcast %223 : f32 to vector<16x16xf32>
    %225 = arith.mulf %222, %224 : vector<16x16xf32>
    %226 = arith.addf %221, %225 : vector<16x16xf32>
    %c2_192 = arith.constant 2 : index
    %227 = memref.load %arg5[%c2_192] : memref<18xf32, #tpu.memory_space<smem>>
    %228 = vector.broadcast %227 : f32 to vector<16x16xf32>
    %229 = arith.addf %226, %228 : vector<16x16xf32>
    %c0_193 = arith.constant 0 : index
    %c2_194 = arith.constant 2 : index
    %c0_195 = arith.constant 0 : index
    %c0_196 = arith.constant 0 : index
    %230 = vector.load %arg6[%c0_193, %c2_194, %c0_195, %c0_196] : memref<1x18x16x16xf32, #tpu.memory_space<vmem>>, vector<1x1x16x16xf32>
    %231 = vector.shape_cast %230 : vector<1x1x16x16xf32> to vector<16x16xf32>
    %232 = vector.shape_cast %229 : vector<16x16xf32> to vector<1x1x16x16xf32>
    tpu.vector_store %arg6[%c0_193, %c2_194, %c0_195, %c0_196], %232 {strides = array<i32>} : memref<1x18x16x16xf32, #tpu.memory_space<vmem>>, vector<1x1x16x16xf32>,
    %c0_197 = arith.constant 0 : index
    %c0_198 = arith.constant 0 : index
    %c0_199 = arith.constant 0 : index
    %c0_200 = arith.constant 0 : index
    %233 = vector.load %arg1[%c0_197, %c0_198, %c0_199, %c0_200] : memref<1x4x16x16xf32, #tpu.memory_space<vmem>>, vector<1x1x16x16xf32>
    %234 = vector.shape_cast %233 : vector<1x1x16x16xf32> to vector<16x16xf32>
    %c0_201 = arith.constant 0 : index
    %c3_202 = arith.constant 3 : index
    %235 = memref.load %arg2[%c0_201, %c3_202] : memref<4x18xf32, #tpu.memory_space<smem>>
    %236 = vector.broadcast %235 : f32 to vector<16x16xf32>
    %237 = arith.mulf %234, %236 : vector<16x16xf32>
    %c0_203 = arith.constant 0 : index
    %c1_204 = arith.constant 1 : index
    %c0_205 = arith.constant 0 : index
    %c0_206 = arith.constant 0 : index
    %238 = vector.load %arg1[%c0_203, %c1_204, %c0_205, %c0_206] : memref<1x4x16x16xf32, #tpu.memory_space<vmem>>, vector<1x1x16x16xf32>
    %239 = vector.shape_cast %238 : vector<1x1x16x16xf32> to vector<16x16xf32>
    %c1_207 = arith.constant 1 : index
    %c3_208 = arith.constant 3 : index
    %240 = memref.load %arg2[%c1_207, %c3_208] : memref<4x18xf32, #tpu.memory_space<smem>>
    %241 = vector.broadcast %240 : f32 to vector<16x16xf32>
    %242 = arith.mulf %239, %241 : vector<16x16xf32>
    %243 = arith.addf %237, %242 : vector<16x16xf32>
    %c0_209 = arith.constant 0 : index
    %c2_210 = arith.constant 2 : index
    %c0_211 = arith.constant 0 : index
    %c0_212 = arith.constant 0 : index
    %244 = vector.load %arg1[%c0_209, %c2_210, %c0_211, %c0_212] : memref<1x4x16x16xf32, #tpu.memory_space<vmem>>, vector<1x1x16x16xf32>
    %245 = vector.shape_cast %244 : vector<1x1x16x16xf32> to vector<16x16xf32>
    %c2_213 = arith.constant 2 : index
    %c3_214 = arith.constant 3 : index
    %246 = memref.load %arg2[%c2_213, %c3_214] : memref<4x18xf32, #tpu.memory_space<smem>>
    %247 = vector.broadcast %246 : f32 to vector<16x16xf32>
    %248 = arith.mulf %245, %247 : vector<16x16xf32>
    %249 = arith.addf %243, %248 : vector<16x16xf32>
    %c0_215 = arith.constant 0 : index
    %c3_216 = arith.constant 3 : index
    %c0_217 = arith.constant 0 : index
    %c0_218 = arith.constant 0 : index
    %250 = vector.load %arg1[%c0_215, %c3_216, %c0_217, %c0_218] : memref<1x4x16x16xf32, #tpu.memory_space<vmem>>, vector<1x1x16x16xf32>
    %251 = vector.shape_cast %250 : vector<1x1x16x16xf32> to vector<16x16xf32>
    %c3_219 = arith.constant 3 : index
    %c3_220 = arith.constant 3 : index
    %252 = memref.load %arg2[%c3_219, %c3_220] : memref<4x18xf32, #tpu.memory_space<smem>>
    %253 = vector.broadcast %252 : f32 to vector<16x16xf32>
    %254 = arith.mulf %251, %253 : vector<16x16xf32>
    %255 = arith.addf %249, %254 : vector<16x16xf32>
    %c3_221 = arith.constant 3 : index
    %256 = memref.load %arg3[%c3_221] : memref<18xf32, #tpu.memory_space<smem>>
    %257 = vector.broadcast %256 : f32 to vector<16x16xf32>
    %258 = arith.addf %255, %257 : vector<16x16xf32>
    %c1_222 = arith.constant 1 : index
    %c1_223 = arith.constant 1 : index
    %259 = vector.load %arg7[%c1_222, %c1_223] : memref<18x18xf32, #tpu.memory_space<vmem>>, vector<16x16xf32>
    tpu.vector_store %arg7[%c1_222, %c1_223], %258 {strides = array<i32>} : memref<18x18xf32, #tpu.memory_space<vmem>>, vector<16x16xf32>,
    %c0_224 = arith.constant 0 : index
    %c0_225 = arith.constant 0 : index
    %260 = vector.load %arg7[%c0_224, %c0_225] : memref<18x18xf32, #tpu.memory_space<vmem>>, vector<16x16xf32>
    %c3_226 = arith.constant 3 : index
    %c0_227 = arith.constant 0 : index
    %261 = memref.load %arg4[%c3_226, %c0_227] : memref<18x9xf32, #tpu.memory_space<smem>>
    %262 = vector.broadcast %261 : f32 to vector<16x16xf32>
    %263 = arith.mulf %260, %262 : vector<16x16xf32>
    %c0_228 = arith.constant 0 : index
    %c1_229 = arith.constant 1 : index
    %264 = vector.load %arg7[%c0_228, %c1_229] : memref<18x18xf32, #tpu.memory_space<vmem>>, vector<16x16xf32>
    %c3_230 = arith.constant 3 : index
    %c1_231 = arith.constant 1 : index
    %265 = memref.load %arg4[%c3_230, %c1_231] : memref<18x9xf32, #tpu.memory_space<smem>>
    %266 = vector.broadcast %265 : f32 to vector<16x16xf32>
    %267 = arith.mulf %264, %266 : vector<16x16xf32>
    %268 = arith.addf %263, %267 : vector<16x16xf32>
    %c0_232 = arith.constant 0 : index
    %c2_233 = arith.constant 2 : index
    %269 = vector.load %arg7[%c0_232, %c2_233] : memref<18x18xf32, #tpu.memory_space<vmem>>, vector<16x16xf32>
    %c3_234 = arith.constant 3 : index
    %c2_235 = arith.constant 2 : index
    %270 = memref.load %arg4[%c3_234, %c2_235] : memref<18x9xf32, #tpu.memory_space<smem>>
    %271 = vector.broadcast %270 : f32 to vector<16x16xf32>
    %272 = arith.mulf %269, %271 : vector<16x16xf32>
    %273 = arith.addf %268, %272 : vector<16x16xf32>
    %c1_236 = arith.constant 1 : index
    %c0_237 = arith.constant 0 : index
    %274 = vector.load %arg7[%c1_236, %c0_237] : memref<18x18xf32, #tpu.memory_space<vmem>>, vector<16x16xf32>
    %c3_238 = arith.constant 3 : index
    %c3_239 = arith.constant 3 : index
    %275 = memref.load %arg4[%c3_238, %c3_239] : memref<18x9xf32, #tpu.memory_space<smem>>
    %276 = vector.broadcast %275 : f32 to vector<16x16xf32>
    %277 = arith.mulf %274, %276 : vector<16x16xf32>
    %278 = arith.addf %273, %277 : vector<16x16xf32>
    %c1_240 = arith.constant 1 : index
    %c1_241 = arith.constant 1 : index
    %279 = vector.load %arg7[%c1_240, %c1_241] : memref<18x18xf32, #tpu.memory_space<vmem>>, vector<16x16xf32>
    %c3_242 = arith.constant 3 : index
    %c4_243 = arith.constant 4 : index
    %280 = memref.load %arg4[%c3_242, %c4_243] : memref<18x9xf32, #tpu.memory_space<smem>>
    %281 = vector.broadcast %280 : f32 to vector<16x16xf32>
    %282 = arith.mulf %279, %281 : vector<16x16xf32>
    %283 = arith.addf %278, %282 : vector<16x16xf32>
    %c1_244 = arith.constant 1 : index
    %c2_245 = arith.constant 2 : index
    %284 = vector.load %arg7[%c1_244, %c2_245] : memref<18x18xf32, #tpu.memory_space<vmem>>, vector<16x16xf32>
    %c3_246 = arith.constant 3 : index
    %c5_247 = arith.constant 5 : index
    %285 = memref.load %arg4[%c3_246, %c5_247] : memref<18x9xf32, #tpu.memory_space<smem>>
    %286 = vector.broadcast %285 : f32 to vector<16x16xf32>
    %287 = arith.mulf %284, %286 : vector<16x16xf32>
    %288 = arith.addf %283, %287 : vector<16x16xf32>
    %c2_248 = arith.constant 2 : index
    %c0_249 = arith.constant 0 : index
    %289 = vector.load %arg7[%c2_248, %c0_249] : memref<18x18xf32, #tpu.memory_space<vmem>>, vector<16x16xf32>
    %c3_250 = arith.constant 3 : index
    %c6_251 = arith.constant 6 : index
    %290 = memref.load %arg4[%c3_250, %c6_251] : memref<18x9xf32, #tpu.memory_space<smem>>
    %291 = vector.broadcast %290 : f32 to vector<16x16xf32>
    %292 = arith.mulf %289, %291 : vector<16x16xf32>
    %293 = arith.addf %288, %292 : vector<16x16xf32>
    %c2_252 = arith.constant 2 : index
    %c1_253 = arith.constant 1 : index
    %294 = vector.load %arg7[%c2_252, %c1_253] : memref<18x18xf32, #tpu.memory_space<vmem>>, vector<16x16xf32>
    %c3_254 = arith.constant 3 : index
    %c7_255 = arith.constant 7 : index
    %295 = memref.load %arg4[%c3_254, %c7_255] : memref<18x9xf32, #tpu.memory_space<smem>>
    %296 = vector.broadcast %295 : f32 to vector<16x16xf32>
    %297 = arith.mulf %294, %296 : vector<16x16xf32>
    %298 = arith.addf %293, %297 : vector<16x16xf32>
    %c2_256 = arith.constant 2 : index
    %c2_257 = arith.constant 2 : index
    %299 = vector.load %arg7[%c2_256, %c2_257] : memref<18x18xf32, #tpu.memory_space<vmem>>, vector<16x16xf32>
    %c3_258 = arith.constant 3 : index
    %c8_259 = arith.constant 8 : index
    %300 = memref.load %arg4[%c3_258, %c8_259] : memref<18x9xf32, #tpu.memory_space<smem>>
    %301 = vector.broadcast %300 : f32 to vector<16x16xf32>
    %302 = arith.mulf %299, %301 : vector<16x16xf32>
    %303 = arith.addf %298, %302 : vector<16x16xf32>
    %c3_260 = arith.constant 3 : index
    %304 = memref.load %arg5[%c3_260] : memref<18xf32, #tpu.memory_space<smem>>
    %305 = vector.broadcast %304 : f32 to vector<16x16xf32>
    %306 = arith.addf %303, %305 : vector<16x16xf32>
    %c0_261 = arith.constant 0 : index
    %c3_262 = arith.constant 3 : index
    %c0_263 = arith.constant 0 : index
    %c0_264 = arith.constant 0 : index
    %307 = vector.load %arg6[%c0_261, %c3_262, %c0_263, %c0_264] : memref<1x18x16x16xf32, #tpu.memory_space<vmem>>, vector<1x1x16x16xf32>
    %308 = vector.shape_cast %307 : vector<1x1x16x16xf32> to vector<16x16xf32>
    %309 = vector.shape_cast %306 : vector<16x16xf32> to vector<1x1x16x16xf32>
    tpu.vector_store %arg6[%c0_261, %c3_262, %c0_263, %c0_264], %309 {strides = array<i32>} : memref<1x18x16x16xf32, #tpu.memory_space<vmem>>, vector<1x1x16x16xf32>,
    %c0_265 = arith.constant 0 : index
    %c0_266 = arith.constant 0 : index
    %c0_267 = arith.constant 0 : index
    %c0_268 = arith.constant 0 : index
    %310 = vector.load %arg1[%c0_265, %c0_266, %c0_267, %c0_268] : memref<1x4x16x16xf32, #tpu.memory_space<vmem>>, vector<1x1x16x16xf32>
    %311 = vector.shape_cast %310 : vector<1x1x16x16xf32> to vector<16x16xf32>
    %c0_269 = arith.constant 0 : index
    %c4_270 = arith.constant 4 : index
    %312 = memref.load %arg2[%c0_269, %c4_270] : memref<4x18xf32, #tpu.memory_space<smem>>
    %313 = vector.broadcast %312 : f32 to vector<16x16xf32>
    %314 = arith.mulf %311, %313 : vector<16x16xf32>
    %c0_271 = arith.constant 0 : index
    %c1_272 = arith.constant 1 : index
    %c0_273 = arith.constant 0 : index
    %c0_274 = arith.constant 0 : index
    %315 = vector.load %arg1[%c0_271, %c1_272, %c0_273, %c0_274] : memref<1x4x16x16xf32, #tpu.memory_space<vmem>>, vector<1x1x16x16xf32>
    %316 = vector.shape_cast %315 : vector<1x1x16x16xf32> to vector<16x16xf32>
    %c1_275 = arith.constant 1 : index
    %c4_276 = arith.constant 4 : index
    %317 = memref.load %arg2[%c1_275, %c4_276] : memref<4x18xf32, #tpu.memory_space<smem>>
    %318 = vector.broadcast %317 : f32 to vector<16x16xf32>
    %319 = arith.mulf %316, %318 : vector<16x16xf32>
    %320 = arith.addf %314, %319 : vector<16x16xf32>
    %c0_277 = arith.constant 0 : index
    %c2_278 = arith.constant 2 : index
    %c0_279 = arith.constant 0 : index
    %c0_280 = arith.constant 0 : index
    %321 = vector.load %arg1[%c0_277, %c2_278, %c0_279, %c0_280] : memref<1x4x16x16xf32, #tpu.memory_space<vmem>>, vector<1x1x16x16xf32>
    %322 = vector.shape_cast %321 : vector<1x1x16x16xf32> to vector<16x16xf32>
    %c2_281 = arith.constant 2 : index
    %c4_282 = arith.constant 4 : index
    %323 = memref.load %arg2[%c2_281, %c4_282] : memref<4x18xf32, #tpu.memory_space<smem>>
    %324 = vector.broadcast %323 : f32 to vector<16x16xf32>
    %325 = arith.mulf %322, %324 : vector<16x16xf32>
    %326 = arith.addf %320, %325 : vector<16x16xf32>
    %c0_283 = arith.constant 0 : index
    %c3_284 = arith.constant 3 : index
    %c0_285 = arith.constant 0 : index
    %c0_286 = arith.constant 0 : index
    %327 = vector.load %arg1[%c0_283, %c3_284, %c0_285, %c0_286] : memref<1x4x16x16xf32, #tpu.memory_space<vmem>>, vector<1x1x16x16xf32>
    %328 = vector.shape_cast %327 : vector<1x1x16x16xf32> to vector<16x16xf32>
    %c3_287 = arith.constant 3 : index
    %c4_288 = arith.constant 4 : index
    %329 = memref.load %arg2[%c3_287, %c4_288] : memref<4x18xf32, #tpu.memory_space<smem>>
    %330 = vector.broadcast %329 : f32 to vector<16x16xf32>
    %331 = arith.mulf %328, %330 : vector<16x16xf32>
    %332 = arith.addf %326, %331 : vector<16x16xf32>
    %c4_289 = arith.constant 4 : index
    %333 = memref.load %arg3[%c4_289] : memref<18xf32, #tpu.memory_space<smem>>
    %334 = vector.broadcast %333 : f32 to vector<16x16xf32>
    %335 = arith.addf %332, %334 : vector<16x16xf32>
    %c1_290 = arith.constant 1 : index
    %c1_291 = arith.constant 1 : index
    %336 = vector.load %arg7[%c1_290, %c1_291] : memref<18x18xf32, #tpu.memory_space<vmem>>, vector<16x16xf32>
    tpu.vector_store %arg7[%c1_290, %c1_291], %335 {strides = array<i32>} : memref<18x18xf32, #tpu.memory_space<vmem>>, vector<16x16xf32>,
    %c0_292 = arith.constant 0 : index
    %c0_293 = arith.constant 0 : index
    %337 = vector.load %arg7[%c0_292, %c0_293] : memref<18x18xf32, #tpu.memory_space<vmem>>, vector<16x16xf32>
    %c4_294 = arith.constant 4 : index
    %c0_295 = arith.constant 0 : index
    %338 = memref.load %arg4[%c4_294, %c0_295] : memref<18x9xf32, #tpu.memory_space<smem>>
    %339 = vector.broadcast %338 : f32 to vector<16x16xf32>
    %340 = arith.mulf %337, %339 : vector<16x16xf32>
    %c0_296 = arith.constant 0 : index
    %c1_297 = arith.constant 1 : index
    %341 = vector.load %arg7[%c0_296, %c1_297] : memref<18x18xf32, #tpu.memory_space<vmem>>, vector<16x16xf32>
    %c4_298 = arith.constant 4 : index
    %c1_299 = arith.constant 1 : index
    %342 = memref.load %arg4[%c4_298, %c1_299] : memref<18x9xf32, #tpu.memory_space<smem>>
    %343 = vector.broadcast %342 : f32 to vector<16x16xf32>
    %344 = arith.mulf %341, %343 : vector<16x16xf32>
    %345 = arith.addf %340, %344 : vector<16x16xf32>
    %c0_300 = arith.constant 0 : index
    %c2_301 = arith.constant 2 : index
    %346 = vector.load %arg7[%c0_300, %c2_301] : memref<18x18xf32, #tpu.memory_space<vmem>>, vector<16x16xf32>
    %c4_302 = arith.constant 4 : index
    %c2_303 = arith.constant 2 : index
    %347 = memref.load %arg4[%c4_302, %c2_303] : memref<18x9xf32, #tpu.memory_space<smem>>
    %348 = vector.broadcast %347 : f32 to vector<16x16xf32>
    %349 = arith.mulf %346, %348 : vector<16x16xf32>
    %350 = arith.addf %345, %349 : vector<16x16xf32>
    %c1_304 = arith.constant 1 : index
    %c0_305 = arith.constant 0 : index
    %351 = vector.load %arg7[%c1_304, %c0_305] : memref<18x18xf32, #tpu.memory_space<vmem>>, vector<16x16xf32>
    %c4_306 = arith.constant 4 : index
    %c3_307 = arith.constant 3 : index
    %352 = memref.load %arg4[%c4_306, %c3_307] : memref<18x9xf32, #tpu.memory_space<smem>>
    %353 = vector.broadcast %352 : f32 to vector<16x16xf32>
    %354 = arith.mulf %351, %353 : vector<16x16xf32>
    %355 = arith.addf %350, %354 : vector<16x16xf32>
    %c1_308 = arith.constant 1 : index
    %c1_309 = arith.constant 1 : index
    %356 = vector.load %arg7[%c1_308, %c1_309] : memref<18x18xf32, #tpu.memory_space<vmem>>, vector<16x16xf32>
    %c4_310 = arith.constant 4 : index
    %c4_311 = arith.constant 4 : index
    %357 = memref.load %arg4[%c4_310, %c4_311] : memref<18x9xf32, #tpu.memory_space<smem>>
    %358 = vector.broadcast %357 : f32 to vector<16x16xf32>
    %359 = arith.mulf %356, %358 : vector<16x16xf32>
    %360 = arith.addf %355, %359 : vector<16x16xf32>
    %c1_312 = arith.constant 1 : index
    %c2_313 = arith.constant 2 : index
    %361 = vector.load %arg7[%c1_312, %c2_313] : memref<18x18xf32, #tpu.memory_space<vmem>>, vector<16x16xf32>
    %c4_314 = arith.constant 4 : index
    %c5_315 = arith.constant 5 : index
    %362 = memref.load %arg4[%c4_314, %c5_315] : memref<18x9xf32, #tpu.memory_space<smem>>
    %363 = vector.broadcast %362 : f32 to vector<16x16xf32>
    %364 = arith.mulf %361, %363 : vector<16x16xf32>
    %365 = arith.addf %360, %364 : vector<16x16xf32>
    %c2_316 = arith.constant 2 : index
    %c0_317 = arith.constant 0 : index
    %366 = vector.load %arg7[%c2_316, %c0_317] : memref<18x18xf32, #tpu.memory_space<vmem>>, vector<16x16xf32>
    %c4_318 = arith.constant 4 : index
    %c6_319 = arith.constant 6 : index
    %367 = memref.load %arg4[%c4_318, %c6_319] : memref<18x9xf32, #tpu.memory_space<smem>>
    %368 = vector.broadcast %367 : f32 to vector<16x16xf32>
    %369 = arith.mulf %366, %368 : vector<16x16xf32>
    %370 = arith.addf %365, %369 : vector<16x16xf32>
    %c2_320 = arith.constant 2 : index
    %c1_321 = arith.constant 1 : index
    %371 = vector.load %arg7[%c2_320, %c1_321] : memref<18x18xf32, #tpu.memory_space<vmem>>, vector<16x16xf32>
    %c4_322 = arith.constant 4 : index
    %c7_323 = arith.constant 7 : index
    %372 = memref.load %arg4[%c4_322, %c7_323] : memref<18x9xf32, #tpu.memory_space<smem>>
    %373 = vector.broadcast %372 : f32 to vector<16x16xf32>
    %374 = arith.mulf %371, %373 : vector<16x16xf32>
    %375 = arith.addf %370, %374 : vector<16x16xf32>
    %c2_324 = arith.constant 2 : index
    %c2_325 = arith.constant 2 : index
    %376 = vector.load %arg7[%c2_324, %c2_325] : memref<18x18xf32, #tpu.memory_space<vmem>>, vector<16x16xf32>
    %c4_326 = arith.constant 4 : index
    %c8_327 = arith.constant 8 : index
    %377 = memref.load %arg4[%c4_326, %c8_327] : memref<18x9xf32, #tpu.memory_space<smem>>
    %378 = vector.broadcast %377 : f32 to vector<16x16xf32>
    %379 = arith.mulf %376, %378 : vector<16x16xf32>
    %380 = arith.addf %375, %379 : vector<16x16xf32>
    %c4_328 = arith.constant 4 : index
    %381 = memref.load %arg5[%c4_328] : memref<18xf32, #tpu.memory_space<smem>>
    %382 = vector.broadcast %381 : f32 to vector<16x16xf32>
    %383 = arith.addf %380, %382 : vector<16x16xf32>
    %c0_329 = arith.constant 0 : index
    %c4_330 = arith.constant 4 : index
    %c0_331 = arith.constant 0 : index
    %c0_332 = arith.constant 0 : index
    %384 = vector.load %arg6[%c0_329, %c4_330, %c0_331, %c0_332] : memref<1x18x16x16xf32, #tpu.memory_space<vmem>>, vector<1x1x16x16xf32>
    %385 = vector.shape_cast %384 : vector<1x1x16x16xf32> to vector<16x16xf32>
    %386 = vector.shape_cast %383 : vector<16x16xf32> to vector<1x1x16x16xf32>
    tpu.vector_store %arg6[%c0_329, %c4_330, %c0_331, %c0_332], %386 {strides = array<i32>} : memref<1x18x16x16xf32, #tpu.memory_space<vmem>>, vector<1x1x16x16xf32>,
    %c0_333 = arith.constant 0 : index
    %c0_334 = arith.constant 0 : index
    %c0_335 = arith.constant 0 : index
    %c0_336 = arith.constant 0 : index
    %387 = vector.load %arg1[%c0_333, %c0_334, %c0_335, %c0_336] : memref<1x4x16x16xf32, #tpu.memory_space<vmem>>, vector<1x1x16x16xf32>
    %388 = vector.shape_cast %387 : vector<1x1x16x16xf32> to vector<16x16xf32>
    %c0_337 = arith.constant 0 : index
    %c5_338 = arith.constant 5 : index
    %389 = memref.load %arg2[%c0_337, %c5_338] : memref<4x18xf32, #tpu.memory_space<smem>>
    %390 = vector.broadcast %389 : f32 to vector<16x16xf32>
    %391 = arith.mulf %388, %390 : vector<16x16xf32>
    %c0_339 = arith.constant 0 : index
    %c1_340 = arith.constant 1 : index
    %c0_341 = arith.constant 0 : index
    %c0_342 = arith.constant 0 : index
    %392 = vector.load %arg1[%c0_339, %c1_340, %c0_341, %c0_342] : memref<1x4x16x16xf32, #tpu.memory_space<vmem>>, vector<1x1x16x16xf32>
    %393 = vector.shape_cast %392 : vector<1x1x16x16xf32> to vector<16x16xf32>
    %c1_343 = arith.constant 1 : index
    %c5_344 = arith.constant 5 : index
    %394 = memref.load %arg2[%c1_343, %c5_344] : memref<4x18xf32, #tpu.memory_space<smem>>
    %395 = vector.broadcast %394 : f32 to vector<16x16xf32>
    %396 = arith.mulf %393, %395 : vector<16x16xf32>
    %397 = arith.addf %391, %396 : vector<16x16xf32>
    %c0_345 = arith.constant 0 : index
    %c2_346 = arith.constant 2 : index
    %c0_347 = arith.constant 0 : index
    %c0_348 = arith.constant 0 : index
    %398 = vector.load %arg1[%c0_345, %c2_346, %c0_347, %c0_348] : memref<1x4x16x16xf32, #tpu.memory_space<vmem>>, vector<1x1x16x16xf32>
    %399 = vector.shape_cast %398 : vector<1x1x16x16xf32> to vector<16x16xf32>
    %c2_349 = arith.constant 2 : index
    %c5_350 = arith.constant 5 : index
    %400 = memref.load %arg2[%c2_349, %c5_350] : memref<4x18xf32, #tpu.memory_space<smem>>
    %401 = vector.broadcast %400 : f32 to vector<16x16xf32>
    %402 = arith.mulf %399, %401 : vector<16x16xf32>
    %403 = arith.addf %397, %402 : vector<16x16xf32>
    %c0_351 = arith.constant 0 : index
    %c3_352 = arith.constant 3 : index
    %c0_353 = arith.constant 0 : index
    %c0_354 = arith.constant 0 : index
    %404 = vector.load %arg1[%c0_351, %c3_352, %c0_353, %c0_354] : memref<1x4x16x16xf32, #tpu.memory_space<vmem>>, vector<1x1x16x16xf32>
    %405 = vector.shape_cast %404 : vector<1x1x16x16xf32> to vector<16x16xf32>
    %c3_355 = arith.constant 3 : index
    %c5_356 = arith.constant 5 : index
    %406 = memref.load %arg2[%c3_355, %c5_356] : memref<4x18xf32, #tpu.memory_space<smem>>
    %407 = vector.broadcast %406 : f32 to vector<16x16xf32>
    %408 = arith.mulf %405, %407 : vector<16x16xf32>
    %409 = arith.addf %403, %408 : vector<16x16xf32>
    %c5_357 = arith.constant 5 : index
    %410 = memref.load %arg3[%c5_357] : memref<18xf32, #tpu.memory_space<smem>>
    %411 = vector.broadcast %410 : f32 to vector<16x16xf32>
    %412 = arith.addf %409, %411 : vector<16x16xf32>
    %c1_358 = arith.constant 1 : index
    %c1_359 = arith.constant 1 : index
    %413 = vector.load %arg7[%c1_358, %c1_359] : memref<18x18xf32, #tpu.memory_space<vmem>>, vector<16x16xf32>
    tpu.vector_store %arg7[%c1_358, %c1_359], %412 {strides = array<i32>} : memref<18x18xf32, #tpu.memory_space<vmem>>, vector<16x16xf32>,
    %c0_360 = arith.constant 0 : index
    %c0_361 = arith.constant 0 : index
    %414 = vector.load %arg7[%c0_360, %c0_361] : memref<18x18xf32, #tpu.memory_space<vmem>>, vector<16x16xf32>
    %c5_362 = arith.constant 5 : index
    %c0_363 = arith.constant 0 : index
    %415 = memref.load %arg4[%c5_362, %c0_363] : memref<18x9xf32, #tpu.memory_space<smem>>
    %416 = vector.broadcast %415 : f32 to vector<16x16xf32>
    %417 = arith.mulf %414, %416 : vector<16x16xf32>
    %c0_364 = arith.constant 0 : index
    %c1_365 = arith.constant 1 : index
    %418 = vector.load %arg7[%c0_364, %c1_365] : memref<18x18xf32, #tpu.memory_space<vmem>>, vector<16x16xf32>
    %c5_366 = arith.constant 5 : index
    %c1_367 = arith.constant 1 : index
    %419 = memref.load %arg4[%c5_366, %c1_367] : memref<18x9xf32, #tpu.memory_space<smem>>
    %420 = vector.broadcast %419 : f32 to vector<16x16xf32>
    %421 = arith.mulf %418, %420 : vector<16x16xf32>
    %422 = arith.addf %417, %421 : vector<16x16xf32>
    %c0_368 = arith.constant 0 : index
    %c2_369 = arith.constant 2 : index
    %423 = vector.load %arg7[%c0_368, %c2_369] : memref<18x18xf32, #tpu.memory_space<vmem>>, vector<16x16xf32>
    %c5_370 = arith.constant 5 : index
    %c2_371 = arith.constant 2 : index
    %424 = memref.load %arg4[%c5_370, %c2_371] : memref<18x9xf32, #tpu.memory_space<smem>>
    %425 = vector.broadcast %424 : f32 to vector<16x16xf32>
    %426 = arith.mulf %423, %425 : vector<16x16xf32>
    %427 = arith.addf %422, %426 : vector<16x16xf32>
    %c1_372 = arith.constant 1 : index
    %c0_373 = arith.constant 0 : index
    %428 = vector.load %arg7[%c1_372, %c0_373] : memref<18x18xf32, #tpu.memory_space<vmem>>, vector<16x16xf32>
    %c5_374 = arith.constant 5 : index
    %c3_375 = arith.constant 3 : index
    %429 = memref.load %arg4[%c5_374, %c3_375] : memref<18x9xf32, #tpu.memory_space<smem>>
    %430 = vector.broadcast %429 : f32 to vector<16x16xf32>
    %431 = arith.mulf %428, %430 : vector<16x16xf32>
    %432 = arith.addf %427, %431 : vector<16x16xf32>
    %c1_376 = arith.constant 1 : index
    %c1_377 = arith.constant 1 : index
    %433 = vector.load %arg7[%c1_376, %c1_377] : memref<18x18xf32, #tpu.memory_space<vmem>>, vector<16x16xf32>
    %c5_378 = arith.constant 5 : index
    %c4_379 = arith.constant 4 : index
    %434 = memref.load %arg4[%c5_378, %c4_379] : memref<18x9xf32, #tpu.memory_space<smem>>
    %435 = vector.broadcast %434 : f32 to vector<16x16xf32>
    %436 = arith.mulf %433, %435 : vector<16x16xf32>
    %437 = arith.addf %432, %436 : vector<16x16xf32>
    %c1_380 = arith.constant 1 : index
    %c2_381 = arith.constant 2 : index
    %438 = vector.load %arg7[%c1_380, %c2_381] : memref<18x18xf32, #tpu.memory_space<vmem>>, vector<16x16xf32>
    %c5_382 = arith.constant 5 : index
    %c5_383 = arith.constant 5 : index
    %439 = memref.load %arg4[%c5_382, %c5_383] : memref<18x9xf32, #tpu.memory_space<smem>>
    %440 = vector.broadcast %439 : f32 to vector<16x16xf32>
    %441 = arith.mulf %438, %440 : vector<16x16xf32>
    %442 = arith.addf %437, %441 : vector<16x16xf32>
    %c2_384 = arith.constant 2 : index
    %c0_385 = arith.constant 0 : index
    %443 = vector.load %arg7[%c2_384, %c0_385] : memref<18x18xf32, #tpu.memory_space<vmem>>, vector<16x16xf32>
    %c5_386 = arith.constant 5 : index
    %c6_387 = arith.constant 6 : index
    %444 = memref.load %arg4[%c5_386, %c6_387] : memref<18x9xf32, #tpu.memory_space<smem>>
    %445 = vector.broadcast %444 : f32 to vector<16x16xf32>
    %446 = arith.mulf %443, %445 : vector<16x16xf32>
    %447 = arith.addf %442, %446 : vector<16x16xf32>
    %c2_388 = arith.constant 2 : index
    %c1_389 = arith.constant 1 : index
    %448 = vector.load %arg7[%c2_388, %c1_389] : memref<18x18xf32, #tpu.memory_space<vmem>>, vector<16x16xf32>
    %c5_390 = arith.constant 5 : index
    %c7_391 = arith.constant 7 : index
    %449 = memref.load %arg4[%c5_390, %c7_391] : memref<18x9xf32, #tpu.memory_space<smem>>
    %450 = vector.broadcast %449 : f32 to vector<16x16xf32>
    %451 = arith.mulf %448, %450 : vector<16x16xf32>
    %452 = arith.addf %447, %451 : vector<16x16xf32>
    %c2_392 = arith.constant 2 : index
    %c2_393 = arith.constant 2 : index
    %453 = vector.load %arg7[%c2_392, %c2_393] : memref<18x18xf32, #tpu.memory_space<vmem>>, vector<16x16xf32>
    %c5_394 = arith.constant 5 : index
    %c8_395 = arith.constant 8 : index
    %454 = memref.load %arg4[%c5_394, %c8_395] : memref<18x9xf32, #tpu.memory_space<smem>>
    %455 = vector.broadcast %454 : f32 to vector<16x16xf32>
    %456 = arith.mulf %453, %455 : vector<16x16xf32>
    %457 = arith.addf %452, %456 : vector<16x16xf32>
    %c5_396 = arith.constant 5 : index
    %458 = memref.load %arg5[%c5_396] : memref<18xf32, #tpu.memory_space<smem>>
    %459 = vector.broadcast %458 : f32 to vector<16x16xf32>
    %460 = arith.addf %457, %459 : vector<16x16xf32>
    %c0_397 = arith.constant 0 : index
    %c5_398 = arith.constant 5 : index
    %c0_399 = arith.constant 0 : index
    %c0_400 = arith.constant 0 : index
    %461 = vector.load %arg6[%c0_397, %c5_398, %c0_399, %c0_400] : memref<1x18x16x16xf32, #tpu.memory_space<vmem>>, vector<1x1x16x16xf32>
    %462 = vector.shape_cast %461 : vector<1x1x16x16xf32> to vector<16x16xf32>
    %463 = vector.shape_cast %460 : vector<16x16xf32> to vector<1x1x16x16xf32>
    tpu.vector_store %arg6[%c0_397, %c5_398, %c0_399, %c0_400], %463 {strides = array<i32>} : memref<1x18x16x16xf32, #tpu.memory_space<vmem>>, vector<1x1x16x16xf32>,
    %c0_401 = arith.constant 0 : index
    %c0_402 = arith.constant 0 : index
    %c0_403 = arith.constant 0 : index
    %c0_404 = arith.constant 0 : index
    %464 = vector.load %arg1[%c0_401, %c0_402, %c0_403, %c0_404] : memref<1x4x16x16xf32, #tpu.memory_space<vmem>>, vector<1x1x16x16xf32>
    %465 = vector.shape_cast %464 : vector<1x1x16x16xf32> to vector<16x16xf32>
    %c0_405 = arith.constant 0 : index
    %c6_406 = arith.constant 6 : index
    %466 = memref.load %arg2[%c0_405, %c6_406] : memref<4x18xf32, #tpu.memory_space<smem>>
    %467 = vector.broadcast %466 : f32 to vector<16x16xf32>
    %468 = arith.mulf %465, %467 : vector<16x16xf32>
    %c0_407 = arith.constant 0 : index
    %c1_408 = arith.constant 1 : index
    %c0_409 = arith.constant 0 : index
    %c0_410 = arith.constant 0 : index
    %469 = vector.load %arg1[%c0_407, %c1_408, %c0_409, %c0_410] : memref<1x4x16x16xf32, #tpu.memory_space<vmem>>, vector<1x1x16x16xf32>
    %470 = vector.shape_cast %469 : vector<1x1x16x16xf32> to vector<16x16xf32>
    %c1_411 = arith.constant 1 : index
    %c6_412 = arith.constant 6 : index
    %471 = memref.load %arg2[%c1_411, %c6_412] : memref<4x18xf32, #tpu.memory_space<smem>>
    %472 = vector.broadcast %471 : f32 to vector<16x16xf32>
    %473 = arith.mulf %470, %472 : vector<16x16xf32>
    %474 = arith.addf %468, %473 : vector<16x16xf32>
    %c0_413 = arith.constant 0 : index
    %c2_414 = arith.constant 2 : index
    %c0_415 = arith.constant 0 : index
    %c0_416 = arith.constant 0 : index
    %475 = vector.load %arg1[%c0_413, %c2_414, %c0_415, %c0_416] : memref<1x4x16x16xf32, #tpu.memory_space<vmem>>, vector<1x1x16x16xf32>
    %476 = vector.shape_cast %475 : vector<1x1x16x16xf32> to vector<16x16xf32>
    %c2_417 = arith.constant 2 : index
    %c6_418 = arith.constant 6 : index
    %477 = memref.load %arg2[%c2_417, %c6_418] : memref<4x18xf32, #tpu.memory_space<smem>>
    %478 = vector.broadcast %477 : f32 to vector<16x16xf32>
    %479 = arith.mulf %476, %478 : vector<16x16xf32>
    %480 = arith.addf %474, %479 : vector<16x16xf32>
    %c0_419 = arith.constant 0 : index
    %c3_420 = arith.constant 3 : index
    %c0_421 = arith.constant 0 : index
    %c0_422 = arith.constant 0 : index
    %481 = vector.load %arg1[%c0_419, %c3_420, %c0_421, %c0_422] : memref<1x4x16x16xf32, #tpu.memory_space<vmem>>, vector<1x1x16x16xf32>
    %482 = vector.shape_cast %481 : vector<1x1x16x16xf32> to vector<16x16xf32>
    %c3_423 = arith.constant 3 : index
    %c6_424 = arith.constant 6 : index
    %483 = memref.load %arg2[%c3_423, %c6_424] : memref<4x18xf32, #tpu.memory_space<smem>>
    %484 = vector.broadcast %483 : f32 to vector<16x16xf32>
    %485 = arith.mulf %482, %484 : vector<16x16xf32>
    %486 = arith.addf %480, %485 : vector<16x16xf32>
    %c6_425 = arith.constant 6 : index
    %487 = memref.load %arg3[%c6_425] : memref<18xf32, #tpu.memory_space<smem>>
    %488 = vector.broadcast %487 : f32 to vector<16x16xf32>
    %489 = arith.addf %486, %488 : vector<16x16xf32>
    %c1_426 = arith.constant 1 : index
    %c1_427 = arith.constant 1 : index
    %490 = vector.load %arg7[%c1_426, %c1_427] : memref<18x18xf32, #tpu.memory_space<vmem>>, vector<16x16xf32>
    tpu.vector_store %arg7[%c1_426, %c1_427], %489 {strides = array<i32>} : memref<18x18xf32, #tpu.memory_space<vmem>>, vector<16x16xf32>,
    %c0_428 = arith.constant 0 : index
    %c0_429 = arith.constant 0 : index
    %491 = vector.load %arg7[%c0_428, %c0_429] : memref<18x18xf32, #tpu.memory_space<vmem>>, vector<16x16xf32>
    %c6_430 = arith.constant 6 : index
    %c0_431 = arith.constant 0 : index
    %492 = memref.load %arg4[%c6_430, %c0_431] : memref<18x9xf32, #tpu.memory_space<smem>>
    %493 = vector.broadcast %492 : f32 to vector<16x16xf32>
    %494 = arith.mulf %491, %493 : vector<16x16xf32>
    %c0_432 = arith.constant 0 : index
    %c1_433 = arith.constant 1 : index
    %495 = vector.load %arg7[%c0_432, %c1_433] : memref<18x18xf32, #tpu.memory_space<vmem>>, vector<16x16xf32>
    %c6_434 = arith.constant 6 : index
    %c1_435 = arith.constant 1 : index
    %496 = memref.load %arg4[%c6_434, %c1_435] : memref<18x9xf32, #tpu.memory_space<smem>>
    %497 = vector.broadcast %496 : f32 to vector<16x16xf32>
    %498 = arith.mulf %495, %497 : vector<16x16xf32>
    %499 = arith.addf %494, %498 : vector<16x16xf32>
    %c0_436 = arith.constant 0 : index
    %c2_437 = arith.constant 2 : index
    %500 = vector.load %arg7[%c0_436, %c2_437] : memref<18x18xf32, #tpu.memory_space<vmem>>, vector<16x16xf32>
    %c6_438 = arith.constant 6 : index
    %c2_439 = arith.constant 2 : index
    %501 = memref.load %arg4[%c6_438, %c2_439] : memref<18x9xf32, #tpu.memory_space<smem>>
    %502 = vector.broadcast %501 : f32 to vector<16x16xf32>
    %503 = arith.mulf %500, %502 : vector<16x16xf32>
    %504 = arith.addf %499, %503 : vector<16x16xf32>
    %c1_440 = arith.constant 1 : index
    %c0_441 = arith.constant 0 : index
    %505 = vector.load %arg7[%c1_440, %c0_441] : memref<18x18xf32, #tpu.memory_space<vmem>>, vector<16x16xf32>
    %c6_442 = arith.constant 6 : index
    %c3_443 = arith.constant 3 : index
    %506 = memref.load %arg4[%c6_442, %c3_443] : memref<18x9xf32, #tpu.memory_space<smem>>
    %507 = vector.broadcast %506 : f32 to vector<16x16xf32>
    %508 = arith.mulf %505, %507 : vector<16x16xf32>
    %509 = arith.addf %504, %508 : vector<16x16xf32>
    %c1_444 = arith.constant 1 : index
    %c1_445 = arith.constant 1 : index
    %510 = vector.load %arg7[%c1_444, %c1_445] : memref<18x18xf32, #tpu.memory_space<vmem>>, vector<16x16xf32>
    %c6_446 = arith.constant 6 : index
    %c4_447 = arith.constant 4 : index
    %511 = memref.load %arg4[%c6_446, %c4_447] : memref<18x9xf32, #tpu.memory_space<smem>>
    %512 = vector.broadcast %511 : f32 to vector<16x16xf32>
    %513 = arith.mulf %510, %512 : vector<16x16xf32>
    %514 = arith.addf %509, %513 : vector<16x16xf32>
    %c1_448 = arith.constant 1 : index
    %c2_449 = arith.constant 2 : index
    %515 = vector.load %arg7[%c1_448, %c2_449] : memref<18x18xf32, #tpu.memory_space<vmem>>, vector<16x16xf32>
    %c6_450 = arith.constant 6 : index
    %c5_451 = arith.constant 5 : index
    %516 = memref.load %arg4[%c6_450, %c5_451] : memref<18x9xf32, #tpu.memory_space<smem>>
    %517 = vector.broadcast %516 : f32 to vector<16x16xf32>
    %518 = arith.mulf %515, %517 : vector<16x16xf32>
    %519 = arith.addf %514, %518 : vector<16x16xf32>
    %c2_452 = arith.constant 2 : index
    %c0_453 = arith.constant 0 : index
    %520 = vector.load %arg7[%c2_452, %c0_453] : memref<18x18xf32, #tpu.memory_space<vmem>>, vector<16x16xf32>
    %c6_454 = arith.constant 6 : index
    %c6_455 = arith.constant 6 : index
    %521 = memref.load %arg4[%c6_454, %c6_455] : memref<18x9xf32, #tpu.memory_space<smem>>
    %522 = vector.broadcast %521 : f32 to vector<16x16xf32>
    %523 = arith.mulf %520, %522 : vector<16x16xf32>
    %524 = arith.addf %519, %523 : vector<16x16xf32>
    %c2_456 = arith.constant 2 : index
    %c1_457 = arith.constant 1 : index
    %525 = vector.load %arg7[%c2_456, %c1_457] : memref<18x18xf32, #tpu.memory_space<vmem>>, vector<16x16xf32>
    %c6_458 = arith.constant 6 : index
    %c7_459 = arith.constant 7 : index
    %526 = memref.load %arg4[%c6_458, %c7_459] : memref<18x9xf32, #tpu.memory_space<smem>>
    %527 = vector.broadcast %526 : f32 to vector<16x16xf32>
    %528 = arith.mulf %525, %527 : vector<16x16xf32>
    %529 = arith.addf %524, %528 : vector<16x16xf32>
    %c2_460 = arith.constant 2 : index
    %c2_461 = arith.constant 2 : index
    %530 = vector.load %arg7[%c2_460, %c2_461] : memref<18x18xf32, #tpu.memory_space<vmem>>, vector<16x16xf32>
    %c6_462 = arith.constant 6 : index
    %c8_463 = arith.constant 8 : index
    %531 = memref.load %arg4[%c6_462, %c8_463] : memref<18x9xf32, #tpu.memory_space<smem>>
    %532 = vector.broadcast %531 : f32 to vector<16x16xf32>
    %533 = arith.mulf %530, %532 : vector<16x16xf32>
    %534 = arith.addf %529, %533 : vector<16x16xf32>
    %c6_464 = arith.constant 6 : index
    %535 = memref.load %arg5[%c6_464] : memref<18xf32, #tpu.memory_space<smem>>
    %536 = vector.broadcast %535 : f32 to vector<16x16xf32>
    %537 = arith.addf %534, %536 : vector<16x16xf32>
    %c0_465 = arith.constant 0 : index
    %c6_466 = arith.constant 6 : index
    %c0_467 = arith.constant 0 : index
    %c0_468 = arith.constant 0 : index
    %538 = vector.load %arg6[%c0_465, %c6_466, %c0_467, %c0_468] : memref<1x18x16x16xf32, #tpu.memory_space<vmem>>, vector<1x1x16x16xf32>
    %539 = vector.shape_cast %538 : vector<1x1x16x16xf32> to vector<16x16xf32>
    %540 = vector.shape_cast %537 : vector<16x16xf32> to vector<1x1x16x16xf32>
    tpu.vector_store %arg6[%c0_465, %c6_466, %c0_467, %c0_468], %540 {strides = array<i32>} : memref<1x18x16x16xf32, #tpu.memory_space<vmem>>, vector<1x1x16x16xf32>,
    %c0_469 = arith.constant 0 : index
    %c0_470 = arith.constant 0 : index
    %c0_471 = arith.constant 0 : index
    %c0_472 = arith.constant 0 : index
    %541 = vector.load %arg1[%c0_469, %c0_470, %c0_471, %c0_472] : memref<1x4x16x16xf32, #tpu.memory_space<vmem>>, vector<1x1x16x16xf32>
    %542 = vector.shape_cast %541 : vector<1x1x16x16xf32> to vector<16x16xf32>
    %c0_473 = arith.constant 0 : index
    %c7_474 = arith.constant 7 : index
    %543 = memref.load %arg2[%c0_473, %c7_474] : memref<4x18xf32, #tpu.memory_space<smem>>
    %544 = vector.broadcast %543 : f32 to vector<16x16xf32>
    %545 = arith.mulf %542, %544 : vector<16x16xf32>
    %c0_475 = arith.constant 0 : index
    %c1_476 = arith.constant 1 : index
    %c0_477 = arith.constant 0 : index
    %c0_478 = arith.constant 0 : index
    %546 = vector.load %arg1[%c0_475, %c1_476, %c0_477, %c0_478] : memref<1x4x16x16xf32, #tpu.memory_space<vmem>>, vector<1x1x16x16xf32>
    %547 = vector.shape_cast %546 : vector<1x1x16x16xf32> to vector<16x16xf32>
    %c1_479 = arith.constant 1 : index
    %c7_480 = arith.constant 7 : index
    %548 = memref.load %arg2[%c1_479, %c7_480] : memref<4x18xf32, #tpu.memory_space<smem>>
    %549 = vector.broadcast %548 : f32 to vector<16x16xf32>
    %550 = arith.mulf %547, %549 : vector<16x16xf32>
    %551 = arith.addf %545, %550 : vector<16x16xf32>
    %c0_481 = arith.constant 0 : index
    %c2_482 = arith.constant 2 : index
    %c0_483 = arith.constant 0 : index
    %c0_484 = arith.constant 0 : index
    %552 = vector.load %arg1[%c0_481, %c2_482, %c0_483, %c0_484] : memref<1x4x16x16xf32, #tpu.memory_space<vmem>>, vector<1x1x16x16xf32>
    %553 = vector.shape_cast %552 : vector<1x1x16x16xf32> to vector<16x16xf32>
    %c2_485 = arith.constant 2 : index
    %c7_486 = arith.constant 7 : index
    %554 = memref.load %arg2[%c2_485, %c7_486] : memref<4x18xf32, #tpu.memory_space<smem>>
    %555 = vector.broadcast %554 : f32 to vector<16x16xf32>
    %556 = arith.mulf %553, %555 : vector<16x16xf32>
    %557 = arith.addf %551, %556 : vector<16x16xf32>
    %c0_487 = arith.constant 0 : index
    %c3_488 = arith.constant 3 : index
    %c0_489 = arith.constant 0 : index
    %c0_490 = arith.constant 0 : index
    %558 = vector.load %arg1[%c0_487, %c3_488, %c0_489, %c0_490] : memref<1x4x16x16xf32, #tpu.memory_space<vmem>>, vector<1x1x16x16xf32>
    %559 = vector.shape_cast %558 : vector<1x1x16x16xf32> to vector<16x16xf32>
    %c3_491 = arith.constant 3 : index
    %c7_492 = arith.constant 7 : index
    %560 = memref.load %arg2[%c3_491, %c7_492] : memref<4x18xf32, #tpu.memory_space<smem>>
    %561 = vector.broadcast %560 : f32 to vector<16x16xf32>
    %562 = arith.mulf %559, %561 : vector<16x16xf32>
    %563 = arith.addf %557, %562 : vector<16x16xf32>
    %c7_493 = arith.constant 7 : index
    %564 = memref.load %arg3[%c7_493] : memref<18xf32, #tpu.memory_space<smem>>
    %565 = vector.broadcast %564 : f32 to vector<16x16xf32>
    %566 = arith.addf %563, %565 : vector<16x16xf32>
    %c1_494 = arith.constant 1 : index
    %c1_495 = arith.constant 1 : index
    %567 = vector.load %arg7[%c1_494, %c1_495] : memref<18x18xf32, #tpu.memory_space<vmem>>, vector<16x16xf32>
    tpu.vector_store %arg7[%c1_494, %c1_495], %566 {strides = array<i32>} : memref<18x18xf32, #tpu.memory_space<vmem>>, vector<16x16xf32>,
    %c0_496 = arith.constant 0 : index
    %c0_497 = arith.constant 0 : index
    %568 = vector.load %arg7[%c0_496, %c0_497] : memref<18x18xf32, #tpu.memory_space<vmem>>, vector<16x16xf32>
    %c7_498 = arith.constant 7 : index
    %c0_499 = arith.constant 0 : index
    %569 = memref.load %arg4[%c7_498, %c0_499] : memref<18x9xf32, #tpu.memory_space<smem>>
    %570 = vector.broadcast %569 : f32 to vector<16x16xf32>
    %571 = arith.mulf %568, %570 : vector<16x16xf32>
    %c0_500 = arith.constant 0 : index
    %c1_501 = arith.constant 1 : index
    %572 = vector.load %arg7[%c0_500, %c1_501] : memref<18x18xf32, #tpu.memory_space<vmem>>, vector<16x16xf32>
    %c7_502 = arith.constant 7 : index
    %c1_503 = arith.constant 1 : index
    %573 = memref.load %arg4[%c7_502, %c1_503] : memref<18x9xf32, #tpu.memory_space<smem>>
    %574 = vector.broadcast %573 : f32 to vector<16x16xf32>
    %575 = arith.mulf %572, %574 : vector<16x16xf32>
    %576 = arith.addf %571, %575 : vector<16x16xf32>
    %c0_504 = arith.constant 0 : index
    %c2_505 = arith.constant 2 : index
    %577 = vector.load %arg7[%c0_504, %c2_505] : memref<18x18xf32, #tpu.memory_space<vmem>>, vector<16x16xf32>
    %c7_506 = arith.constant 7 : index
    %c2_507 = arith.constant 2 : index
    %578 = memref.load %arg4[%c7_506, %c2_507] : memref<18x9xf32, #tpu.memory_space<smem>>
    %579 = vector.broadcast %578 : f32 to vector<16x16xf32>
    %580 = arith.mulf %577, %579 : vector<16x16xf32>
    %581 = arith.addf %576, %580 : vector<16x16xf32>
    %c1_508 = arith.constant 1 : index
    %c0_509 = arith.constant 0 : index
    %582 = vector.load %arg7[%c1_508, %c0_509] : memref<18x18xf32, #tpu.memory_space<vmem>>, vector<16x16xf32>
    %c7_510 = arith.constant 7 : index
    %c3_511 = arith.constant 3 : index
    %583 = memref.load %arg4[%c7_510, %c3_511] : memref<18x9xf32, #tpu.memory_space<smem>>
    %584 = vector.broadcast %583 : f32 to vector<16x16xf32>
    %585 = arith.mulf %582, %584 : vector<16x16xf32>
    %586 = arith.addf %581, %585 : vector<16x16xf32>
    %c1_512 = arith.constant 1 : index
    %c1_513 = arith.constant 1 : index
    %587 = vector.load %arg7[%c1_512, %c1_513] : memref<18x18xf32, #tpu.memory_space<vmem>>, vector<16x16xf32>
    %c7_514 = arith.constant 7 : index
    %c4_515 = arith.constant 4 : index
    %588 = memref.load %arg4[%c7_514, %c4_515] : memref<18x9xf32, #tpu.memory_space<smem>>
    %589 = vector.broadcast %588 : f32 to vector<16x16xf32>
    %590 = arith.mulf %587, %589 : vector<16x16xf32>
    %591 = arith.addf %586, %590 : vector<16x16xf32>
    %c1_516 = arith.constant 1 : index
    %c2_517 = arith.constant 2 : index
    %592 = vector.load %arg7[%c1_516, %c2_517] : memref<18x18xf32, #tpu.memory_space<vmem>>, vector<16x16xf32>
    %c7_518 = arith.constant 7 : index
    %c5_519 = arith.constant 5 : index
    %593 = memref.load %arg4[%c7_518, %c5_519] : memref<18x9xf32, #tpu.memory_space<smem>>
    %594 = vector.broadcast %593 : f32 to vector<16x16xf32>
    %595 = arith.mulf %592, %594 : vector<16x16xf32>
    %596 = arith.addf %591, %595 : vector<16x16xf32>
    %c2_520 = arith.constant 2 : index
    %c0_521 = arith.constant 0 : index
    %597 = vector.load %arg7[%c2_520, %c0_521] : memref<18x18xf32, #tpu.memory_space<vmem>>, vector<16x16xf32>
    %c7_522 = arith.constant 7 : index
    %c6_523 = arith.constant 6 : index
    %598 = memref.load %arg4[%c7_522, %c6_523] : memref<18x9xf32, #tpu.memory_space<smem>>
    %599 = vector.broadcast %598 : f32 to vector<16x16xf32>
    %600 = arith.mulf %597, %599 : vector<16x16xf32>
    %601 = arith.addf %596, %600 : vector<16x16xf32>
    %c2_524 = arith.constant 2 : index
    %c1_525 = arith.constant 1 : index
    %602 = vector.load %arg7[%c2_524, %c1_525] : memref<18x18xf32, #tpu.memory_space<vmem>>, vector<16x16xf32>
    %c7_526 = arith.constant 7 : index
    %c7_527 = arith.constant 7 : index
    %603 = memref.load %arg4[%c7_526, %c7_527] : memref<18x9xf32, #tpu.memory_space<smem>>
    %604 = vector.broadcast %603 : f32 to vector<16x16xf32>
    %605 = arith.mulf %602, %604 : vector<16x16xf32>
    %606 = arith.addf %601, %605 : vector<16x16xf32>
    %c2_528 = arith.constant 2 : index
    %c2_529 = arith.constant 2 : index
    %607 = vector.load %arg7[%c2_528, %c2_529] : memref<18x18xf32, #tpu.memory_space<vmem>>, vector<16x16xf32>
    %c7_530 = arith.constant 7 : index
    %c8_531 = arith.constant 8 : index
    %608 = memref.load %arg4[%c7_530, %c8_531] : memref<18x9xf32, #tpu.memory_space<smem>>
    %609 = vector.broadcast %608 : f32 to vector<16x16xf32>
    %610 = arith.mulf %607, %609 : vector<16x16xf32>
    %611 = arith.addf %606, %610 : vector<16x16xf32>
    %c7_532 = arith.constant 7 : index
    %612 = memref.load %arg5[%c7_532] : memref<18xf32, #tpu.memory_space<smem>>
    %613 = vector.broadcast %612 : f32 to vector<16x16xf32>
    %614 = arith.addf %611, %613 : vector<16x16xf32>
    %c0_533 = arith.constant 0 : index
    %c7_534 = arith.constant 7 : index
    %c0_535 = arith.constant 0 : index
    %c0_536 = arith.constant 0 : index
    %615 = vector.load %arg6[%c0_533, %c7_534, %c0_535, %c0_536] : memref<1x18x16x16xf32, #tpu.memory_space<vmem>>, vector<1x1x16x16xf32>
    %616 = vector.shape_cast %615 : vector<1x1x16x16xf32> to vector<16x16xf32>
    %617 = vector.shape_cast %614 : vector<16x16xf32> to vector<1x1x16x16xf32>
    tpu.vector_store %arg6[%c0_533, %c7_534, %c0_535, %c0_536], %617 {strides = array<i32>} : memref<1x18x16x16xf32, #tpu.memory_space<vmem>>, vector<1x1x16x16xf32>,
    %c0_537 = arith.constant 0 : index
    %c0_538 = arith.constant 0 : index
    %c0_539 = arith.constant 0 : index
    %c0_540 = arith.constant 0 : index
    %618 = vector.load %arg1[%c0_537, %c0_538, %c0_539, %c0_540] : memref<1x4x16x16xf32, #tpu.memory_space<vmem>>, vector<1x1x16x16xf32>
    %619 = vector.shape_cast %618 : vector<1x1x16x16xf32> to vector<16x16xf32>
    %c0_541 = arith.constant 0 : index
    %c8_542 = arith.constant 8 : index
    %620 = memref.load %arg2[%c0_541, %c8_542] : memref<4x18xf32, #tpu.memory_space<smem>>
    %621 = vector.broadcast %620 : f32 to vector<16x16xf32>
    %622 = arith.mulf %619, %621 : vector<16x16xf32>
    %c0_543 = arith.constant 0 : index
    %c1_544 = arith.constant 1 : index
    %c0_545 = arith.constant 0 : index
    %c0_546 = arith.constant 0 : index
    %623 = vector.load %arg1[%c0_543, %c1_544, %c0_545, %c0_546] : memref<1x4x16x16xf32, #tpu.memory_space<vmem>>, vector<1x1x16x16xf32>
    %624 = vector.shape_cast %623 : vector<1x1x16x16xf32> to vector<16x16xf32>
    %c1_547 = arith.constant 1 : index
    %c8_548 = arith.constant 8 : index
    %625 = memref.load %arg2[%c1_547, %c8_548] : memref<4x18xf32, #tpu.memory_space<smem>>
    %626 = vector.broadcast %625 : f32 to vector<16x16xf32>
    %627 = arith.mulf %624, %626 : vector<16x16xf32>
    %628 = arith.addf %622, %627 : vector<16x16xf32>
    %c0_549 = arith.constant 0 : index
    %c2_550 = arith.constant 2 : index
    %c0_551 = arith.constant 0 : index
    %c0_552 = arith.constant 0 : index
    %629 = vector.load %arg1[%c0_549, %c2_550, %c0_551, %c0_552] : memref<1x4x16x16xf32, #tpu.memory_space<vmem>>, vector<1x1x16x16xf32>
    %630 = vector.shape_cast %629 : vector<1x1x16x16xf32> to vector<16x16xf32>
    %c2_553 = arith.constant 2 : index
    %c8_554 = arith.constant 8 : index
    %631 = memref.load %arg2[%c2_553, %c8_554] : memref<4x18xf32, #tpu.memory_space<smem>>
    %632 = vector.broadcast %631 : f32 to vector<16x16xf32>
    %633 = arith.mulf %630, %632 : vector<16x16xf32>
    %634 = arith.addf %628, %633 : vector<16x16xf32>
    %c0_555 = arith.constant 0 : index
    %c3_556 = arith.constant 3 : index
    %c0_557 = arith.constant 0 : index
    %c0_558 = arith.constant 0 : index
    %635 = vector.load %arg1[%c0_555, %c3_556, %c0_557, %c0_558] : memref<1x4x16x16xf32, #tpu.memory_space<vmem>>, vector<1x1x16x16xf32>
    %636 = vector.shape_cast %635 : vector<1x1x16x16xf32> to vector<16x16xf32>
    %c3_559 = arith.constant 3 : index
    %c8_560 = arith.constant 8 : index
    %637 = memref.load %arg2[%c3_559, %c8_560] : memref<4x18xf32, #tpu.memory_space<smem>>
    %638 = vector.broadcast %637 : f32 to vector<16x16xf32>
    %639 = arith.mulf %636, %638 : vector<16x16xf32>
    %640 = arith.addf %634, %639 : vector<16x16xf32>
    %c8_561 = arith.constant 8 : index
    %641 = memref.load %arg3[%c8_561] : memref<18xf32, #tpu.memory_space<smem>>
    %642 = vector.broadcast %641 : f32 to vector<16x16xf32>
    %643 = arith.addf %640, %642 : vector<16x16xf32>
    %c1_562 = arith.constant 1 : index
    %c1_563 = arith.constant 1 : index
    %644 = vector.load %arg7[%c1_562, %c1_563] : memref<18x18xf32, #tpu.memory_space<vmem>>, vector<16x16xf32>
    tpu.vector_store %arg7[%c1_562, %c1_563], %643 {strides = array<i32>} : memref<18x18xf32, #tpu.memory_space<vmem>>, vector<16x16xf32>,
    %c0_564 = arith.constant 0 : index
    %c0_565 = arith.constant 0 : index
    %645 = vector.load %arg7[%c0_564, %c0_565] : memref<18x18xf32, #tpu.memory_space<vmem>>, vector<16x16xf32>
    %c8_566 = arith.constant 8 : index
    %c0_567 = arith.constant 0 : index
    %646 = memref.load %arg4[%c8_566, %c0_567] : memref<18x9xf32, #tpu.memory_space<smem>>
    %647 = vector.broadcast %646 : f32 to vector<16x16xf32>
    %648 = arith.mulf %645, %647 : vector<16x16xf32>
    %c0_568 = arith.constant 0 : index
    %c1_569 = arith.constant 1 : index
    %649 = vector.load %arg7[%c0_568, %c1_569] : memref<18x18xf32, #tpu.memory_space<vmem>>, vector<16x16xf32>
    %c8_570 = arith.constant 8 : index
    %c1_571 = arith.constant 1 : index
    %650 = memref.load %arg4[%c8_570, %c1_571] : memref<18x9xf32, #tpu.memory_space<smem>>
    %651 = vector.broadcast %650 : f32 to vector<16x16xf32>
    %652 = arith.mulf %649, %651 : vector<16x16xf32>
    %653 = arith.addf %648, %652 : vector<16x16xf32>
    %c0_572 = arith.constant 0 : index
    %c2_573 = arith.constant 2 : index
    %654 = vector.load %arg7[%c0_572, %c2_573] : memref<18x18xf32, #tpu.memory_space<vmem>>, vector<16x16xf32>
    %c8_574 = arith.constant 8 : index
    %c2_575 = arith.constant 2 : index
    %655 = memref.load %arg4[%c8_574, %c2_575] : memref<18x9xf32, #tpu.memory_space<smem>>
    %656 = vector.broadcast %655 : f32 to vector<16x16xf32>
    %657 = arith.mulf %654, %656 : vector<16x16xf32>
    %658 = arith.addf %653, %657 : vector<16x16xf32>
    %c1_576 = arith.constant 1 : index
    %c0_577 = arith.constant 0 : index
    %659 = vector.load %arg7[%c1_576, %c0_577] : memref<18x18xf32, #tpu.memory_space<vmem>>, vector<16x16xf32>
    %c8_578 = arith.constant 8 : index
    %c3_579 = arith.constant 3 : index
    %660 = memref.load %arg4[%c8_578, %c3_579] : memref<18x9xf32, #tpu.memory_space<smem>>
    %661 = vector.broadcast %660 : f32 to vector<16x16xf32>
    %662 = arith.mulf %659, %661 : vector<16x16xf32>
    %663 = arith.addf %658, %662 : vector<16x16xf32>
    %c1_580 = arith.constant 1 : index
    %c1_581 = arith.constant 1 : index
    %664 = vector.load %arg7[%c1_580, %c1_581] : memref<18x18xf32, #tpu.memory_space<vmem>>, vector<16x16xf32>
    %c8_582 = arith.constant 8 : index
    %c4_583 = arith.constant 4 : index
    %665 = memref.load %arg4[%c8_582, %c4_583] : memref<18x9xf32, #tpu.memory_space<smem>>
    %666 = vector.broadcast %665 : f32 to vector<16x16xf32>
    %667 = arith.mulf %664, %666 : vector<16x16xf32>
    %668 = arith.addf %663, %667 : vector<16x16xf32>
    %c1_584 = arith.constant 1 : index
    %c2_585 = arith.constant 2 : index
    %669 = vector.load %arg7[%c1_584, %c2_585] : memref<18x18xf32, #tpu.memory_space<vmem>>, vector<16x16xf32>
    %c8_586 = arith.constant 8 : index
    %c5_587 = arith.constant 5 : index
    %670 = memref.load %arg4[%c8_586, %c5_587] : memref<18x9xf32, #tpu.memory_space<smem>>
    %671 = vector.broadcast %670 : f32 to vector<16x16xf32>
    %672 = arith.mulf %669, %671 : vector<16x16xf32>
    %673 = arith.addf %668, %672 : vector<16x16xf32>
    %c2_588 = arith.constant 2 : index
    %c0_589 = arith.constant 0 : index
    %674 = vector.load %arg7[%c2_588, %c0_589] : memref<18x18xf32, #tpu.memory_space<vmem>>, vector<16x16xf32>
    %c8_590 = arith.constant 8 : index
    %c6_591 = arith.constant 6 : index
    %675 = memref.load %arg4[%c8_590, %c6_591] : memref<18x9xf32, #tpu.memory_space<smem>>
    %676 = vector.broadcast %675 : f32 to vector<16x16xf32>
    %677 = arith.mulf %674, %676 : vector<16x16xf32>
    %678 = arith.addf %673, %677 : vector<16x16xf32>
    %c2_592 = arith.constant 2 : index
    %c1_593 = arith.constant 1 : index
    %679 = vector.load %arg7[%c2_592, %c1_593] : memref<18x18xf32, #tpu.memory_space<vmem>>, vector<16x16xf32>
    %c8_594 = arith.constant 8 : index
    %c7_595 = arith.constant 7 : index
    %680 = memref.load %arg4[%c8_594, %c7_595] : memref<18x9xf32, #tpu.memory_space<smem>>
    %681 = vector.broadcast %680 : f32 to vector<16x16xf32>
    %682 = arith.mulf %679, %681 : vector<16x16xf32>
    %683 = arith.addf %678, %682 : vector<16x16xf32>
    %c2_596 = arith.constant 2 : index
    %c2_597 = arith.constant 2 : index
    %684 = vector.load %arg7[%c2_596, %c2_597] : memref<18x18xf32, #tpu.memory_space<vmem>>, vector<16x16xf32>
    %c8_598 = arith.constant 8 : index
    %c8_599 = arith.constant 8 : index
    %685 = memref.load %arg4[%c8_598, %c8_599] : memref<18x9xf32, #tpu.memory_space<smem>>
    %686 = vector.broadcast %685 : f32 to vector<16x16xf32>
    %687 = arith.mulf %684, %686 : vector<16x16xf32>
    %688 = arith.addf %683, %687 : vector<16x16xf32>
    %c8_600 = arith.constant 8 : index
    %689 = memref.load %arg5[%c8_600] : memref<18xf32, #tpu.memory_space<smem>>
    %690 = vector.broadcast %689 : f32 to vector<16x16xf32>
    %691 = arith.addf %688, %690 : vector<16x16xf32>
    %c0_601 = arith.constant 0 : index
    %c8_602 = arith.constant 8 : index
    %c0_603 = arith.constant 0 : index
    %c0_604 = arith.constant 0 : index
    %692 = vector.load %arg6[%c0_601, %c8_602, %c0_603, %c0_604] : memref<1x18x16x16xf32, #tpu.memory_space<vmem>>, vector<1x1x16x16xf32>
    %693 = vector.shape_cast %692 : vector<1x1x16x16xf32> to vector<16x16xf32>
    %694 = vector.shape_cast %691 : vector<16x16xf32> to vector<1x1x16x16xf32>
    tpu.vector_store %arg6[%c0_601, %c8_602, %c0_603, %c0_604], %694 {strides = array<i32>} : memref<1x18x16x16xf32, #tpu.memory_space<vmem>>, vector<1x1x16x16xf32>,
    %c0_605 = arith.constant 0 : index
    %c0_606 = arith.constant 0 : index
    %c0_607 = arith.constant 0 : index
    %c0_608 = arith.constant 0 : index
    %695 = vector.load %arg1[%c0_605, %c0_606, %c0_607, %c0_608] : memref<1x4x16x16xf32, #tpu.memory_space<vmem>>, vector<1x1x16x16xf32>
    %696 = vector.shape_cast %695 : vector<1x1x16x16xf32> to vector<16x16xf32>
    %c0_609 = arith.constant 0 : index
    %c9 = arith.constant 9 : index
    %697 = memref.load %arg2[%c0_609, %c9] : memref<4x18xf32, #tpu.memory_space<smem>>
    %698 = vector.broadcast %697 : f32 to vector<16x16xf32>
    %699 = arith.mulf %696, %698 : vector<16x16xf32>
    %c0_610 = arith.constant 0 : index
    %c1_611 = arith.constant 1 : index
    %c0_612 = arith.constant 0 : index
    %c0_613 = arith.constant 0 : index
    %700 = vector.load %arg1[%c0_610, %c1_611, %c0_612, %c0_613] : memref<1x4x16x16xf32, #tpu.memory_space<vmem>>, vector<1x1x16x16xf32>
    %701 = vector.shape_cast %700 : vector<1x1x16x16xf32> to vector<16x16xf32>
    %c1_614 = arith.constant 1 : index
    %c9_615 = arith.constant 9 : index
    %702 = memref.load %arg2[%c1_614, %c9_615] : memref<4x18xf32, #tpu.memory_space<smem>>
    %703 = vector.broadcast %702 : f32 to vector<16x16xf32>
    %704 = arith.mulf %701, %703 : vector<16x16xf32>
    %705 = arith.addf %699, %704 : vector<16x16xf32>
    %c0_616 = arith.constant 0 : index
    %c2_617 = arith.constant 2 : index
    %c0_618 = arith.constant 0 : index
    %c0_619 = arith.constant 0 : index
    %706 = vector.load %arg1[%c0_616, %c2_617, %c0_618, %c0_619] : memref<1x4x16x16xf32, #tpu.memory_space<vmem>>, vector<1x1x16x16xf32>
    %707 = vector.shape_cast %706 : vector<1x1x16x16xf32> to vector<16x16xf32>
    %c2_620 = arith.constant 2 : index
    %c9_621 = arith.constant 9 : index
    %708 = memref.load %arg2[%c2_620, %c9_621] : memref<4x18xf32, #tpu.memory_space<smem>>
    %709 = vector.broadcast %708 : f32 to vector<16x16xf32>
    %710 = arith.mulf %707, %709 : vector<16x16xf32>
    %711 = arith.addf %705, %710 : vector<16x16xf32>
    %c0_622 = arith.constant 0 : index
    %c3_623 = arith.constant 3 : index
    %c0_624 = arith.constant 0 : index
    %c0_625 = arith.constant 0 : index
    %712 = vector.load %arg1[%c0_622, %c3_623, %c0_624, %c0_625] : memref<1x4x16x16xf32, #tpu.memory_space<vmem>>, vector<1x1x16x16xf32>
    %713 = vector.shape_cast %712 : vector<1x1x16x16xf32> to vector<16x16xf32>
    %c3_626 = arith.constant 3 : index
    %c9_627 = arith.constant 9 : index
    %714 = memref.load %arg2[%c3_626, %c9_627] : memref<4x18xf32, #tpu.memory_space<smem>>
    %715 = vector.broadcast %714 : f32 to vector<16x16xf32>
    %716 = arith.mulf %713, %715 : vector<16x16xf32>
    %717 = arith.addf %711, %716 : vector<16x16xf32>
    %c9_628 = arith.constant 9 : index
    %718 = memref.load %arg3[%c9_628] : memref<18xf32, #tpu.memory_space<smem>>
    %719 = vector.broadcast %718 : f32 to vector<16x16xf32>
    %720 = arith.addf %717, %719 : vector<16x16xf32>
    %c1_629 = arith.constant 1 : index
    %c1_630 = arith.constant 1 : index
    %721 = vector.load %arg7[%c1_629, %c1_630] : memref<18x18xf32, #tpu.memory_space<vmem>>, vector<16x16xf32>
    tpu.vector_store %arg7[%c1_629, %c1_630], %720 {strides = array<i32>} : memref<18x18xf32, #tpu.memory_space<vmem>>, vector<16x16xf32>,
    %c0_631 = arith.constant 0 : index
    %c0_632 = arith.constant 0 : index
    %722 = vector.load %arg7[%c0_631, %c0_632] : memref<18x18xf32, #tpu.memory_space<vmem>>, vector<16x16xf32>
    %c9_633 = arith.constant 9 : index
    %c0_634 = arith.constant 0 : index
    %723 = memref.load %arg4[%c9_633, %c0_634] : memref<18x9xf32, #tpu.memory_space<smem>>
    %724 = vector.broadcast %723 : f32 to vector<16x16xf32>
    %725 = arith.mulf %722, %724 : vector<16x16xf32>
    %c0_635 = arith.constant 0 : index
    %c1_636 = arith.constant 1 : index
    %726 = vector.load %arg7[%c0_635, %c1_636] : memref<18x18xf32, #tpu.memory_space<vmem>>, vector<16x16xf32>
    %c9_637 = arith.constant 9 : index
    %c1_638 = arith.constant 1 : index
    %727 = memref.load %arg4[%c9_637, %c1_638] : memref<18x9xf32, #tpu.memory_space<smem>>
    %728 = vector.broadcast %727 : f32 to vector<16x16xf32>
    %729 = arith.mulf %726, %728 : vector<16x16xf32>
    %730 = arith.addf %725, %729 : vector<16x16xf32>
    %c0_639 = arith.constant 0 : index
    %c2_640 = arith.constant 2 : index
    %731 = vector.load %arg7[%c0_639, %c2_640] : memref<18x18xf32, #tpu.memory_space<vmem>>, vector<16x16xf32>
    %c9_641 = arith.constant 9 : index
    %c2_642 = arith.constant 2 : index
    %732 = memref.load %arg4[%c9_641, %c2_642] : memref<18x9xf32, #tpu.memory_space<smem>>
    %733 = vector.broadcast %732 : f32 to vector<16x16xf32>
    %734 = arith.mulf %731, %733 : vector<16x16xf32>
    %735 = arith.addf %730, %734 : vector<16x16xf32>
    %c1_643 = arith.constant 1 : index
    %c0_644 = arith.constant 0 : index
    %736 = vector.load %arg7[%c1_643, %c0_644] : memref<18x18xf32, #tpu.memory_space<vmem>>, vector<16x16xf32>
    %c9_645 = arith.constant 9 : index
    %c3_646 = arith.constant 3 : index
    %737 = memref.load %arg4[%c9_645, %c3_646] : memref<18x9xf32, #tpu.memory_space<smem>>
    %738 = vector.broadcast %737 : f32 to vector<16x16xf32>
    %739 = arith.mulf %736, %738 : vector<16x16xf32>
    %740 = arith.addf %735, %739 : vector<16x16xf32>
    %c1_647 = arith.constant 1 : index
    %c1_648 = arith.constant 1 : index
    %741 = vector.load %arg7[%c1_647, %c1_648] : memref<18x18xf32, #tpu.memory_space<vmem>>, vector<16x16xf32>
    %c9_649 = arith.constant 9 : index
    %c4_650 = arith.constant 4 : index
    %742 = memref.load %arg4[%c9_649, %c4_650] : memref<18x9xf32, #tpu.memory_space<smem>>
    %743 = vector.broadcast %742 : f32 to vector<16x16xf32>
    %744 = arith.mulf %741, %743 : vector<16x16xf32>
    %745 = arith.addf %740, %744 : vector<16x16xf32>
    %c1_651 = arith.constant 1 : index
    %c2_652 = arith.constant 2 : index
    %746 = vector.load %arg7[%c1_651, %c2_652] : memref<18x18xf32, #tpu.memory_space<vmem>>, vector<16x16xf32>
    %c9_653 = arith.constant 9 : index
    %c5_654 = arith.constant 5 : index
    %747 = memref.load %arg4[%c9_653, %c5_654] : memref<18x9xf32, #tpu.memory_space<smem>>
    %748 = vector.broadcast %747 : f32 to vector<16x16xf32>
    %749 = arith.mulf %746, %748 : vector<16x16xf32>
    %750 = arith.addf %745, %749 : vector<16x16xf32>
    %c2_655 = arith.constant 2 : index
    %c0_656 = arith.constant 0 : index
    %751 = vector.load %arg7[%c2_655, %c0_656] : memref<18x18xf32, #tpu.memory_space<vmem>>, vector<16x16xf32>
    %c9_657 = arith.constant 9 : index
    %c6_658 = arith.constant 6 : index
    %752 = memref.load %arg4[%c9_657, %c6_658] : memref<18x9xf32, #tpu.memory_space<smem>>
    %753 = vector.broadcast %752 : f32 to vector<16x16xf32>
    %754 = arith.mulf %751, %753 : vector<16x16xf32>
    %755 = arith.addf %750, %754 : vector<16x16xf32>
    %c2_659 = arith.constant 2 : index
    %c1_660 = arith.constant 1 : index
    %756 = vector.load %arg7[%c2_659, %c1_660] : memref<18x18xf32, #tpu.memory_space<vmem>>, vector<16x16xf32>
    %c9_661 = arith.constant 9 : index
    %c7_662 = arith.constant 7 : index
    %757 = memref.load %arg4[%c9_661, %c7_662] : memref<18x9xf32, #tpu.memory_space<smem>>
    %758 = vector.broadcast %757 : f32 to vector<16x16xf32>
    %759 = arith.mulf %756, %758 : vector<16x16xf32>
    %760 = arith.addf %755, %759 : vector<16x16xf32>
    %c2_663 = arith.constant 2 : index
    %c2_664 = arith.constant 2 : index
    %761 = vector.load %arg7[%c2_663, %c2_664] : memref<18x18xf32, #tpu.memory_space<vmem>>, vector<16x16xf32>
    %c9_665 = arith.constant 9 : index
    %c8_666 = arith.constant 8 : index
    %762 = memref.load %arg4[%c9_665, %c8_666] : memref<18x9xf32, #tpu.memory_space<smem>>
    %763 = vector.broadcast %762 : f32 to vector<16x16xf32>
    %764 = arith.mulf %761, %763 : vector<16x16xf32>
    %765 = arith.addf %760, %764 : vector<16x16xf32>
    %c9_667 = arith.constant 9 : index
    %766 = memref.load %arg5[%c9_667] : memref<18xf32, #tpu.memory_space<smem>>
    %767 = vector.broadcast %766 : f32 to vector<16x16xf32>
    %768 = arith.addf %765, %767 : vector<16x16xf32>
    %c0_668 = arith.constant 0 : index
    %c9_669 = arith.constant 9 : index
    %c0_670 = arith.constant 0 : index
    %c0_671 = arith.constant 0 : index
    %769 = vector.load %arg6[%c0_668, %c9_669, %c0_670, %c0_671] : memref<1x18x16x16xf32, #tpu.memory_space<vmem>>, vector<1x1x16x16xf32>
    %770 = vector.shape_cast %769 : vector<1x1x16x16xf32> to vector<16x16xf32>
    %771 = vector.shape_cast %768 : vector<16x16xf32> to vector<1x1x16x16xf32>
    tpu.vector_store %arg6[%c0_668, %c9_669, %c0_670, %c0_671], %771 {strides = array<i32>} : memref<1x18x16x16xf32, #tpu.memory_space<vmem>>, vector<1x1x16x16xf32>,
    %c0_672 = arith.constant 0 : index
    %c0_673 = arith.constant 0 : index
    %c0_674 = arith.constant 0 : index
    %c0_675 = arith.constant 0 : index
    %772 = vector.load %arg1[%c0_672, %c0_673, %c0_674, %c0_675] : memref<1x4x16x16xf32, #tpu.memory_space<vmem>>, vector<1x1x16x16xf32>
    %773 = vector.shape_cast %772 : vector<1x1x16x16xf32> to vector<16x16xf32>
    %c0_676 = arith.constant 0 : index
    %c10 = arith.constant 10 : index
    %774 = memref.load %arg2[%c0_676, %c10] : memref<4x18xf32, #tpu.memory_space<smem>>
    %775 = vector.broadcast %774 : f32 to vector<16x16xf32>
    %776 = arith.mulf %773, %775 : vector<16x16xf32>
    %c0_677 = arith.constant 0 : index
    %c1_678 = arith.constant 1 : index
    %c0_679 = arith.constant 0 : index
    %c0_680 = arith.constant 0 : index
    %777 = vector.load %arg1[%c0_677, %c1_678, %c0_679, %c0_680] : memref<1x4x16x16xf32, #tpu.memory_space<vmem>>, vector<1x1x16x16xf32>
    %778 = vector.shape_cast %777 : vector<1x1x16x16xf32> to vector<16x16xf32>
    %c1_681 = arith.constant 1 : index
    %c10_682 = arith.constant 10 : index
    %779 = memref.load %arg2[%c1_681, %c10_682] : memref<4x18xf32, #tpu.memory_space<smem>>
    %780 = vector.broadcast %779 : f32 to vector<16x16xf32>
    %781 = arith.mulf %778, %780 : vector<16x16xf32>
    %782 = arith.addf %776, %781 : vector<16x16xf32>
    %c0_683 = arith.constant 0 : index
    %c2_684 = arith.constant 2 : index
    %c0_685 = arith.constant 0 : index
    %c0_686 = arith.constant 0 : index
    %783 = vector.load %arg1[%c0_683, %c2_684, %c0_685, %c0_686] : memref<1x4x16x16xf32, #tpu.memory_space<vmem>>, vector<1x1x16x16xf32>
    %784 = vector.shape_cast %783 : vector<1x1x16x16xf32> to vector<16x16xf32>
    %c2_687 = arith.constant 2 : index
    %c10_688 = arith.constant 10 : index
    %785 = memref.load %arg2[%c2_687, %c10_688] : memref<4x18xf32, #tpu.memory_space<smem>>
    %786 = vector.broadcast %785 : f32 to vector<16x16xf32>
    %787 = arith.mulf %784, %786 : vector<16x16xf32>
    %788 = arith.addf %782, %787 : vector<16x16xf32>
    %c0_689 = arith.constant 0 : index
    %c3_690 = arith.constant 3 : index
    %c0_691 = arith.constant 0 : index
    %c0_692 = arith.constant 0 : index
    %789 = vector.load %arg1[%c0_689, %c3_690, %c0_691, %c0_692] : memref<1x4x16x16xf32, #tpu.memory_space<vmem>>, vector<1x1x16x16xf32>
    %790 = vector.shape_cast %789 : vector<1x1x16x16xf32> to vector<16x16xf32>
    %c3_693 = arith.constant 3 : index
    %c10_694 = arith.constant 10 : index
    %791 = memref.load %arg2[%c3_693, %c10_694] : memref<4x18xf32, #tpu.memory_space<smem>>
    %792 = vector.broadcast %791 : f32 to vector<16x16xf32>
    %793 = arith.mulf %790, %792 : vector<16x16xf32>
    %794 = arith.addf %788, %793 : vector<16x16xf32>
    %c10_695 = arith.constant 10 : index
    %795 = memref.load %arg3[%c10_695] : memref<18xf32, #tpu.memory_space<smem>>
    %796 = vector.broadcast %795 : f32 to vector<16x16xf32>
    %797 = arith.addf %794, %796 : vector<16x16xf32>
    %c1_696 = arith.constant 1 : index
    %c1_697 = arith.constant 1 : index
    %798 = vector.load %arg7[%c1_696, %c1_697] : memref<18x18xf32, #tpu.memory_space<vmem>>, vector<16x16xf32>
    tpu.vector_store %arg7[%c1_696, %c1_697], %797 {strides = array<i32>} : memref<18x18xf32, #tpu.memory_space<vmem>>, vector<16x16xf32>,
    %c0_698 = arith.constant 0 : index
    %c0_699 = arith.constant 0 : index
    %799 = vector.load %arg7[%c0_698, %c0_699] : memref<18x18xf32, #tpu.memory_space<vmem>>, vector<16x16xf32>
    %c10_700 = arith.constant 10 : index
    %c0_701 = arith.constant 0 : index
    %800 = memref.load %arg4[%c10_700, %c0_701] : memref<18x9xf32, #tpu.memory_space<smem>>
    %801 = vector.broadcast %800 : f32 to vector<16x16xf32>
    %802 = arith.mulf %799, %801 : vector<16x16xf32>
    %c0_702 = arith.constant 0 : index
    %c1_703 = arith.constant 1 : index
    %803 = vector.load %arg7[%c0_702, %c1_703] : memref<18x18xf32, #tpu.memory_space<vmem>>, vector<16x16xf32>
    %c10_704 = arith.constant 10 : index
    %c1_705 = arith.constant 1 : index
    %804 = memref.load %arg4[%c10_704, %c1_705] : memref<18x9xf32, #tpu.memory_space<smem>>
    %805 = vector.broadcast %804 : f32 to vector<16x16xf32>
    %806 = arith.mulf %803, %805 : vector<16x16xf32>
    %807 = arith.addf %802, %806 : vector<16x16xf32>
    %c0_706 = arith.constant 0 : index
    %c2_707 = arith.constant 2 : index
    %808 = vector.load %arg7[%c0_706, %c2_707] : memref<18x18xf32, #tpu.memory_space<vmem>>, vector<16x16xf32>
    %c10_708 = arith.constant 10 : index
    %c2_709 = arith.constant 2 : index
    %809 = memref.load %arg4[%c10_708, %c2_709] : memref<18x9xf32, #tpu.memory_space<smem>>
    %810 = vector.broadcast %809 : f32 to vector<16x16xf32>
    %811 = arith.mulf %808, %810 : vector<16x16xf32>
    %812 = arith.addf %807, %811 : vector<16x16xf32>
    %c1_710 = arith.constant 1 : index
    %c0_711 = arith.constant 0 : index
    %813 = vector.load %arg7[%c1_710, %c0_711] : memref<18x18xf32, #tpu.memory_space<vmem>>, vector<16x16xf32>
    %c10_712 = arith.constant 10 : index
    %c3_713 = arith.constant 3 : index
    %814 = memref.load %arg4[%c10_712, %c3_713] : memref<18x9xf32, #tpu.memory_space<smem>>
    %815 = vector.broadcast %814 : f32 to vector<16x16xf32>
    %816 = arith.mulf %813, %815 : vector<16x16xf32>
    %817 = arith.addf %812, %816 : vector<16x16xf32>
    %c1_714 = arith.constant 1 : index
    %c1_715 = arith.constant 1 : index
    %818 = vector.load %arg7[%c1_714, %c1_715] : memref<18x18xf32, #tpu.memory_space<vmem>>, vector<16x16xf32>
    %c10_716 = arith.constant 10 : index
    %c4_717 = arith.constant 4 : index
    %819 = memref.load %arg4[%c10_716, %c4_717] : memref<18x9xf32, #tpu.memory_space<smem>>
    %820 = vector.broadcast %819 : f32 to vector<16x16xf32>
    %821 = arith.mulf %818, %820 : vector<16x16xf32>
    %822 = arith.addf %817, %821 : vector<16x16xf32>
    %c1_718 = arith.constant 1 : index
    %c2_719 = arith.constant 2 : index
    %823 = vector.load %arg7[%c1_718, %c2_719] : memref<18x18xf32, #tpu.memory_space<vmem>>, vector<16x16xf32>
    %c10_720 = arith.constant 10 : index
    %c5_721 = arith.constant 5 : index
    %824 = memref.load %arg4[%c10_720, %c5_721] : memref<18x9xf32, #tpu.memory_space<smem>>
    %825 = vector.broadcast %824 : f32 to vector<16x16xf32>
    %826 = arith.mulf %823, %825 : vector<16x16xf32>
    %827 = arith.addf %822, %826 : vector<16x16xf32>
    %c2_722 = arith.constant 2 : index
    %c0_723 = arith.constant 0 : index
    %828 = vector.load %arg7[%c2_722, %c0_723] : memref<18x18xf32, #tpu.memory_space<vmem>>, vector<16x16xf32>
    %c10_724 = arith.constant 10 : index
    %c6_725 = arith.constant 6 : index
    %829 = memref.load %arg4[%c10_724, %c6_725] : memref<18x9xf32, #tpu.memory_space<smem>>
    %830 = vector.broadcast %829 : f32 to vector<16x16xf32>
    %831 = arith.mulf %828, %830 : vector<16x16xf32>
    %832 = arith.addf %827, %831 : vector<16x16xf32>
    %c2_726 = arith.constant 2 : index
    %c1_727 = arith.constant 1 : index
    %833 = vector.load %arg7[%c2_726, %c1_727] : memref<18x18xf32, #tpu.memory_space<vmem>>, vector<16x16xf32>
    %c10_728 = arith.constant 10 : index
    %c7_729 = arith.constant 7 : index
    %834 = memref.load %arg4[%c10_728, %c7_729] : memref<18x9xf32, #tpu.memory_space<smem>>
    %835 = vector.broadcast %834 : f32 to vector<16x16xf32>
    %836 = arith.mulf %833, %835 : vector<16x16xf32>
    %837 = arith.addf %832, %836 : vector<16x16xf32>
    %c2_730 = arith.constant 2 : index
    %c2_731 = arith.constant 2 : index
    %838 = vector.load %arg7[%c2_730, %c2_731] : memref<18x18xf32, #tpu.memory_space<vmem>>, vector<16x16xf32>
    %c10_732 = arith.constant 10 : index
    %c8_733 = arith.constant 8 : index
    %839 = memref.load %arg4[%c10_732, %c8_733] : memref<18x9xf32, #tpu.memory_space<smem>>
    %840 = vector.broadcast %839 : f32 to vector<16x16xf32>
    %841 = arith.mulf %838, %840 : vector<16x16xf32>
    %842 = arith.addf %837, %841 : vector<16x16xf32>
    %c10_734 = arith.constant 10 : index
    %843 = memref.load %arg5[%c10_734] : memref<18xf32, #tpu.memory_space<smem>>
    %844 = vector.broadcast %843 : f32 to vector<16x16xf32>
    %845 = arith.addf %842, %844 : vector<16x16xf32>
    %c0_735 = arith.constant 0 : index
    %c10_736 = arith.constant 10 : index
    %c0_737 = arith.constant 0 : index
    %c0_738 = arith.constant 0 : index
    %846 = vector.load %arg6[%c0_735, %c10_736, %c0_737, %c0_738] : memref<1x18x16x16xf32, #tpu.memory_space<vmem>>, vector<1x1x16x16xf32>
    %847 = vector.shape_cast %846 : vector<1x1x16x16xf32> to vector<16x16xf32>
    %848 = vector.shape_cast %845 : vector<16x16xf32> to vector<1x1x16x16xf32>
    tpu.vector_store %arg6[%c0_735, %c10_736, %c0_737, %c0_738], %848 {strides = array<i32>} : memref<1x18x16x16xf32, #tpu.memory_space<vmem>>, vector<1x1x16x16xf32>,
    %c0_739 = arith.constant 0 : index
    %c0_740 = arith.constant 0 : index
    %c0_741 = arith.constant 0 : index
    %c0_742 = arith.constant 0 : index
    %849 = vector.load %arg1[%c0_739, %c0_740, %c0_741, %c0_742] : memref<1x4x16x16xf32, #tpu.memory_space<vmem>>, vector<1x1x16x16xf32>
    %850 = vector.shape_cast %849 : vector<1x1x16x16xf32> to vector<16x16xf32>
    %c0_743 = arith.constant 0 : index
    %c11 = arith.constant 11 : index
    %851 = memref.load %arg2[%c0_743, %c11] : memref<4x18xf32, #tpu.memory_space<smem>>
    %852 = vector.broadcast %851 : f32 to vector<16x16xf32>
    %853 = arith.mulf %850, %852 : vector<16x16xf32>
    %c0_744 = arith.constant 0 : index
    %c1_745 = arith.constant 1 : index
    %c0_746 = arith.constant 0 : index
    %c0_747 = arith.constant 0 : index
    %854 = vector.load %arg1[%c0_744, %c1_745, %c0_746, %c0_747] : memref<1x4x16x16xf32, #tpu.memory_space<vmem>>, vector<1x1x16x16xf32>
    %855 = vector.shape_cast %854 : vector<1x1x16x16xf32> to vector<16x16xf32>
    %c1_748 = arith.constant 1 : index
    %c11_749 = arith.constant 11 : index
    %856 = memref.load %arg2[%c1_748, %c11_749] : memref<4x18xf32, #tpu.memory_space<smem>>
    %857 = vector.broadcast %856 : f32 to vector<16x16xf32>
    %858 = arith.mulf %855, %857 : vector<16x16xf32>
    %859 = arith.addf %853, %858 : vector<16x16xf32>
    %c0_750 = arith.constant 0 : index
    %c2_751 = arith.constant 2 : index
    %c0_752 = arith.constant 0 : index
    %c0_753 = arith.constant 0 : index
    %860 = vector.load %arg1[%c0_750, %c2_751, %c0_752, %c0_753] : memref<1x4x16x16xf32, #tpu.memory_space<vmem>>, vector<1x1x16x16xf32>
    %861 = vector.shape_cast %860 : vector<1x1x16x16xf32> to vector<16x16xf32>
    %c2_754 = arith.constant 2 : index
    %c11_755 = arith.constant 11 : index
    %862 = memref.load %arg2[%c2_754, %c11_755] : memref<4x18xf32, #tpu.memory_space<smem>>
    %863 = vector.broadcast %862 : f32 to vector<16x16xf32>
    %864 = arith.mulf %861, %863 : vector<16x16xf32>
    %865 = arith.addf %859, %864 : vector<16x16xf32>
    %c0_756 = arith.constant 0 : index
    %c3_757 = arith.constant 3 : index
    %c0_758 = arith.constant 0 : index
    %c0_759 = arith.constant 0 : index
    %866 = vector.load %arg1[%c0_756, %c3_757, %c0_758, %c0_759] : memref<1x4x16x16xf32, #tpu.memory_space<vmem>>, vector<1x1x16x16xf32>
    %867 = vector.shape_cast %866 : vector<1x1x16x16xf32> to vector<16x16xf32>
    %c3_760 = arith.constant 3 : index
    %c11_761 = arith.constant 11 : index
    %868 = memref.load %arg2[%c3_760, %c11_761] : memref<4x18xf32, #tpu.memory_space<smem>>
    %869 = vector.broadcast %868 : f32 to vector<16x16xf32>
    %870 = arith.mulf %867, %869 : vector<16x16xf32>
    %871 = arith.addf %865, %870 : vector<16x16xf32>
    %c11_762 = arith.constant 11 : index
    %872 = memref.load %arg3[%c11_762] : memref<18xf32, #tpu.memory_space<smem>>
    %873 = vector.broadcast %872 : f32 to vector<16x16xf32>
    %874 = arith.addf %871, %873 : vector<16x16xf32>
    %c1_763 = arith.constant 1 : index
    %c1_764 = arith.constant 1 : index
    %875 = vector.load %arg7[%c1_763, %c1_764] : memref<18x18xf32, #tpu.memory_space<vmem>>, vector<16x16xf32>
    tpu.vector_store %arg7[%c1_763, %c1_764], %874 {strides = array<i32>} : memref<18x18xf32, #tpu.memory_space<vmem>>, vector<16x16xf32>,
    %c0_765 = arith.constant 0 : index
    %c0_766 = arith.constant 0 : index
    %876 = vector.load %arg7[%c0_765, %c0_766] : memref<18x18xf32, #tpu.memory_space<vmem>>, vector<16x16xf32>
    %c11_767 = arith.constant 11 : index
    %c0_768 = arith.constant 0 : index
    %877 = memref.load %arg4[%c11_767, %c0_768] : memref<18x9xf32, #tpu.memory_space<smem>>
    %878 = vector.broadcast %877 : f32 to vector<16x16xf32>
    %879 = arith.mulf %876, %878 : vector<16x16xf32>
    %c0_769 = arith.constant 0 : index
    %c1_770 = arith.constant 1 : index
    %880 = vector.load %arg7[%c0_769, %c1_770] : memref<18x18xf32, #tpu.memory_space<vmem>>, vector<16x16xf32>
    %c11_771 = arith.constant 11 : index
    %c1_772 = arith.constant 1 : index
    %881 = memref.load %arg4[%c11_771, %c1_772] : memref<18x9xf32, #tpu.memory_space<smem>>
    %882 = vector.broadcast %881 : f32 to vector<16x16xf32>
    %883 = arith.mulf %880, %882 : vector<16x16xf32>
    %884 = arith.addf %879, %883 : vector<16x16xf32>
    %c0_773 = arith.constant 0 : index
    %c2_774 = arith.constant 2 : index
    %885 = vector.load %arg7[%c0_773, %c2_774] : memref<18x18xf32, #tpu.memory_space<vmem>>, vector<16x16xf32>
    %c11_775 = arith.constant 11 : index
    %c2_776 = arith.constant 2 : index
    %886 = memref.load %arg4[%c11_775, %c2_776] : memref<18x9xf32, #tpu.memory_space<smem>>
    %887 = vector.broadcast %886 : f32 to vector<16x16xf32>
    %888 = arith.mulf %885, %887 : vector<16x16xf32>
    %889 = arith.addf %884, %888 : vector<16x16xf32>
    %c1_777 = arith.constant 1 : index
    %c0_778 = arith.constant 0 : index
    %890 = vector.load %arg7[%c1_777, %c0_778] : memref<18x18xf32, #tpu.memory_space<vmem>>, vector<16x16xf32>
    %c11_779 = arith.constant 11 : index
    %c3_780 = arith.constant 3 : index
    %891 = memref.load %arg4[%c11_779, %c3_780] : memref<18x9xf32, #tpu.memory_space<smem>>
    %892 = vector.broadcast %891 : f32 to vector<16x16xf32>
    %893 = arith.mulf %890, %892 : vector<16x16xf32>
    %894 = arith.addf %889, %893 : vector<16x16xf32>
    %c1_781 = arith.constant 1 : index
    %c1_782 = arith.constant 1 : index
    %895 = vector.load %arg7[%c1_781, %c1_782] : memref<18x18xf32, #tpu.memory_space<vmem>>, vector<16x16xf32>
    %c11_783 = arith.constant 11 : index
    %c4_784 = arith.constant 4 : index
    %896 = memref.load %arg4[%c11_783, %c4_784] : memref<18x9xf32, #tpu.memory_space<smem>>
    %897 = vector.broadcast %896 : f32 to vector<16x16xf32>
    %898 = arith.mulf %895, %897 : vector<16x16xf32>
    %899 = arith.addf %894, %898 : vector<16x16xf32>
    %c1_785 = arith.constant 1 : index
    %c2_786 = arith.constant 2 : index
    %900 = vector.load %arg7[%c1_785, %c2_786] : memref<18x18xf32, #tpu.memory_space<vmem>>, vector<16x16xf32>
    %c11_787 = arith.constant 11 : index
    %c5_788 = arith.constant 5 : index
    %901 = memref.load %arg4[%c11_787, %c5_788] : memref<18x9xf32, #tpu.memory_space<smem>>
    %902 = vector.broadcast %901 : f32 to vector<16x16xf32>
    %903 = arith.mulf %900, %902 : vector<16x16xf32>
    %904 = arith.addf %899, %903 : vector<16x16xf32>
    %c2_789 = arith.constant 2 : index
    %c0_790 = arith.constant 0 : index
    %905 = vector.load %arg7[%c2_789, %c0_790] : memref<18x18xf32, #tpu.memory_space<vmem>>, vector<16x16xf32>
    %c11_791 = arith.constant 11 : index
    %c6_792 = arith.constant 6 : index
    %906 = memref.load %arg4[%c11_791, %c6_792] : memref<18x9xf32, #tpu.memory_space<smem>>
    %907 = vector.broadcast %906 : f32 to vector<16x16xf32>
    %908 = arith.mulf %905, %907 : vector<16x16xf32>
    %909 = arith.addf %904, %908 : vector<16x16xf32>
    %c2_793 = arith.constant 2 : index
    %c1_794 = arith.constant 1 : index
    %910 = vector.load %arg7[%c2_793, %c1_794] : memref<18x18xf32, #tpu.memory_space<vmem>>, vector<16x16xf32>
    %c11_795 = arith.constant 11 : index
    %c7_796 = arith.constant 7 : index
    %911 = memref.load %arg4[%c11_795, %c7_796] : memref<18x9xf32, #tpu.memory_space<smem>>
    %912 = vector.broadcast %911 : f32 to vector<16x16xf32>
    %913 = arith.mulf %910, %912 : vector<16x16xf32>
    %914 = arith.addf %909, %913 : vector<16x16xf32>
    %c2_797 = arith.constant 2 : index
    %c2_798 = arith.constant 2 : index
    %915 = vector.load %arg7[%c2_797, %c2_798] : memref<18x18xf32, #tpu.memory_space<vmem>>, vector<16x16xf32>
    %c11_799 = arith.constant 11 : index
    %c8_800 = arith.constant 8 : index
    %916 = memref.load %arg4[%c11_799, %c8_800] : memref<18x9xf32, #tpu.memory_space<smem>>
    %917 = vector.broadcast %916 : f32 to vector<16x16xf32>
    %918 = arith.mulf %915, %917 : vector<16x16xf32>
    %919 = arith.addf %914, %918 : vector<16x16xf32>
    %c11_801 = arith.constant 11 : index
    %920 = memref.load %arg5[%c11_801] : memref<18xf32, #tpu.memory_space<smem>>
    %921 = vector.broadcast %920 : f32 to vector<16x16xf32>
    %922 = arith.addf %919, %921 : vector<16x16xf32>
    %c0_802 = arith.constant 0 : index
    %c11_803 = arith.constant 11 : index
    %c0_804 = arith.constant 0 : index
    %c0_805 = arith.constant 0 : index
    %923 = vector.load %arg6[%c0_802, %c11_803, %c0_804, %c0_805] : memref<1x18x16x16xf32, #tpu.memory_space<vmem>>, vector<1x1x16x16xf32>
    %924 = vector.shape_cast %923 : vector<1x1x16x16xf32> to vector<16x16xf32>
    %925 = vector.shape_cast %922 : vector<16x16xf32> to vector<1x1x16x16xf32>
    tpu.vector_store %arg6[%c0_802, %c11_803, %c0_804, %c0_805], %925 {strides = array<i32>} : memref<1x18x16x16xf32, #tpu.memory_space<vmem>>, vector<1x1x16x16xf32>,
    %c0_806 = arith.constant 0 : index
    %c0_807 = arith.constant 0 : index
    %c0_808 = arith.constant 0 : index
    %c0_809 = arith.constant 0 : index
    %926 = vector.load %arg1[%c0_806, %c0_807, %c0_808, %c0_809] : memref<1x4x16x16xf32, #tpu.memory_space<vmem>>, vector<1x1x16x16xf32>
    %927 = vector.shape_cast %926 : vector<1x1x16x16xf32> to vector<16x16xf32>
    %c0_810 = arith.constant 0 : index
    %c12 = arith.constant 12 : index
    %928 = memref.load %arg2[%c0_810, %c12] : memref<4x18xf32, #tpu.memory_space<smem>>
    %929 = vector.broadcast %928 : f32 to vector<16x16xf32>
    %930 = arith.mulf %927, %929 : vector<16x16xf32>
    %c0_811 = arith.constant 0 : index
    %c1_812 = arith.constant 1 : index
    %c0_813 = arith.constant 0 : index
    %c0_814 = arith.constant 0 : index
    %931 = vector.load %arg1[%c0_811, %c1_812, %c0_813, %c0_814] : memref<1x4x16x16xf32, #tpu.memory_space<vmem>>, vector<1x1x16x16xf32>
    %932 = vector.shape_cast %931 : vector<1x1x16x16xf32> to vector<16x16xf32>
    %c1_815 = arith.constant 1 : index
    %c12_816 = arith.constant 12 : index
    %933 = memref.load %arg2[%c1_815, %c12_816] : memref<4x18xf32, #tpu.memory_space<smem>>
    %934 = vector.broadcast %933 : f32 to vector<16x16xf32>
    %935 = arith.mulf %932, %934 : vector<16x16xf32>
    %936 = arith.addf %930, %935 : vector<16x16xf32>
    %c0_817 = arith.constant 0 : index
    %c2_818 = arith.constant 2 : index
    %c0_819 = arith.constant 0 : index
    %c0_820 = arith.constant 0 : index
    %937 = vector.load %arg1[%c0_817, %c2_818, %c0_819, %c0_820] : memref<1x4x16x16xf32, #tpu.memory_space<vmem>>, vector<1x1x16x16xf32>
    %938 = vector.shape_cast %937 : vector<1x1x16x16xf32> to vector<16x16xf32>
    %c2_821 = arith.constant 2 : index
    %c12_822 = arith.constant 12 : index
    %939 = memref.load %arg2[%c2_821, %c12_822] : memref<4x18xf32, #tpu.memory_space<smem>>
    %940 = vector.broadcast %939 : f32 to vector<16x16xf32>
    %941 = arith.mulf %938, %940 : vector<16x16xf32>
    %942 = arith.addf %936, %941 : vector<16x16xf32>
    %c0_823 = arith.constant 0 : index
    %c3_824 = arith.constant 3 : index
    %c0_825 = arith.constant 0 : index
    %c0_826 = arith.constant 0 : index
    %943 = vector.load %arg1[%c0_823, %c3_824, %c0_825, %c0_826] : memref<1x4x16x16xf32, #tpu.memory_space<vmem>>, vector<1x1x16x16xf32>
    %944 = vector.shape_cast %943 : vector<1x1x16x16xf32> to vector<16x16xf32>
    %c3_827 = arith.constant 3 : index
    %c12_828 = arith.constant 12 : index
    %945 = memref.load %arg2[%c3_827, %c12_828] : memref<4x18xf32, #tpu.memory_space<smem>>
    %946 = vector.broadcast %945 : f32 to vector<16x16xf32>
    %947 = arith.mulf %944, %946 : vector<16x16xf32>
    %948 = arith.addf %942, %947 : vector<16x16xf32>
    %c12_829 = arith.constant 12 : index
    %949 = memref.load %arg3[%c12_829] : memref<18xf32, #tpu.memory_space<smem>>
    %950 = vector.broadcast %949 : f32 to vector<16x16xf32>
    %951 = arith.addf %948, %950 : vector<16x16xf32>
    %c1_830 = arith.constant 1 : index
    %c1_831 = arith.constant 1 : index
    %952 = vector.load %arg7[%c1_830, %c1_831] : memref<18x18xf32, #tpu.memory_space<vmem>>, vector<16x16xf32>
    tpu.vector_store %arg7[%c1_830, %c1_831], %951 {strides = array<i32>} : memref<18x18xf32, #tpu.memory_space<vmem>>, vector<16x16xf32>,
    %c0_832 = arith.constant 0 : index
    %c0_833 = arith.constant 0 : index
    %953 = vector.load %arg7[%c0_832, %c0_833] : memref<18x18xf32, #tpu.memory_space<vmem>>, vector<16x16xf32>
    %c12_834 = arith.constant 12 : index
    %c0_835 = arith.constant 0 : index
    %954 = memref.load %arg4[%c12_834, %c0_835] : memref<18x9xf32, #tpu.memory_space<smem>>
    %955 = vector.broadcast %954 : f32 to vector<16x16xf32>
    %956 = arith.mulf %953, %955 : vector<16x16xf32>
    %c0_836 = arith.constant 0 : index
    %c1_837 = arith.constant 1 : index
    %957 = vector.load %arg7[%c0_836, %c1_837] : memref<18x18xf32, #tpu.memory_space<vmem>>, vector<16x16xf32>
    %c12_838 = arith.constant 12 : index
    %c1_839 = arith.constant 1 : index
    %958 = memref.load %arg4[%c12_838, %c1_839] : memref<18x9xf32, #tpu.memory_space<smem>>
    %959 = vector.broadcast %958 : f32 to vector<16x16xf32>
    %960 = arith.mulf %957, %959 : vector<16x16xf32>
    %961 = arith.addf %956, %960 : vector<16x16xf32>
    %c0_840 = arith.constant 0 : index
    %c2_841 = arith.constant 2 : index
    %962 = vector.load %arg7[%c0_840, %c2_841] : memref<18x18xf32, #tpu.memory_space<vmem>>, vector<16x16xf32>
    %c12_842 = arith.constant 12 : index
    %c2_843 = arith.constant 2 : index
    %963 = memref.load %arg4[%c12_842, %c2_843] : memref<18x9xf32, #tpu.memory_space<smem>>
    %964 = vector.broadcast %963 : f32 to vector<16x16xf32>
    %965 = arith.mulf %962, %964 : vector<16x16xf32>
    %966 = arith.addf %961, %965 : vector<16x16xf32>
    %c1_844 = arith.constant 1 : index
    %c0_845 = arith.constant 0 : index
    %967 = vector.load %arg7[%c1_844, %c0_845] : memref<18x18xf32, #tpu.memory_space<vmem>>, vector<16x16xf32>
    %c12_846 = arith.constant 12 : index
    %c3_847 = arith.constant 3 : index
    %968 = memref.load %arg4[%c12_846, %c3_847] : memref<18x9xf32, #tpu.memory_space<smem>>
    %969 = vector.broadcast %968 : f32 to vector<16x16xf32>
    %970 = arith.mulf %967, %969 : vector<16x16xf32>
    %971 = arith.addf %966, %970 : vector<16x16xf32>
    %c1_848 = arith.constant 1 : index
    %c1_849 = arith.constant 1 : index
    %972 = vector.load %arg7[%c1_848, %c1_849] : memref<18x18xf32, #tpu.memory_space<vmem>>, vector<16x16xf32>
    %c12_850 = arith.constant 12 : index
    %c4_851 = arith.constant 4 : index
    %973 = memref.load %arg4[%c12_850, %c4_851] : memref<18x9xf32, #tpu.memory_space<smem>>
    %974 = vector.broadcast %973 : f32 to vector<16x16xf32>
    %975 = arith.mulf %972, %974 : vector<16x16xf32>
    %976 = arith.addf %971, %975 : vector<16x16xf32>
    %c1_852 = arith.constant 1 : index
    %c2_853 = arith.constant 2 : index
    %977 = vector.load %arg7[%c1_852, %c2_853] : memref<18x18xf32, #tpu.memory_space<vmem>>, vector<16x16xf32>
    %c12_854 = arith.constant 12 : index
    %c5_855 = arith.constant 5 : index
    %978 = memref.load %arg4[%c12_854, %c5_855] : memref<18x9xf32, #tpu.memory_space<smem>>
    %979 = vector.broadcast %978 : f32 to vector<16x16xf32>
    %980 = arith.mulf %977, %979 : vector<16x16xf32>
    %981 = arith.addf %976, %980 : vector<16x16xf32>
    %c2_856 = arith.constant 2 : index
    %c0_857 = arith.constant 0 : index
    %982 = vector.load %arg7[%c2_856, %c0_857] : memref<18x18xf32, #tpu.memory_space<vmem>>, vector<16x16xf32>
    %c12_858 = arith.constant 12 : index
    %c6_859 = arith.constant 6 : index
    %983 = memref.load %arg4[%c12_858, %c6_859] : memref<18x9xf32, #tpu.memory_space<smem>>
    %984 = vector.broadcast %983 : f32 to vector<16x16xf32>
    %985 = arith.mulf %982, %984 : vector<16x16xf32>
    %986 = arith.addf %981, %985 : vector<16x16xf32>
    %c2_860 = arith.constant 2 : index
    %c1_861 = arith.constant 1 : index
    %987 = vector.load %arg7[%c2_860, %c1_861] : memref<18x18xf32, #tpu.memory_space<vmem>>, vector<16x16xf32>
    %c12_862 = arith.constant 12 : index
    %c7_863 = arith.constant 7 : index
    %988 = memref.load %arg4[%c12_862, %c7_863] : memref<18x9xf32, #tpu.memory_space<smem>>
    %989 = vector.broadcast %988 : f32 to vector<16x16xf32>
    %990 = arith.mulf %987, %989 : vector<16x16xf32>
    %991 = arith.addf %986, %990 : vector<16x16xf32>
    %c2_864 = arith.constant 2 : index
    %c2_865 = arith.constant 2 : index
    %992 = vector.load %arg7[%c2_864, %c2_865] : memref<18x18xf32, #tpu.memory_space<vmem>>, vector<16x16xf32>
    %c12_866 = arith.constant 12 : index
    %c8_867 = arith.constant 8 : index
    %993 = memref.load %arg4[%c12_866, %c8_867] : memref<18x9xf32, #tpu.memory_space<smem>>
    %994 = vector.broadcast %993 : f32 to vector<16x16xf32>
    %995 = arith.mulf %992, %994 : vector<16x16xf32>
    %996 = arith.addf %991, %995 : vector<16x16xf32>
    %c12_868 = arith.constant 12 : index
    %997 = memref.load %arg5[%c12_868] : memref<18xf32, #tpu.memory_space<smem>>
    %998 = vector.broadcast %997 : f32 to vector<16x16xf32>
    %999 = arith.addf %996, %998 : vector<16x16xf32>
    %c0_869 = arith.constant 0 : index
    %c12_870 = arith.constant 12 : index
    %c0_871 = arith.constant 0 : index
    %c0_872 = arith.constant 0 : index
    %1000 = vector.load %arg6[%c0_869, %c12_870, %c0_871, %c0_872] : memref<1x18x16x16xf32, #tpu.memory_space<vmem>>, vector<1x1x16x16xf32>
    %1001 = vector.shape_cast %1000 : vector<1x1x16x16xf32> to vector<16x16xf32>
    %1002 = vector.shape_cast %999 : vector<16x16xf32> to vector<1x1x16x16xf32>
    tpu.vector_store %arg6[%c0_869, %c12_870, %c0_871, %c0_872], %1002 {strides = array<i32>} : memref<1x18x16x16xf32, #tpu.memory_space<vmem>>, vector<1x1x16x16xf32>,
    %c0_873 = arith.constant 0 : index
    %c0_874 = arith.constant 0 : index
    %c0_875 = arith.constant 0 : index
    %c0_876 = arith.constant 0 : index
    %1003 = vector.load %arg1[%c0_873, %c0_874, %c0_875, %c0_876] : memref<1x4x16x16xf32, #tpu.memory_space<vmem>>, vector<1x1x16x16xf32>
    %1004 = vector.shape_cast %1003 : vector<1x1x16x16xf32> to vector<16x16xf32>
    %c0_877 = arith.constant 0 : index
    %c13 = arith.constant 13 : index
    %1005 = memref.load %arg2[%c0_877, %c13] : memref<4x18xf32, #tpu.memory_space<smem>>
    %1006 = vector.broadcast %1005 : f32 to vector<16x16xf32>
    %1007 = arith.mulf %1004, %1006 : vector<16x16xf32>
    %c0_878 = arith.constant 0 : index
    %c1_879 = arith.constant 1 : index
    %c0_880 = arith.constant 0 : index
    %c0_881 = arith.constant 0 : index
    %1008 = vector.load %arg1[%c0_878, %c1_879, %c0_880, %c0_881] : memref<1x4x16x16xf32, #tpu.memory_space<vmem>>, vector<1x1x16x16xf32>
    %1009 = vector.shape_cast %1008 : vector<1x1x16x16xf32> to vector<16x16xf32>
    %c1_882 = arith.constant 1 : index
    %c13_883 = arith.constant 13 : index
    %1010 = memref.load %arg2[%c1_882, %c13_883] : memref<4x18xf32, #tpu.memory_space<smem>>
    %1011 = vector.broadcast %1010 : f32 to vector<16x16xf32>
    %1012 = arith.mulf %1009, %1011 : vector<16x16xf32>
    %1013 = arith.addf %1007, %1012 : vector<16x16xf32>
    %c0_884 = arith.constant 0 : index
    %c2_885 = arith.constant 2 : index
    %c0_886 = arith.constant 0 : index
    %c0_887 = arith.constant 0 : index
    %1014 = vector.load %arg1[%c0_884, %c2_885, %c0_886, %c0_887] : memref<1x4x16x16xf32, #tpu.memory_space<vmem>>, vector<1x1x16x16xf32>
    %1015 = vector.shape_cast %1014 : vector<1x1x16x16xf32> to vector<16x16xf32>
    %c2_888 = arith.constant 2 : index
    %c13_889 = arith.constant 13 : index
    %1016 = memref.load %arg2[%c2_888, %c13_889] : memref<4x18xf32, #tpu.memory_space<smem>>
    %1017 = vector.broadcast %1016 : f32 to vector<16x16xf32>
    %1018 = arith.mulf %1015, %1017 : vector<16x16xf32>
    %1019 = arith.addf %1013, %1018 : vector<16x16xf32>
    %c0_890 = arith.constant 0 : index
    %c3_891 = arith.constant 3 : index
    %c0_892 = arith.constant 0 : index
    %c0_893 = arith.constant 0 : index
    %1020 = vector.load %arg1[%c0_890, %c3_891, %c0_892, %c0_893] : memref<1x4x16x16xf32, #tpu.memory_space<vmem>>, vector<1x1x16x16xf32>
    %1021 = vector.shape_cast %1020 : vector<1x1x16x16xf32> to vector<16x16xf32>
    %c3_894 = arith.constant 3 : index
    %c13_895 = arith.constant 13 : index
    %1022 = memref.load %arg2[%c3_894, %c13_895] : memref<4x18xf32, #tpu.memory_space<smem>>
    %1023 = vector.broadcast %1022 : f32 to vector<16x16xf32>
    %1024 = arith.mulf %1021, %1023 : vector<16x16xf32>
    %1025 = arith.addf %1019, %1024 : vector<16x16xf32>
    %c13_896 = arith.constant 13 : index
    %1026 = memref.load %arg3[%c13_896] : memref<18xf32, #tpu.memory_space<smem>>
    %1027 = vector.broadcast %1026 : f32 to vector<16x16xf32>
    %1028 = arith.addf %1025, %1027 : vector<16x16xf32>
    %c1_897 = arith.constant 1 : index
    %c1_898 = arith.constant 1 : index
    %1029 = vector.load %arg7[%c1_897, %c1_898] : memref<18x18xf32, #tpu.memory_space<vmem>>, vector<16x16xf32>
    tpu.vector_store %arg7[%c1_897, %c1_898], %1028 {strides = array<i32>} : memref<18x18xf32, #tpu.memory_space<vmem>>, vector<16x16xf32>,
    %c0_899 = arith.constant 0 : index
    %c0_900 = arith.constant 0 : index
    %1030 = vector.load %arg7[%c0_899, %c0_900] : memref<18x18xf32, #tpu.memory_space<vmem>>, vector<16x16xf32>
    %c13_901 = arith.constant 13 : index
    %c0_902 = arith.constant 0 : index
    %1031 = memref.load %arg4[%c13_901, %c0_902] : memref<18x9xf32, #tpu.memory_space<smem>>
    %1032 = vector.broadcast %1031 : f32 to vector<16x16xf32>
    %1033 = arith.mulf %1030, %1032 : vector<16x16xf32>
    %c0_903 = arith.constant 0 : index
    %c1_904 = arith.constant 1 : index
    %1034 = vector.load %arg7[%c0_903, %c1_904] : memref<18x18xf32, #tpu.memory_space<vmem>>, vector<16x16xf32>
    %c13_905 = arith.constant 13 : index
    %c1_906 = arith.constant 1 : index
    %1035 = memref.load %arg4[%c13_905, %c1_906] : memref<18x9xf32, #tpu.memory_space<smem>>
    %1036 = vector.broadcast %1035 : f32 to vector<16x16xf32>
    %1037 = arith.mulf %1034, %1036 : vector<16x16xf32>
    %1038 = arith.addf %1033, %1037 : vector<16x16xf32>
    %c0_907 = arith.constant 0 : index
    %c2_908 = arith.constant 2 : index
    %1039 = vector.load %arg7[%c0_907, %c2_908] : memref<18x18xf32, #tpu.memory_space<vmem>>, vector<16x16xf32>
    %c13_909 = arith.constant 13 : index
    %c2_910 = arith.constant 2 : index
    %1040 = memref.load %arg4[%c13_909, %c2_910] : memref<18x9xf32, #tpu.memory_space<smem>>
    %1041 = vector.broadcast %1040 : f32 to vector<16x16xf32>
    %1042 = arith.mulf %1039, %1041 : vector<16x16xf32>
    %1043 = arith.addf %1038, %1042 : vector<16x16xf32>
    %c1_911 = arith.constant 1 : index
    %c0_912 = arith.constant 0 : index
    %1044 = vector.load %arg7[%c1_911, %c0_912] : memref<18x18xf32, #tpu.memory_space<vmem>>, vector<16x16xf32>
    %c13_913 = arith.constant 13 : index
    %c3_914 = arith.constant 3 : index
    %1045 = memref.load %arg4[%c13_913, %c3_914] : memref<18x9xf32, #tpu.memory_space<smem>>
    %1046 = vector.broadcast %1045 : f32 to vector<16x16xf32>
    %1047 = arith.mulf %1044, %1046 : vector<16x16xf32>
    %1048 = arith.addf %1043, %1047 : vector<16x16xf32>
    %c1_915 = arith.constant 1 : index
    %c1_916 = arith.constant 1 : index
    %1049 = vector.load %arg7[%c1_915, %c1_916] : memref<18x18xf32, #tpu.memory_space<vmem>>, vector<16x16xf32>
    %c13_917 = arith.constant 13 : index
    %c4_918 = arith.constant 4 : index
    %1050 = memref.load %arg4[%c13_917, %c4_918] : memref<18x9xf32, #tpu.memory_space<smem>>
    %1051 = vector.broadcast %1050 : f32 to vector<16x16xf32>
    %1052 = arith.mulf %1049, %1051 : vector<16x16xf32>
    %1053 = arith.addf %1048, %1052 : vector<16x16xf32>
    %c1_919 = arith.constant 1 : index
    %c2_920 = arith.constant 2 : index
    %1054 = vector.load %arg7[%c1_919, %c2_920] : memref<18x18xf32, #tpu.memory_space<vmem>>, vector<16x16xf32>
    %c13_921 = arith.constant 13 : index
    %c5_922 = arith.constant 5 : index
    %1055 = memref.load %arg4[%c13_921, %c5_922] : memref<18x9xf32, #tpu.memory_space<smem>>
    %1056 = vector.broadcast %1055 : f32 to vector<16x16xf32>
    %1057 = arith.mulf %1054, %1056 : vector<16x16xf32>
    %1058 = arith.addf %1053, %1057 : vector<16x16xf32>
    %c2_923 = arith.constant 2 : index
    %c0_924 = arith.constant 0 : index
    %1059 = vector.load %arg7[%c2_923, %c0_924] : memref<18x18xf32, #tpu.memory_space<vmem>>, vector<16x16xf32>
    %c13_925 = arith.constant 13 : index
    %c6_926 = arith.constant 6 : index
    %1060 = memref.load %arg4[%c13_925, %c6_926] : memref<18x9xf32, #tpu.memory_space<smem>>
    %1061 = vector.broadcast %1060 : f32 to vector<16x16xf32>
    %1062 = arith.mulf %1059, %1061 : vector<16x16xf32>
    %1063 = arith.addf %1058, %1062 : vector<16x16xf32>
    %c2_927 = arith.constant 2 : index
    %c1_928 = arith.constant 1 : index
    %1064 = vector.load %arg7[%c2_927, %c1_928] : memref<18x18xf32, #tpu.memory_space<vmem>>, vector<16x16xf32>
    %c13_929 = arith.constant 13 : index
    %c7_930 = arith.constant 7 : index
    %1065 = memref.load %arg4[%c13_929, %c7_930] : memref<18x9xf32, #tpu.memory_space<smem>>
    %1066 = vector.broadcast %1065 : f32 to vector<16x16xf32>
    %1067 = arith.mulf %1064, %1066 : vector<16x16xf32>
    %1068 = arith.addf %1063, %1067 : vector<16x16xf32>
    %c2_931 = arith.constant 2 : index
    %c2_932 = arith.constant 2 : index
    %1069 = vector.load %arg7[%c2_931, %c2_932] : memref<18x18xf32, #tpu.memory_space<vmem>>, vector<16x16xf32>
    %c13_933 = arith.constant 13 : index
    %c8_934 = arith.constant 8 : index
    %1070 = memref.load %arg4[%c13_933, %c8_934] : memref<18x9xf32, #tpu.memory_space<smem>>
    %1071 = vector.broadcast %1070 : f32 to vector<16x16xf32>
    %1072 = arith.mulf %1069, %1071 : vector<16x16xf32>
    %1073 = arith.addf %1068, %1072 : vector<16x16xf32>
    %c13_935 = arith.constant 13 : index
    %1074 = memref.load %arg5[%c13_935] : memref<18xf32, #tpu.memory_space<smem>>
    %1075 = vector.broadcast %1074 : f32 to vector<16x16xf32>
    %1076 = arith.addf %1073, %1075 : vector<16x16xf32>
    %c0_936 = arith.constant 0 : index
    %c13_937 = arith.constant 13 : index
    %c0_938 = arith.constant 0 : index
    %c0_939 = arith.constant 0 : index
    %1077 = vector.load %arg6[%c0_936, %c13_937, %c0_938, %c0_939] : memref<1x18x16x16xf32, #tpu.memory_space<vmem>>, vector<1x1x16x16xf32>
    %1078 = vector.shape_cast %1077 : vector<1x1x16x16xf32> to vector<16x16xf32>
    %1079 = vector.shape_cast %1076 : vector<16x16xf32> to vector<1x1x16x16xf32>
    tpu.vector_store %arg6[%c0_936, %c13_937, %c0_938, %c0_939], %1079 {strides = array<i32>} : memref<1x18x16x16xf32, #tpu.memory_space<vmem>>, vector<1x1x16x16xf32>,
    %c0_940 = arith.constant 0 : index
    %c0_941 = arith.constant 0 : index
    %c0_942 = arith.constant 0 : index
    %c0_943 = arith.constant 0 : index
    %1080 = vector.load %arg1[%c0_940, %c0_941, %c0_942, %c0_943] : memref<1x4x16x16xf32, #tpu.memory_space<vmem>>, vector<1x1x16x16xf32>
    %1081 = vector.shape_cast %1080 : vector<1x1x16x16xf32> to vector<16x16xf32>
    %c0_944 = arith.constant 0 : index
    %c14 = arith.constant 14 : index
    %1082 = memref.load %arg2[%c0_944, %c14] : memref<4x18xf32, #tpu.memory_space<smem>>
    %1083 = vector.broadcast %1082 : f32 to vector<16x16xf32>
    %1084 = arith.mulf %1081, %1083 : vector<16x16xf32>
    %c0_945 = arith.constant 0 : index
    %c1_946 = arith.constant 1 : index
    %c0_947 = arith.constant 0 : index
    %c0_948 = arith.constant 0 : index
    %1085 = vector.load %arg1[%c0_945, %c1_946, %c0_947, %c0_948] : memref<1x4x16x16xf32, #tpu.memory_space<vmem>>, vector<1x1x16x16xf32>
    %1086 = vector.shape_cast %1085 : vector<1x1x16x16xf32> to vector<16x16xf32>
    %c1_949 = arith.constant 1 : index
    %c14_950 = arith.constant 14 : index
    %1087 = memref.load %arg2[%c1_949, %c14_950] : memref<4x18xf32, #tpu.memory_space<smem>>
    %1088 = vector.broadcast %1087 : f32 to vector<16x16xf32>
    %1089 = arith.mulf %1086, %1088 : vector<16x16xf32>
    %1090 = arith.addf %1084, %1089 : vector<16x16xf32>
    %c0_951 = arith.constant 0 : index
    %c2_952 = arith.constant 2 : index
    %c0_953 = arith.constant 0 : index
    %c0_954 = arith.constant 0 : index
    %1091 = vector.load %arg1[%c0_951, %c2_952, %c0_953, %c0_954] : memref<1x4x16x16xf32, #tpu.memory_space<vmem>>, vector<1x1x16x16xf32>
    %1092 = vector.shape_cast %1091 : vector<1x1x16x16xf32> to vector<16x16xf32>
    %c2_955 = arith.constant 2 : index
    %c14_956 = arith.constant 14 : index
    %1093 = memref.load %arg2[%c2_955, %c14_956] : memref<4x18xf32, #tpu.memory_space<smem>>
    %1094 = vector.broadcast %1093 : f32 to vector<16x16xf32>
    %1095 = arith.mulf %1092, %1094 : vector<16x16xf32>
    %1096 = arith.addf %1090, %1095 : vector<16x16xf32>
    %c0_957 = arith.constant 0 : index
    %c3_958 = arith.constant 3 : index
    %c0_959 = arith.constant 0 : index
    %c0_960 = arith.constant 0 : index
    %1097 = vector.load %arg1[%c0_957, %c3_958, %c0_959, %c0_960] : memref<1x4x16x16xf32, #tpu.memory_space<vmem>>, vector<1x1x16x16xf32>
    %1098 = vector.shape_cast %1097 : vector<1x1x16x16xf32> to vector<16x16xf32>
    %c3_961 = arith.constant 3 : index
    %c14_962 = arith.constant 14 : index
    %1099 = memref.load %arg2[%c3_961, %c14_962] : memref<4x18xf32, #tpu.memory_space<smem>>
    %1100 = vector.broadcast %1099 : f32 to vector<16x16xf32>
    %1101 = arith.mulf %1098, %1100 : vector<16x16xf32>
    %1102 = arith.addf %1096, %1101 : vector<16x16xf32>
    %c14_963 = arith.constant 14 : index
    %1103 = memref.load %arg3[%c14_963] : memref<18xf32, #tpu.memory_space<smem>>
    %1104 = vector.broadcast %1103 : f32 to vector<16x16xf32>
    %1105 = arith.addf %1102, %1104 : vector<16x16xf32>
    %c1_964 = arith.constant 1 : index
    %c1_965 = arith.constant 1 : index
    %1106 = vector.load %arg7[%c1_964, %c1_965] : memref<18x18xf32, #tpu.memory_space<vmem>>, vector<16x16xf32>
    tpu.vector_store %arg7[%c1_964, %c1_965], %1105 {strides = array<i32>} : memref<18x18xf32, #tpu.memory_space<vmem>>, vector<16x16xf32>,
    %c0_966 = arith.constant 0 : index
    %c0_967 = arith.constant 0 : index
    %1107 = vector.load %arg7[%c0_966, %c0_967] : memref<18x18xf32, #tpu.memory_space<vmem>>, vector<16x16xf32>
    %c14_968 = arith.constant 14 : index
    %c0_969 = arith.constant 0 : index
    %1108 = memref.load %arg4[%c14_968, %c0_969] : memref<18x9xf32, #tpu.memory_space<smem>>
    %1109 = vector.broadcast %1108 : f32 to vector<16x16xf32>
    %1110 = arith.mulf %1107, %1109 : vector<16x16xf32>
    %c0_970 = arith.constant 0 : index
    %c1_971 = arith.constant 1 : index
    %1111 = vector.load %arg7[%c0_970, %c1_971] : memref<18x18xf32, #tpu.memory_space<vmem>>, vector<16x16xf32>
    %c14_972 = arith.constant 14 : index
    %c1_973 = arith.constant 1 : index
    %1112 = memref.load %arg4[%c14_972, %c1_973] : memref<18x9xf32, #tpu.memory_space<smem>>
    %1113 = vector.broadcast %1112 : f32 to vector<16x16xf32>
    %1114 = arith.mulf %1111, %1113 : vector<16x16xf32>
    %1115 = arith.addf %1110, %1114 : vector<16x16xf32>
    %c0_974 = arith.constant 0 : index
    %c2_975 = arith.constant 2 : index
    %1116 = vector.load %arg7[%c0_974, %c2_975] : memref<18x18xf32, #tpu.memory_space<vmem>>, vector<16x16xf32>
    %c14_976 = arith.constant 14 : index
    %c2_977 = arith.constant 2 : index
    %1117 = memref.load %arg4[%c14_976, %c2_977] : memref<18x9xf32, #tpu.memory_space<smem>>
    %1118 = vector.broadcast %1117 : f32 to vector<16x16xf32>
    %1119 = arith.mulf %1116, %1118 : vector<16x16xf32>
    %1120 = arith.addf %1115, %1119 : vector<16x16xf32>
    %c1_978 = arith.constant 1 : index
    %c0_979 = arith.constant 0 : index
    %1121 = vector.load %arg7[%c1_978, %c0_979] : memref<18x18xf32, #tpu.memory_space<vmem>>, vector<16x16xf32>
    %c14_980 = arith.constant 14 : index
    %c3_981 = arith.constant 3 : index
    %1122 = memref.load %arg4[%c14_980, %c3_981] : memref<18x9xf32, #tpu.memory_space<smem>>
    %1123 = vector.broadcast %1122 : f32 to vector<16x16xf32>
    %1124 = arith.mulf %1121, %1123 : vector<16x16xf32>
    %1125 = arith.addf %1120, %1124 : vector<16x16xf32>
    %c1_982 = arith.constant 1 : index
    %c1_983 = arith.constant 1 : index
    %1126 = vector.load %arg7[%c1_982, %c1_983] : memref<18x18xf32, #tpu.memory_space<vmem>>, vector<16x16xf32>
    %c14_984 = arith.constant 14 : index
    %c4_985 = arith.constant 4 : index
    %1127 = memref.load %arg4[%c14_984, %c4_985] : memref<18x9xf32, #tpu.memory_space<smem>>
    %1128 = vector.broadcast %1127 : f32 to vector<16x16xf32>
    %1129 = arith.mulf %1126, %1128 : vector<16x16xf32>
    %1130 = arith.addf %1125, %1129 : vector<16x16xf32>
    %c1_986 = arith.constant 1 : index
    %c2_987 = arith.constant 2 : index
    %1131 = vector.load %arg7[%c1_986, %c2_987] : memref<18x18xf32, #tpu.memory_space<vmem>>, vector<16x16xf32>
    %c14_988 = arith.constant 14 : index
    %c5_989 = arith.constant 5 : index
    %1132 = memref.load %arg4[%c14_988, %c5_989] : memref<18x9xf32, #tpu.memory_space<smem>>
    %1133 = vector.broadcast %1132 : f32 to vector<16x16xf32>
    %1134 = arith.mulf %1131, %1133 : vector<16x16xf32>
    %1135 = arith.addf %1130, %1134 : vector<16x16xf32>
    %c2_990 = arith.constant 2 : index
    %c0_991 = arith.constant 0 : index
    %1136 = vector.load %arg7[%c2_990, %c0_991] : memref<18x18xf32, #tpu.memory_space<vmem>>, vector<16x16xf32>
    %c14_992 = arith.constant 14 : index
    %c6_993 = arith.constant 6 : index
    %1137 = memref.load %arg4[%c14_992, %c6_993] : memref<18x9xf32, #tpu.memory_space<smem>>
    %1138 = vector.broadcast %1137 : f32 to vector<16x16xf32>
    %1139 = arith.mulf %1136, %1138 : vector<16x16xf32>
    %1140 = arith.addf %1135, %1139 : vector<16x16xf32>
    %c2_994 = arith.constant 2 : index
    %c1_995 = arith.constant 1 : index
    %1141 = vector.load %arg7[%c2_994, %c1_995] : memref<18x18xf32, #tpu.memory_space<vmem>>, vector<16x16xf32>
    %c14_996 = arith.constant 14 : index
    %c7_997 = arith.constant 7 : index
    %1142 = memref.load %arg4[%c14_996, %c7_997] : memref<18x9xf32, #tpu.memory_space<smem>>
    %1143 = vector.broadcast %1142 : f32 to vector<16x16xf32>
    %1144 = arith.mulf %1141, %1143 : vector<16x16xf32>
    %1145 = arith.addf %1140, %1144 : vector<16x16xf32>
    %c2_998 = arith.constant 2 : index
    %c2_999 = arith.constant 2 : index
    %1146 = vector.load %arg7[%c2_998, %c2_999] : memref<18x18xf32, #tpu.memory_space<vmem>>, vector<16x16xf32>
    %c14_1000 = arith.constant 14 : index
    %c8_1001 = arith.constant 8 : index
    %1147 = memref.load %arg4[%c14_1000, %c8_1001] : memref<18x9xf32, #tpu.memory_space<smem>>
    %1148 = vector.broadcast %1147 : f32 to vector<16x16xf32>
    %1149 = arith.mulf %1146, %1148 : vector<16x16xf32>
    %1150 = arith.addf %1145, %1149 : vector<16x16xf32>
    %c14_1002 = arith.constant 14 : index
    %1151 = memref.load %arg5[%c14_1002] : memref<18xf32, #tpu.memory_space<smem>>
    %1152 = vector.broadcast %1151 : f32 to vector<16x16xf32>
    %1153 = arith.addf %1150, %1152 : vector<16x16xf32>
    %c0_1003 = arith.constant 0 : index
    %c14_1004 = arith.constant 14 : index
    %c0_1005 = arith.constant 0 : index
    %c0_1006 = arith.constant 0 : index
    %1154 = vector.load %arg6[%c0_1003, %c14_1004, %c0_1005, %c0_1006] : memref<1x18x16x16xf32, #tpu.memory_space<vmem>>, vector<1x1x16x16xf32>
    %1155 = vector.shape_cast %1154 : vector<1x1x16x16xf32> to vector<16x16xf32>
    %1156 = vector.shape_cast %1153 : vector<16x16xf32> to vector<1x1x16x16xf32>
    tpu.vector_store %arg6[%c0_1003, %c14_1004, %c0_1005, %c0_1006], %1156 {strides = array<i32>} : memref<1x18x16x16xf32, #tpu.memory_space<vmem>>, vector<1x1x16x16xf32>,
    %c0_1007 = arith.constant 0 : index
    %c0_1008 = arith.constant 0 : index
    %c0_1009 = arith.constant 0 : index
    %c0_1010 = arith.constant 0 : index
    %1157 = vector.load %arg1[%c0_1007, %c0_1008, %c0_1009, %c0_1010] : memref<1x4x16x16xf32, #tpu.memory_space<vmem>>, vector<1x1x16x16xf32>
    %1158 = vector.shape_cast %1157 : vector<1x1x16x16xf32> to vector<16x16xf32>
    %c0_1011 = arith.constant 0 : index
    %c15 = arith.constant 15 : index
    %1159 = memref.load %arg2[%c0_1011, %c15] : memref<4x18xf32, #tpu.memory_space<smem>>
    %1160 = vector.broadcast %1159 : f32 to vector<16x16xf32>
    %1161 = arith.mulf %1158, %1160 : vector<16x16xf32>
    %c0_1012 = arith.constant 0 : index
    %c1_1013 = arith.constant 1 : index
    %c0_1014 = arith.constant 0 : index
    %c0_1015 = arith.constant 0 : index
    %1162 = vector.load %arg1[%c0_1012, %c1_1013, %c0_1014, %c0_1015] : memref<1x4x16x16xf32, #tpu.memory_space<vmem>>, vector<1x1x16x16xf32>
    %1163 = vector.shape_cast %1162 : vector<1x1x16x16xf32> to vector<16x16xf32>
    %c1_1016 = arith.constant 1 : index
    %c15_1017 = arith.constant 15 : index
    %1164 = memref.load %arg2[%c1_1016, %c15_1017] : memref<4x18xf32, #tpu.memory_space<smem>>
    %1165 = vector.broadcast %1164 : f32 to vector<16x16xf32>
    %1166 = arith.mulf %1163, %1165 : vector<16x16xf32>
    %1167 = arith.addf %1161, %1166 : vector<16x16xf32>
    %c0_1018 = arith.constant 0 : index
    %c2_1019 = arith.constant 2 : index
    %c0_1020 = arith.constant 0 : index
    %c0_1021 = arith.constant 0 : index
    %1168 = vector.load %arg1[%c0_1018, %c2_1019, %c0_1020, %c0_1021] : memref<1x4x16x16xf32, #tpu.memory_space<vmem>>, vector<1x1x16x16xf32>
    %1169 = vector.shape_cast %1168 : vector<1x1x16x16xf32> to vector<16x16xf32>
    %c2_1022 = arith.constant 2 : index
    %c15_1023 = arith.constant 15 : index
    %1170 = memref.load %arg2[%c2_1022, %c15_1023] : memref<4x18xf32, #tpu.memory_space<smem>>
    %1171 = vector.broadcast %1170 : f32 to vector<16x16xf32>
    %1172 = arith.mulf %1169, %1171 : vector<16x16xf32>
    %1173 = arith.addf %1167, %1172 : vector<16x16xf32>
    %c0_1024 = arith.constant 0 : index
    %c3_1025 = arith.constant 3 : index
    %c0_1026 = arith.constant 0 : index
    %c0_1027 = arith.constant 0 : index
    %1174 = vector.load %arg1[%c0_1024, %c3_1025, %c0_1026, %c0_1027] : memref<1x4x16x16xf32, #tpu.memory_space<vmem>>, vector<1x1x16x16xf32>
    %1175 = vector.shape_cast %1174 : vector<1x1x16x16xf32> to vector<16x16xf32>
    %c3_1028 = arith.constant 3 : index
    %c15_1029 = arith.constant 15 : index
    %1176 = memref.load %arg2[%c3_1028, %c15_1029] : memref<4x18xf32, #tpu.memory_space<smem>>
    %1177 = vector.broadcast %1176 : f32 to vector<16x16xf32>
    %1178 = arith.mulf %1175, %1177 : vector<16x16xf32>
    %1179 = arith.addf %1173, %1178 : vector<16x16xf32>
    %c15_1030 = arith.constant 15 : index
    %1180 = memref.load %arg3[%c15_1030] : memref<18xf32, #tpu.memory_space<smem>>
    %1181 = vector.broadcast %1180 : f32 to vector<16x16xf32>
    %1182 = arith.addf %1179, %1181 : vector<16x16xf32>
    %c1_1031 = arith.constant 1 : index
    %c1_1032 = arith.constant 1 : index
    %1183 = vector.load %arg7[%c1_1031, %c1_1032] : memref<18x18xf32, #tpu.memory_space<vmem>>, vector<16x16xf32>
    tpu.vector_store %arg7[%c1_1031, %c1_1032], %1182 {strides = array<i32>} : memref<18x18xf32, #tpu.memory_space<vmem>>, vector<16x16xf32>,
    %c0_1033 = arith.constant 0 : index
    %c0_1034 = arith.constant 0 : index
    %1184 = vector.load %arg7[%c0_1033, %c0_1034] : memref<18x18xf32, #tpu.memory_space<vmem>>, vector<16x16xf32>
    %c15_1035 = arith.constant 15 : index
    %c0_1036 = arith.constant 0 : index
    %1185 = memref.load %arg4[%c15_1035, %c0_1036] : memref<18x9xf32, #tpu.memory_space<smem>>
    %1186 = vector.broadcast %1185 : f32 to vector<16x16xf32>
    %1187 = arith.mulf %1184, %1186 : vector<16x16xf32>
    %c0_1037 = arith.constant 0 : index
    %c1_1038 = arith.constant 1 : index
    %1188 = vector.load %arg7[%c0_1037, %c1_1038] : memref<18x18xf32, #tpu.memory_space<vmem>>, vector<16x16xf32>
    %c15_1039 = arith.constant 15 : index
    %c1_1040 = arith.constant 1 : index
    %1189 = memref.load %arg4[%c15_1039, %c1_1040] : memref<18x9xf32, #tpu.memory_space<smem>>
    %1190 = vector.broadcast %1189 : f32 to vector<16x16xf32>
    %1191 = arith.mulf %1188, %1190 : vector<16x16xf32>
    %1192 = arith.addf %1187, %1191 : vector<16x16xf32>
    %c0_1041 = arith.constant 0 : index
    %c2_1042 = arith.constant 2 : index
    %1193 = vector.load %arg7[%c0_1041, %c2_1042] : memref<18x18xf32, #tpu.memory_space<vmem>>, vector<16x16xf32>
    %c15_1043 = arith.constant 15 : index
    %c2_1044 = arith.constant 2 : index
    %1194 = memref.load %arg4[%c15_1043, %c2_1044] : memref<18x9xf32, #tpu.memory_space<smem>>
    %1195 = vector.broadcast %1194 : f32 to vector<16x16xf32>
    %1196 = arith.mulf %1193, %1195 : vector<16x16xf32>
    %1197 = arith.addf %1192, %1196 : vector<16x16xf32>
    %c1_1045 = arith.constant 1 : index
    %c0_1046 = arith.constant 0 : index
    %1198 = vector.load %arg7[%c1_1045, %c0_1046] : memref<18x18xf32, #tpu.memory_space<vmem>>, vector<16x16xf32>
    %c15_1047 = arith.constant 15 : index
    %c3_1048 = arith.constant 3 : index
    %1199 = memref.load %arg4[%c15_1047, %c3_1048] : memref<18x9xf32, #tpu.memory_space<smem>>
    %1200 = vector.broadcast %1199 : f32 to vector<16x16xf32>
    %1201 = arith.mulf %1198, %1200 : vector<16x16xf32>
    %1202 = arith.addf %1197, %1201 : vector<16x16xf32>
    %c1_1049 = arith.constant 1 : index
    %c1_1050 = arith.constant 1 : index
    %1203 = vector.load %arg7[%c1_1049, %c1_1050] : memref<18x18xf32, #tpu.memory_space<vmem>>, vector<16x16xf32>
    %c15_1051 = arith.constant 15 : index
    %c4_1052 = arith.constant 4 : index
    %1204 = memref.load %arg4[%c15_1051, %c4_1052] : memref<18x9xf32, #tpu.memory_space<smem>>
    %1205 = vector.broadcast %1204 : f32 to vector<16x16xf32>
    %1206 = arith.mulf %1203, %1205 : vector<16x16xf32>
    %1207 = arith.addf %1202, %1206 : vector<16x16xf32>
    %c1_1053 = arith.constant 1 : index
    %c2_1054 = arith.constant 2 : index
    %1208 = vector.load %arg7[%c1_1053, %c2_1054] : memref<18x18xf32, #tpu.memory_space<vmem>>, vector<16x16xf32>
    %c15_1055 = arith.constant 15 : index
    %c5_1056 = arith.constant 5 : index
    %1209 = memref.load %arg4[%c15_1055, %c5_1056] : memref<18x9xf32, #tpu.memory_space<smem>>
    %1210 = vector.broadcast %1209 : f32 to vector<16x16xf32>
    %1211 = arith.mulf %1208, %1210 : vector<16x16xf32>
    %1212 = arith.addf %1207, %1211 : vector<16x16xf32>
    %c2_1057 = arith.constant 2 : index
    %c0_1058 = arith.constant 0 : index
    %1213 = vector.load %arg7[%c2_1057, %c0_1058] : memref<18x18xf32, #tpu.memory_space<vmem>>, vector<16x16xf32>
    %c15_1059 = arith.constant 15 : index
    %c6_1060 = arith.constant 6 : index
    %1214 = memref.load %arg4[%c15_1059, %c6_1060] : memref<18x9xf32, #tpu.memory_space<smem>>
    %1215 = vector.broadcast %1214 : f32 to vector<16x16xf32>
    %1216 = arith.mulf %1213, %1215 : vector<16x16xf32>
    %1217 = arith.addf %1212, %1216 : vector<16x16xf32>
    %c2_1061 = arith.constant 2 : index
    %c1_1062 = arith.constant 1 : index
    %1218 = vector.load %arg7[%c2_1061, %c1_1062] : memref<18x18xf32, #tpu.memory_space<vmem>>, vector<16x16xf32>
    %c15_1063 = arith.constant 15 : index
    %c7_1064 = arith.constant 7 : index
    %1219 = memref.load %arg4[%c15_1063, %c7_1064] : memref<18x9xf32, #tpu.memory_space<smem>>
    %1220 = vector.broadcast %1219 : f32 to vector<16x16xf32>
    %1221 = arith.mulf %1218, %1220 : vector<16x16xf32>
    %1222 = arith.addf %1217, %1221 : vector<16x16xf32>
    %c2_1065 = arith.constant 2 : index
    %c2_1066 = arith.constant 2 : index
    %1223 = vector.load %arg7[%c2_1065, %c2_1066] : memref<18x18xf32, #tpu.memory_space<vmem>>, vector<16x16xf32>
    %c15_1067 = arith.constant 15 : index
    %c8_1068 = arith.constant 8 : index
    %1224 = memref.load %arg4[%c15_1067, %c8_1068] : memref<18x9xf32, #tpu.memory_space<smem>>
    %1225 = vector.broadcast %1224 : f32 to vector<16x16xf32>
    %1226 = arith.mulf %1223, %1225 : vector<16x16xf32>
    %1227 = arith.addf %1222, %1226 : vector<16x16xf32>
    %c15_1069 = arith.constant 15 : index
    %1228 = memref.load %arg5[%c15_1069] : memref<18xf32, #tpu.memory_space<smem>>
    %1229 = vector.broadcast %1228 : f32 to vector<16x16xf32>
    %1230 = arith.addf %1227, %1229 : vector<16x16xf32>
    %c0_1070 = arith.constant 0 : index
    %c15_1071 = arith.constant 15 : index
    %c0_1072 = arith.constant 0 : index
    %c0_1073 = arith.constant 0 : index
    %1231 = vector.load %arg6[%c0_1070, %c15_1071, %c0_1072, %c0_1073] : memref<1x18x16x16xf32, #tpu.memory_space<vmem>>, vector<1x1x16x16xf32>
    %1232 = vector.shape_cast %1231 : vector<1x1x16x16xf32> to vector<16x16xf32>
    %1233 = vector.shape_cast %1230 : vector<16x16xf32> to vector<1x1x16x16xf32>
    tpu.vector_store %arg6[%c0_1070, %c15_1071, %c0_1072, %c0_1073], %1233 {strides = array<i32>} : memref<1x18x16x16xf32, #tpu.memory_space<vmem>>, vector<1x1x16x16xf32>,
    %c0_1074 = arith.constant 0 : index
    %c0_1075 = arith.constant 0 : index
    %c0_1076 = arith.constant 0 : index
    %c0_1077 = arith.constant 0 : index
    %1234 = vector.load %arg1[%c0_1074, %c0_1075, %c0_1076, %c0_1077] : memref<1x4x16x16xf32, #tpu.memory_space<vmem>>, vector<1x1x16x16xf32>
    %1235 = vector.shape_cast %1234 : vector<1x1x16x16xf32> to vector<16x16xf32>
    %c0_1078 = arith.constant 0 : index
    %c16 = arith.constant 16 : index
    %1236 = memref.load %arg2[%c0_1078, %c16] : memref<4x18xf32, #tpu.memory_space<smem>>
    %1237 = vector.broadcast %1236 : f32 to vector<16x16xf32>
    %1238 = arith.mulf %1235, %1237 : vector<16x16xf32>
    %c0_1079 = arith.constant 0 : index
    %c1_1080 = arith.constant 1 : index
    %c0_1081 = arith.constant 0 : index
    %c0_1082 = arith.constant 0 : index
    %1239 = vector.load %arg1[%c0_1079, %c1_1080, %c0_1081, %c0_1082] : memref<1x4x16x16xf32, #tpu.memory_space<vmem>>, vector<1x1x16x16xf32>
    %1240 = vector.shape_cast %1239 : vector<1x1x16x16xf32> to vector<16x16xf32>
    %c1_1083 = arith.constant 1 : index
    %c16_1084 = arith.constant 16 : index
    %1241 = memref.load %arg2[%c1_1083, %c16_1084] : memref<4x18xf32, #tpu.memory_space<smem>>
    %1242 = vector.broadcast %1241 : f32 to vector<16x16xf32>
    %1243 = arith.mulf %1240, %1242 : vector<16x16xf32>
    %1244 = arith.addf %1238, %1243 : vector<16x16xf32>
    %c0_1085 = arith.constant 0 : index
    %c2_1086 = arith.constant 2 : index
    %c0_1087 = arith.constant 0 : index
    %c0_1088 = arith.constant 0 : index
    %1245 = vector.load %arg1[%c0_1085, %c2_1086, %c0_1087, %c0_1088] : memref<1x4x16x16xf32, #tpu.memory_space<vmem>>, vector<1x1x16x16xf32>
    %1246 = vector.shape_cast %1245 : vector<1x1x16x16xf32> to vector<16x16xf32>
    %c2_1089 = arith.constant 2 : index
    %c16_1090 = arith.constant 16 : index
    %1247 = memref.load %arg2[%c2_1089, %c16_1090] : memref<4x18xf32, #tpu.memory_space<smem>>
    %1248 = vector.broadcast %1247 : f32 to vector<16x16xf32>
    %1249 = arith.mulf %1246, %1248 : vector<16x16xf32>
    %1250 = arith.addf %1244, %1249 : vector<16x16xf32>
    %c0_1091 = arith.constant 0 : index
    %c3_1092 = arith.constant 3 : index
    %c0_1093 = arith.constant 0 : index
    %c0_1094 = arith.constant 0 : index
    %1251 = vector.load %arg1[%c0_1091, %c3_1092, %c0_1093, %c0_1094] : memref<1x4x16x16xf32, #tpu.memory_space<vmem>>, vector<1x1x16x16xf32>
    %1252 = vector.shape_cast %1251 : vector<1x1x16x16xf32> to vector<16x16xf32>
    %c3_1095 = arith.constant 3 : index
    %c16_1096 = arith.constant 16 : index
    %1253 = memref.load %arg2[%c3_1095, %c16_1096] : memref<4x18xf32, #tpu.memory_space<smem>>
    %1254 = vector.broadcast %1253 : f32 to vector<16x16xf32>
    %1255 = arith.mulf %1252, %1254 : vector<16x16xf32>
    %1256 = arith.addf %1250, %1255 : vector<16x16xf32>
    %c16_1097 = arith.constant 16 : index
    %1257 = memref.load %arg3[%c16_1097] : memref<18xf32, #tpu.memory_space<smem>>
    %1258 = vector.broadcast %1257 : f32 to vector<16x16xf32>
    %1259 = arith.addf %1256, %1258 : vector<16x16xf32>
    %c1_1098 = arith.constant 1 : index
    %c1_1099 = arith.constant 1 : index
    %1260 = vector.load %arg7[%c1_1098, %c1_1099] : memref<18x18xf32, #tpu.memory_space<vmem>>, vector<16x16xf32>
    tpu.vector_store %arg7[%c1_1098, %c1_1099], %1259 {strides = array<i32>} : memref<18x18xf32, #tpu.memory_space<vmem>>, vector<16x16xf32>,
    %c0_1100 = arith.constant 0 : index
    %c0_1101 = arith.constant 0 : index
    %1261 = vector.load %arg7[%c0_1100, %c0_1101] : memref<18x18xf32, #tpu.memory_space<vmem>>, vector<16x16xf32>
    %c16_1102 = arith.constant 16 : index
    %c0_1103 = arith.constant 0 : index
    %1262 = memref.load %arg4[%c16_1102, %c0_1103] : memref<18x9xf32, #tpu.memory_space<smem>>
    %1263 = vector.broadcast %1262 : f32 to vector<16x16xf32>
    %1264 = arith.mulf %1261, %1263 : vector<16x16xf32>
    %c0_1104 = arith.constant 0 : index
    %c1_1105 = arith.constant 1 : index
    %1265 = vector.load %arg7[%c0_1104, %c1_1105] : memref<18x18xf32, #tpu.memory_space<vmem>>, vector<16x16xf32>
    %c16_1106 = arith.constant 16 : index
    %c1_1107 = arith.constant 1 : index
    %1266 = memref.load %arg4[%c16_1106, %c1_1107] : memref<18x9xf32, #tpu.memory_space<smem>>
    %1267 = vector.broadcast %1266 : f32 to vector<16x16xf32>
    %1268 = arith.mulf %1265, %1267 : vector<16x16xf32>
    %1269 = arith.addf %1264, %1268 : vector<16x16xf32>
    %c0_1108 = arith.constant 0 : index
    %c2_1109 = arith.constant 2 : index
    %1270 = vector.load %arg7[%c0_1108, %c2_1109] : memref<18x18xf32, #tpu.memory_space<vmem>>, vector<16x16xf32>
    %c16_1110 = arith.constant 16 : index
    %c2_1111 = arith.constant 2 : index
    %1271 = memref.load %arg4[%c16_1110, %c2_1111] : memref<18x9xf32, #tpu.memory_space<smem>>
    %1272 = vector.broadcast %1271 : f32 to vector<16x16xf32>
    %1273 = arith.mulf %1270, %1272 : vector<16x16xf32>
    %1274 = arith.addf %1269, %1273 : vector<16x16xf32>
    %c1_1112 = arith.constant 1 : index
    %c0_1113 = arith.constant 0 : index
    %1275 = vector.load %arg7[%c1_1112, %c0_1113] : memref<18x18xf32, #tpu.memory_space<vmem>>, vector<16x16xf32>
    %c16_1114 = arith.constant 16 : index
    %c3_1115 = arith.constant 3 : index
    %1276 = memref.load %arg4[%c16_1114, %c3_1115] : memref<18x9xf32, #tpu.memory_space<smem>>
    %1277 = vector.broadcast %1276 : f32 to vector<16x16xf32>
    %1278 = arith.mulf %1275, %1277 : vector<16x16xf32>
    %1279 = arith.addf %1274, %1278 : vector<16x16xf32>
    %c1_1116 = arith.constant 1 : index
    %c1_1117 = arith.constant 1 : index
    %1280 = vector.load %arg7[%c1_1116, %c1_1117] : memref<18x18xf32, #tpu.memory_space<vmem>>, vector<16x16xf32>
    %c16_1118 = arith.constant 16 : index
    %c4_1119 = arith.constant 4 : index
    %1281 = memref.load %arg4[%c16_1118, %c4_1119] : memref<18x9xf32, #tpu.memory_space<smem>>
    %1282 = vector.broadcast %1281 : f32 to vector<16x16xf32>
    %1283 = arith.mulf %1280, %1282 : vector<16x16xf32>
    %1284 = arith.addf %1279, %1283 : vector<16x16xf32>
    %c1_1120 = arith.constant 1 : index
    %c2_1121 = arith.constant 2 : index
    %1285 = vector.load %arg7[%c1_1120, %c2_1121] : memref<18x18xf32, #tpu.memory_space<vmem>>, vector<16x16xf32>
    %c16_1122 = arith.constant 16 : index
    %c5_1123 = arith.constant 5 : index
    %1286 = memref.load %arg4[%c16_1122, %c5_1123] : memref<18x9xf32, #tpu.memory_space<smem>>
    %1287 = vector.broadcast %1286 : f32 to vector<16x16xf32>
    %1288 = arith.mulf %1285, %1287 : vector<16x16xf32>
    %1289 = arith.addf %1284, %1288 : vector<16x16xf32>
    %c2_1124 = arith.constant 2 : index
    %c0_1125 = arith.constant 0 : index
    %1290 = vector.load %arg7[%c2_1124, %c0_1125] : memref<18x18xf32, #tpu.memory_space<vmem>>, vector<16x16xf32>
    %c16_1126 = arith.constant 16 : index
    %c6_1127 = arith.constant 6 : index
    %1291 = memref.load %arg4[%c16_1126, %c6_1127] : memref<18x9xf32, #tpu.memory_space<smem>>
    %1292 = vector.broadcast %1291 : f32 to vector<16x16xf32>
    %1293 = arith.mulf %1290, %1292 : vector<16x16xf32>
    %1294 = arith.addf %1289, %1293 : vector<16x16xf32>
    %c2_1128 = arith.constant 2 : index
    %c1_1129 = arith.constant 1 : index
    %1295 = vector.load %arg7[%c2_1128, %c1_1129] : memref<18x18xf32, #tpu.memory_space<vmem>>, vector<16x16xf32>
    %c16_1130 = arith.constant 16 : index
    %c7_1131 = arith.constant 7 : index
    %1296 = memref.load %arg4[%c16_1130, %c7_1131] : memref<18x9xf32, #tpu.memory_space<smem>>
    %1297 = vector.broadcast %1296 : f32 to vector<16x16xf32>
    %1298 = arith.mulf %1295, %1297 : vector<16x16xf32>
    %1299 = arith.addf %1294, %1298 : vector<16x16xf32>
    %c2_1132 = arith.constant 2 : index
    %c2_1133 = arith.constant 2 : index
    %1300 = vector.load %arg7[%c2_1132, %c2_1133] : memref<18x18xf32, #tpu.memory_space<vmem>>, vector<16x16xf32>
    %c16_1134 = arith.constant 16 : index
    %c8_1135 = arith.constant 8 : index
    %1301 = memref.load %arg4[%c16_1134, %c8_1135] : memref<18x9xf32, #tpu.memory_space<smem>>
    %1302 = vector.broadcast %1301 : f32 to vector<16x16xf32>
    %1303 = arith.mulf %1300, %1302 : vector<16x16xf32>
    %1304 = arith.addf %1299, %1303 : vector<16x16xf32>
    %c16_1136 = arith.constant 16 : index
    %1305 = memref.load %arg5[%c16_1136] : memref<18xf32, #tpu.memory_space<smem>>
    %1306 = vector.broadcast %1305 : f32 to vector<16x16xf32>
    %1307 = arith.addf %1304, %1306 : vector<16x16xf32>
    %c0_1137 = arith.constant 0 : index
    %c16_1138 = arith.constant 16 : index
    %c0_1139 = arith.constant 0 : index
    %c0_1140 = arith.constant 0 : index
    %1308 = vector.load %arg6[%c0_1137, %c16_1138, %c0_1139, %c0_1140] : memref<1x18x16x16xf32, #tpu.memory_space<vmem>>, vector<1x1x16x16xf32>
    %1309 = vector.shape_cast %1308 : vector<1x1x16x16xf32> to vector<16x16xf32>
    %1310 = vector.shape_cast %1307 : vector<16x16xf32> to vector<1x1x16x16xf32>
    tpu.vector_store %arg6[%c0_1137, %c16_1138, %c0_1139, %c0_1140], %1310 {strides = array<i32>} : memref<1x18x16x16xf32, #tpu.memory_space<vmem>>, vector<1x1x16x16xf32>,
    %c0_1141 = arith.constant 0 : index
    %c0_1142 = arith.constant 0 : index
    %c0_1143 = arith.constant 0 : index
    %c0_1144 = arith.constant 0 : index
    %1311 = vector.load %arg1[%c0_1141, %c0_1142, %c0_1143, %c0_1144] : memref<1x4x16x16xf32, #tpu.memory_space<vmem>>, vector<1x1x16x16xf32>
    %1312 = vector.shape_cast %1311 : vector<1x1x16x16xf32> to vector<16x16xf32>
    %c0_1145 = arith.constant 0 : index
    %c17 = arith.constant 17 : index
    %1313 = memref.load %arg2[%c0_1145, %c17] : memref<4x18xf32, #tpu.memory_space<smem>>
    %1314 = vector.broadcast %1313 : f32 to vector<16x16xf32>
    %1315 = arith.mulf %1312, %1314 : vector<16x16xf32>
    %c0_1146 = arith.constant 0 : index
    %c1_1147 = arith.constant 1 : index
    %c0_1148 = arith.constant 0 : index
    %c0_1149 = arith.constant 0 : index
    %1316 = vector.load %arg1[%c0_1146, %c1_1147, %c0_1148, %c0_1149] : memref<1x4x16x16xf32, #tpu.memory_space<vmem>>, vector<1x1x16x16xf32>
    %1317 = vector.shape_cast %1316 : vector<1x1x16x16xf32> to vector<16x16xf32>
    %c1_1150 = arith.constant 1 : index
    %c17_1151 = arith.constant 17 : index
    %1318 = memref.load %arg2[%c1_1150, %c17_1151] : memref<4x18xf32, #tpu.memory_space<smem>>
    %1319 = vector.broadcast %1318 : f32 to vector<16x16xf32>
    %1320 = arith.mulf %1317, %1319 : vector<16x16xf32>
    %1321 = arith.addf %1315, %1320 : vector<16x16xf32>
    %c0_1152 = arith.constant 0 : index
    %c2_1153 = arith.constant 2 : index
    %c0_1154 = arith.constant 0 : index
    %c0_1155 = arith.constant 0 : index
    %1322 = vector.load %arg1[%c0_1152, %c2_1153, %c0_1154, %c0_1155] : memref<1x4x16x16xf32, #tpu.memory_space<vmem>>, vector<1x1x16x16xf32>
    %1323 = vector.shape_cast %1322 : vector<1x1x16x16xf32> to vector<16x16xf32>
    %c2_1156 = arith.constant 2 : index
    %c17_1157 = arith.constant 17 : index
    %1324 = memref.load %arg2[%c2_1156, %c17_1157] : memref<4x18xf32, #tpu.memory_space<smem>>
    %1325 = vector.broadcast %1324 : f32 to vector<16x16xf32>
    %1326 = arith.mulf %1323, %1325 : vector<16x16xf32>
    %1327 = arith.addf %1321, %1326 : vector<16x16xf32>
    %c0_1158 = arith.constant 0 : index
    %c3_1159 = arith.constant 3 : index
    %c0_1160 = arith.constant 0 : index
    %c0_1161 = arith.constant 0 : index
    %1328 = vector.load %arg1[%c0_1158, %c3_1159, %c0_1160, %c0_1161] : memref<1x4x16x16xf32, #tpu.memory_space<vmem>>, vector<1x1x16x16xf32>
    %1329 = vector.shape_cast %1328 : vector<1x1x16x16xf32> to vector<16x16xf32>
    %c3_1162 = arith.constant 3 : index
    %c17_1163 = arith.constant 17 : index
    %1330 = memref.load %arg2[%c3_1162, %c17_1163] : memref<4x18xf32, #tpu.memory_space<smem>>
    %1331 = vector.broadcast %1330 : f32 to vector<16x16xf32>
    %1332 = arith.mulf %1329, %1331 : vector<16x16xf32>
    %1333 = arith.addf %1327, %1332 : vector<16x16xf32>
    %c17_1164 = arith.constant 17 : index
    %1334 = memref.load %arg3[%c17_1164] : memref<18xf32, #tpu.memory_space<smem>>
    %1335 = vector.broadcast %1334 : f32 to vector<16x16xf32>
    %1336 = arith.addf %1333, %1335 : vector<16x16xf32>
    %c1_1165 = arith.constant 1 : index
    %c1_1166 = arith.constant 1 : index
    %1337 = vector.load %arg7[%c1_1165, %c1_1166] : memref<18x18xf32, #tpu.memory_space<vmem>>, vector<16x16xf32>
    tpu.vector_store %arg7[%c1_1165, %c1_1166], %1336 {strides = array<i32>} : memref<18x18xf32, #tpu.memory_space<vmem>>, vector<16x16xf32>,
    %c0_1167 = arith.constant 0 : index
    %c0_1168 = arith.constant 0 : index
    %1338 = vector.load %arg7[%c0_1167, %c0_1168] : memref<18x18xf32, #tpu.memory_space<vmem>>, vector<16x16xf32>
    %c17_1169 = arith.constant 17 : index
    %c0_1170 = arith.constant 0 : index
    %1339 = memref.load %arg4[%c17_1169, %c0_1170] : memref<18x9xf32, #tpu.memory_space<smem>>
    %1340 = vector.broadcast %1339 : f32 to vector<16x16xf32>
    %1341 = arith.mulf %1338, %1340 : vector<16x16xf32>
    %c0_1171 = arith.constant 0 : index
    %c1_1172 = arith.constant 1 : index
    %1342 = vector.load %arg7[%c0_1171, %c1_1172] : memref<18x18xf32, #tpu.memory_space<vmem>>, vector<16x16xf32>
    %c17_1173 = arith.constant 17 : index
    %c1_1174 = arith.constant 1 : index
    %1343 = memref.load %arg4[%c17_1173, %c1_1174] : memref<18x9xf32, #tpu.memory_space<smem>>
    %1344 = vector.broadcast %1343 : f32 to vector<16x16xf32>
    %1345 = arith.mulf %1342, %1344 : vector<16x16xf32>
    %1346 = arith.addf %1341, %1345 : vector<16x16xf32>
    %c0_1175 = arith.constant 0 : index
    %c2_1176 = arith.constant 2 : index
    %1347 = vector.load %arg7[%c0_1175, %c2_1176] : memref<18x18xf32, #tpu.memory_space<vmem>>, vector<16x16xf32>
    %c17_1177 = arith.constant 17 : index
    %c2_1178 = arith.constant 2 : index
    %1348 = memref.load %arg4[%c17_1177, %c2_1178] : memref<18x9xf32, #tpu.memory_space<smem>>
    %1349 = vector.broadcast %1348 : f32 to vector<16x16xf32>
    %1350 = arith.mulf %1347, %1349 : vector<16x16xf32>
    %1351 = arith.addf %1346, %1350 : vector<16x16xf32>
    %c1_1179 = arith.constant 1 : index
    %c0_1180 = arith.constant 0 : index
    %1352 = vector.load %arg7[%c1_1179, %c0_1180] : memref<18x18xf32, #tpu.memory_space<vmem>>, vector<16x16xf32>
    %c17_1181 = arith.constant 17 : index
    %c3_1182 = arith.constant 3 : index
    %1353 = memref.load %arg4[%c17_1181, %c3_1182] : memref<18x9xf32, #tpu.memory_space<smem>>
    %1354 = vector.broadcast %1353 : f32 to vector<16x16xf32>
    %1355 = arith.mulf %1352, %1354 : vector<16x16xf32>
    %1356 = arith.addf %1351, %1355 : vector<16x16xf32>
    %c1_1183 = arith.constant 1 : index
    %c1_1184 = arith.constant 1 : index
    %1357 = vector.load %arg7[%c1_1183, %c1_1184] : memref<18x18xf32, #tpu.memory_space<vmem>>, vector<16x16xf32>
    %c17_1185 = arith.constant 17 : index
    %c4_1186 = arith.constant 4 : index
    %1358 = memref.load %arg4[%c17_1185, %c4_1186] : memref<18x9xf32, #tpu.memory_space<smem>>
    %1359 = vector.broadcast %1358 : f32 to vector<16x16xf32>
    %1360 = arith.mulf %1357, %1359 : vector<16x16xf32>
    %1361 = arith.addf %1356, %1360 : vector<16x16xf32>
    %c1_1187 = arith.constant 1 : index
    %c2_1188 = arith.constant 2 : index
    %1362 = vector.load %arg7[%c1_1187, %c2_1188] : memref<18x18xf32, #tpu.memory_space<vmem>>, vector<16x16xf32>
    %c17_1189 = arith.constant 17 : index
    %c5_1190 = arith.constant 5 : index
    %1363 = memref.load %arg4[%c17_1189, %c5_1190] : memref<18x9xf32, #tpu.memory_space<smem>>
    %1364 = vector.broadcast %1363 : f32 to vector<16x16xf32>
    %1365 = arith.mulf %1362, %1364 : vector<16x16xf32>
    %1366 = arith.addf %1361, %1365 : vector<16x16xf32>
    %c2_1191 = arith.constant 2 : index
    %c0_1192 = arith.constant 0 : index
    %1367 = vector.load %arg7[%c2_1191, %c0_1192] : memref<18x18xf32, #tpu.memory_space<vmem>>, vector<16x16xf32>
    %c17_1193 = arith.constant 17 : index
    %c6_1194 = arith.constant 6 : index
    %1368 = memref.load %arg4[%c17_1193, %c6_1194] : memref<18x9xf32, #tpu.memory_space<smem>>
    %1369 = vector.broadcast %1368 : f32 to vector<16x16xf32>
    %1370 = arith.mulf %1367, %1369 : vector<16x16xf32>
    %1371 = arith.addf %1366, %1370 : vector<16x16xf32>
    %c2_1195 = arith.constant 2 : index
    %c1_1196 = arith.constant 1 : index
    %1372 = vector.load %arg7[%c2_1195, %c1_1196] : memref<18x18xf32, #tpu.memory_space<vmem>>, vector<16x16xf32>
    %c17_1197 = arith.constant 17 : index
    %c7_1198 = arith.constant 7 : index
    %1373 = memref.load %arg4[%c17_1197, %c7_1198] : memref<18x9xf32, #tpu.memory_space<smem>>
    %1374 = vector.broadcast %1373 : f32 to vector<16x16xf32>
    %1375 = arith.mulf %1372, %1374 : vector<16x16xf32>
    %1376 = arith.addf %1371, %1375 : vector<16x16xf32>
    %c2_1199 = arith.constant 2 : index
    %c2_1200 = arith.constant 2 : index
    %1377 = vector.load %arg7[%c2_1199, %c2_1200] : memref<18x18xf32, #tpu.memory_space<vmem>>, vector<16x16xf32>
    %c17_1201 = arith.constant 17 : index
    %c8_1202 = arith.constant 8 : index
    %1378 = memref.load %arg4[%c17_1201, %c8_1202] : memref<18x9xf32, #tpu.memory_space<smem>>
    %1379 = vector.broadcast %1378 : f32 to vector<16x16xf32>
    %1380 = arith.mulf %1377, %1379 : vector<16x16xf32>
    %1381 = arith.addf %1376, %1380 : vector<16x16xf32>
    %c17_1203 = arith.constant 17 : index
    %1382 = memref.load %arg5[%c17_1203] : memref<18xf32, #tpu.memory_space<smem>>
    %1383 = vector.broadcast %1382 : f32 to vector<16x16xf32>
    %1384 = arith.addf %1381, %1383 : vector<16x16xf32>
    %c0_1204 = arith.constant 0 : index
    %c17_1205 = arith.constant 17 : index
    %c0_1206 = arith.constant 0 : index
    %c0_1207 = arith.constant 0 : index
    %1385 = vector.load %arg6[%c0_1204, %c17_1205, %c0_1206, %c0_1207] : memref<1x18x16x16xf32, #tpu.memory_space<vmem>>, vector<1x1x16x16xf32>
    %1386 = vector.shape_cast %1385 : vector<1x1x16x16xf32> to vector<16x16xf32>
    %1387 = vector.shape_cast %1384 : vector<16x16xf32> to vector<1x1x16x16xf32>
    tpu.vector_store %arg6[%c0_1204, %c17_1205, %c0_1206, %c0_1207], %1387 {strides = array<i32>} : memref<1x18x16x16xf32, #tpu.memory_space<vmem>>, vector<1x1x16x16xf32>,
    return
  }
  func.func @transform_0(%arg0: i32) -> (i32, i32, i32, i32) {
    %c0_i32 = arith.constant 0 : i32
    %c0_i32_0 = arith.constant 0 : i32
    %c0_i32_1 = arith.constant 0 : i32
    %c0_i32_2 = arith.constant 0 : i32
    return %arg0, %c0_i32, %c0_i32_0, %c0_i32_1 : i32, i32, i32, i32
  }
  func.func @transform_1(%arg0: i32) -> (i32, i32) {
    %c0_i32 = arith.constant 0 : i32
    %c0_i32_0 = arith.constant 0 : i32
    %c0_i32_1 = arith.constant 0 : i32
    return %c0_i32, %c0_i32_0 : i32, i32
  }
  func.func @transform_2(%arg0: i32) -> i32 {
    %c0_i32 = arith.constant 0 : i32
    %c0_i32_0 = arith.constant 0 : i32
    return %c0_i32 : i32
  }
  func.func @transform_3(%arg0: i32) -> (i32, i32) {
    %c0_i32 = arith.constant 0 : i32
    %c0_i32_0 = arith.constant 0 : i32
    %c0_i32_1 = arith.constant 0 : i32
    return %c0_i32, %c0_i32_0 : i32, i32
  }
  func.func @transform_4(%arg0: i32) -> i32 {
    %c0_i32 = arith.constant 0 : i32
    %c0_i32_0 = arith.constant 0 : i32
    return %c0_i32 : i32
  }
  func.func @transform_5(%arg0: i32) -> (i32, i32, i32, i32) {
    %c0_i32 = arith.constant 0 : i32
    %c0_i32_0 = arith.constant 0 : i32
    %c0_i32_1 = arith.constant 0 : i32
    %c0_i32_2 = arith.constant 0 : i32
    return %arg0, %c0_i32, %c0_i32_0, %c0_i32_1 : i32, i32, i32, i32
  }
}

module attributes {stable_mosaic.version = 11 : i64} {
  func.func @_deform_kernel(%arg0: i32, %arg1: i32, %arg2: i32, %arg3: memref<1x8x9x256xf32, #tpu.memory_space<vmem>>, %arg4: memref<1x4x9x256xf32, #tpu.memory_space<vmem>>, %arg5: memref<1x2x18xf32, #tpu.memory_space<vmem>>, %arg6: memref<1x2x256xf32, #tpu.memory_space<vmem>>) attributes {dimension_semantics = [#tpu.dimension_semantics<parallel>, #tpu.dimension_semantics<parallel>, #tpu.dimension_semantics<parallel>], iteration_bounds = array<i64: 2, 2, 1>, scalar_prefetch = 0 : i64, scratch_operands = 0 : i64, tpu.core_type = #tpu.core_type<tc>, window_params = [{transform_indices = @transform_0, window_bounds = array<i64: 1, 8, 9, 256>}, {transform_indices = @transform_1, window_bounds = array<i64: 1, 4, 9, 256>}, {transform_indices = @transform_2, window_bounds = array<i64: 1, 2, 18>}, {transform_indices = @transform_3, window_bounds = array<i64: 1, 2, 256>}]} {
    %c0 = arith.constant 0 : index
    %c0_0 = arith.constant 0 : index
    %c0_1 = arith.constant 0 : index
    %c0_2 = arith.constant 0 : index
    %0 = vector.load %arg4[%c0, %c0_0, %c0_1, %c0_2] : memref<1x4x9x256xf32, #tpu.memory_space<vmem>>, vector<1x1x9x256xf32>
    %1 = vector.shape_cast %0 : vector<1x1x9x256xf32> to vector<9x256xf32>
    %c0_3 = arith.constant 0 : index
    %c0_4 = arith.constant 0 : index
    %c0_5 = arith.constant 0 : index
    %c0_6 = arith.constant 0 : index
    %2 = vector.load %arg3[%c0_3, %c0_4, %c0_5, %c0_6] : memref<1x8x9x256xf32, #tpu.memory_space<vmem>>, vector<1x1x9x256xf32>
    %3 = vector.shape_cast %2 : vector<1x1x9x256xf32> to vector<9x256xf32>
    %4 = arith.mulf %1, %3 : vector<9x256xf32>
    %c0_7 = arith.constant 0 : index
    %c1 = arith.constant 1 : index
    %c0_8 = arith.constant 0 : index
    %c0_9 = arith.constant 0 : index
    %5 = vector.load %arg4[%c0_7, %c1, %c0_8, %c0_9] : memref<1x4x9x256xf32, #tpu.memory_space<vmem>>, vector<1x1x9x256xf32>
    %6 = vector.shape_cast %5 : vector<1x1x9x256xf32> to vector<9x256xf32>
    %c0_10 = arith.constant 0 : index
    %c1_11 = arith.constant 1 : index
    %c0_12 = arith.constant 0 : index
    %c0_13 = arith.constant 0 : index
    %7 = vector.load %arg3[%c0_10, %c1_11, %c0_12, %c0_13] : memref<1x8x9x256xf32, #tpu.memory_space<vmem>>, vector<1x1x9x256xf32>
    %8 = vector.shape_cast %7 : vector<1x1x9x256xf32> to vector<9x256xf32>
    %9 = arith.mulf %6, %8 : vector<9x256xf32>
    %10 = arith.addf %4, %9 : vector<9x256xf32>
    %c0_14 = arith.constant 0 : index
    %c2 = arith.constant 2 : index
    %c0_15 = arith.constant 0 : index
    %c0_16 = arith.constant 0 : index
    %11 = vector.load %arg4[%c0_14, %c2, %c0_15, %c0_16] : memref<1x4x9x256xf32, #tpu.memory_space<vmem>>, vector<1x1x9x256xf32>
    %12 = vector.shape_cast %11 : vector<1x1x9x256xf32> to vector<9x256xf32>
    %c0_17 = arith.constant 0 : index
    %c2_18 = arith.constant 2 : index
    %c0_19 = arith.constant 0 : index
    %c0_20 = arith.constant 0 : index
    %13 = vector.load %arg3[%c0_17, %c2_18, %c0_19, %c0_20] : memref<1x8x9x256xf32, #tpu.memory_space<vmem>>, vector<1x1x9x256xf32>
    %14 = vector.shape_cast %13 : vector<1x1x9x256xf32> to vector<9x256xf32>
    %15 = arith.mulf %12, %14 : vector<9x256xf32>
    %16 = arith.addf %10, %15 : vector<9x256xf32>
    %c0_21 = arith.constant 0 : index
    %c3 = arith.constant 3 : index
    %c0_22 = arith.constant 0 : index
    %c0_23 = arith.constant 0 : index
    %17 = vector.load %arg4[%c0_21, %c3, %c0_22, %c0_23] : memref<1x4x9x256xf32, #tpu.memory_space<vmem>>, vector<1x1x9x256xf32>
    %18 = vector.shape_cast %17 : vector<1x1x9x256xf32> to vector<9x256xf32>
    %c0_24 = arith.constant 0 : index
    %c3_25 = arith.constant 3 : index
    %c0_26 = arith.constant 0 : index
    %c0_27 = arith.constant 0 : index
    %19 = vector.load %arg3[%c0_24, %c3_25, %c0_26, %c0_27] : memref<1x8x9x256xf32, #tpu.memory_space<vmem>>, vector<1x1x9x256xf32>
    %20 = vector.shape_cast %19 : vector<1x1x9x256xf32> to vector<9x256xf32>
    %21 = arith.mulf %18, %20 : vector<9x256xf32>
    %22 = arith.addf %16, %21 : vector<9x256xf32>
    %c0_28 = arith.constant 0 : index
    %c0_29 = arith.constant 0 : index
    %c0_30 = arith.constant 0 : index
    %23 = vector.load %arg5[%c0_28, %c0_29, %c0_30] : memref<1x2x18xf32, #tpu.memory_space<vmem>>, vector<1x2x9xf32>
    %24 = vector.shape_cast %23 : vector<1x2x9xf32> to vector<2x9xf32>
    %cst = arith.constant dense<0.000000e+00> : vector<2x256xf32>
    %25 = tpu.matmul %24, %22, %cst {dimension_numbers = #tpu.dot_dimension_numbers<[1], [0], [0], [1], [0, 0, 1, 1], [], []>} : vector<2x9xf32>, vector<9x256xf32>, vector<2x256xf32> -> vector<2x256xf32>
    %c0_31 = arith.constant 0 : index
    %c0_32 = arith.constant 0 : index
    %c0_33 = arith.constant 0 : index
    %c0_34 = arith.constant 0 : index
    %26 = vector.load %arg4[%c0_31, %c0_32, %c0_33, %c0_34] : memref<1x4x9x256xf32, #tpu.memory_space<vmem>>, vector<1x1x9x256xf32>
    %27 = vector.shape_cast %26 : vector<1x1x9x256xf32> to vector<9x256xf32>
    %c0_35 = arith.constant 0 : index
    %c4 = arith.constant 4 : index
    %c0_36 = arith.constant 0 : index
    %c0_37 = arith.constant 0 : index
    %28 = vector.load %arg3[%c0_35, %c4, %c0_36, %c0_37] : memref<1x8x9x256xf32, #tpu.memory_space<vmem>>, vector<1x1x9x256xf32>
    %29 = vector.shape_cast %28 : vector<1x1x9x256xf32> to vector<9x256xf32>
    %30 = arith.mulf %27, %29 : vector<9x256xf32>
    %c0_38 = arith.constant 0 : index
    %c1_39 = arith.constant 1 : index
    %c0_40 = arith.constant 0 : index
    %c0_41 = arith.constant 0 : index
    %31 = vector.load %arg4[%c0_38, %c1_39, %c0_40, %c0_41] : memref<1x4x9x256xf32, #tpu.memory_space<vmem>>, vector<1x1x9x256xf32>
    %32 = vector.shape_cast %31 : vector<1x1x9x256xf32> to vector<9x256xf32>
    %c0_42 = arith.constant 0 : index
    %c5 = arith.constant 5 : index
    %c0_43 = arith.constant 0 : index
    %c0_44 = arith.constant 0 : index
    %33 = vector.load %arg3[%c0_42, %c5, %c0_43, %c0_44] : memref<1x8x9x256xf32, #tpu.memory_space<vmem>>, vector<1x1x9x256xf32>
    %34 = vector.shape_cast %33 : vector<1x1x9x256xf32> to vector<9x256xf32>
    %35 = arith.mulf %32, %34 : vector<9x256xf32>
    %36 = arith.addf %30, %35 : vector<9x256xf32>
    %c0_45 = arith.constant 0 : index
    %c2_46 = arith.constant 2 : index
    %c0_47 = arith.constant 0 : index
    %c0_48 = arith.constant 0 : index
    %37 = vector.load %arg4[%c0_45, %c2_46, %c0_47, %c0_48] : memref<1x4x9x256xf32, #tpu.memory_space<vmem>>, vector<1x1x9x256xf32>
    %38 = vector.shape_cast %37 : vector<1x1x9x256xf32> to vector<9x256xf32>
    %c0_49 = arith.constant 0 : index
    %c6 = arith.constant 6 : index
    %c0_50 = arith.constant 0 : index
    %c0_51 = arith.constant 0 : index
    %39 = vector.load %arg3[%c0_49, %c6, %c0_50, %c0_51] : memref<1x8x9x256xf32, #tpu.memory_space<vmem>>, vector<1x1x9x256xf32>
    %40 = vector.shape_cast %39 : vector<1x1x9x256xf32> to vector<9x256xf32>
    %41 = arith.mulf %38, %40 : vector<9x256xf32>
    %42 = arith.addf %36, %41 : vector<9x256xf32>
    %c0_52 = arith.constant 0 : index
    %c3_53 = arith.constant 3 : index
    %c0_54 = arith.constant 0 : index
    %c0_55 = arith.constant 0 : index
    %43 = vector.load %arg4[%c0_52, %c3_53, %c0_54, %c0_55] : memref<1x4x9x256xf32, #tpu.memory_space<vmem>>, vector<1x1x9x256xf32>
    %44 = vector.shape_cast %43 : vector<1x1x9x256xf32> to vector<9x256xf32>
    %c0_56 = arith.constant 0 : index
    %c7 = arith.constant 7 : index
    %c0_57 = arith.constant 0 : index
    %c0_58 = arith.constant 0 : index
    %45 = vector.load %arg3[%c0_56, %c7, %c0_57, %c0_58] : memref<1x8x9x256xf32, #tpu.memory_space<vmem>>, vector<1x1x9x256xf32>
    %46 = vector.shape_cast %45 : vector<1x1x9x256xf32> to vector<9x256xf32>
    %47 = arith.mulf %44, %46 : vector<9x256xf32>
    %48 = arith.addf %42, %47 : vector<9x256xf32>
    %c0_59 = arith.constant 0 : index
    %c0_60 = arith.constant 0 : index
    %c9 = arith.constant 9 : index
    %49 = vector.load %arg5[%c0_59, %c0_60, %c9] : memref<1x2x18xf32, #tpu.memory_space<vmem>>, vector<1x2x9xf32>
    %50 = vector.shape_cast %49 : vector<1x2x9xf32> to vector<2x9xf32>
    %cst_61 = arith.constant dense<0.000000e+00> : vector<2x256xf32>
    %51 = tpu.matmul %50, %48, %cst_61 {dimension_numbers = #tpu.dot_dimension_numbers<[1], [0], [0], [1], [0, 0, 1, 1], [], []>} : vector<2x9xf32>, vector<9x256xf32>, vector<2x256xf32> -> vector<2x256xf32>
    %52 = arith.addf %25, %51 : vector<2x256xf32>
    %c0_62 = arith.constant 0 : index
    %c0_63 = arith.constant 0 : index
    %c0_64 = arith.constant 0 : index
    %53 = vector.load %arg6[%c0_62, %c0_63, %c0_64] : memref<1x2x256xf32, #tpu.memory_space<vmem>>, vector<1x2x256xf32>
    %54 = vector.shape_cast %53 : vector<1x2x256xf32> to vector<2x256xf32>
    %55 = vector.shape_cast %52 : vector<2x256xf32> to vector<1x2x256xf32>
    tpu.vector_store %arg6[%c0_62, %c0_63, %c0_64], %55 {strides = array<i32>} : memref<1x2x256xf32, #tpu.memory_space<vmem>>, vector<1x2x256xf32>,
    return
  }
  func.func @transform_0(%arg0: i32, %arg1: i32, %arg2: i32) -> (i32, i32, i32, i32) {
    %c2_i32 = arith.constant 2 : i32
    %0 = arith.muli %arg0, %c2_i32 : i32
    %1 = arith.addi %0, %arg1 : i32
    %c0_i32 = arith.constant 0 : i32
    %c0_i32_0 = arith.constant 0 : i32
    %c0_i32_1 = arith.constant 0 : i32
    return %1, %c0_i32, %c0_i32_0, %arg2 : i32, i32, i32, i32
  }
  func.func @transform_1(%arg0: i32, %arg1: i32, %arg2: i32) -> (i32, i32, i32, i32) {
    %c0_i32 = arith.constant 0 : i32
    %c0_i32_0 = arith.constant 0 : i32
    %c0_i32_1 = arith.constant 0 : i32
    return %arg0, %c0_i32, %c0_i32_0, %arg2 : i32, i32, i32, i32
  }
  func.func @transform_2(%arg0: i32, %arg1: i32, %arg2: i32) -> (i32, i32, i32) {
    %c0_i32 = arith.constant 0 : i32
    %c0_i32_0 = arith.constant 0 : i32
    %c0_i32_1 = arith.constant 0 : i32
    return %arg1, %c0_i32, %c0_i32_0 : i32, i32, i32
  }
  func.func @transform_3(%arg0: i32, %arg1: i32, %arg2: i32) -> (i32, i32, i32) {
    %c2_i32 = arith.constant 2 : i32
    %0 = arith.muli %arg0, %c2_i32 : i32
    %1 = arith.addi %0, %arg1 : i32
    %c0_i32 = arith.constant 0 : i32
    %c0_i32_0 = arith.constant 0 : i32
    return %1, %c0_i32, %arg2 : i32, i32, i32
  }
}

</mosaic_0001>

<bundles_post_ra>
// kernel: _lambda_.2
= control target key start
LH: loop header
LB: loop body
LE: loop exit
PB: predicated region body
PF: predicated region fallthrough
CT: control target
= control target key end

     0   :  { %10 = vsyncpa [#allocation4], 0  ;;  %s5568_s0 = inlined_call_operand.hbm [shape: f32[2,4,16,16], index: 0, kind: input, shape index: {}]   ;;  %s5569_s1 = inlined_call_operand.hbm [shape: f32[4,18], index: 1, kind: input, shape index: {}]   ;;  %s5570_s2 = inlined_call_operand.hbm [shape: f32[18], index: 2, kind: input, shape index: {}]   ;;  %s5571_s3 = inlined_call_operand.vmem [shape: f32[18,9], index: 3, kind: input, shape index: {}]   ;;  %s5572_s4 = inlined_call_operand.hbm [shape: f32[18], index: 4, kind: input, shape index: {}]   ;;  %s5573_s5 = inlined_call_operand.vmem [shape: f32[2,18,16,16], index: 5, kind: output, shape index: {}]  }
   0x1   :  { %12 = vsyncpa [#allocation4 + $0x1], 0 }
   0x2   :  { %13 = vsyncpa [#allocation5], 0 }
   0x3   :  { %14 = vsyncpa [#allocation9], 0 }
   0x4   :  { %15 = vsyncpa [#allocation6], 0  ;;  %s3943_s18 = smov 0   ;;  %s3945_s19 = smov 0  }
   0x5   :  { %s3947_s20 = smov 0   ;;  %s3949_s21 = smov 0  }
   0x6 LB: > { %s3962_s22 = sadd.s32 4294967295, %s3901_s21   ;;  %p41_p0 = scmp.ne.s32.totalorder %s3893_s19, %s3889_s18  ;;  %s3901_s21 = sphi %s3949_s21, %s5581_s21   ;;  %s3897_s20 = sphi %s3947_s20, %s5580_s20   ;;  %s3893_s19 = sphi %s3945_s19, %s5579_s19   ;;  %s3889_s18 = sphi %s3943_s18, %s5578_s18  }
   0x7   : > { %p42_p1 = scmp.eq.s32.totalorder %s3962_s22, 0  ;;  %p3247_p2 = scmp.ge.s32.totalorder %s3901_s21, 1 }
   0x8   : > { %p162_p3 = scmp.lt.s32.totalorder %s3901_s21, 3  ;;  %s184_s26 = sshll.u32 %s5570_s2, 4  ;;  %s185_s26 = int_to_ptr.hbm [resolvable:$true] %s184_s26 }
   0x9   : > { %p3970_p4 = por %p42_p1, %p41_p0  ;;  %s174_s30 = sshll.u32 %s5569_s1, 4  ;;  %s175_s30 = int_to_ptr.hbm [resolvable:$true] %s174_s30 }
   0xa   : > { %p3977_p5 = pnand %p3247_p2, %p162_p3  ;;  %s193_s9 = sshll.u32 %s5571_s3, 4  ;;  %s194_s9 = int_to_ptr.vmem [resolvable:$true] %s193_s9 }
   0xb   : > { %s3903_s10 = smov [#allocation8]   ;;  %s3904_s11 = smov [#allocation7]  }
   0xc   : > { %p3693_p6 = pneg %p3977_p5  ;;  %s206_s14 = sshll.u32 %s5572_s4, 4  ;;  %s207_s14 = int_to_ptr.hbm [resolvable:$true] %s206_s14 }
   0xd   : > { %s3905_s15 = smov [#allocation10]   ;;  %s3906_s16 = smov 128  }
   0xe   : > { %p3988_p7 = pnand %p3693_p6, %p42_p1  ;;  %s3907_s17 = smov 8  }
   0xf   : > { %s3908_s18 = smov [#allocation11]   ;;  %s4010_s24 = sadd.s32 1, %s3901_s21  }
  0x10   : > { %3699 = dma.hbm_to_smem (!%p3988_p7), %s185_s26, 16, %s3903_s10, [#allocation9]  }
  0x11   : > { %3696 = dma.hbm_to_smem (!%p3988_p7), %s175_s30, 64, %s3904_s11, [#allocation5]  }
  0x12   : > { %3702 = dma.vmem_to_smem (!%p3988_p7), %s194_s9, 384, %s3905_s15, [#allocation6], %s3906_s16, %s3906_s16, %s3907_s17  }
  0x13   : > { %3705 = dma.hbm_to_smem (!%p3988_p7), %s207_s14, 16, %s3908_s18, [#allocation9]  }
  0x14   : > { %s25_s25 = ssub.s32 %s3901_s21, %s4010_s24  ;;  %s28_s26 = sadd.s32 1, %s3897_s20 }
  0x15   : > { %p26_p8 = scmp.eq.s32.totalorder %s25_s25, 0  ;;  %p35_p9 = scmp.ne.s32.totalorder %s3897_s20, %s3893_s19 }
  0x16   : > { %p36_p10 = scmp.eq.s32.totalorder %s3901_s21, 0  ;;  %s217_s29 = sand.u32 1, %s3897_s20  }
  0x17   : > { %s4019_s28 = scalar_select %p26_p8, %s3897_s20, %s28_s26  }
  0x18   : > { %p37_p11 = por %p36_p10, %p35_p9  ;;  %s3673_s30 = sshll.u32 %s3901_s21, 6 }
  0x19   : > { %p3714_p12 = scmp.lt.s32.totalorder %s3901_s21, 2  ;;  %s3253_s7 = sshll.u32 %s217_s29, 6 }
  0x1a   : > { %s226_s6 = scalar_lea.hbm %s5568_s0, %s3673_s30  ;;  %s221_s11 = scalar_lea.vmem [#allocation3], %s3253_s7 }
  0x1b   : > { %s227_s10 = sshll.u32 %s226_s6, 4  ;;  %s229_s12 = sshll.u32 %s221_s11, 4  ;;  %s228_s10 = int_to_ptr.hbm [resolvable:$true] %s227_s10  ;;  %s230_s12 = int_to_ptr.vmem [resolvable:$true] %s229_s12 }
  0x1c   : > { %p4027_p13 = pnand %p3714_p12, %p37_p11  ;;  %s218_s14 = scalar_lea.sflag [#allocation4], %s217_s29 }
  0x1d   : > { %s3821_s15 = sshra.s32 %s228_s10, 4  ;;  %s3828_s26 = scalar_lea.hbm %s5568_s0, 128  ;;  %s3822_s15 = int_to_ptr.hbm [resolvable:$true] %s3821_s15 }
  0x1e   : > { %s3823_s18 = scalar_lea.hbm %s3822_s15, 64  ;;  %p3825_p2 = pneg %p4027_p13 }
  0x1f   : > { %p3824_p0 = scmp.ne.s32.totalorder %s3822_s15, %s3823_s18  ;;  %p3829_p7 = scmp.lt.s32.totalorder %s3822_s15, %s5568_s0 }
  0x20   : > { %p3830_p8 = scmp.lt.s32.totalorder %s3828_s26, %s3823_s18 }
  0x21   : > { %p3826_p3 = pnand %p3825_p2, %p3824_p0 }
  0x22   : > { %p3831_p9 = por %p3830_p8, %p3829_p7 }
  0x23   : > { %p3827_p6 = pneg %p3826_p3 }
  0x25   : > { %p3832_p10 = pnand %p3831_p9, %p3827_p6 }
  0x27   : > { %3835 = shalt.err (!%p3832_p10)
}
  0x28   : > { %3709 = dma.hbm_to_vmem [thread:$0]  (!%p4027_p13), %s228_s10, 1024, %s230_s12, %s218_s14, %s3906_s16, %s3906_s16, %s3907_s17  }
  0x29   : > { %241 = sbr.rel (%p3977_p5) target bundleno = 2331 (0x91b), region = 40  ;;  %s243_s29 = sand.u32 (!%p3977_p5), 1, %s3893_s19  }
  0x2a   : > { %s3257_s8 = sshll.u32 (!%p3977_p5), %s243_s29, 6  ;;  %s244_s9 = scalar_lea.sflag (!%p3977_p5), [#allocation4], %s243_s29 }
  0x2b   : > { %s4047_s6 = scalar_lea.vmem (!%p3977_p5), [#allocation3], %s3257_s8 }
  0x2e   : > { %3868 = dma.done.wait (%p3970_p4), %s244_s9, 1024  }
  0x2f   : > { %3870 = vsyncadd (%p3970_p4), %s244_s9, 4294966272 }
  0x30   : > { %3872 = dma.done.wait (%p42_p1), [#allocation5], 64  }
  0x31   : > { %3874 = vsyncadd (%p42_p1), [#allocation5], 4294967232 }
  0x32   : > { %3876 = dma.done.wait (%p42_p1), [#allocation9], 16  }
  0x33   : > { %3878 = vsyncadd (%p42_p1), [#allocation9], 4294967280 }
  0x34   : > { %3880 = dma.done.wait (%p42_p1), [#allocation6], 384  }
  0x35   : > { %3882 = vsyncadd (%p42_p1), [#allocation6], 4294966912 }
  0x36   : > { %3884 = dma.done.wait (%p42_p1), [#allocation9], 16  }
  0x37   : > { %3886 = vsyncadd (%p42_p1), [#allocation9], 4294967280 }
  0x38   : > { %273 = sfence }
  0x39   : > { %s308_s23 = sld [smem:[#allocation7]]  ;;  %v4070_v0 = vld [vmem:[%s4047_s6] sm:$0xff]  ;;  %v4073_v1 = vld [vmem:[%s4047_s6 + $0x8] sm:$0xff]  ;;  %v4078_v2 = vld [vmem:[%s4047_s6 + $0x10] sm:$0xff]  ;;  %s3909_s9 = smov 1   ;;  %vm301_vm0 = vcmask 146432  }
  0x3a   : > { %s3265_s27 = sld [smem:[#allocation7 + $0x80]]  ;;  %v4081_v3 = vld [vmem:[%s4047_s6 + $0x18] sm:$0xff]  ;;  %v4086_v5 = vld [vmem:[%s4047_s6 + $0x20] sm:$0xff]  ;;  %v4089_v6 = vld [vmem:[%s4047_s6 + $0x28] sm:$0xff]  ;;  %vm304_vm1 = vcmask 140288   ;;  %vm351_vm2 = vcmask 138248  }
  0x3b   : > { %s3268_s16 = sld [smem:[#allocation7 + $0x100]]  ;;  %v4096_v10 = vld [vmem:[%s4047_s6 + $0x30] sm:$0xff]  ;;  %v4103_v14 = vld [vmem:[%s4047_s6 + $0x38] sm:$0xff]  ;;  %p296_p1 = scmp.lt.s32.totalorder %s3962_s22, 1  ;;  %vm464_vm3 = vcmask 130048  }
  0x3c   : > { %s3271_s17 = sld [smem:[#allocation7 + $0x180]] }
  0x3d   : > { %s4075_s10 = sld [smem:[#allocation8]]  ;;  %s5583_s22 = smov (!%p296_p1, %s3962_s22), 1 }
  0x3e   : > { %s4083_s11 = sld [smem:[#allocation7 + $0x1]] }
  0x3f   : > { %v309_v4 = vstv %s308_s23  ;;  %s4091_s12 = sld [smem:[#allocation7 + $0x81]] }
  0x40   : > { %v310_v7 = vmul.f32 %v309_v4, %v4070_v0  ;;  %v311_v8 = vmul.f32 %v309_v4, %v4073_v1  ;;  %v316_v9 = vstv %s3265_s27  ;;  %s4098_s13 = sld [smem:[#allocation7 + $0x101]] }
  0x41   : > { %v317_v11 = vmul.f32 %v4078_v2, %v316_v9  ;;  %v318_v12 = vmul.f32 %v4081_v3, %v316_v9  ;;  %v325_v13 = vstv %s3268_s16  ;;  %s4105_s14 = sld [smem:[#allocation7 + $0x181]] }
  0x42   : > { %v326_v15 = vmul.f32 %v4086_v5, %v325_v13  ;;  %v327_v16 = vmul.f32 %v4089_v6, %v325_v13  ;;  %v334_v17 = vstv %s3271_s17  ;;  %s4109_s15 = sld [smem:[#allocation8 + $0x1]] }
  0x43   : > { %v319_v18 = vadd.f32 %v317_v11, %v310_v7  ;;  %v320_v19 = vadd.f32 %v318_v12, %v311_v8  ;;  %v335_v20 = vmul.f32 %v4096_v10, %v334_v17  ;;  %s4112_s18 = sld [smem:[#allocation7 + $0x2]]  ;;  %v336_v21 = vmul.f32 %v4103_v14, %v334_v17 }
  0x44   : > { %v340_v22 = vstv %s4075_s10  ;;  %v470_v23 = vstv %s4083_s11  ;;  %s4117_s21 = sld [smem:[#allocation7 + $0x82]] }
  0x45   : > { %v328_v24 = vadd.f32 %v326_v15, %v319_v18  ;;  %v329_v25 = vadd.f32 %v327_v16, %v320_v19  ;;  %v472_v26 = vmul.f32 %v470_v23, %v4073_v1  ;;  %v476_v27 = vstv %s4091_s12  ;;  %s4121_s25 = sld [smem:[#allocation7 + $0x102]] }
  0x46   : > { %v478_v28 = vmul.f32 %v4081_v3, %v476_v27  ;;  %v484_v29 = vstv %s4098_s13  ;;  %v471_v30 = vmul.f32 %v470_v23, %v4070_v0  ;;  %v477_v31 = vmul.f32 %v4078_v2, %v476_v27  ;;  %s4127_s26 = sld [smem:[#allocation7 + $0x182]] }
  0x47   : > { %v337_v32 = vadd.f32 %v335_v20, %v328_v24  ;;  %v492_v33 = vstv %s4105_s14  ;;  %s4130_s30 = sld [smem:[#allocation8 + $0x2]]  ;;  %v338_v34 = vadd.f32 %v336_v21, %v329_v25  ;;  %v486_v35 = vmul.f32 %v4089_v6, %v484_v29 }
  0x48   : > { %v479_v36 = vadd.f32 %v477_v31, %v471_v30  ;;  %s4133_s7 = sld [smem:[#allocation7 + $0x3]]  ;;  %v480_v38 = vadd.f32 %v478_v28, %v472_v26  ;;  %v485_v39 = vmul.f32 %v4086_v5, %v484_v29  ;;  %v493_v40 = vmul.f32 %v4096_v10, %v492_v33 }
  0x49   : > { %v341_v37 = vadd.f32 %v340_v22, %v337_v32  ;;  %s4137_s29 = sld [smem:[#allocation7 + $0x83]]  ;;  %v494_v41 = vmul.f32 %v4103_v14, %v492_v33  ;;  %v498_v42 = vstv %s4109_s15  ;;  %v627_v43 = vstv %s4112_s18 }
  0x4a   : > { %v633_v44 = vstv %s4117_s21  ;;  %s4143_s8 = sld [smem:[#allocation7 + $0x103]]  ;;  %v487_v45 = vadd.f32 %v485_v39, %v479_v36  ;;  %v628_v46 = vmul.f32 %v627_v43, %v4070_v0  ;;  %v629_v47 = vmul.f32 %v627_v43, %v4073_v1  ;;  %s3911_s21 = smov 127  }
  0x4b   : > { %345 = vrot.lane.b32.xlu0 %v341_v37, %s3909_s9  ;;  %v634_v48 = vmul.f32 %v4078_v2, %v633_v44  ;;  %s4149_s23 = sld [smem:[#allocation7 + $0x183]]  ;;  %v342_v49 = vadd.f32 %v340_v22, %v338_v34  ;;  %v635_v50 = vmul.f32 %v4081_v3, %v633_v44  ;;  %v641_v51 = vstv %s4121_s25  ;;  %s3912_s25 = smov 126  }
  0x4c   : > { %v649_v52 = vstv %s4127_s26  ;;  %v495_v53 = vadd.f32 %v493_v40, %v487_v45  ;;  %v642_v55 = vmul.f32 %v4086_v5, %v641_v51  ;;  %v643_v56 = vmul.f32 %v4089_v6, %v641_v51  ;;  %s4158_s27 = sld [smem:[#allocation8 + $0x3]] }
  0x4d   : > { %v636_v54 = vadd.f32 %v634_v48, %v628_v46  ;;  %v488_v57 = vadd.f32 %v486_v35, %v480_v38  ;;  %v637_v58 = vadd.f32 %v635_v50, %v629_v47  ;;  %v650_v59 = vmul.f32 %v4096_v10, %v649_v52  ;;  %s3349_s16 = sld [smem:[#allocation7 + $0x4]] }
  0x4e   : > { %v651_v60 = vmul.f32 %v4103_v14, %v649_v52  ;;  %v499_v61 = vadd.f32 %v498_v42, %v495_v53  ;;  %v655_v63 = vstv %s4130_s30  ;;  %v784_v4 = vstv %s4133_s7  ;;  %s3352_s17 = sld [smem:[#allocation7 + $0x84]] }
  0x4f   : > { %v644_v62 = vadd.f32 %v642_v55, %v636_v54  ;;  %v645_v7 = vadd.f32 %v643_v56, %v637_v58  ;;  %v786_v8 = vmul.f32 %v784_v4, %v4073_v1  ;;  %v790_v9 = vstv %s4137_s29  ;;  %s3355_s10 = sld [smem:[#allocation7 + $0x104]] }
  0x50   : > { %v798_v11 = vstv %s4143_s8  ;;  %503 = vrot.lane.b32.xlu2 %v499_v61, %s3909_s9  ;;  %v792_v13 = vmul.f32 %v4081_v3, %v790_v9  ;;  %v496_v17 = vadd.f32 %v494_v41, %v488_v57  ;;  %v785_v20 = vmul.f32 %v784_v4, %v4070_v0  ;;  %s3358_s11 = sld [smem:[#allocation7 + $0x184]] }
  0x51   : > { %v652_v12 = vadd.f32 %v650_v59, %v644_v62  ;;  %v800_v15 = vmul.f32 %v4089_v6, %v798_v11  ;;  %v806_v16 = vstv %s4149_s23  ;;  %v653_v18 = vadd.f32 %v651_v60, %v645_v7  ;;  %s3359_s12 = sld [smem:[#allocation8 + $0x4]] }
  0x52   : > { %v808_v19 = vmul.f32 %v4103_v14, %v806_v16  ;;  %v794_v22 = vadd.f32 %v792_v13, %v786_v8  ;;  %v791_v23 = vmul.f32 %v4078_v2, %v790_v9  ;;  %v799_v24 = vmul.f32 %v4086_v5, %v798_v11  ;;  %s4191_s13 = sld [smem:[#allocation10 + $0x4]] }
  0x53   : > { %347 = vrot.lane.b32.xlu0 %v342_v49, %s3909_s9  ;;  %v656_v21 = vadd.f32 %v655_v63, %v652_v12  ;;  %v657_v25 = vadd.f32 %v655_v63, %v653_v18  ;;  %v812_v28 = vstv %s4158_s27  ;;  %v500_v29 = vadd.f32 %v498_v42, %v496_v17  ;;  %s3273_s14 = sld [smem:[#allocation10 + $0x2]] }
  0x54   : > { %v802_v26 = vadd.f32 %v800_v15, %v794_v22  ;;  %v793_v27 = vadd.f32 %v791_v23, %v785_v20  ;;  %v807_v32 = vmul.f32 %v4096_v10, %v806_v16  ;;  %v941_v36 = vstv %s3349_s16  ;;  %s3272_s15 = sld [smem:[#allocation10 + $0x1]] }
  0x55   : > { %660 = vrot.lane.b32.xlu1 %v656_v21, %s3909_s9  ;;  %v947_v37 = vstv %s3352_s17  ;;  %v942_v38 = vmul.f32 %v941_v36, %v4070_v0  ;;  %v943_v40 = vmul.f32 %v941_v36, %v4073_v1  ;;  %v955_v42 = vstv %s3355_s10  ;;  %s3276_s18 = sld [smem:[#allocation10 + $0x5]] }
  0x56   : > { %v810_v30 = vadd.f32 %v808_v19, %v802_v26  ;;  %v801_v31 = vadd.f32 %v799_v24, %v793_v27  ;;  %v948_v39 = vmul.f32 %v4078_v2, %v947_v37  ;;  %v949_v41 = vmul.f32 %v4081_v3, %v947_v37  ;;  %s4206_s26 = sld [smem:[#allocation10 + $0x8]] }
  0x57   : > { %v956_v44 = vmul.f32 %v4086_v5, %v955_v42  ;;  %v957_v46 = vmul.f32 %v4089_v6, %v955_v42  ;;  %v963_v47 = vstv %s3358_s11  ;;  %v3910_v1 = vmov 0.0   ;;  %s4224_s30 = sld [smem:[#allocation10 + $0x82]] }
  0x58   : > { %v814_v33 = vadd.f32 %v812_v28, %v810_v30  ;;  %662 = vrot.lane.b32.xlu2 %v657_v25, %s3909_s9  ;;  %v809_v34 = vadd.f32 %v807_v32, %v801_v31  ;;  %v950_v43 = vadd.f32 %v948_v39, %v942_v38  ;;  %v951_v45 = vadd.f32 %v949_v41, %v943_v40  ;;  %s3278_s7 = sld [smem:[#allocation10 + $0x7]] }
  0x59   : > { %v964_v49 = vmul.f32 %v4096_v10, %v963_v47  ;;  %v965_v51 = vmul.f32 %v4103_v14, %v963_v47  ;;  %302 = vst.msk [vmem:[#allocation2] sm:$0xff] %vm301_vm0, %v3910_v1  ;;  %v969_v3 = vstv %s3359_s12  ;;  %v397_v14 = vstv %s4191_s13  ;;  %s3292_s29 = sld [smem:[#allocation10 + $0x81]] }
  0x5a   : > { %v813_v35 = vadd.f32 %v812_v28, %v809_v34  ;;  %v958_v48 = vadd.f32 %v956_v44, %v950_v43  ;;  %v959_v50 = vadd.f32 %v957_v46, %v951_v45  ;;  %303 = vst.msk [vmem:[#allocation2 + $0x8] sm:$0xff] %vm301_vm0, %v3910_v1  ;;  %v375_v56 = vstv %s3273_s14  ;;  %s3295_s8 = sld [smem:[#allocation10 + $0x84]] }
  0x5b   : > { %505 = vrot.lane.b32.xlu0 %v500_v29, %s3909_s9  ;;  %305 = vst.msk [vmem:[#allocation2 + $0x10] sm:$0x3] %vm304_vm1, %v3910_v1  ;;  %v361_v57 = vstv %s3272_s15  ;;  %v411_v13 = vstv %s3276_s18  ;;  %s4254_s23 = sld [smem:[#allocation10 + $0x87]] }
  0x5c   : > { %v966_v52 = vadd.f32 %v964_v49, %v958_v48  ;;  %v967_v53 = vadd.f32 %v965_v51, %v959_v50  ;;  %v447_v18 = vstv %s4206_s26  ;;  %s4263_s27 = sld [smem:[#allocation10 + $0x85]] }
  0x5d   : > { %819 = vrot.lane.b32.xlu1 %v814_v33, %s3909_s9  ;;  %v532_v30 = vstv %s4224_s30  ;;  %s3299_s16 = sld [smem:[#allocation10 + $0x88]] }
  0x5e   : > { %v970_v54 = vadd.f32 %v969_v3, %v966_v52  ;;  %v971_v55 = vadd.f32 %v969_v3, %v967_v53  ;;  %v433_v31 = vstv %s3278_s7  ;;  %s4281_s17 = sld [smem:[#allocation10 + $0x101]] }
  0x5f   : > { %s3316_s10 = sld [smem:[#allocation10 + $0x102]] }
  0x60   : > { %974 = vrot.lane.b32.xlu2 %v970_v54, %s3909_s9  ;;  %v554_v36 = vstv %s3295_s8  ;;  %s4301_s11 = sld [smem:[#allocation10 + $0x104]] }
  0x61   : > { %v590_v40 = vstv %s4254_s23  ;;  %s4305_s12 = sld [smem:[#allocation10 + $0x105]] }
  0x62   : > { %v568_v52 = vstv %s4263_s27  ;;  %s3321_s13 = sld [smem:[#allocation10 + $0x107]] }
  0x63   : > { %817 = vrot.lane.b32.xlu0 %v813_v35, %s3909_s9  ;;  %v518_v35 = vstv %s3292_s29  ;;  %v604_v53 = vstv %s3299_s16  ;;  %s3338_s14 = sld [smem:[#allocation10 + $0x181]] }
  0x64   : > { %s3322_s15 = sld [smem:[#allocation10 + $0x108]] }
  0x65   : > { %s4339_s18 = sld [smem:[#allocation10 + $0x184]] }
  0x66   : > { %s3339_s26 = sld [smem:[#allocation10 + $0x182]] }
  0x67   : > { %s3342_s30 = sld [smem:[#allocation10 + $0x185]] }
  0x68   : > { %s4355_s7 = sld [smem:[#allocation10 + $0x188]] }
  0x69   : > { %s4362_s29 = sld [smem:[#allocation10]] }
  0x6a   : > { %s4366_s8 = sld [smem:[#allocation10 + $0x202]] }
  0x6b   : > { %976 = vrot.lane.b32.xlu0 %v971_v55, %s3909_s9  ;;  %v675_v55 = vstv %s4281_s17  ;;  %s3344_s23 = sld [smem:[#allocation10 + $0x187]] }
  0x6c   : > { %s4376_s27 = sld [smem:[#allocation10 + $0x3]] }
  0x6d   : > { %s4383_s16 = sld [smem:[#allocation10 + $0x201]] }
  0x6e   : > { %s4386_s17 = sld [smem:[#allocation10 + $0x204]] }
  0xaa   : > { %v504_v4 = vpop.permute.xlu2 %503 }
  0xb2   : > { %v663_v29 = vpop.permute.xlu2 %662 }
  0xbd   : > { %v346_v6 = vpop.permute.xlu0 %345 }
  0xbe   : > { %352 = vst.msk [vmem:[#allocation2 + $0x1] sm:$0xff] %vm351_vm2, %v346_v6 }
  0xc5   : > { %v4195_v58 = vld [vmem:[#allocation2] sm:$0xff]  ;;  %v348_v59 = vpop.permute.xlu0 %347 }
  0xc6   : > { %v4197_v60 = vld [vmem:[#allocation2 + $0x1] sm:$0xff]  ;;  %353 = vst.msk [vmem:[#allocation2 + $0x9] sm:$0xff] %vm351_vm2, %v348_v59  ;;  %v376_v62 = vmul.f32 %v375_v56, %v4195_v58  ;;  %v362_v63 = vmul.f32 %v361_v57, %v4195_v58 }
  0xc7   : > { %v398_v61 = vmul.f32 %v397_v14, %v4197_v60  ;;  %v661_v19 = vpop.permute.xlu1 %660  ;;  %v412_v21 = vmul.f32 %v411_v13, %v4197_v60 }
  0xc8   : > { %380 = vrot.lane.b32.xlu2 %v376_v62, %s3912_s25  ;;  %366 = vrot.lane.b32.xlu1 %v362_v63, %s3911_s21  ;;  %v975_v63 = vpop.permute.xlu2 %974 }
  0xc9   : > { %402 = vrot.lane.b32.xlu0 %v398_v61, %s3911_s21 }
  0xcd   : > { %v4208_v7 = vld [vmem:[#allocation2 + $0x8] sm:$0xff]  ;;  %v506_v9 = vpop.permute.xlu0 %505 }
  0xce   : > { %v4210_v8 = vld [vmem:[#allocation2 + $0x2] sm:$0xff]  ;;  %v4212_v11 = vld [vmem:[#allocation2 + $0xa] sm:$0xff]  ;;  %v377_v15 = vmul.f32 %v375_v56, %v4208_v7  ;;  %v363_v16 = vmul.f32 %v361_v57, %v4208_v7  ;;  %v689_v57 = vstv %s3316_s10  ;;  %s4407_s10 = sld [smem:[#allocation10 + $0x207]] }
  0xcf   : > { %v4214_v12 = vld [vmem:[#allocation2 + $0x9] sm:$0xff]  ;;  %509 = vst.msk [vmem:[#allocation2 + $0x1] sm:$0xff] %vm351_vm2, %v504_v4  ;;  %v448_v25 = vmul.f32 %v447_v18, %v4210_v8  ;;  %v435_v33 = vmul.f32 %v433_v31, %v4212_v11  ;;  %v434_v34 = vmul.f32 %v433_v31, %v4210_v8  ;;  %v449_v39 = vmul.f32 %v447_v18, %v4212_v11  ;;  %v820_v48 = vpop.permute.xlu1 %819 }
  0xd0   : > { %v413_v17 = vmul.f32 %v411_v13, %v4214_v12  ;;  %510 = vst.msk [vmem:[#allocation2 + $0x9] sm:$0xff] %vm351_vm2, %v506_v9  ;;  %382 = vrot.lane.b32.xlu2 %v377_v15, %s3912_s25  ;;  %368 = vrot.lane.b32.xlu1 %v363_v16, %s3911_s21  ;;  %v399_v26 = vmul.f32 %v397_v14, %v4214_v12  ;;  %v711_v16 = vstv %s4301_s11  ;;  %s4410_s11 = sld [smem:[#allocation10 + $0x6]] }
  0xd2   : > { %418 = vrot.lane.b32.xlu0 %v413_v17, %s3912_s25  ;;  %v725_v17 = vstv %s4305_s12  ;;  %s4422_s12 = sld [smem:[#allocation10 + $0x205]] }
  0xd5   : > { %v818_v49 = vpop.permute.xlu0 %817 }
  0xd6   : > { %v4227_v20 = vld [vmem:[#allocation2] sm:$0xff] }
  0xd7   : > { %v4230_v22 = vld [vmem:[#allocation2 + $0x8] sm:$0xff]  ;;  %v533_v32 = vmul.f32 %v532_v30, %v4227_v20  ;;  %v519_v43 = vmul.f32 %v518_v35, %v4227_v20 }
  0xd8   : > { %v4232_v23 = vld [vmem:[#allocation2 + $0x2] sm:$0xff]  ;;  %416 = vrot.lane.b32.xlu2 %v412_v21, %s3912_s25  ;;  %404 = vrot.lane.b32.xlu1 %v399_v26, %s3911_s21  ;;  %v4242_v27 = vld [vmem:[#allocation2 + $0xa] sm:$0xff]  ;;  %v520_v37 = vmul.f32 %v518_v35, %v4230_v22  ;;  %v534_v54 = vmul.f32 %v532_v30, %v4230_v22  ;;  %v747_v30 = vstv %s3321_s13  ;;  %v761_v35 = vstv %s3322_s15  ;;  %s4428_s13 = sld [smem:[#allocation10 + $0x208]] }
  0xd9   : > { %v4234_v24 = vld [vmem:[#allocation2 + $0x1] sm:$0xff]  ;;  %v4244_v28 = vld [vmem:[#allocation2 + $0x9] sm:$0xff]  ;;  %v591_v42 = vmul.f32 %v590_v40, %v4232_v23  ;;  %v606_v3 = vmul.f32 %v604_v53, %v4242_v27  ;;  %v605_v14 = vmul.f32 %v604_v53, %v4232_v23  ;;  %v592_v15 = vmul.f32 %v590_v40, %v4242_v27  ;;  %s4444_s15 = sld [smem:[#allocation7 + $0x5]] }
  0xda   : > { %666 = vst.msk [vmem:[#allocation2 + $0x1] sm:$0xff] %vm351_vm2, %v661_v19  ;;  %452 = vrot.lane.b32.xlu0 %v448_v25, %s3912_s25  ;;  %v556_v38 = vmul.f32 %v554_v36, %v4244_v28  ;;  %v555_v41 = vmul.f32 %v554_v36, %v4234_v24  ;;  %v570_v1 = vmul.f32 %v568_v52, %v4244_v28  ;;  %v868_v40 = vstv %s4339_s18  ;;  %s4450_s18 = sld [smem:[#allocation7 + $0x85]] }
  0xdb   : > { %667 = vst.msk [vmem:[#allocation2 + $0x9] sm:$0xff] %vm351_vm2, %v663_v29  ;;  %v569_v56 = vmul.f32 %v568_v52, %v4234_v24  ;;  %v882_v52 = vstv %s3342_s30  ;;  %s4460_s30 = sld [smem:[#allocation7 + $0x105]] }
  0xdd   : > { %v977_v29 = vpop.permute.xlu0 %976 }
  0xe0   : > { %440 = vrot.lane.b32.xlu2 %v435_v33, %s3911_s21  ;;  %438 = vrot.lane.b32.xlu1 %v434_v34, %s3911_s21  ;;  %v832_v34 = vstv %s3338_s14  ;;  %s4431_s14 = sld [smem:[#allocation11]] }
  0xe1   : > { %v4279_v50 = vld [vmem:[#allocation2] sm:$0xff] }
  0xe2   : > { %537 = vrot.lane.b32.xlu0 %v533_v32, %s3912_s25  ;;  %v4269_v44 = vld [vmem:[#allocation2 + $0x8] sm:$0xff]  ;;  %v676_v6 = vmul.f32 %v675_v55, %v4279_v50  ;;  %v690_v9 = vmul.f32 %v689_v57, %v4279_v50 }
  0xe3   : > { %v4273_v45 = vld [vmem:[#allocation2 + $0x2] sm:$0xff]  ;;  %v4275_v46 = vld [vmem:[#allocation2 + $0xa] sm:$0xff]  ;;  %v691_v13 = vmul.f32 %v689_v57, %v4269_v44  ;;  %v677_v21 = vmul.f32 %v675_v55, %v4269_v44  ;;  %v918_v55 = vstv %s4355_s7  ;;  %v357_v57 = vstv %s4362_s29  ;;  %s4462_s7 = sld [smem:[#allocation10 + $0x80]] }
  0xe4   : > { %v4277_v47 = vld [vmem:[#allocation2 + $0x9] sm:$0xff]  ;;  %v4283_v51 = vld [vmem:[#allocation2 + $0x1] sm:$0xff]  ;;  %v748_v31 = vmul.f32 %v747_v30, %v4273_v45  ;;  %v749_v32 = vmul.f32 %v747_v30, %v4275_v46  ;;  %s3366_s29 = sld [smem:[#allocation10 + $0x206]] }
  0xe5   : > { %824 = vst.msk [vmem:[#allocation2 + $0x9] sm:$0xff] %vm351_vm2, %v820_v48  ;;  %v713_v18 = vmul.f32 %v711_v16, %v4277_v47  ;;  %v726_v19 = vmul.f32 %v725_v17, %v4283_v51  ;;  %v712_v33 = vmul.f32 %v711_v16, %v4283_v51  ;;  %v846_v48 = vstv %s3339_s26  ;;  %s3674_s26 = smul.u32 288, %s5583_s22  ;;  %s3363_s22 = sld [smem:[#allocation10 + $0x203]] }
  0xe6   : > { %823 = vst.msk [vmem:[#allocation2 + $0x1] sm:$0xff] %vm351_vm2, %v818_v49 }
  0xe8   : > { %525 = vrot.lane.b32.xlu2 %v520_v37, %s3911_s21  ;;  %454 = vrot.lane.b32.xlu1 %v449_v39, %s3912_s25  ;;  %v763_v37 = vmul.f32 %v761_v35, %v4275_v46 }
  0xea   : > { %561 = vrot.lane.b32.xlu0 %v556_v38, %s3911_s21  ;;  %v727_v38 = vmul.f32 %v725_v17, %v4277_v47  ;;  %v358_v17 = vmul.f32 %v357_v57, %v4195_v58 }
  0xec   : > { %v4328_v25 = vld [vmem:[#allocation2 + $0xa] sm:$0xff] }
  0xed   : > { %v4303_v59 = vld [vmem:[#allocation2] sm:$0xff]  ;;  %v4307_v61 = vld [vmem:[#allocation2 + $0x8] sm:$0xff] }
  0xee   : > { %v4309_v62 = vld [vmem:[#allocation2 + $0x2] sm:$0xff]  ;;  %v834_v36 = vmul.f32 %v832_v34, %v4307_v61  ;;  %v848_v53 = vmul.f32 %v846_v48, %v4307_v61 }
  0xef   : > { %v4311_v4 = vld [vmem:[#allocation2 + $0x1] sm:$0xff]  ;;  %v4330_v26 = vld [vmem:[#allocation2 + $0x9] sm:$0xff] }
  0xf0   : > { %559 = vrot.lane.b32.xlu2 %v555_v41, %s3911_s21  ;;  %523 = vrot.lane.b32.xlu1 %v519_v43, %s3911_s21  ;;  %980 = vst.msk [vmem:[#allocation2 + $0x1] sm:$0xff] %vm351_vm2, %v975_v63  ;;  %v833_v41 = vmul.f32 %v832_v34, %v4303_v59  ;;  %v762_v43 = vmul.f32 %v761_v35, %v4273_v45 }
  0xf1   : > { %981 = vst.msk [vmem:[#allocation2 + $0x9] sm:$0xff] %vm351_vm2, %v977_v29 }
  0xf2   : > { %595 = vrot.lane.b32.xlu0 %v591_v42, %s3911_s21  ;;  %v869_v42 = vmul.f32 %v868_v40, %v4311_v4 }
  0xf8   : > { %575 = vrot.lane.b32.xlu2 %v570_v1, %s3912_s25  ;;  %539 = vrot.lane.b32.xlu1 %v534_v54, %s3912_s25  ;;  %v884_v1 = vmul.f32 %v882_v52, %v4330_v26  ;;  %v4400_v34 = vld [vmem:[#allocation2 + $0x9] sm:$0xff] }
  0xfa   : > { %611 = vrot.lane.b32.xlu0 %v606_v3, %s3912_s25  ;;  %v847_v3 = vmul.f32 %v846_v48, %v4303_v59  ;;  %v920_v48 = vmul.f32 %v918_v55, %v4328_v25 }
 0x100   : > { %609 = vrot.lane.b32.xlu2 %v605_v14, %s3912_s25  ;;  %573 = vrot.lane.b32.xlu1 %v569_v56, %s3912_s25  ;;  %v883_v14 = vmul.f32 %v882_v52, %v4311_v4  ;;  %v919_v56 = vmul.f32 %v918_v55, %v4309_v62 }
 0x102   : > { %680 = vrot.lane.b32.xlu0 %v676_v6, %s3911_s21  ;;  %v870_v6 = vmul.f32 %v868_v40, %v4330_v26 }
 0x108   : > { %694 = vrot.lane.b32.xlu2 %v690_v9, %s3912_s25  ;;  %597 = vrot.lane.b32.xlu1 %v592_v15, %s3911_s21  ;;  %v1003_v15 = vstv %s4366_s8  ;;  %s4482_s8 = sld [smem:[#allocation7 + $0x185]] }
 0x10a   : > { %696 = vrot.lane.b32.xlu0 %v691_v13, %s3912_s25  ;;  %v4380_v13 = vld [vmem:[#allocation2] sm:$0xff] }
 0x110   : > { %718 = vrot.lane.b32.xlu2 %v713_v18, %s3911_s21  ;;  %682 = vrot.lane.b32.xlu1 %v677_v21, %s3911_s21  ;;  %v904_v18 = vstv %s3344_s23  ;;  %s4470_s23 = scalar_lea.vmem %s5573_s5, %s3674_s26  ;;  %s3343_s26 = sld [smem:[#allocation10 + $0x186]] }
 0x111   : > { %v906_v29 = vmul.f32 %v904_v18, %v4328_v25  ;;  %v905_v30 = vmul.f32 %v904_v18, %v4309_v62 }
 0x112   : > { %730 = vrot.lane.b32.xlu0 %v726_v19, %s3912_s25  ;;  %v1004_v19 = vmul.f32 %v1003_v15, %v4380_v13 }
 0x118   : > { %752 = vrot.lane.b32.xlu2 %v748_v31, %s3911_s21  ;;  %716 = vrot.lane.b32.xlu1 %v712_v33, %s3911_s21  ;;  %v391_v31 = vstv %s4376_s27  ;;  %v359_v33 = vmul.f32 %v357_v57, %v4208_v7  ;;  %v427_v57 = vstv %s4410_s11  ;;  %s4493_s27 = sld [smem:[#allocation8 + $0x5]] }
 0x119   : > { %v392_v40 = vmul.f32 %v391_v31, %v4197_v60  ;;  %s3314_s11 = sld [smem:[#allocation10 + $0x100]] }
 0x11a   : > { %754 = vrot.lane.b32.xlu0 %v749_v32, %s3911_s21 }
 0x120   : > { %768 = vrot.lane.b32.xlu2 %v763_v37, %s3912_s25  ;;  %732 = vrot.lane.b32.xlu1 %v727_v38, %s3912_s25  ;;  %v4402_v37 = vld [vmem:[#allocation2 + $0x8] sm:$0xff]  ;;  %v989_v38 = vstv %s4383_s16  ;;  %s4502_s16 = sld [smem:[#allocation10 + $0x83]] }
 0x121   : > { %v991_v7 = vmul.f32 %v989_v38, %v4402_v37  ;;  %v990_v18 = vmul.f32 %v989_v38, %v4380_v13 }
 0x122   : > { %839 = vrot.lane.b32.xlu0 %v834_v36, %s3911_s21  ;;  %v381_v39 = vpop.permute.xlu2 %380 }
 0x128   : > { %837 = vrot.lane.b32.xlu2 %v833_v41, %s3911_s21  ;;  %766 = vrot.lane.b32.xlu1 %v762_v43, %s3912_s25 }
 0x12a   : > { %873 = vrot.lane.b32.xlu0 %v869_v42, %s3911_s21  ;;  %v383_v49 = vpop.permute.xlu2 %382  ;;  %v1025_v42 = vstv %s4386_s17  ;;  %s3297_s17 = sld [smem:[#allocation10 + $0x86]] }
 0x12b   : > { %v1027_v43 = vmul.f32 %v1025_v42, %v4400_v34 }
 0x130   : > { %853 = vrot.lane.b32.xlu2 %v848_v53, %s3912_s25  ;;  %851 = vrot.lane.b32.xlu1 %v847_v3, %s3912_s25  ;;  %v393_v53 = vmul.f32 %v391_v31, %v4214_v12 }
 0x132   : > { %889 = vrot.lane.b32.xlu0 %v884_v1, %s3912_s25  ;;  %v4364_v54 = vpop.permute.xlu2 %416 }
 0x138   : > { %887 = vrot.lane.b32.xlu2 %v883_v14, %s3912_s25  ;;  %875 = vrot.lane.b32.xlu1 %v870_v6, %s3911_s21  ;;  %v4420_v14 = vld [vmem:[#allocation2 + $0x1] sm:$0xff] }
 0x13a   : > { %923 = vrot.lane.b32.xlu0 %v919_v56, %s3912_s25  ;;  %v4378_v9 = vpop.permute.xlu2 %440  ;;  %v367_v16 = vpop.permute.xlu1 %366  ;;  %v1061_v56 = vstv %s4407_s10  ;;  %s3300_s10 = sld [smem:[#allocation11 + $0x1]] }
 0x13b   : > { %v403_v63 = vpop.permute.xlu0 %402  ;;  %v372_v21 = vadd.f32 %v367_v16, %v358_v17 }
 0x13d   : > { %v386_v58 = vadd.f32 %v381_v39, %v372_v21 }
 0x13f   : > { %v394_v39 = vadd.f32 %v392_v40, %v386_v58  ;;  %v429_v40 = vmul.f32 %v427_v57, %v4212_v11 }
 0x140   : > { %911 = vrot.lane.b32.xlu2 %v906_v29, %s3911_s21  ;;  %909 = vrot.lane.b32.xlu1 %v905_v30, %s3911_s21  ;;  %v4448_v30 = vld [vmem:[#allocation2 + $0xa] sm:$0xff] }
 0x141   : > { %v408_v1 = vadd.f32 %v403_v63, %v394_v39  ;;  %v1026_v63 = vmul.f32 %v1025_v42, %v4420_v14  ;;  %v1005_v39 = vmul.f32 %v1003_v15, %v4402_v37 }
 0x142   : > { %1008 = vrot.lane.b32.xlu0 %v1004_v19, %s3912_s25  ;;  %v4397_v32 = vpop.permute.xlu2 %525  ;;  %v369_v36 = vpop.permute.xlu1 %368  ;;  %v428_v19 = vmul.f32 %v427_v57, %v4210_v8  ;;  %v1039_v8 = vstv %s4422_s12  ;;  %s3317_s12 = sld [smem:[#allocation10 + $0x103]] }
 0x143   : > { %v373_v41 = vadd.f32 %v369_v36, %v359_v33  ;;  %v422_v16 = vadd.f32 %v4364_v54, %v408_v1  ;;  %v1075_v36 = vstv %s4428_s13  ;;  %v1041_v38 = vmul.f32 %v1039_v8, %v4400_v34  ;;  %s3320_s13 = sld [smem:[#allocation10 + $0x106]] }
 0x144   : > { %v419_v35 = vpop.permute.xlu0 %418 }
 0x145   : > { %v387_v52 = vadd.f32 %v383_v49, %v373_v41  ;;  %v4425_v49 = vld [vmem:[#allocation2 + $0x2] sm:$0xff]  ;;  %v430_v29 = vadd.f32 %v428_v19, %v422_v16  ;;  %v461_v41 = vstv %s4431_s14  ;;  %v1040_v16 = vmul.f32 %v1039_v8, %v4420_v14  ;;  %s3323_s14 = sld [smem:[#allocation11 + $0x2]] }
 0x146   : > { %v1062_v17 = vmul.f32 %v1061_v56, %v4425_v49  ;;  %v4511_v8 = vld [vmem:[%s4047_s6 + $0x28] sm:$0xff] }
 0x147   : > { %v395_v55 = vadd.f32 %v393_v53, %v387_v52  ;;  %v1104_v52 = vstv %s4450_s18  ;;  %s3340_s18 = sld [smem:[#allocation10 + $0x183]] }
 0x148   : > { %996 = vrot.lane.b32.xlu2 %v991_v7, %s3911_s21  ;;  %925 = vrot.lane.b32.xlu1 %v920_v48, %s3912_s25  ;;  %v1098_v48 = vstv %s4444_s15  ;;  %s3337_s15 = sld [smem:[#allocation10 + $0x180]] }
 0x14a   : > { %1032 = vrot.lane.b32.xlu0 %v1027_v43, %s3911_s21  ;;  %v4417_v60 = vpop.permute.xlu2 %559  ;;  %v405_v6 = vpop.permute.xlu1 %404 }
 0x14b   : > { %v409_v12 = vadd.f32 %v405_v6, %v395_v55  ;;  %v1099_v6 = vmul.f32 %v1098_v48, %v4070_v0  ;;  %v1105_v55 = vmul.f32 %v4078_v2, %v1104_v52  ;;  %v4499_v0 = vld [vmem:[%s4047_s6 + $0x18] sm:$0xff] }
 0x14c   : > { %v453_v3 = vpop.permute.xlu0 %452 }
 0x14d   : > { %v423_v54 = vadd.f32 %v419_v35, %v409_v12  ;;  %v1077_v35 = vmul.f32 %v1075_v36, %v4448_v30  ;;  %v1076_v12 = vmul.f32 %v1075_v36, %v4425_v49  ;;  %v1107_v2 = vadd.f32 %v1105_v55, %v1099_v6 }
 0x14f   : > { %v431_v43 = vadd.f32 %v429_v40, %v423_v54  ;;  %v1106_v54 = vmul.f32 %v4499_v0, %v1104_v52 }
 0x150   : > { %1030 = vrot.lane.b32.xlu2 %v1026_v63, %s3911_s21  ;;  %994 = vrot.lane.b32.xlu1 %v990_v18, %s3911_s21  ;;  %v514_v63 = vstv %s4462_s7  ;;  %s3360_s7 = sld [smem:[#allocation10 + $0x200]] }
 0x151   : > { %v445_v15 = vadd.f32 %v4378_v9, %v431_v43  ;;  %v1112_v9 = vstv %s4460_s30  ;;  %v516_v52 = vmul.f32 %v514_v63, %v4230_v22  ;;  %s3346_s30 = sld [smem:[#allocation11 + $0x3]] }
 0x152   : > { %1066 = vrot.lane.b32.xlu0 %v1062_v17, %s3911_s21  ;;  %v4446_v21 = vpop.permute.xlu2 %575  ;;  %v439_v58 = vpop.permute.xlu1 %438  ;;  %v4496_v17 = vld [vmem:[%s4047_s6 + $0x8] sm:$0xff]  ;;  %v1113_v18 = vmul.f32 %v4086_v5, %v1112_v9  ;;  %v1114_v40 = vmul.f32 %v4511_v8, %v1112_v9  ;;  %v4516_v5 = vld [vmem:[%s4047_s6 + $0x38] sm:$0xff] }
 0x153   : > { %v444_v33 = vadd.f32 %v439_v58, %v430_v29  ;;  %v1100_v19 = vmul.f32 %v1098_v48, %v4496_v17  ;;  %v1120_v58 = vstv %s4482_s8  ;;  %v530_v55 = vadd.f32 %v4397_v32, %v516_v52  ;;  %s3369_s8 = sld [smem:[#allocation11 + $0x4]] }
 0x154   : > { %v4452_v31 = vpop.permute.xlu0 %537  ;;  %v671_v52 = vstv %s3314_s11  ;;  %s3398_s11 = sld [smem:[#allocation7 + $0x86]] }
 0x155   : > { %v458_v42 = vadd.f32 %v453_v3, %v444_v33 }
 0x157   : > { %v462_v11 = vadd.f32 %v461_v41, %v458_v42  ;;  %v1121_v42 = vmul.f32 %v4096_v10, %v1120_v58 }
 0x158   : > { %1046 = vrot.lane.b32.xlu2 %v1041_v38, %s3912_s25  ;;  %1010 = vrot.lane.b32.xlu1 %v1005_v39, %s3912_s25  ;;  %v1108_v38 = vadd.f32 %v1106_v54, %v1100_v19  ;;  %v1122_v39 = vmul.f32 %v4516_v5, %v1120_v58  ;;  %v584_v19 = vstv %s3297_s17  ;;  %s3387_s17 = sld [smem:[#allocation10 + $0x284]] }
 0x159   : > { %465 = vst.msk [vmem:[%s4470_s23] sm:$0xff] %vm464_vm3, %v462_v11 }
 0x15a   : > { %1082 = vrot.lane.b32.xlu0 %v1077_v35, %s3912_s25  ;;  %v4475_v7 = vpop.permute.xlu2 %609  ;;  %v455_v1 = vpop.permute.xlu1 %454  ;;  %v515_v35 = vmul.f32 %v514_v63, %v4227_v20  ;;  %v1116_v43 = vadd.f32 %v1114_v40, %v1108_v38  ;;  %v585_v38 = vmul.f32 %v584_v19, %v4232_v23 }
 0x15b   : > { %v459_v3 = vadd.f32 %v455_v1, %v445_v15  ;;  %v1063_v15 = vmul.f32 %v1061_v56, %v4448_v30  ;;  %v1126_v1 = vstv %s4493_s27  ;;  %s3384_s27 = sld [smem:[#allocation10 + $0x281]] }
 0x15c   : > { %v562_v53 = vpop.permute.xlu0 %561  ;;  %v1124_v48 = vadd.f32 %v1122_v39, %v1116_v43 }
 0x15d   : > { %v463_v57 = vadd.f32 %v461_v41, %v459_v3  ;;  %v1115_v41 = vadd.f32 %v1113_v18, %v1107_v2  ;;  %v548_v3 = vstv %s4502_s16  ;;  %s3385_s16 = sld [smem:[#allocation10 + $0x282]] }
 0x15e   : > { %v1128_v6 = vadd.f32 %v1126_v1, %v1124_v48  ;;  %v550_v56 = vmul.f32 %v548_v3, %v4244_v28  ;;  %v549_v22 = vmul.f32 %v548_v3, %v4234_v24 }
 0x15f   : > { %466 = vst.msk [vmem:[%s4470_s23 + $0x8] sm:$0xff] %vm464_vm3, %v463_v57  ;;  %v1123_v20 = vadd.f32 %v1121_v42, %v1115_v41  ;;  %v586_v41 = vmul.f32 %v584_v19, %v4242_v27  ;;  %v618_v42 = vstv %s3300_s10  ;;  %v741_v19 = vstv %s3320_s13  ;;  %s3395_s10 = sld [smem:[#allocation7 + $0x6]] }
 0x160   : > { %1080 = vrot.lane.b32.xlu2 %v1076_v12, %s3912_s25  ;;  %1044 = vrot.lane.b32.xlu1 %v1040_v16, %s3912_s25  ;;  %s4589_s13 = sld [smem:[#allocation10 + $0x287]] }
 0x161   : > { %v1127_v63 = vadd.f32 %v1126_v1, %v1123_v20  ;;  %v673_v20 = vmul.f32 %v671_v52, %v4269_v44 }
 0x162   : > { %v4507_v29 = vpop.permute.xlu2 %694  ;;  %v524_v36 = vpop.permute.xlu1 %523 }
 0x163   : > { %v529_v11 = vadd.f32 %v524_v36, %v515_v35 }
 0x164   : > { %v596_v33 = vpop.permute.xlu0 %595 }
 0x165   : > { %v543_v10 = vadd.f32 %v4452_v31, %v529_v11 }
 0x167   : > { %v551_v18 = vadd.f32 %v549_v22, %v543_v10 }
 0x168   : > { %1068 = vrot.lane.b32.xlu1 %v1063_v15, %s3911_s21  ;;  %1133 = vrot.lane.b32.xlu2 %v1128_v6, %s3909_s9 }
 0x169   : > { %v565_v31 = vadd.f32 %v4417_v60, %v551_v18 }
 0x16a   : > { %v719_v57 = vpop.permute.xlu2 %718  ;;  %v540_v9 = vpop.permute.xlu1 %539 }
 0x16b   : > { %v544_v16 = vadd.f32 %v540_v9, %v530_v55  ;;  %v705_v55 = vstv %s3317_s12  ;;  %s3388_s12 = sld [smem:[#allocation10 + $0x285]] }
 0x16c   : > { %v612_v12 = vpop.permute.xlu0 %611 }
 0x16d   : > { %v552_v2 = vadd.f32 %v550_v56, %v544_v16  ;;  %v706_v56 = vmul.f32 %v705_v55, %v4283_v51 }
 0x16f   : > { %v566_v32 = vadd.f32 %v562_v53, %v552_v2 }
 0x170   : > { %1131 = vrot.lane.b32.xlu1 %v1127_v63, %s3909_s9 }
 0x171   : > { %v580_v24 = vadd.f32 %v4446_v21, %v566_v32 }
 0x172   : > { %v753_v54 = vpop.permute.xlu2 %752  ;;  %v574_v36 = vpop.permute.xlu1 %573 }
 0x173   : > { %v579_v28 = vadd.f32 %v574_v36, %v565_v31  ;;  %v588_v39 = vadd.f32 %v586_v41, %v580_v24  ;;  %v775_v24 = vstv %s3323_s14  ;;  %s4591_s14 = sld [smem:[#allocation7 + $0x106]] }
 0x174   : > { %v681_v58 = vpop.permute.xlu0 %680 }
 0x175   : > { %v587_v40 = vadd.f32 %v585_v38, %v579_v28  ;;  %v742_v38 = vmul.f32 %v741_v19, %v4273_v45 }
 0x177   : > { %v601_v35 = vadd.f32 %v596_v33, %v587_v40  ;;  %v672_v33 = vmul.f32 %v671_v52, %v4279_v50  ;;  %v707_v50 = vmul.f32 %v705_v55, %v4277_v47 }
 0x179   : > { %v615_v53 = vadd.f32 %v4475_v7, %v601_v35  ;;  %v686_v7 = vadd.f32 %v681_v58, %v672_v33 }
 0x17a   : > { %v769_v43 = vpop.permute.xlu2 %768  ;;  %v598_v11 = vpop.permute.xlu1 %597 }
 0x17b   : > { %v619_v15 = vadd.f32 %v618_v42, %v615_v53  ;;  %v602_v48 = vadd.f32 %v598_v11, %v588_v39  ;;  %v700_v10 = vadd.f32 %v4507_v29, %v686_v7  ;;  %v743_v29 = vmul.f32 %v741_v19, %v4275_v46 }
 0x17c   : > { %v697_v60 = vpop.permute.xlu0 %696 }
 0x17d   : > { %v616_v23 = vadd.f32 %v612_v12, %v602_v48  ;;  %3301 = vst.msk [vmem:[%s4470_s23 + $0x10] sm:$0xff] %vm464_vm3, %v619_v15  ;;  %v708_v22 = vadd.f32 %v706_v56, %v700_v10  ;;  %v862_v15 = vstv %s3340_s18  ;;  %s3391_s18 = sld [smem:[#allocation10 + $0x288]] }
 0x17f   : > { %v620_v21 = vadd.f32 %v618_v42, %v616_v23 }
 0x181   : > { %3302 = vst.msk [vmem:[%s4470_s23 + $0x18] sm:$0xff] %vm464_vm3, %v620_v21 }
 0x182   : > { %v838_v27 = vpop.permute.xlu2 %837  ;;  %v683_v3 = vpop.permute.xlu1 %682 }
 0x183   : > { %v687_v6 = vadd.f32 %v683_v3, %v673_v20 }
 0x184   : > { %v731_v1 = vpop.permute.xlu0 %730 }
 0x185   : > { %v701_v12 = vadd.f32 %v697_v60, %v687_v6  ;;  %v828_v60 = vstv %s3337_s15  ;;  %s4599_s15 = sld [smem:[#allocation7 + $0x186]] }
 0x186   : > { %v829_v45 = vmul.f32 %v828_v60, %v4303_v59  ;;  %v830_v23 = vmul.f32 %v828_v60, %v4307_v61  ;;  %v864_v59 = vmul.f32 %v862_v15, %v4330_v26  ;;  %v932_v26 = vstv %s3346_s30  ;;  %s3383_s30 = sld [smem:[#allocation10 + $0x280]] }
 0x187   : > { %v709_v18 = vadd.f32 %v707_v50, %v701_v12  ;;  %v898_v12 = vstv %s3343_s26  ;;  %s3405_s26 = sld [smem:[#allocation8 + $0x6]] }
 0x188   : > { %v843_v48 = vadd.f32 %v838_v27, %v829_v45  ;;  %v899_v56 = vmul.f32 %v898_v12, %v4309_v62 }
 0x189   : > { %v723_v31 = vadd.f32 %v719_v57, %v709_v18 }
 0x18a   : > { %v854_v9 = vpop.permute.xlu2 %853  ;;  %v717_v16 = vpop.permute.xlu1 %716 }
 0x18b   : > { %v722_v2 = vadd.f32 %v717_v16, %v708_v22 }
 0x18c   : > { %v755_v63 = vpop.permute.xlu0 %754 }
 0x18d   : > { %v736_v32 = vadd.f32 %v731_v1, %v722_v2 }
 0x18f   : > { %v744_v28 = vadd.f32 %v742_v38, %v736_v32  ;;  %v985_v38 = vstv %s3360_s7  ;;  %s3386_s7 = sld [smem:[#allocation10 + $0x283]] }
 0x191   : > { %v758_v41 = vadd.f32 %v753_v54, %v744_v28 }
 0x192   : > { %v888_v44 = vpop.permute.xlu2 %887  ;;  %v733_v58 = vpop.permute.xlu1 %732 }
 0x193   : > { %v737_v36 = vadd.f32 %v733_v58, %v723_v31 }
 0x194   : > { %v840_v47 = vpop.permute.xlu0 %839 }
 0x195   : > { %v745_v51 = vadd.f32 %v743_v29, %v737_v36  ;;  %v844_v54 = vadd.f32 %v840_v47, %v830_v23 }
 0x197   : > { %v759_v40 = vadd.f32 %v755_v63, %v745_v51  ;;  %v858_v3 = vadd.f32 %v854_v9, %v844_v54  ;;  %v900_v63 = vmul.f32 %v898_v12, %v4328_v25  ;;  %v986_v25 = vmul.f32 %v985_v38, %v4380_v13 }
 0x198   : > { %v1055_v13 = vstv %s3366_s29  ;;  %s3392_s29 = sld [smem:[#allocation11 + $0x5]] }
 0x199   : > { %v773_v42 = vadd.f32 %v769_v43, %v759_v40  ;;  %v863_v43 = vmul.f32 %v862_v15, %v4311_v4  ;;  %v866_v10 = vadd.f32 %v864_v59, %v858_v3  ;;  %v987_v40 = vmul.f32 %v985_v38, %v4402_v37 }
 0x19a   : > { %v912_v35 = vpop.permute.xlu2 %911  ;;  %v767_v53 = vpop.permute.xlu1 %766  ;;  %v1056_v23 = vmul.f32 %v1055_v13, %v4425_v49 }
 0x19b   : > { %v777_v57 = vadd.f32 %v775_v24, %v773_v42  ;;  %v772_v39 = vadd.f32 %v767_v53, %v758_v41 }
 0x19c   : > { %v874_v11 = vpop.permute.xlu0 %873 }
 0x19d   : > { %v776_v46 = vadd.f32 %v775_v24, %v772_v39  ;;  %3325 = vst.msk [vmem:[%s4470_s23 + $0x28] sm:$0xff] %vm464_vm3, %v777_v57 }
 0x19f   : > { %3324 = vst.msk [vmem:[%s4470_s23 + $0x20] sm:$0xff] %vm464_vm3, %v776_v46 }
 0x1a2   : > { %v997_v52 = vpop.permute.xlu2 %996  ;;  %v852_v21 = vpop.permute.xlu1 %851 }
 0x1a3   : > { %v857_v33 = vadd.f32 %v852_v21, %v843_v48  ;;  %v1001_v41 = vadd.f32 %v997_v52, %v987_v40 }
 0x1a4   : > { %v890_v6 = vpop.permute.xlu0 %889 }
 0x1a5   : > { %v865_v1 = vadd.f32 %v863_v43, %v857_v33  ;;  %v1089_v33 = vstv %s3369_s8  ;;  %s3407_s8 = sld [smem:[#allocation10 + $0x301]] }
 0x1a7   : > { %v879_v7 = vadd.f32 %v874_v11, %v865_v1 }
 0x1a9   : > { %v893_v61 = vadd.f32 %v888_v44, %v879_v7 }
 0x1aa   : > { %v1031_v20 = vpop.permute.xlu2 %1030  ;;  %v876_v55 = vpop.permute.xlu1 %875 }
 0x1ab   : > { %v880_v27 = vadd.f32 %v876_v55, %v866_v10  ;;  %v901_v4 = vadd.f32 %v899_v56, %v893_v61  ;;  %v1146_v10 = vstv %s3384_s27  ;;  %s3408_s27 = sld [smem:[#allocation10 + $0x302]] }
 0x1ac   : > { %v924_v2 = vpop.permute.xlu0 %923 }
 0x1ad   : > { %v894_v16 = vadd.f32 %v890_v6, %v880_v27 }
 0x1af   : > { %v902_v19 = vadd.f32 %v900_v63, %v894_v16 }
 0x1b1   : > { %v916_v31 = vadd.f32 %v912_v35, %v902_v19  ;;  %v1019_v35 = vstv %s3363_s22  ;;  %v4602_v19 = vld [vmem:[%s4047_s6] sm:$0xff]  ;;  %s3389_s22 = sld [smem:[#allocation10 + $0x286]] }
 0x1b2   : > { %v1047_v22 = vpop.permute.xlu2 %1046  ;;  %v910_v50 = vpop.permute.xlu1 %909  ;;  %v1021_v57 = vmul.f32 %v1019_v35, %v4400_v34  ;;  %v1020_v60 = vmul.f32 %v1019_v35, %v4420_v14  ;;  %v1057_v34 = vmul.f32 %v1055_v13, %v4448_v30  ;;  %v1160_v30 = vstv %s3385_s16  ;;  %s3410_s16 = sld [smem:[#allocation10 + $0x304]] }
 0x1b3   : > { %v915_v9 = vadd.f32 %v910_v50, %v901_v4 }
 0x1b4   : > { %v1009_v36 = vpop.permute.xlu0 %1008 }
 0x1b5   : > { %v929_v18 = vadd.f32 %v924_v2, %v915_v9 }
 0x1b7   : > { %v933_v32 = vadd.f32 %v932_v26, %v929_v18  ;;  %v1261_v18 = vstv %s3398_s11  ;;  %s3411_s11 = sld [smem:[#allocation10 + $0x305]] }
 0x1b9   : > { %3347 = vst.msk [vmem:[%s4470_s23 + $0x30] sm:$0xff] %vm464_vm3, %v933_v32  ;;  %v4605_v32 = vld [vmem:[%s4047_s6 + $0x10] sm:$0xff] }
 0x1ba   : > { %v926_v44 = vpop.permute.xlu1 %925  ;;  %v1081_v62 = vpop.permute.xlu2 %1080 }
 0x1bb   : > { %v930_v58 = vadd.f32 %v926_v44, %v916_v31  ;;  %v1196_v44 = vstv %s3388_s12  ;;  %s4663_s12 = sld [smem:[#allocation10 + $0x307]] }
 0x1bc   : > { %v1033_v24 = vpop.permute.xlu0 %1032 }
 0x1bd   : > { %v934_v29 = vadd.f32 %v932_v26, %v930_v58  ;;  %v1255_v26 = vstv %s3395_s10  ;;  %v1218_v58 = vstv %s4589_s13  ;;  %s3421_s10 = sld [smem:[#allocation7 + $0x87]] }
 0x1be   : > { %v1256_v38 = vmul.f32 %v1255_v26, %v4602_v19  ;;  %s3424_s13 = sld [smem:[#allocation7 + $0x107]] }
 0x1bf   : > { %3348 = vst.msk [vmem:[%s4470_s23 + $0x38] sm:$0xff] %vm464_vm3, %v934_v29  ;;  %v1263_v29 = vmul.f32 %v4499_v0, %v1261_v18 }
 0x1c2   : > { %v995_v51 = vpop.permute.xlu1 %994  ;;  %v1134_v28 = vpop.permute.xlu2 %1133 }
 0x1c3   : > { %v1000_v47 = vadd.f32 %v995_v51, %v986_v25  ;;  %1138 = vst.msk [vmem:[#allocation2 + $0x9] sm:$0xff] %vm351_vm2, %v1134_v28  ;;  %v1262_v51 = vmul.f32 %v4605_v32, %v1261_v18 }
 0x1c4   : > { %v1067_v48 = vpop.permute.xlu0 %1066 }
 0x1c5   : > { %v1014_v42 = vadd.f32 %v1009_v36, %v1000_v47  ;;  %v1269_v36 = vstv %s4591_s14  ;;  %v4618_v47 = vld [vmem:[%s4047_s6 + $0x20] sm:$0xff]  ;;  %s3427_s14 = sld [smem:[#allocation7 + $0x187]] }
 0x1c6   : > { %v1271_v35 = vmul.f32 %v4511_v8, %v1269_v36 }
 0x1c7   : > { %v1022_v45 = vadd.f32 %v1020_v60, %v1014_v42  ;;  %v1264_v42 = vadd.f32 %v1262_v51, %v1256_v38  ;;  %v1246_v38 = vstv %s3392_s29  ;;  %s4698_s29 = sld [smem:[#allocation10 + $0x382]] }
 0x1c9   : > { %v1036_v15 = vadd.f32 %v1031_v20, %v1022_v45 }
 0x1ca   : > { %v1011_v53 = vpop.permute.xlu1 %1010  ;;  %v4587_v50 = vld [vmem:[#allocation2 + $0x9] sm:$0xff] }
 0x1cb   : > { %v1015_v39 = vadd.f32 %v1011_v53, %v1001_v41  ;;  %v1198_v25 = vmul.f32 %v1196_v44, %v4587_v50  ;;  %v1277_v41 = vstv %s4599_s15  ;;  %v1270_v53 = vmul.f32 %v4618_v47, %v1269_v36  ;;  %v1210_v60 = vld [vmem:[#allocation2 + $0xa] sm:$0xff]  ;;  %s3414_s15 = sld [smem:[#allocation10 + $0x308]] }
 0x1cc   : > { %v1083_v6 = vpop.permute.xlu0 %1082  ;;  %v1279_v45 = vmul.f32 %v4516_v5, %v1277_v41 }
 0x1cd   : > { %v1023_v46 = vadd.f32 %v1021_v57, %v1015_v39  ;;  %v4628_v57 = vld [vmem:[%s4047_s6 + $0x30] sm:$0xff]  ;;  %v1232_v39 = vstv %s3391_s18  ;;  %v1272_v13 = vadd.f32 %v1270_v53, %v1264_v42  ;;  %s3428_s18 = sld [smem:[#allocation8 + $0x7]] }
 0x1cf   : > { %v1037_v11 = vadd.f32 %v1033_v24, %v1023_v46 }
 0x1d1   : > { %v1051_v54 = vadd.f32 %v1047_v22, %v1037_v11  ;;  %v1182_v22 = vstv %s3387_s17  ;;  %v1278_v11 = vmul.f32 %v4628_v57, %v1277_v41  ;;  %s3418_s17 = sld [smem:[#allocation7 + $0x7]] }
 0x1d2   : > { %v1045_v37 = vpop.permute.xlu1 %1044  ;;  %v1184_v63 = vmul.f32 %v1182_v22, %v4587_v50 }
 0x1d3   : > { %v1050_v21 = vadd.f32 %v1045_v37, %v1036_v15  ;;  %v1059_v1 = vadd.f32 %v1057_v34, %v1051_v54  ;;  %v1220_v37 = vmul.f32 %v1218_v58, %v1210_v60 }
 0x1d5   : > { %v1058_v52 = vadd.f32 %v1056_v23, %v1050_v21  ;;  %v1283_v21 = vstv %s3405_s26  ;;  %s3406_s26 = sld [smem:[#allocation10 + $0x300]] }
 0x1d7   : > { %v1072_v43 = vadd.f32 %v1067_v48, %v1058_v52  ;;  %v1234_v48 = vmul.f32 %v1232_v39, %v1210_v60  ;;  %v1280_v52 = vadd.f32 %v1278_v11, %v1272_v13 }
 0x1d9   : > { %v1086_v14 = vadd.f32 %v1081_v62, %v1072_v43  ;;  %v1257_v62 = vmul.f32 %v1255_v26, %v4496_v17  ;;  %v1284_v43 = vadd.f32 %v1283_v21, %v1280_v52 }
 0x1da   : > { %v1069_v3 = vpop.permute.xlu1 %1068 }
 0x1db   : > { %v1090_v7 = vadd.f32 %v1089_v33, %v1086_v14  ;;  %v1073_v59 = vadd.f32 %v1069_v3, %v1059_v1  ;;  %v1265_v24 = vadd.f32 %v1263_v29, %v1257_v62  ;;  %v1142_v14 = vstv %s3383_s30  ;;  %s3409_s30 = sld [smem:[#allocation10 + $0x303]] }
 0x1dd   : > { %v1087_v20 = vadd.f32 %v1083_v6, %v1073_v59  ;;  %3370 = vst.msk [vmem:[%s4470_s23 + $0x40] sm:$0xff] %vm464_vm3, %v1090_v7  ;;  %v1273_v46 = vadd.f32 %v1271_v35, %v1265_v24 }
 0x1df   : > { %v1091_v55 = vadd.f32 %v1089_v33, %v1087_v20  ;;  %v1281_v23 = vadd.f32 %v1279_v45, %v1273_v46 }
 0x1e1   : > { %3371 = vst.msk [vmem:[%s4470_s23 + $0x48] sm:$0xff] %vm464_vm3, %v1091_v55  ;;  %v1285_v54 = vadd.f32 %v1283_v21, %v1281_v23 }
 0x1e2   : > { %v1132_v49 = vpop.permute.xlu1 %1131 }
 0x1e3   : > { %1137 = vst.msk [vmem:[#allocation2 + $0x1] sm:$0xff] %vm351_vm2, %v1132_v49  ;;  %v1176_v49 = vstv %s3386_s7  ;;  %s3412_s7 = sld [smem:[#allocation10 + $0x306]] }
 0x1ea   : > { %v4575_v12 = vld [vmem:[#allocation2 + $0x8] sm:$0xff]  ;;  %v4577_v27 = vld [vmem:[#allocation2] sm:$0xff] }
 0x1eb   : > { %v1148_v61 = vmul.f32 %v1146_v10, %v4575_v12  ;;  %v1161_v56 = vmul.f32 %v1160_v30, %v4577_v27  ;;  %v1147_v16 = vmul.f32 %v1146_v10, %v4577_v27  ;;  %v4585_v4 = vld [vmem:[#allocation2 + $0x1] sm:$0xff]  ;;  %v1162_v2 = vmul.f32 %v1160_v30, %v4575_v12 }
 0x1ec   : > { %v1183_v9 = vmul.f32 %v1182_v22, %v4585_v4  ;;  %v4607_v31 = vld [vmem:[#allocation2 + $0x2] sm:$0xff]  ;;  %v1197_v40 = vmul.f32 %v1196_v44, %v4585_v4  ;;  %v1143_v3 = vmul.f32 %v1142_v14, %v4577_v27  ;;  %v1144_v7 = vmul.f32 %v1142_v14, %v4575_v12 }
 0x1ed   : > { %1153 = vrot.lane.b32.xlu1 %v1148_v61, %s3911_s21  ;;  %1165 = vrot.lane.b32.xlu2 %v1161_v56, %s3912_s25  ;;  %v1219_v28 = vmul.f32 %v1218_v58, %v4607_v31  ;;  %v1233_v15 = vmul.f32 %v1232_v39, %v4607_v31  ;;  %v1177_v56 = vmul.f32 %v1176_v49, %v4585_v4  ;;  %v1303_v39 = vstv %s3407_s8  ;;  %s3415_s8 = sld [smem:[#allocation11 + $0x6]] }
 0x1ee   : > { %1151 = vrot.lane.b32.xlu0 %v1147_v16, %s3911_s21  ;;  %v1178_v16 = vmul.f32 %v1176_v49, %v4587_v50  ;;  %v1353_v14 = vstv %s3411_s11  ;;  %s4723_s11 = sld [smem:[#allocation10 + $0x385]] }
 0x1f5   : > { %1187 = vrot.lane.b32.xlu1 %v1183_v9, %s3911_s21  ;;  %1189 = vrot.lane.b32.xlu2 %v1184_v63, %s3911_s21  ;;  %v1212_v63 = vstv %s3389_s22  ;;  %s4696_s22 = sld [smem:[#allocation10 + $0x381]] }
 0x1f6   : > { %1167 = vrot.lane.b32.xlu0 %v1162_v2, %s3912_s25  ;;  %v1213_v44 = vmul.f32 %v1212_v63, %v4607_v31  ;;  %v1214_v36 = vmul.f32 %v1212_v63, %v1210_v60  ;;  %v1317_v60 = vstv %s3408_s27  ;;  %s3433_s27 = sld [smem:[#allocation10 + $0x384]] }
 0x1fd   : > { %1203 = vrot.lane.b32.xlu1 %v1198_v25, %s3912_s25  ;;  %1223 = vrot.lane.b32.xlu2 %v1219_v28, %s3911_s21 }
 0x1fe   : > { %1201 = vrot.lane.b32.xlu0 %v1197_v40, %s3912_s25 }
 0x205   : > { %1237 = vrot.lane.b32.xlu1 %v1233_v15, %s3912_s25  ;;  %1239 = vrot.lane.b32.xlu2 %v1234_v48, %s3912_s25 }
 0x206   : > { %1225 = vrot.lane.b32.xlu0 %v1220_v37, %s3911_s21  ;;  %v1339_v37 = vstv %s3410_s16  ;;  %s4717_s16 = sld [smem:[#allocation7 + $0x8]] }
 0x20d   : > { %1290 = vrot.lane.b32.xlu1 %v1285_v54, %s3909_s9 }
 0x20e   : > { %1288 = vrot.lane.b32.xlu0 %v1284_v43, %s3909_s9  ;;  %v1412_v43 = vstv %s3418_s17  ;;  %s4719_s17 = sld [smem:[#allocation7 + $0x88]] }
 0x247   : > { %v1166_v34 = vpop.permute.xlu2 %1165 }
 0x24f   : > { %v1190_v6 = vpop.permute.xlu2 %1189 }
 0x257   : > { %v1224_v12 = vpop.permute.xlu2 %1223 }
 0x25f   : > { %v1154_v33 = vpop.permute.xlu1 %1153  ;;  %v1240_v24 = vpop.permute.xlu2 %1239 }
 0x260   : > { %v1152_v1 = vpop.permute.xlu0 %1151  ;;  %v1158_v20 = vadd.f32 %v1154_v33, %v1144_v7 }
 0x261   : > { %v1157_v59 = vadd.f32 %v1152_v1, %v1143_v3  ;;  %v1375_v1 = vstv %s4663_s12  ;;  %v1414_v3 = vmul.f32 %v1412_v43, %v4496_v17  ;;  %s4732_s12 = sld [smem:[#allocation7 + $0x108]] }
 0x263   : > { %v1171_v30 = vadd.f32 %v1166_v34, %v1157_v59  ;;  %v1418_v34 = vstv %s3421_s10  ;;  %v1426_v59 = vstv %s3424_s13  ;;  %s4721_s10 = sld [smem:[#allocation10 + $0x387]] }
 0x264   : > { %v1420_v7 = vmul.f32 %v4499_v0, %v1418_v34  ;;  %s4739_s13 = sld [smem:[#allocation7 + $0x188]] }
 0x265   : > { %v1179_v22 = vadd.f32 %v1177_v56, %v1171_v30  ;;  %v1434_v56 = vstv %s3427_s14  ;;  %s4746_s14 = sld [smem:[#allocation10 + $0x388]] }
 0x266   : > { %v1422_v30 = vadd.f32 %v1420_v7, %v1414_v3 }
 0x267   : > { %v1188_v55 = vpop.permute.xlu1 %1187 }
 0x268   : > { %v1168_v10 = vpop.permute.xlu0 %1167  ;;  %v1193_v2 = vadd.f32 %v1188_v55, %v1179_v22  ;;  %v1427_v22 = vmul.f32 %v4618_v47, %v1426_v59 }
 0x269   : > { %v1172_v61 = vadd.f32 %v1168_v10, %v1158_v20  ;;  %v1419_v20 = vmul.f32 %v4605_v32, %v1418_v34 }
 0x26b   : > { %v1180_v9 = vadd.f32 %v1178_v16, %v1172_v61  ;;  %v1428_v61 = vmul.f32 %v4511_v8, %v1426_v59 }
 0x26d   : > { %v1194_v18 = vadd.f32 %v1190_v6, %v1180_v9  ;;  %v1413_v6 = vmul.f32 %v1412_v43, %v4602_v19  ;;  %v1389_v9 = vstv %s3414_s15  ;;  %v1369_v43 = vstv %s3412_s7  ;;  %s3451_s15 = sld [smem:[#allocation8 + $0x8]] }
 0x26e   : > { %s3438_s7 = sld [smem:[#allocation11 + $0x7]] }
 0x26f   : > { %v1204_v27 = vpop.permute.xlu1 %1203  ;;  %v1421_v16 = vadd.f32 %v1419_v20, %v1413_v6 }
 0x270   : > { %v1202_v26 = vpop.permute.xlu0 %1201  ;;  %v1208_v62 = vadd.f32 %v1204_v27, %v1194_v18  ;;  %v1436_v27 = vmul.f32 %v4516_v5, %v1434_v56 }
 0x271   : > { %v1207_v58 = vadd.f32 %v1202_v26, %v1193_v2  ;;  %v1430_v2 = vadd.f32 %v1428_v61, %v1422_v30  ;;  %v1435_v26 = vmul.f32 %v4628_v57, %v1434_v56 }
 0x272   : > { %v1216_v51 = vadd.f32 %v1214_v36, %v1208_v62 }
 0x273   : > { %v1215_v29 = vadd.f32 %v1213_v44, %v1207_v58  ;;  %v1438_v62 = vadd.f32 %v1436_v27, %v1430_v2 }
 0x275   : > { %v1229_v4 = vadd.f32 %v1224_v12, %v1215_v29  ;;  %v1429_v12 = vadd.f32 %v1427_v22, %v1421_v16  ;;  %v1440_v29 = vstv %s3428_s18  ;;  %v1403_v16 = vstv %s3415_s8  ;;  %s3429_s18 = sld [smem:[#allocation10 + $0x380]] }
 0x276   : > { %s3456_s8 = sld [smem:[#allocation10 + $0x404]] }
 0x277   : > { %v1238_v50 = vpop.permute.xlu1 %1237  ;;  %v1437_v36 = vadd.f32 %v1435_v26, %v1429_v12 }
 0x278   : > { %v1243_v25 = vadd.f32 %v1238_v50, %v1229_v4  ;;  %v1226_v28 = vpop.permute.xlu0 %1225  ;;  %v1442_v4 = vadd.f32 %v1440_v29, %v1438_v62 }
 0x279   : > { %v1230_v40 = vadd.f32 %v1226_v28, %v1216_v51  ;;  %v1299_v28 = vstv %s3406_s26  ;;  %s3432_s26 = sld [smem:[#allocation10 + $0x383]] }
 0x27a   : > { %v1247_v35 = vadd.f32 %v1246_v38, %v1243_v25 }
 0x27b   : > { %v1244_v41 = vadd.f32 %v1240_v24, %v1230_v40 }
 0x27c   : > { %3393 = vst.msk [vmem:[%s4470_s23 + $0x50] sm:$0xff] %vm464_vm3, %v1247_v35 }
 0x27d   : > { %v1248_v42 = vadd.f32 %v1246_v38, %v1244_v41  ;;  %v1441_v38 = vadd.f32 %v1440_v29, %v1437_v36  ;;  %v1569_v36 = vstv %s4717_s16  ;;  %s3467_s16 = sld [smem:[#allocation7 + $0x89]] }
 0x27f   : > { %3394 = vst.msk [vmem:[%s4470_s23 + $0x58] sm:$0xff] %vm464_vm3, %v1248_v42  ;;  %v1291_v31 = vpop.permute.xlu1 %1290 }
 0x280   : > { %1295 = vst.msk [vmem:[#allocation2 + $0x9] sm:$0xff] %vm351_vm2, %v1291_v31  ;;  %v1289_v53 = vpop.permute.xlu0 %1288 }
 0x281   : > { %1294 = vst.msk [vmem:[#allocation2 + $0x1] sm:$0xff] %vm351_vm2, %v1289_v53 }
 0x287   : > { %v4661_v23 = vld [vmem:[#allocation2 + $0x9] sm:$0xff] }
 0x288   : > { %v4649_v46 = vld [vmem:[#allocation2 + $0x8] sm:$0xff]  ;;  %v4651_v45 = vld [vmem:[#allocation2] sm:$0xff]  ;;  %v1341_v52 = vmul.f32 %v1339_v37, %v4661_v23  ;;  %v1355_v55 = vmul.f32 %v1353_v14, %v4661_v23 }
 0x289   : > { %v1305_v13 = vmul.f32 %v1303_v39, %v4649_v46  ;;  %v1318_v11 = vmul.f32 %v1317_v60, %v4651_v45  ;;  %v1304_v15 = vmul.f32 %v1303_v39, %v4651_v45  ;;  %v4659_v48 = vld [vmem:[#allocation2 + $0x1] sm:$0xff]  ;;  %v1319_v54 = vmul.f32 %v1317_v60, %v4649_v46  ;;  %v1367_v63 = vld [vmem:[#allocation2 + $0xa] sm:$0xff] }
 0x28a   : > { %v1340_v21 = vmul.f32 %v1339_v37, %v4659_v48  ;;  %v4671_v33 = vld [vmem:[#allocation2 + $0x2] sm:$0xff]  ;;  %v1354_v10 = vmul.f32 %v1353_v14, %v4659_v48  ;;  %v1391_v44 = vmul.f32 %v1389_v9, %v1367_v63  ;;  %v1377_v58 = vmul.f32 %v1375_v1, %v1367_v63 }
 0x28b   : > { %1310 = vrot.lane.b32.xlu0 %v1305_v13, %s3911_s21  ;;  %1322 = vrot.lane.b32.xlu1 %v1318_v11, %s3912_s25  ;;  %v1376_v49 = vmul.f32 %v1375_v1, %v4671_v33  ;;  %v1390_v18 = vmul.f32 %v1389_v9, %v4671_v33  ;;  %v1300_v41 = vmul.f32 %v1299_v28, %v4651_v45  ;;  %v1333_v39 = vstv %s3409_s30  ;;  %s3435_s30 = sld [smem:[#allocation10 + $0x386]] }
 0x28c   : > { %1308 = vrot.lane.b32.xlu2 %v1304_v15, %s3911_s21  ;;  %v1301_v42 = vmul.f32 %v1299_v28, %v4649_v46  ;;  %v1334_v37 = vmul.f32 %v1333_v39, %v4659_v48  ;;  %v1335_v45 = vmul.f32 %v1333_v39, %v4661_v23  ;;  %v1460_v14 = vstv %s4696_s22  ;;  %s3453_s22 = sld [smem:[#allocation10 + $0x401]] }
 0x28d   : > { %v1474_v1 = vstv %s4698_s29  ;;  %v1371_v6 = vmul.f32 %v1369_v43, %v1367_v63  ;;  %v1570_v28 = vmul.f32 %v1569_v36, %v4602_v19  ;;  %v1591_v39 = vstv %s4739_s13  ;;  %s3454_s29 = sld [smem:[#allocation10 + $0x402]] }
 0x28e   : > { %s3460_s13 = sld [smem:[#allocation10 + $0x408]] }
 0x293   : > { %1344 = vrot.lane.b32.xlu0 %v1340_v21, %s3911_s21  ;;  %1346 = vrot.lane.b32.xlu1 %v1341_v52, %s3911_s21 }
 0x294   : > { %1324 = vrot.lane.b32.xlu2 %v1319_v54, %s3912_s25 }
 0x29b   : > { %1360 = vrot.lane.b32.xlu0 %v1355_v55, %s3912_s25  ;;  %1380 = vrot.lane.b32.xlu1 %v1376_v49, %s3911_s21 }
 0x29c   : > { %1358 = vrot.lane.b32.xlu2 %v1354_v10, %s3912_s25  ;;  %v1370_v10 = vmul.f32 %v1369_v43, %v4671_v33 }
 0x2a3   : > { %1394 = vrot.lane.b32.xlu0 %v1390_v18, %s3912_s25  ;;  %1396 = vrot.lane.b32.xlu1 %v1391_v44, %s3912_s25  ;;  %v1496_v44 = vstv %s3433_s27  ;;  %s3464_s27 = sld [smem:[#allocation7 + $0x9]] }
 0x2a4   : > { %1382 = vrot.lane.b32.xlu2 %v1377_v58, %s3911_s21 }
 0x2ab   : > { %1447 = vrot.lane.b32.xlu0 %v1442_v4, %s3909_s9  ;;  %v1575_v4 = vstv %s4719_s17  ;;  %s3457_s17 = sld [smem:[#allocation10 + $0x405]] }
 0x2ac   : > { %1445 = vrot.lane.b32.xlu2 %v1441_v38, %s3909_s9 }
 0x2e6   : > { %v1309_v50 = vpop.permute.xlu2 %1308 }
 0x2e7   : > { %v1314_v31 = vadd.f32 %v1309_v50, %v1300_v41  ;;  %v1583_v41 = vstv %s4732_s12  ;;  %s3473_s12 = sld [smem:[#allocation7 + $0x189]] }
 0x2e8   : > { %v1585_v43 = vmul.f32 %v4511_v8, %v1583_v41 }
 0x2ee   : > { %v1325_v51 = vpop.permute.xlu2 %1324 }
 0x2f6   : > { %v1359_v25 = vpop.permute.xlu2 %1358 }
 0x2fd   : > { %v1311_v40 = vpop.permute.xlu0 %1310  ;;  %v1323_v24 = vpop.permute.xlu1 %1322 }
 0x2fe   : > { %v1383_v35 = vpop.permute.xlu2 %1382  ;;  %v1315_v53 = vadd.f32 %v1311_v40, %v1301_v42  ;;  %v1328_v60 = vadd.f32 %v1323_v24, %v1314_v31  ;;  %v1576_v40 = vmul.f32 %v4605_v32, %v1575_v4 }
 0x300   : > { %v1329_v15 = vadd.f32 %v1325_v51, %v1315_v53  ;;  %v1336_v46 = vadd.f32 %v1334_v37, %v1328_v60  ;;  %v1532_v51 = vstv %s4721_s10  ;;  %v1578_v31 = vadd.f32 %v1576_v40, %v1570_v28  ;;  %s4799_s10 = sld [smem:[#allocation10 + $0x407]] }
 0x301   : > { %v1584_v53 = vmul.f32 %v4618_v47, %v1583_v41  ;;  %v1560_v40 = vstv %s3438_s7  ;;  %s3476_s7 = sld [smem:[#allocation10 + $0x481]] }
 0x302   : > { %v1337_v54 = vadd.f32 %v1335_v45, %v1329_v15  ;;  %v1577_v15 = vmul.f32 %v4499_v0, %v1575_v4  ;;  %v1593_v0 = vmul.f32 %v4516_v5, %v1591_v39 }
 0x303   : > { %v1586_v37 = vadd.f32 %v1584_v53, %v1578_v31 }
 0x305   : > { %v1345_v13 = vpop.permute.xlu0 %1344  ;;  %v1347_v11 = vpop.permute.xlu1 %1346 }
 0x306   : > { %v1446_v21 = vpop.permute.xlu2 %1445  ;;  %v1350_v52 = vadd.f32 %v1345_v13, %v1336_v46  ;;  %v1351_v34 = vadd.f32 %v1347_v11, %v1337_v54  ;;  %v1546_v13 = vstv %s4746_s14  ;;  %v1571_v11 = vmul.f32 %v1569_v36, %v4496_v17  ;;  %s3474_s14 = sld [smem:[#allocation8 + $0x9]] }
 0x307   : > { %1451 = vst.msk [vmem:[#allocation2 + $0x1] sm:$0xff] %vm351_vm2, %v1446_v21  ;;  %v1592_v21 = vmul.f32 %v4628_v57, %v1591_v39  ;;  %v1597_v17 = vstv %s3451_s15  ;;  %s3452_s15 = sld [smem:[#allocation10 + $0x400]] }
 0x308   : > { %v1364_v59 = vadd.f32 %v1359_v25, %v1350_v52  ;;  %v1510_v25 = vstv %s4723_s11  ;;  %v1579_v54 = vadd.f32 %v1577_v15, %v1571_v11  ;;  %v1617_v11 = vstv %s3453_s22  ;;  %s4801_s11 = sld [smem:[#allocation7 + $0x109]] }
 0x309   : > { %s3477_s22 = sld [smem:[#allocation10 + $0x482]] }
 0x30a   : > { %v1372_v30 = vadd.f32 %v1370_v10, %v1364_v59 }
 0x30d   : > { %v1361_v3 = vpop.permute.xlu0 %1360  ;;  %v1381_v7 = vpop.permute.xlu1 %1380 }
 0x30e   : > { %v1365_v20 = vadd.f32 %v1361_v3, %v1351_v34  ;;  %v4705_v55 = vld [vmem:[#allocation2] sm:$0xff]  ;;  %v1386_v61 = vadd.f32 %v1381_v7, %v1372_v30  ;;  %v1594_v34 = vadd.f32 %v1592_v21, %v1586_v37 }
 0x30f   : > { %v1461_v48 = vmul.f32 %v1460_v14, %v4705_v55  ;;  %v1475_v49 = vmul.f32 %v1474_v1, %v4705_v55  ;;  %v4741_v38 = vld [vmem:[#allocation2 + $0x1] sm:$0xff] }
 0x310   : > { %v1373_v23 = vadd.f32 %v1371_v6, %v1365_v20  ;;  %v1497_v24 = vmul.f32 %v1496_v44, %v4741_v38  ;;  %v1511_v42 = vmul.f32 %v1510_v25, %v4741_v38 }
 0x311   : > { %1465 = vrot.lane.b32.xlu1 %v1461_v48, %s3911_s21  ;;  %1479 = vrot.lane.b32.xlu0 %v1475_v49, %s3912_s25  ;;  %v1456_v49 = vstv %s3429_s18  ;;  %s3455_s18 = sld [smem:[#allocation10 + $0x403]] }
 0x312   : > { %v1387_v56 = vadd.f32 %v1383_v35, %v1373_v23  ;;  %v1457_v5 = vmul.f32 %v1456_v49, %v4705_v55 }
 0x315   : > { %v1395_v22 = vpop.permute.xlu0 %1394  ;;  %v1397_v9 = vpop.permute.xlu1 %1396 }
 0x316   : > { %v1400_v63 = vadd.f32 %v1395_v22, %v1386_v61  ;;  %v1401_v2 = vadd.f32 %v1397_v9, %v1387_v56  ;;  %v1490_v22 = vstv %s3432_s26  ;;  %s3458_s26 = sld [smem:[#allocation10 + $0x406]] }
 0x318   : > { %v1404_v27 = vadd.f32 %v1403_v16, %v1400_v63  ;;  %v1405_v12 = vadd.f32 %v1403_v16, %v1401_v2 }
 0x31a   : > { %3416 = vst.msk [vmem:[%s4470_s23 + $0x60] sm:$0xff] %vm464_vm3, %v1404_v27 }
 0x31b   : > { %3417 = vst.msk [vmem:[%s4470_s23 + $0x68] sm:$0xff] %vm464_vm3, %v1405_v12  ;;  %v1491_v12 = vmul.f32 %v1490_v22, %v4741_v38 }
 0x31d   : > { %v1448_v26 = vpop.permute.xlu0 %1447 }
 0x31e   : > { %1452 = vst.msk [vmem:[#allocation2 + $0x9] sm:$0xff] %vm351_vm2, %v1448_v26 }
 0x325   : > { %v4725_v33 = vld [vmem:[#allocation2 + $0x8] sm:$0xff] }
 0x326   : > { %v4727_v18 = vld [vmem:[#allocation2 + $0x9] sm:$0xff]  ;;  %v1462_v58 = vmul.f32 %v1460_v14, %v4725_v33  ;;  %v1476_v29 = vmul.f32 %v1474_v1, %v4725_v33  ;;  %v1587_v14 = vadd.f32 %v1585_v43, %v1579_v54  ;;  %v1598_v1 = vadd.f32 %v1597_v17, %v1594_v34 }
 0x327   : > { %v1498_v62 = vmul.f32 %v1496_v44, %v4727_v18  ;;  %v4743_v50 = vld [vmem:[#allocation2 + $0x2] sm:$0xff]  ;;  %v1524_v60 = vld [vmem:[#allocation2 + $0xa] sm:$0xff]  ;;  %v1512_v46 = vmul.f32 %v1510_v25, %v4727_v18  ;;  %v1458_v10 = vmul.f32 %v1456_v49, %v4725_v33  ;;  %v1492_v2 = vmul.f32 %v1490_v22, %v4727_v18 }
 0x328   : > { %1467 = vrot.lane.b32.xlu2 %v1462_v58, %s3911_s21  ;;  %1481 = vrot.lane.b32.xlu1 %v1476_v29, %s3912_s25  ;;  %v1533_v35 = vmul.f32 %v1532_v51, %v4743_v50  ;;  %v1548_v45 = vmul.f32 %v1546_v13, %v1524_v60  ;;  %v1534_v52 = vmul.f32 %v1532_v51, %v1524_v60  ;;  %v1526_v58 = vstv %s3435_s30  ;;  %v4821_v49 = vld [vmem:[%s4047_s6 + $0x28] sm:$0xff]  ;;  %s3461_s30 = sld [smem:[#allocation11 + $0x8]] }
 0x329   : > { %1503 = vrot.lane.b32.xlu0 %v1498_v62, %s3911_s21  ;;  %v1547_v3 = vmul.f32 %v1546_v13, %v4743_v50  ;;  %v1595_v7 = vadd.f32 %v1593_v0, %v1587_v14  ;;  %v1527_v4 = vmul.f32 %v1526_v58, %v4743_v50  ;;  %v1528_v38 = vmul.f32 %v1526_v58, %v1524_v60  ;;  %v4809_v0 = vld [vmem:[%s4047_s6 + $0x8] sm:$0xff] }
 0x32a   : > { %v1631_v60 = vstv %s3454_s29  ;;  %v1653_v54 = vstv %s3456_s8  ;;  %s3479_s29 = sld [smem:[#allocation10 + $0x484]] }
 0x32b   : > { %v1599_v59 = vadd.f32 %v1597_v17, %v1595_v7  ;;  %v1732_v7 = vstv %s3467_s16  ;;  %s3487_s8 = sld [smem:[#allocation7 + $0xa]] }
 0x32c   : > { %s3480_s16 = sld [smem:[#allocation10 + $0x485]] }
 0x330   : > { %1501 = vrot.lane.b32.xlu2 %v1497_v24, %s3911_s21  ;;  %1515 = vrot.lane.b32.xlu1 %v1511_v42, %s3912_s25 }
 0x331   : > { %1537 = vrot.lane.b32.xlu0 %v1533_v35, %s3911_s21 }
 0x338   : > { %1517 = vrot.lane.b32.xlu2 %v1512_v46, %s3912_s25  ;;  %1539 = vrot.lane.b32.xlu1 %v1534_v52, %s3911_s21 }
 0x339   : > { %1553 = vrot.lane.b32.xlu0 %v1548_v45, %s3912_s25 }
 0x340   : > { %1551 = vrot.lane.b32.xlu2 %v1547_v3, %s3912_s25  ;;  %1602 = vrot.lane.b32.xlu1 %v1598_v1, %s3909_s9  ;;  %v1726_v1 = vstv %s3464_s27  ;;  %v4813_v3 = vld [vmem:[%s4047_s6 + $0x18] sm:$0xff]  ;;  %s3490_s27 = sld [smem:[#allocation7 + $0x8a]] }
 0x348   : > { %1604 = vrot.lane.b32.xlu2 %v1599_v59, %s3909_s9  ;;  %v1667_v59 = vstv %s3457_s17  ;;  %s4870_s17 = sld [smem:[#allocation10 + $0x487]] }
 0x382   : > { %v1468_v6 = vpop.permute.xlu2 %1467 }
 0x383   : > { %v1480_v20 = vpop.permute.xlu0 %1479  ;;  %v1466_v23 = vpop.permute.xlu1 %1465  ;;  %v1472_v61 = vadd.f32 %v1468_v6, %v1458_v10  ;;  %v1733_v10 = vmul.f32 %v4605_v32, %v1732_v7 }
 0x384   : > { %v1471_v30 = vadd.f32 %v1466_v23, %v1457_v5  ;;  %v1740_v23 = vstv %s4801_s11  ;;  %v1727_v5 = vmul.f32 %v1726_v1, %v4602_v19  ;;  %s3496_s11 = sld [smem:[#allocation7 + $0x18a]] }
 0x385   : > { %v1742_v22 = vmul.f32 %v4821_v49, %v1740_v23 }
 0x386   : > { %v1485_v63 = vadd.f32 %v1480_v20, %v1471_v30  ;;  %v1728_v20 = vmul.f32 %v1726_v1, %v4809_v0 }
 0x388   : > { %v1493_v44 = vadd.f32 %v1491_v12, %v1485_v63  ;;  %v1748_v63 = vstv %s3473_s12  ;;  %v1703_v12 = vstv %s3460_s13  ;;  %s3483_s12 = sld [smem:[#allocation10 + $0x488]] }
 0x389   : > { %s3497_s13 = sld [smem:[#allocation8 + $0xa]] }
 0x38a   : > { %v1502_v8 = vpop.permute.xlu2 %1501 }
 0x38b   : > { %v1507_v55 = vadd.f32 %v1502_v8, %v1493_v44  ;;  %v1689_v8 = vstv %s4799_s10  ;;  %s3493_s10 = sld [smem:[#allocation7 + $0x10a]] }
 0x392   : > { %v1518_v48 = vpop.permute.xlu2 %1517 }
 0x39a   : > { %v1552_v56 = vpop.permute.xlu2 %1551  ;;  %v1482_v9 = vpop.permute.xlu1 %1481 }
 0x39b   : > { %v1504_v16 = vpop.permute.xlu0 %1503  ;;  %v1486_v27 = vadd.f32 %v1482_v9, %v1472_v61  ;;  %v4834_v9 = vld [vmem:[%s4047_s6 + $0x38] sm:$0xff] }
 0x39c   : > { %v1750_v58 = vmul.f32 %v4834_v9, %v1748_v63 }
 0x39d   : > { %v1494_v26 = vadd.f32 %v1492_v2, %v1486_v27  ;;  %v1735_v2 = vadd.f32 %v1733_v10, %v1727_v5  ;;  %v1741_v27 = vmul.f32 %v4618_v47, %v1740_v23  ;;  %v1717_v5 = vstv %s3461_s30  ;;  %s4905_s30 = sld [smem:[#allocation10 + $0x502]] }
 0x39f   : > { %v1508_v62 = vadd.f32 %v1504_v16, %v1494_v26 }
 0x3a1   : > { %v1522_v18 = vadd.f32 %v1518_v48, %v1508_v62  ;;  %v1734_v48 = vmul.f32 %v4813_v3, %v1732_v7  ;;  %v1749_v62 = vmul.f32 %v4628_v57, %v1748_v63 }
 0x3a2   : > { %v1605_v33 = vpop.permute.xlu2 %1604  ;;  %v1516_v36 = vpop.permute.xlu1 %1515 }
 0x3a3   : > { %v1538_v29 = vpop.permute.xlu0 %1537  ;;  %1609 = vst.msk [vmem:[#allocation2 + $0x9] sm:$0xff] %vm351_vm2, %v1605_v33  ;;  %v1521_v51 = vadd.f32 %v1516_v36, %v1507_v55  ;;  %v1530_v35 = vadd.f32 %v1528_v38, %v1522_v18  ;;  %v1736_v16 = vadd.f32 %v1734_v48, %v1728_v20  ;;  %v1743_v55 = vadd.f32 %v1741_v27, %v1735_v2 }
 0x3a5   : > { %v1529_v25 = vadd.f32 %v1527_v4, %v1521_v51  ;;  %v1744_v44 = vadd.f32 %v1742_v22, %v1736_v16  ;;  %v1754_v51 = vstv %s3474_s14  ;;  %s3475_s14 = sld [smem:[#allocation10 + $0x480]] }
 0x3a7   : > { %v1543_v28 = vadd.f32 %v1538_v29, %v1529_v25  ;;  %v1752_v4 = vadd.f32 %v1750_v58, %v1744_v44  ;;  %v1751_v25 = vadd.f32 %v1749_v62, %v1743_v55 }
 0x3a9   : > { %v1557_v24 = vadd.f32 %v1552_v56, %v1543_v28  ;;  %v1756_v18 = vadd.f32 %v1754_v51, %v1752_v4  ;;  %v1755_v28 = vadd.f32 %v1754_v51, %v1751_v25 }
 0x3aa   : > { %v1540_v41 = vpop.permute.xlu1 %1539  ;;  %v4797_v43 = vld [vmem:[#allocation2 + $0x9] sm:$0xff] }
 0x3ab   : > { %v1544_v42 = vadd.f32 %v1540_v41, %v1530_v35  ;;  %v1561_v31 = vadd.f32 %v1560_v40, %v1557_v24  ;;  %v1554_v53 = vpop.permute.xlu0 %1553  ;;  %v1655_v17 = vmul.f32 %v1653_v54, %v4797_v43  ;;  %v1669_v30 = vmul.f32 %v1667_v59, %v4797_v43  ;;  %v1681_v26 = vld [vmem:[#allocation2 + $0xa] sm:$0xff] }
 0x3ac   : > { %v1705_v29 = vmul.f32 %v1703_v12, %v1681_v26  ;;  %v1691_v36 = vmul.f32 %v1689_v8, %v1681_v26  ;;  %v1613_v24 = vstv %s3452_s15  ;;  %s3478_s15 = sld [smem:[#allocation10 + $0x483]] }
 0x3ad   : > { %v1558_v39 = vadd.f32 %v1554_v53, %v1544_v42  ;;  %3439 = vst.msk [vmem:[%s4470_s23 + $0x70] sm:$0xff] %vm464_vm3, %v1561_v31 }
 0x3af   : > { %v1562_v13 = vadd.f32 %v1560_v40, %v1558_v39 }
 0x3b1   : > { %3440 = vst.msk [vmem:[%s4470_s23 + $0x78] sm:$0xff] %vm464_vm3, %v1562_v13 }
 0x3b2   : > { %v1603_v50 = vpop.permute.xlu1 %1602 }
 0x3b3   : > { %1608 = vst.msk [vmem:[#allocation2 + $0x1] sm:$0xff] %vm351_vm2, %v1603_v50  ;;  %v1647_v50 = vstv %s3455_s18  ;;  %s3481_s18 = sld [smem:[#allocation10 + $0x486]] }
 0x3ba   : > { %v4785_v15 = vld [vmem:[#allocation2 + $0x8] sm:$0xff]  ;;  %v4787_v37 = vld [vmem:[#allocation2] sm:$0xff] }
 0x3bb   : > { %v1619_v21 = vmul.f32 %v1617_v11, %v4785_v15  ;;  %v1632_v46 = vmul.f32 %v1631_v60, %v4787_v37  ;;  %v1618_v45 = vmul.f32 %v1617_v11, %v4787_v37  ;;  %v4795_v52 = vld [vmem:[#allocation2 + $0x1] sm:$0xff]  ;;  %v1633_v14 = vmul.f32 %v1631_v60, %v4785_v15 }
 0x3bc   : > { %v1654_v34 = vmul.f32 %v1653_v54, %v4795_v52  ;;  %v4815_v6 = vld [vmem:[#allocation2 + $0x2] sm:$0xff]  ;;  %v1668_v56 = vmul.f32 %v1667_v59, %v4795_v52  ;;  %v1614_v41 = vmul.f32 %v1613_v24, %v4787_v37  ;;  %v1615_v42 = vmul.f32 %v1613_v24, %v4785_v15 }
 0x3bd   : > { %1624 = vrot.lane.b32.xlu1 %v1619_v21, %s3911_s21  ;;  %1636 = vrot.lane.b32.xlu2 %v1632_v46, %s3912_s25  ;;  %v1690_v61 = vmul.f32 %v1689_v8, %v4815_v6  ;;  %v1704_v33 = vmul.f32 %v1703_v12, %v4815_v6  ;;  %v1648_v46 = vmul.f32 %v1647_v50, %v4795_v52  ;;  %v1774_v12 = vstv %s3476_s7  ;;  %s3484_s7 = sld [smem:[#allocation11 + $0x9]] }
 0x3be   : > { %1622 = vrot.lane.b32.xlu0 %v1618_v45, %s3911_s21  ;;  %v1649_v45 = vmul.f32 %v1647_v50, %v4797_v43 }
 0x3c5   : > { %1658 = vrot.lane.b32.xlu1 %v1654_v34, %s3911_s21  ;;  %1660 = vrot.lane.b32.xlu2 %v1655_v17, %s3911_s21  ;;  %v1683_v17 = vstv %s3458_s26  ;;  %s4903_s26 = sld [smem:[#allocation10 + $0x501]] }
 0x3c6   : > { %1638 = vrot.lane.b32.xlu0 %v1633_v14, %s3912_s25  ;;  %v1684_v59 = vmul.f32 %v1683_v17, %v4815_v6  ;;  %v1685_v23 = vmul.f32 %v1683_v17, %v1681_v26  ;;  %v1788_v26 = vstv %s3477_s22  ;;  %s3502_s22 = sld [smem:[#allocation10 + $0x504]] }
 0x3cd   : > { %1674 = vrot.lane.b32.xlu1 %v1669_v30, %s3912_s25  ;;  %1694 = vrot.lane.b32.xlu2 %v1690_v61, %s3911_s21 }
 0x3ce   : > { %1672 = vrot.lane.b32.xlu0 %v1668_v56, %s3912_s25 }
 0x3d5   : > { %1708 = vrot.lane.b32.xlu1 %v1704_v33, %s3912_s25  ;;  %1710 = vrot.lane.b32.xlu2 %v1705_v29, %s3912_s25 }
 0x3d6   : > { %1696 = vrot.lane.b32.xlu0 %v1691_v36, %s3911_s21  ;;  %v1810_v36 = vstv %s3479_s29  ;;  %s4924_s29 = sld [smem:[#allocation7 + $0xb]] }
 0x3dd   : > { %1761 = vrot.lane.b32.xlu1 %v1756_v18, %s3909_s9 }
 0x3de   : > { %1759 = vrot.lane.b32.xlu0 %v1755_v28, %s3909_s9  ;;  %v1883_v28 = vstv %s3487_s8  ;;  %s4926_s8 = sld [smem:[#allocation7 + $0x8b]] }
 0x417   : > { %v1637_v38 = vpop.permute.xlu2 %1636 }
 0x41f   : > { %v1661_v53 = vpop.permute.xlu2 %1660 }
 0x427   : > { %v1695_v15 = vpop.permute.xlu2 %1694 }
 0x42f   : > { %v1625_v40 = vpop.permute.xlu1 %1624  ;;  %v1711_v16 = vpop.permute.xlu2 %1710 }
 0x430   : > { %v1623_v35 = vpop.permute.xlu0 %1622  ;;  %v1629_v39 = vadd.f32 %v1625_v40, %v1615_v42  ;;  %v1824_v40 = vstv %s3480_s16  ;;  %s4930_s16 = sld [smem:[#allocation10 + $0x505]] }
 0x431   : > { %v1628_v31 = vadd.f32 %v1623_v35, %v1614_v41  ;;  %v1846_v35 = vstv %s4870_s17  ;;  %v1885_v41 = vmul.f32 %v1883_v28, %v4809_v0  ;;  %s4939_s17 = sld [smem:[#allocation7 + $0x10b]] }
 0x433   : > { %v1642_v60 = vadd.f32 %v1637_v38, %v1628_v31  ;;  %v1889_v38 = vstv %s3490_s27  ;;  %v1897_v31 = vstv %s3493_s10  ;;  %s4928_s27 = sld [smem:[#allocation10 + $0x507]] }
 0x434   : > { %v1891_v42 = vmul.f32 %v4813_v3, %v1889_v38  ;;  %s4952_s10 = sld [smem:[#allocation7 + $0x18b]] }
 0x435   : > { %v1650_v54 = vadd.f32 %v1648_v46, %v1642_v60  ;;  %v1905_v46 = vstv %s3496_s11  ;;  %s4959_s11 = sld [smem:[#allocation10 + $0x508]] }
 0x436   : > { %v1893_v60 = vadd.f32 %v1891_v42, %v1885_v41  ;;  %v1907_v17 = vmul.f32 %v4834_v9, %v1905_v46 }
 0x437   : > { %v1659_v13 = vpop.permute.xlu1 %1658 }
 0x438   : > { %v1639_v11 = vpop.permute.xlu0 %1638  ;;  %v1664_v14 = vadd.f32 %v1659_v13, %v1650_v54 }
 0x439   : > { %v1643_v21 = vadd.f32 %v1639_v11, %v1629_v39  ;;  %v1890_v39 = vmul.f32 %v4605_v32, %v1889_v38  ;;  %v1898_v32 = vmul.f32 %v4618_v47, %v1897_v31  ;;  %v1911_v47 = vstv %s3497_s13  ;;  %s3498_s13 = sld [smem:[#allocation10 + $0x500]] }
 0x43b   : > { %v1651_v34 = vadd.f32 %v1649_v45, %v1643_v21  ;;  %v1899_v21 = vmul.f32 %v4821_v49, %v1897_v31  ;;  %v1860_v45 = vstv %s3483_s12  ;;  %s3520_s12 = sld [smem:[#allocation8 + $0xb]] }
 0x43d   : > { %v1665_v7 = vadd.f32 %v1661_v53, %v1651_v34  ;;  %v1884_v53 = vmul.f32 %v1883_v28, %v4602_v19  ;;  %v1901_v34 = vadd.f32 %v1899_v21, %v1893_v60 }
 0x43f   : > { %v1675_v37 = vpop.permute.xlu1 %1674  ;;  %v1892_v19 = vadd.f32 %v1890_v39, %v1884_v53 }
 0x440   : > { %v1673_v1 = vpop.permute.xlu0 %1672  ;;  %v1679_v20 = vadd.f32 %v1675_v37, %v1665_v7  ;;  %v1906_v37 = vmul.f32 %v4628_v57, %v1905_v46 }
 0x441   : > { %v1678_v8 = vadd.f32 %v1673_v1, %v1664_v14  ;;  %v1900_v14 = vadd.f32 %v1898_v32, %v1892_v19 }
 0x442   : > { %v1687_v10 = vadd.f32 %v1685_v23, %v1679_v20 }
 0x443   : > { %v1686_v48 = vadd.f32 %v1684_v59, %v1678_v8  ;;  %v1909_v59 = vadd.f32 %v1907_v17, %v1901_v34  ;;  %v1908_v8 = vadd.f32 %v1906_v37, %v1900_v14  ;;  %v1967_v17 = vstv %s3502_s22  ;;  %s3533_s22 = sld [smem:[#allocation7 + $0xc]] }
 0x445   : > { %v1700_v52 = vadd.f32 %v1695_v15, %v1686_v48  ;;  %v1913_v20 = vadd.f32 %v1911_v47, %v1909_v59  ;;  %v1912_v48 = vadd.f32 %v1911_v47, %v1908_v8  ;;  %v4949_v59 = vld [vmem:[%s4047_s6 + $0x10] sm:$0xff]  ;;  %v2046_v47 = vstv %s4926_s8  ;;  %s3526_s8 = sld [smem:[#allocation10 + $0x585]] }
 0x447   : > { %v1709_v43 = vpop.permute.xlu1 %1708 }
 0x448   : > { %v1714_v30 = vadd.f32 %v1709_v43, %v1700_v52  ;;  %v1697_v61 = vpop.permute.xlu0 %1696 }
 0x449   : > { %v1701_v56 = vadd.f32 %v1697_v61, %v1687_v10 }
 0x44a   : > { %v1718_v22 = vadd.f32 %v1717_v5, %v1714_v30 }
 0x44b   : > { %v1715_v63 = vadd.f32 %v1711_v16, %v1701_v56 }
 0x44c   : > { %3462 = vst.msk [vmem:[%s4470_s23 + $0x80] sm:$0xff] %vm464_vm3, %v1718_v22 }
 0x44d   : > { %v1719_v2 = vadd.f32 %v1717_v5, %v1715_v63  ;;  %v1770_v5 = vstv %s3475_s14  ;;  %v1804_v63 = vstv %s3478_s15  ;;  %s3501_s14 = sld [smem:[#allocation10 + $0x503]] }
 0x44e   : > { %s3504_s15 = sld [smem:[#allocation10 + $0x506]] }
 0x44f   : > { %3463 = vst.msk [vmem:[%s4470_s23 + $0x88] sm:$0xff] %vm464_vm3, %v1719_v2  ;;  %v1762_v6 = vpop.permute.xlu1 %1761 }
 0x450   : > { %1766 = vst.msk [vmem:[#allocation2 + $0x9] sm:$0xff] %vm351_vm2, %v1762_v6  ;;  %v1760_v27 = vpop.permute.xlu0 %1759 }
 0x451   : > { %1765 = vst.msk [vmem:[#allocation2 + $0x1] sm:$0xff] %vm351_vm2, %v1760_v27 }
 0x457   : > { %v4868_v4 = vld [vmem:[#allocation2 + $0x9] sm:$0xff] }
 0x458   : > { %v4856_v44 = vld [vmem:[#allocation2 + $0x8] sm:$0xff]  ;;  %v4858_v58 = vld [vmem:[#allocation2] sm:$0xff]  ;;  %v1812_v25 = vmul.f32 %v1810_v36, %v4868_v4  ;;  %v1826_v13 = vmul.f32 %v1824_v40, %v4868_v4 }
 0x459   : > { %v1776_v55 = vmul.f32 %v1774_v12, %v4856_v44  ;;  %v1789_v62 = vmul.f32 %v1788_v26, %v4858_v58  ;;  %v1775_v33 = vmul.f32 %v1774_v12, %v4858_v58  ;;  %v4866_v29 = vld [vmem:[#allocation2 + $0x1] sm:$0xff]  ;;  %v1790_v18 = vmul.f32 %v1788_v26, %v4856_v44  ;;  %v1838_v54 = vld [vmem:[#allocation2 + $0xa] sm:$0xff] }
 0x45a   : > { %v1811_v51 = vmul.f32 %v1810_v36, %v4866_v29  ;;  %v4878_v24 = vld [vmem:[#allocation2 + $0x2] sm:$0xff]  ;;  %v1825_v11 = vmul.f32 %v1824_v40, %v4866_v29  ;;  %v1862_v1 = vmul.f32 %v1860_v45, %v1838_v54  ;;  %v1848_v7 = vmul.f32 %v1846_v35, %v1838_v54 }
 0x45b   : > { %1781 = vrot.lane.b32.xlu0 %v1776_v55, %s3911_s21  ;;  %1793 = vrot.lane.b32.xlu1 %v1789_v62, %s3912_s25  ;;  %v1847_v50 = vmul.f32 %v1846_v35, %v4878_v24  ;;  %v1861_v15 = vmul.f32 %v1860_v45, %v4878_v24  ;;  %v1771_v61 = vmul.f32 %v1770_v5, %v4858_v58  ;;  %v1840_v36 = vstv %s3481_s18  ;;  %s3507_s18 = sld [smem:[#allocation11 + $0xa]] }
 0x45c   : > { %1779 = vrot.lane.b32.xlu2 %v1775_v33, %s3911_s21  ;;  %v1772_v56 = vmul.f32 %v1770_v5, %v4856_v44  ;;  %v1805_v26 = vmul.f32 %v1804_v63, %v4866_v29  ;;  %v1806_v58 = vmul.f32 %v1804_v63, %v4868_v4  ;;  %v1842_v35 = vmul.f32 %v1840_v36, %v1838_v54 }
 0x45d   : > { %v1841_v53 = vmul.f32 %v1840_v36, %v4878_v24  ;;  %v2062_v63 = vstv %s4952_s10  ;;  %s3529_s10 = sld [smem:[#allocation10 + $0x588]] }
 0x463   : > { %1815 = vrot.lane.b32.xlu0 %v1811_v51, %s3911_s21  ;;  %1817 = vrot.lane.b32.xlu1 %v1812_v25, %s3911_s21  ;;  %v1931_v25 = vstv %s4903_s26  ;;  %s3522_s26 = sld [smem:[#allocation10 + $0x581]] }
 0x464   : > { %1795 = vrot.lane.b32.xlu2 %v1790_v18, %s3912_s25  ;;  %v1945_v18 = vstv %s4905_s30  ;;  %s3523_s30 = sld [smem:[#allocation10 + $0x582]] }
 0x46b   : > { %1831 = vrot.lane.b32.xlu0 %v1826_v13, %s3912_s25  ;;  %1851 = vrot.lane.b32.xlu1 %v1847_v50, %s3911_s21 }
 0x46c   : > { %1829 = vrot.lane.b32.xlu2 %v1825_v11, %s3912_s25  ;;  %v1874_v11 = vstv %s3484_s7  ;;  %s3525_s7 = sld [smem:[#allocation10 + $0x584]] }
 0x473   : > { %1865 = vrot.lane.b32.xlu0 %v1861_v15, %s3912_s25  ;;  %1867 = vrot.lane.b32.xlu1 %v1862_v1, %s3912_s25  ;;  %v4945_v1 = vld [vmem:[%s4047_s6] sm:$0xff] }
 0x474   : > { %1853 = vrot.lane.b32.xlu2 %v1848_v7, %s3911_s21  ;;  %v2040_v7 = vstv %s4924_s29  ;;  %s3536_s29 = sld [smem:[#allocation7 + $0x8c]] }
 0x47b   : > { %1918 = vrot.lane.b32.xlu0 %v1913_v20, %s3909_s9 }
 0x47c   : > { %1916 = vrot.lane.b32.xlu2 %v1912_v48, %s3909_s9  ;;  %v2003_v48 = vstv %s4928_s27  ;;  %s5018_s27 = sld [smem:[#allocation10 + $0x587]] }
 0x4b6   : > { %v1780_v57 = vpop.permute.xlu2 %1779 }
 0x4b7   : > { %v1785_v16 = vadd.f32 %v1780_v57, %v1771_v61  ;;  %v1981_v57 = vstv %s4930_s16  ;;  %s3539_s16 = sld [smem:[#allocation7 + $0x10c]] }
 0x4be   : > { %v1796_v23 = vpop.permute.xlu2 %1795 }
 0x4c6   : > { %v1830_v52 = vpop.permute.xlu2 %1829 }
 0x4cd   : > { %v1782_v43 = vpop.permute.xlu0 %1781  ;;  %v1794_v10 = vpop.permute.xlu1 %1793 }
 0x4ce   : > { %v1854_v30 = vpop.permute.xlu2 %1853  ;;  %v1786_v22 = vadd.f32 %v1782_v43, %v1772_v56  ;;  %v1799_v2 = vadd.f32 %v1794_v10, %v1785_v16  ;;  %v4967_v10 = vld [vmem:[%s4047_s6 + $0x20] sm:$0xff] }
 0x4d0   : > { %v1800_v12 = vadd.f32 %v1796_v23, %v1786_v22  ;;  %v1807_v44 = vadd.f32 %v1805_v26, %v1799_v2  ;;  %v2041_v23 = vmul.f32 %v2040_v7, %v4945_v1  ;;  %v4976_v22 = vld [vmem:[%s4047_s6 + $0x30] sm:$0xff] }
 0x4d2   : > { %v1808_v33 = vadd.f32 %v1806_v58, %v1800_v12  ;;  %v2048_v12 = vmul.f32 %v4813_v3, %v2046_v47 }
 0x4d5   : > { %v1816_v6 = vpop.permute.xlu0 %1815  ;;  %v1818_v27 = vpop.permute.xlu1 %1817 }
 0x4d6   : > { %v1917_v55 = vpop.permute.xlu2 %1916  ;;  %v1821_v62 = vadd.f32 %v1816_v6, %v1807_v44  ;;  %v1822_v51 = vadd.f32 %v1818_v27, %v1808_v33  ;;  %v2017_v6 = vstv %s4959_s11  ;;  %v2042_v27 = vmul.f32 %v2040_v7, %v4809_v0  ;;  %s3543_s11 = sld [smem:[#allocation8 + $0xc]] }
 0x4d7   : > { %1922 = vst.msk [vmem:[#allocation2 + $0x1] sm:$0xff] %vm351_vm2, %v1917_v55  ;;  %v2063_v55 = vmul.f32 %v4976_v22, %v2062_v63 }
 0x4d8   : > { %v1835_v40 = vadd.f32 %v1830_v52, %v1821_v62  ;;  %v2047_v52 = vmul.f32 %v4949_v59, %v2046_v47  ;;  %v2050_v33 = vadd.f32 %v2048_v12, %v2042_v27  ;;  %v1997_v47 = vstv %s3504_s15  ;;  %s3530_s15 = sld [smem:[#allocation11 + $0xb]] }
 0x4da   : > { %v1843_v39 = vadd.f32 %v1841_v53, %v1835_v40  ;;  %v2049_v56 = vadd.f32 %v2047_v52, %v2041_v23 }
 0x4dd   : > { %v1832_v28 = vpop.permute.xlu0 %1831  ;;  %v1852_v38 = vpop.permute.xlu1 %1851 }
 0x4de   : > { %v1836_v41 = vadd.f32 %v1832_v28, %v1822_v51  ;;  %v4912_v42 = vld [vmem:[#allocation2] sm:$0xff]  ;;  %v1857_v13 = vadd.f32 %v1852_v38, %v1843_v39  ;;  %v2064_v28 = vmul.f32 %v4834_v9, %v2062_v63  ;;  %v1927_v39 = vstv %s3498_s13  ;;  %s3524_s13 = sld [smem:[#allocation10 + $0x583]] }
 0x4df   : > { %v1932_v29 = vmul.f32 %v1931_v25, %v4912_v42  ;;  %v1946_v31 = vmul.f32 %v1945_v18, %v4912_v42  ;;  %v4954_v8 = vld [vmem:[#allocation2 + $0x1] sm:$0xff] }
 0x4e0   : > { %v1844_v4 = vadd.f32 %v1842_v35, %v1836_v41  ;;  %v1968_v5 = vmul.f32 %v1967_v17, %v4954_v8  ;;  %v1982_v61 = vmul.f32 %v1981_v57, %v4954_v8 }
 0x4e1   : > { %1936 = vrot.lane.b32.xlu1 %v1932_v29, %s3911_s21  ;;  %1950 = vrot.lane.b32.xlu0 %v1946_v31, %s3912_s25 }
 0x4e2   : > { %v1858_v50 = vadd.f32 %v1854_v30, %v1844_v4  ;;  %v2054_v30 = vstv %s4939_s17  ;;  %s3542_s17 = sld [smem:[#allocation7 + $0x18c]] }
 0x4e3   : > { %v2055_v16 = vmul.f32 %v4967_v10, %v2054_v30  ;;  %v2056_v36 = vmul.f32 %v4821_v49, %v2054_v30 }
 0x4e5   : > { %v1866_v60 = vpop.permute.xlu0 %1865  ;;  %v1868_v21 = vpop.permute.xlu1 %1867  ;;  %v2057_v26 = vadd.f32 %v2055_v16, %v2049_v56 }
 0x4e6   : > { %v1871_v46 = vadd.f32 %v1866_v60, %v1857_v13  ;;  %v1872_v19 = vadd.f32 %v1868_v21, %v1858_v50  ;;  %v1928_v50 = vmul.f32 %v1927_v39, %v4912_v42 }
 0x4e7   : > { %v2065_v51 = vadd.f32 %v2063_v55, %v2057_v26 }
 0x4e8   : > { %v1875_v32 = vadd.f32 %v1874_v11, %v1871_v46  ;;  %v1876_v45 = vadd.f32 %v1874_v11, %v1872_v19 }
 0x4ea   : > { %3485 = vst.msk [vmem:[%s4470_s23 + $0x90] sm:$0xff] %vm464_vm3, %v1875_v32  ;;  %v1961_v32 = vstv %s3501_s14  ;;  %s3527_s14 = sld [smem:[#allocation10 + $0x586]] }
 0x4eb   : > { %3486 = vst.msk [vmem:[%s4470_s23 + $0x98] sm:$0xff] %vm464_vm3, %v1876_v45 }
 0x4ed   : > { %v1919_v54 = vpop.permute.xlu0 %1918 }
 0x4ee   : > { %1923 = vst.msk [vmem:[#allocation2 + $0x9] sm:$0xff] %vm351_vm2, %v1919_v54 }
 0x4f5   : > { %v4932_v24 = vld [vmem:[#allocation2 + $0x8] sm:$0xff] }
 0x4f6   : > { %v4934_v34 = vld [vmem:[#allocation2 + $0x9] sm:$0xff]  ;;  %v1933_v14 = vmul.f32 %v1931_v25, %v4932_v24  ;;  %v1947_v15 = vmul.f32 %v1945_v18, %v4932_v24  ;;  %v2068_v25 = vstv %s3520_s12  ;;  %v2058_v18 = vadd.f32 %v2056_v36, %v2050_v33  ;;  %s3521_s12 = sld [smem:[#allocation10 + $0x580]] }
 0x4f7   : > { %v1969_v37 = vmul.f32 %v1967_v17, %v4934_v34  ;;  %v4956_v20 = vld [vmem:[#allocation2 + $0x2] sm:$0xff]  ;;  %v1995_v2 = vld [vmem:[#allocation2 + $0xa] sm:$0xff]  ;;  %v1983_v44 = vmul.f32 %v1981_v57, %v4934_v34  ;;  %v2069_v38 = vadd.f32 %v2068_v25, %v2065_v51  ;;  %v1929_v11 = vmul.f32 %v1927_v39, %v4932_v24 }
 0x4f8   : > { %1938 = vrot.lane.b32.xlu2 %v1933_v14, %s3911_s21  ;;  %1952 = vrot.lane.b32.xlu1 %v1947_v15, %s3912_s25  ;;  %v2004_v43 = vmul.f32 %v2003_v48, %v4956_v20  ;;  %v2019_v58 = vmul.f32 %v2017_v6, %v1995_v2  ;;  %v2005_v62 = vmul.f32 %v2003_v48, %v1995_v2 }
 0x4f9   : > { %1974 = vrot.lane.b32.xlu0 %v1969_v37, %s3911_s21  ;;  %v2018_v40 = vmul.f32 %v2017_v6, %v4956_v20  ;;  %v2066_v35 = vadd.f32 %v2064_v28, %v2058_v18  ;;  %v1963_v17 = vmul.f32 %v1961_v32, %v4934_v34  ;;  %v1962_v37 = vmul.f32 %v1961_v32, %v4954_v8 }
 0x4fa   : > { %v1998_v52 = vmul.f32 %v1997_v47, %v4956_v20  ;;  %v1999_v8 = vmul.f32 %v1997_v47, %v1995_v2  ;;  %v2102_v2 = vstv %s3523_s30  ;;  %v2124_v18 = vstv %s3525_s7  ;;  %s3548_s30 = sld [smem:[#allocation10 + $0x604]] }
 0x4fb   : > { %v2070_v41 = vadd.f32 %v2068_v25, %v2066_v35  ;;  %s3556_s7 = sld [smem:[#allocation7 + $0xd]] }
 0x500   : > { %1972 = vrot.lane.b32.xlu2 %v1968_v5, %s3911_s21  ;;  %1986 = vrot.lane.b32.xlu1 %v1982_v61, %s3912_s25  ;;  %v2031_v61 = vstv %s3507_s18  ;;  %s3545_s18 = sld [smem:[#allocation10 + $0x601]] }
 0x501   : > { %2008 = vrot.lane.b32.xlu0 %v2004_v43, %s3911_s21 }
 0x508   : > { %1988 = vrot.lane.b32.xlu2 %v1983_v44, %s3912_s25  ;;  %2010 = vrot.lane.b32.xlu1 %v2005_v62, %s3911_s21  ;;  %v2088_v44 = vstv %s3522_s26  ;;  %s3546_s26 = sld [smem:[#allocation10 + $0x602]] }
 0x509   : > { %2024 = vrot.lane.b32.xlu0 %v2019_v58, %s3912_s25 }
 0x510   : > { %2022 = vrot.lane.b32.xlu2 %v2018_v40, %s3912_s25  ;;  %2073 = vrot.lane.b32.xlu1 %v2069_v38, %s3909_s9 }
 0x518   : > { %2075 = vrot.lane.b32.xlu2 %v2070_v41, %s3909_s9  ;;  %v2197_v41 = vstv %s3533_s22  ;;  %s3559_s22 = sld [smem:[#allocation7 + $0x8d]] }
 0x519   : > { %v2199_v39 = vmul.f32 %v2197_v41, %v4809_v0 }
 0x552   : > { %v1939_v29 = vpop.permute.xlu2 %1938 }
 0x553   : > { %v1951_v4 = vpop.permute.xlu0 %1950  ;;  %v1937_v13 = vpop.permute.xlu1 %1936  ;;  %v1943_v21 = vadd.f32 %v1939_v29, %v1929_v11  ;;  %v2203_v29 = vstv %s3536_s29  ;;  %v2198_v11 = vmul.f32 %v2197_v41, %v4945_v1  ;;  %s3549_s29 = sld [smem:[#allocation10 + $0x605]] }
 0x554   : > { %v1942_v60 = vadd.f32 %v1937_v13, %v1928_v50  ;;  %v2205_v13 = vmul.f32 %v4813_v3, %v2203_v29  ;;  %v2211_v50 = vstv %s3539_s16  ;;  %s3565_s16 = sld [smem:[#allocation7 + $0x18d]] }
 0x556   : > { %v1956_v54 = vadd.f32 %v1951_v4, %v1942_v60  ;;  %v2204_v60 = vmul.f32 %v4949_v59, %v2203_v29  ;;  %v2207_v32 = vadd.f32 %v2205_v13, %v2199_v39 }
 0x558   : > { %v1964_v7 = vadd.f32 %v1962_v37, %v1956_v54  ;;  %v2219_v54 = vstv %s3542_s17  ;;  %v2174_v37 = vstv %s3529_s10  ;;  %s3552_s17 = sld [smem:[#allocation10 + $0x608]] }
 0x559   : > { %v2221_v47 = vmul.f32 %v4834_v9, %v2219_v54  ;;  %s3566_s10 = sld [smem:[#allocation8 + $0xd]] }
 0x55a   : > { %v1973_v31 = vpop.permute.xlu2 %1972 }
 0x55b   : > { %v1978_v42 = vadd.f32 %v1973_v31, %v1964_v7  ;;  %v2138_v31 = vstv %s3526_s8  ;;  %s5074_s8 = sld [smem:[#allocation10 + $0x607]] }
 0x562   : > { %v1989_v53 = vpop.permute.xlu2 %1988 }
 0x56a   : > { %v2023_v46 = vpop.permute.xlu2 %2022  ;;  %v1953_v45 = vpop.permute.xlu1 %1952 }
 0x56b   : > { %v1975_v19 = vpop.permute.xlu0 %1974  ;;  %v1957_v14 = vadd.f32 %v1953_v45, %v1943_v21  ;;  %v2213_v45 = vmul.f32 %v4821_v49, %v2211_v50 }
 0x56d   : > { %v1965_v15 = vadd.f32 %v1963_v17, %v1957_v14  ;;  %v2206_v17 = vadd.f32 %v2204_v60, %v2198_v11  ;;  %v2212_v14 = vmul.f32 %v4967_v10, %v2211_v50  ;;  %v2215_v7 = vadd.f32 %v2213_v45, %v2207_v32 }
 0x56e   : > { %v2188_v11 = vstv %s3530_s15  ;;  %s5109_s15 = sld [smem:[#allocation10 + $0x682]] }
 0x56f   : > { %v1979_v48 = vadd.f32 %v1975_v19, %v1965_v15 }
 0x571   : > { %v1993_v34 = vadd.f32 %v1989_v53, %v1979_v48  ;;  %v2160_v53 = vstv %s5018_s27  ;;  %v2220_v48 = vmul.f32 %v4976_v22, %v2219_v54  ;;  %s3562_s27 = sld [smem:[#allocation7 + $0x10d]] }
 0x572   : > { %v2076_v24 = vpop.permute.xlu2 %2075  ;;  %v1987_v23 = vpop.permute.xlu1 %1986 }
 0x573   : > { %v2009_v57 = vpop.permute.xlu0 %2008  ;;  %2080 = vst.msk [vmem:[#allocation2 + $0x9] sm:$0xff] %vm351_vm2, %v2076_v24  ;;  %v1992_v5 = vadd.f32 %v1987_v23, %v1978_v42  ;;  %v2001_v16 = vadd.f32 %v1999_v8, %v1993_v34  ;;  %v2214_v42 = vadd.f32 %v2212_v14, %v2206_v17 }
 0x575   : > { %v2000_v43 = vadd.f32 %v1998_v52, %v1992_v5  ;;  %v2223_v52 = vadd.f32 %v2221_v47, %v2215_v7  ;;  %v2225_v5 = vstv %s3543_s11  ;;  %s3544_s11 = sld [smem:[#allocation10 + $0x600]] }
 0x577   : > { %v2014_v30 = vadd.f32 %v2009_v57, %v2000_v43  ;;  %v2222_v43 = vadd.f32 %v2220_v48, %v2214_v42  ;;  %v2227_v34 = vadd.f32 %v2225_v5, %v2223_v52 }
 0x579   : > { %v2028_v56 = vadd.f32 %v2023_v46, %v2014_v30  ;;  %v2226_v30 = vadd.f32 %v2225_v5, %v2222_v43 }
 0x57a   : > { %v2011_v63 = vpop.permute.xlu1 %2010  ;;  %v5016_v28 = vld [vmem:[#allocation2 + $0x9] sm:$0xff] }
 0x57b   : > { %v2015_v6 = vadd.f32 %v2011_v63, %v2001_v16  ;;  %v2032_v27 = vadd.f32 %v2031_v61, %v2028_v56  ;;  %v2025_v12 = vpop.permute.xlu0 %2024  ;;  %v2126_v40 = vmul.f32 %v2124_v18, %v5016_v28  ;;  %v2140_v21 = vmul.f32 %v2138_v31, %v5016_v28  ;;  %v2152_v15 = vld [vmem:[#allocation2 + $0xa] sm:$0xff] }
 0x57c   : > { %v2176_v57 = vmul.f32 %v2174_v37, %v2152_v15  ;;  %v2162_v23 = vmul.f32 %v2160_v53, %v2152_v15  ;;  %v2084_v56 = vstv %s3521_s12  ;;  %s3547_s12 = sld [smem:[#allocation10 + $0x603]] }
 0x57d   : > { %v2029_v26 = vadd.f32 %v2025_v12, %v2015_v6  ;;  %3508 = vst.msk [vmem:[%s4470_s23 + $0xa0] sm:$0xff] %vm464_vm3, %v2032_v27 }
 0x57f   : > { %v2033_v55 = vadd.f32 %v2031_v61, %v2029_v26 }
 0x581   : > { %3509 = vst.msk [vmem:[%s4470_s23 + $0xa8] sm:$0xff] %vm464_vm3, %v2033_v55 }
 0x582   : > { %v2074_v20 = vpop.permute.xlu1 %2073 }
 0x583   : > { %2079 = vst.msk [vmem:[#allocation2 + $0x1] sm:$0xff] %vm351_vm2, %v2074_v20  ;;  %v2118_v20 = vstv %s3524_s13  ;;  %s3550_s13 = sld [smem:[#allocation10 + $0x606]] }
 0x58a   : > { %v5004_v58 = vld [vmem:[#allocation2 + $0x8] sm:$0xff]  ;;  %v5006_v62 = vld [vmem:[#allocation2] sm:$0xff] }
 0x58b   : > { %v2090_v33 = vmul.f32 %v2088_v44, %v5004_v58  ;;  %v2103_v36 = vmul.f32 %v2102_v2, %v5006_v62  ;;  %v2089_v51 = vmul.f32 %v2088_v44, %v5006_v62  ;;  %v5014_v25 = vld [vmem:[#allocation2 + $0x1] sm:$0xff]  ;;  %v2104_v35 = vmul.f32 %v2102_v2, %v5004_v58 }
 0x58c   : > { %v2125_v38 = vmul.f32 %v2124_v18, %v5014_v25  ;;  %v5026_v4 = vld [vmem:[#allocation2 + $0x2] sm:$0xff]  ;;  %v2139_v19 = vmul.f32 %v2138_v31, %v5014_v25  ;;  %v2085_v63 = vmul.f32 %v2084_v56, %v5006_v62  ;;  %v2086_v6 = vmul.f32 %v2084_v56, %v5004_v58 }
 0x58d   : > { %2095 = vrot.lane.b32.xlu1 %v2090_v33, %s3911_s21  ;;  %2107 = vrot.lane.b32.xlu2 %v2103_v36, %s3912_s25  ;;  %v2161_v46 = vmul.f32 %v2160_v53, %v5026_v4  ;;  %v2175_v24 = vmul.f32 %v2174_v37, %v5026_v4  ;;  %v2119_v36 = vmul.f32 %v2118_v20, %v5014_v25  ;;  %v2245_v37 = vstv %s3545_s18  ;;  %s3553_s18 = sld [smem:[#allocation11 + $0xc]] }
 0x58e   : > { %2093 = vrot.lane.b32.xlu0 %v2089_v51, %s3911_s21  ;;  %v2120_v51 = vmul.f32 %v2118_v20, %v5016_v28 }
 0x595   : > { %2129 = vrot.lane.b32.xlu1 %v2125_v38, %s3911_s21  ;;  %2131 = vrot.lane.b32.xlu2 %v2126_v40, %s3911_s21  ;;  %v2154_v40 = vstv %s3527_s14  ;;  %s5107_s14 = sld [smem:[#allocation10 + $0x681]] }
 0x596   : > { %2109 = vrot.lane.b32.xlu0 %v2104_v35, %s3912_s25  ;;  %v2155_v31 = vmul.f32 %v2154_v40, %v5026_v4  ;;  %v2156_v50 = vmul.f32 %v2154_v40, %v2152_v15  ;;  %v2259_v15 = vstv %s3546_s26  ;;  %s3571_s26 = sld [smem:[#allocation10 + $0x684]] }
 0x59d   : > { %2145 = vrot.lane.b32.xlu1 %v2140_v21, %s3912_s25  ;;  %2165 = vrot.lane.b32.xlu2 %v2161_v46, %s3911_s21 }
 0x59e   : > { %2143 = vrot.lane.b32.xlu0 %v2139_v19, %s3912_s25 }
 0x5a5   : > { %2179 = vrot.lane.b32.xlu1 %v2175_v24, %s3912_s25  ;;  %2181 = vrot.lane.b32.xlu2 %v2176_v57, %s3912_s25 }
 0x5a6   : > { %2167 = vrot.lane.b32.xlu0 %v2162_v23, %s3911_s21  ;;  %v2281_v23 = vstv %s3548_s30  ;;  %s5128_s30 = sld [smem:[#allocation7 + $0xe]] }
 0x5ad   : > { %2232 = vrot.lane.b32.xlu1 %v2227_v34, %s3909_s9 }
 0x5ae   : > { %2230 = vrot.lane.b32.xlu0 %v2226_v30, %s3909_s9  ;;  %v2354_v30 = vstv %s3556_s7  ;;  %s5130_s7 = sld [smem:[#allocation7 + $0x8e]] }
 0x5e7   : > { %v2108_v8 = vpop.permute.xlu2 %2107 }
 0x5ef   : > { %v2132_v12 = vpop.permute.xlu2 %2131 }
 0x5f7   : > { %v2166_v58 = vpop.permute.xlu2 %2165 }
 0x5ff   : > { %v2096_v61 = vpop.permute.xlu1 %2095  ;;  %v2182_v32 = vpop.permute.xlu2 %2181 }
 0x600   : > { %v2094_v16 = vpop.permute.xlu0 %2093  ;;  %v2100_v26 = vadd.f32 %v2096_v61, %v2086_v6  ;;  %v2295_v61 = vstv %s3549_s29  ;;  %s5134_s29 = sld [smem:[#allocation10 + $0x685]] }
 0x601   : > { %v2099_v27 = vadd.f32 %v2094_v16, %v2085_v63  ;;  %v2317_v16 = vstv %s5074_s8  ;;  %v2356_v63 = vmul.f32 %v2354_v30, %v4809_v0  ;;  %s5143_s8 = sld [smem:[#allocation7 + $0x10e]] }
 0x603   : > { %v2113_v2 = vadd.f32 %v2108_v8, %v2099_v27  ;;  %v2360_v8 = vstv %s3559_s22  ;;  %v2368_v27 = vstv %s3562_s27  ;;  %s5132_s22 = sld [smem:[#allocation10 + $0x687]] }
 0x604   : > { %v2362_v6 = vmul.f32 %v4813_v3, %v2360_v8  ;;  %v2370_v0 = vmul.f32 %v4821_v49, %v2368_v27  ;;  %v2376_v3 = vstv %s3565_s16  ;;  %s5150_s27 = sld [smem:[#allocation7 + $0x18e]] }
 0x605   : > { %v2121_v18 = vadd.f32 %v2119_v36, %v2113_v2  ;;  %v2369_v36 = vmul.f32 %v4967_v10, %v2368_v27  ;;  %v2378_v40 = vmul.f32 %v4834_v9, %v2376_v3  ;;  %s5157_s16 = sld [smem:[#allocation10 + $0x688]] }
 0x606   : > { %v2364_v2 = vadd.f32 %v2362_v6, %v2356_v63 }
 0x607   : > { %v2130_v55 = vpop.permute.xlu1 %2129 }
 0x608   : > { %v2110_v44 = vpop.permute.xlu0 %2109  ;;  %v2135_v35 = vadd.f32 %v2130_v55, %v2121_v18 }
 0x609   : > { %v2114_v33 = vadd.f32 %v2110_v44, %v2100_v26  ;;  %v2361_v26 = vmul.f32 %v4949_v59, %v2360_v8 }
 0x60b   : > { %v2122_v38 = vadd.f32 %v2120_v51, %v2114_v33  ;;  %v2331_v51 = vstv %s3552_s17  ;;  %s3589_s17 = sld [smem:[#allocation8 + $0xe]] }
 0x60d   : > { %v2136_v29 = vadd.f32 %v2132_v12, %v2122_v38  ;;  %v2355_v12 = vmul.f32 %v2354_v30, %v4945_v1  ;;  %v2372_v38 = vadd.f32 %v2370_v0, %v2364_v2 }
 0x60f   : > { %v2146_v62 = vpop.permute.xlu1 %2145  ;;  %v2363_v33 = vadd.f32 %v2361_v26, %v2355_v12  ;;  %v2380_v49 = vadd.f32 %v2378_v40, %v2372_v38  ;;  %v2438_v40 = vstv %s3571_s26  ;;  %s3602_s26 = sld [smem:[#allocation7 + $0xf]] }
 0x610   : > { %v2144_v41 = vpop.permute.xlu0 %2143  ;;  %v2150_v39 = vadd.f32 %v2146_v62, %v2136_v29  ;;  %v2377_v62 = vmul.f32 %v4976_v22, %v2376_v3 }
 0x611   : > { %v2149_v53 = vadd.f32 %v2144_v41, %v2135_v35  ;;  %v2371_v35 = vadd.f32 %v2369_v36, %v2363_v33 }
 0x612   : > { %v2158_v60 = vadd.f32 %v2156_v50, %v2150_v39 }
 0x613   : > { %v2157_v13 = vadd.f32 %v2155_v31, %v2149_v53  ;;  %v2382_v31 = vstv %s3566_s10  ;;  %v2379_v53 = vadd.f32 %v2377_v62, %v2371_v35  ;;  %s3567_s10 = sld [smem:[#allocation10 + $0x680]] }
 0x614   : > { %v2384_v39 = vadd.f32 %v2382_v31, %v2380_v49 }
 0x615   : > { %v2171_v25 = vadd.f32 %v2166_v58, %v2157_v13  ;;  %v2383_v13 = vadd.f32 %v2382_v31, %v2379_v53  ;;  %v2474_v53 = vstv %s5132_s22  ;;  %s3595_s22 = sld [smem:[#allocation10 + $0x705]] }
 0x617   : > { %v2180_v28 = vpop.permute.xlu1 %2179 }
 0x618   : > { %v2185_v21 = vadd.f32 %v2180_v28, %v2171_v25  ;;  %v2168_v46 = vpop.permute.xlu0 %2167 }
 0x619   : > { %v2172_v19 = vadd.f32 %v2168_v46, %v2158_v60 }
 0x61a   : > { %v2189_v45 = vadd.f32 %v2188_v11, %v2185_v21 }
 0x61b   : > { %v2186_v54 = vadd.f32 %v2182_v32, %v2172_v19 }
 0x61c   : > { %3531 = vst.msk [vmem:[%s4470_s23 + $0xb0] sm:$0xff] %vm464_vm3, %v2189_v45 }
 0x61d   : > { %v2190_v17 = vadd.f32 %v2188_v11, %v2186_v54  ;;  %v2241_v11 = vstv %s3544_s11  ;;  %v2275_v54 = vstv %s3547_s12  ;;  %s3570_s11 = sld [smem:[#allocation10 + $0x683]] }
 0x61e   : > { %s3573_s12 = sld [smem:[#allocation10 + $0x686]] }
 0x61f   : > { %3532 = vst.msk [vmem:[%s4470_s23 + $0xb8] sm:$0xff] %vm464_vm3, %v2190_v17  ;;  %v2233_v4 = vpop.permute.xlu1 %2232 }
 0x620   : > { %2237 = vst.msk [vmem:[#allocation2 + $0x9] sm:$0xff] %vm351_vm2, %v2233_v4  ;;  %v2231_v14 = vpop.permute.xlu0 %2230 }
 0x621   : > { %2236 = vst.msk [vmem:[#allocation2 + $0x1] sm:$0xff] %vm351_vm2, %v2231_v14 }
 0x627   : > { %v5072_v52 = vld [vmem:[#allocation2 + $0x9] sm:$0xff] }
 0x628   : > { %v5060_v7 = vld [vmem:[#allocation2 + $0x8] sm:$0xff]  ;;  %v5062_v47 = vld [vmem:[#allocation2] sm:$0xff]  ;;  %v2283_v43 = vmul.f32 %v2281_v23, %v5072_v52  ;;  %v2297_v55 = vmul.f32 %v2295_v61, %v5072_v52 }
 0x629   : > { %v2247_v42 = vmul.f32 %v2245_v37, %v5060_v7  ;;  %v2260_v48 = vmul.f32 %v2259_v15, %v5062_v47  ;;  %v2246_v24 = vmul.f32 %v2245_v37, %v5062_v47  ;;  %v5070_v57 = vld [vmem:[#allocation2 + $0x1] sm:$0xff]  ;;  %v2261_v34 = vmul.f32 %v2259_v15, %v5060_v7  ;;  %v2309_v18 = vld [vmem:[#allocation2 + $0xa] sm:$0xff] }
 0x62a   : > { %v2282_v5 = vmul.f32 %v2281_v23, %v5070_v57  ;;  %v5082_v56 = vld [vmem:[#allocation2 + $0x2] sm:$0xff]  ;;  %v2296_v44 = vmul.f32 %v2295_v61, %v5070_v57  ;;  %v2333_v41 = vmul.f32 %v2331_v51, %v2309_v18  ;;  %v2319_v29 = vmul.f32 %v2317_v16, %v2309_v18 }
 0x62b   : > { %2252 = vrot.lane.b32.xlu0 %v2247_v42, %s3911_s21  ;;  %2264 = vrot.lane.b32.xlu1 %v2260_v48, %s3912_s25  ;;  %v2318_v20 = vmul.f32 %v2317_v16, %v5082_v56  ;;  %v2332_v58 = vmul.f32 %v2331_v51, %v5082_v56  ;;  %v2242_v46 = vmul.f32 %v2241_v11, %v5062_v47  ;;  %v2311_v23 = vstv %s3550_s13  ;;  %s3576_s13 = sld [smem:[#allocation11 + $0xd]] }
 0x62c   : > { %2250 = vrot.lane.b32.xlu2 %v2246_v24, %s3911_s21  ;;  %v2243_v19 = vmul.f32 %v2241_v11, %v5060_v7  ;;  %v2276_v15 = vmul.f32 %v2275_v54, %v5070_v57  ;;  %v2277_v47 = vmul.f32 %v2275_v54, %v5072_v52  ;;  %v2313_v16 = vmul.f32 %v2311_v23, %v2309_v18 }
 0x62d   : > { %v2312_v12 = vmul.f32 %v2311_v23, %v5082_v56  ;;  %v2525_v11 = vstv %s5143_s8  ;;  %s5234_s8 = sld [smem:[#allocation7 + $0x18f]] }
 0x633   : > { %2286 = vrot.lane.b32.xlu0 %v2282_v5, %s3911_s21  ;;  %2288 = vrot.lane.b32.xlu1 %v2283_v43, %s3911_s21  ;;  %v2402_v43 = vstv %s5107_s14  ;;  %s3591_s14 = sld [smem:[#allocation10 + $0x701]] }
 0x634   : > { %2266 = vrot.lane.b32.xlu2 %v2261_v34, %s3912_s25  ;;  %v2416_v34 = vstv %s5109_s15  ;;  %s3592_s15 = sld [smem:[#allocation10 + $0x702]] }
 0x63b   : > { %2302 = vrot.lane.b32.xlu0 %v2297_v55, %s3912_s25  ;;  %2322 = vrot.lane.b32.xlu1 %v2318_v20, %s3911_s21 }
 0x63c   : > { %2300 = vrot.lane.b32.xlu2 %v2296_v44, %s3912_s25  ;;  %v2345_v44 = vstv %s3553_s18  ;;  %s3594_s18 = sld [smem:[#allocation10 + $0x704]] }
 0x643   : > { %2336 = vrot.lane.b32.xlu0 %v2332_v58, %s3912_s25  ;;  %2338 = vrot.lane.b32.xlu1 %v2333_v41, %s3912_s25  ;;  %v2511_v41 = vstv %s5128_s30  ;;  %s3605_s30 = sld [smem:[#allocation7 + $0x8f]] }
 0x644   : > { %2324 = vrot.lane.b32.xlu2 %v2319_v29, %s3911_s21  ;;  %v2517_v29 = vstv %s5130_s7  ;;  %s5227_s7 = sld [smem:[#allocation10 + $0x707]] }
 0x64b   : > { %2389 = vrot.lane.b32.xlu0 %v2384_v39, %s3909_s9  ;;  %v2452_v39 = vstv %s5134_s29  ;;  %s5230_s29 = sld [smem:[#allocation7 + $0x10f]] }
 0x64c   : > { %2387 = vrot.lane.b32.xlu2 %v2383_v13, %s3909_s9  ;;  %v2512_v13 = vmul.f32 %v2511_v41, %v4945_v1  ;;  %v2526_v1 = vmul.f32 %v4967_v10, %v2525_v11 }
 0x686   : > { %v2251_v9 = vpop.permute.xlu2 %2250 }
 0x687   : > { %v2256_v32 = vadd.f32 %v2251_v9, %v2242_v46  ;;  %v2518_v9 = vmul.f32 %v4949_v59, %v2517_v29  ;;  %v5174_v59 = vld [vmem:[%s4047_s6 + $0x18] sm:$0xff]  ;;  %v2533_v46 = vstv %s5150_s27  ;;  %s5238_s27 = sld [smem:[#allocation7 + $0x10]] }
 0x688   : > { %v2519_v54 = vmul.f32 %v5174_v59, %v2517_v29 }
 0x68e   : > { %v2267_v50 = vpop.permute.xlu2 %2266 }
 0x696   : > { %v2301_v25 = vpop.permute.xlu2 %2300 }
 0x69d   : > { %v2253_v28 = vpop.permute.xlu0 %2252  ;;  %v2265_v60 = vpop.permute.xlu1 %2264 }
 0x69e   : > { %v2325_v21 = vpop.permute.xlu2 %2324  ;;  %v2257_v45 = vadd.f32 %v2253_v28, %v2243_v19  ;;  %v2270_v17 = vadd.f32 %v2265_v60, %v2256_v32  ;;  %v2520_v60 = vadd.f32 %v2518_v9, %v2512_v13  ;;  %v2488_v32 = vstv %s5157_s16  ;;  %s5241_s16 = sld [smem:[#allocation7 + $0x90]] }
 0x69f   : > { %v2502_v9 = vstv %s3576_s13  ;;  %s5312_s13 = sld [smem:[#allocation7 + $0x11]] }
 0x6a0   : > { %v2271_v37 = vadd.f32 %v2267_v50, %v2257_v45  ;;  %v2278_v7 = vadd.f32 %v2276_v15, %v2270_v17  ;;  %v2528_v17 = vadd.f32 %v2526_v1, %v2520_v60 }
 0x6a2   : > { %v2279_v24 = vadd.f32 %v2277_v47, %v2271_v37 }
 0x6a5   : > { %v2287_v4 = vpop.permute.xlu0 %2286  ;;  %v2289_v14 = vpop.permute.xlu1 %2288 }
 0x6a6   : > { %v2388_v42 = vpop.permute.xlu2 %2387  ;;  %v2292_v48 = vadd.f32 %v2287_v4, %v2278_v7  ;;  %v2293_v5 = vadd.f32 %v2289_v14, %v2279_v24  ;;  %v2534_v4 = vmul.f32 %v4976_v22, %v2533_v46  ;;  %v5184_v14 = vld [vmem:[%s4047_s6 + $0x28] sm:$0xff]  ;;  %v2539_v22 = vstv %s3589_s17  ;;  %s5252_s17 = sld [smem:[#allocation10 + $0x708]] }
 0x6a7   : > { %2393 = vst.msk [vmem:[#allocation2 + $0x1] sm:$0xff] %vm351_vm2, %v2388_v42  ;;  %v2527_v7 = vmul.f32 %v5184_v14, %v2525_v11 }
 0x6a8   : > { %v2306_v61 = vadd.f32 %v2301_v25, %v2292_v48  ;;  %v2536_v47 = vadd.f32 %v2534_v4, %v2528_v17  ;;  %v5194_v48 = vld [vmem:[%s4047_s6 + $0x38] sm:$0xff] }
 0x6a9   : > { %v2535_v23 = vmul.f32 %v5194_v48, %v2533_v46 }
 0x6aa   : > { %v2314_v26 = vadd.f32 %v2312_v12, %v2306_v61 }
 0x6ad   : > { %v2303_v30 = vpop.permute.xlu0 %2302  ;;  %v2323_v8 = vpop.permute.xlu1 %2322 }
 0x6ae   : > { %v2307_v63 = vadd.f32 %v2303_v30, %v2293_v5  ;;  %v5116_v6 = vld [vmem:[#allocation2] sm:$0xff]  ;;  %v2328_v55 = vadd.f32 %v2323_v8, %v2314_v26  ;;  %v2540_v5 = vadd.f32 %v2539_v22, %v2536_v47 }
 0x6af   : > { %v2403_v57 = vmul.f32 %v2402_v43, %v5116_v6  ;;  %v2417_v27 = vmul.f32 %v2416_v34, %v5116_v6  ;;  %v5152_v49 = vld [vmem:[#allocation2 + $0x1] sm:$0xff] }
 0x6b0   : > { %v2315_v52 = vadd.f32 %v2313_v16, %v2307_v63  ;;  %v2439_v50 = vmul.f32 %v2438_v40, %v5152_v49  ;;  %v2453_v28 = vmul.f32 %v2452_v39, %v5152_v49 }
 0x6b1   : > { %2407 = vrot.lane.b32.xlu1 %v2403_v57, %s3911_s21  ;;  %2421 = vrot.lane.b32.xlu0 %v2417_v27, %s3912_s25  ;;  %v2398_v57 = vstv %s3567_s10  ;;  %s5259_s10 = sld [smem:[#allocation7 + $0x110]] }
 0x6b2   : > { %v2329_v20 = vadd.f32 %v2325_v21, %v2315_v52  ;;  %v5171_v21 = vld [vmem:[%s4047_s6 + $0x8] sm:$0xff]  ;;  %v2399_v52 = vmul.f32 %v2398_v57, %v5116_v6 }
 0x6b3   : > { %v2513_v45 = vmul.f32 %v2511_v41, %v5171_v21 }
 0x6b5   : > { %v2337_v2 = vpop.permute.xlu0 %2336  ;;  %v2339_v0 = vpop.permute.xlu1 %2338  ;;  %v2521_v42 = vadd.f32 %v2519_v54, %v2513_v45  ;;  %v2559_v45 = vstv %s3591_s14  ;;  %s5314_s14 = sld [smem:[#allocation7 + $0x91]] }
 0x6b6   : > { %v2342_v3 = vadd.f32 %v2337_v2, %v2328_v55  ;;  %v2343_v33 = vadd.f32 %v2339_v0, %v2329_v20  ;;  %v2432_v2 = vstv %s3570_s11  ;;  %s5271_s11 = sld [smem:[#allocation8 + $0xf]] }
 0x6b7   : > { %v2529_v24 = vadd.f32 %v2527_v7, %v2521_v42  ;;  %v2595_v7 = vstv %s3594_s18  ;;  %s3590_s18 = sld [smem:[#allocation10 + $0x700]] }
 0x6b8   : > { %v2346_v36 = vadd.f32 %v2345_v44, %v2342_v3  ;;  %v2347_v51 = vadd.f32 %v2345_v44, %v2343_v33 }
 0x6ba   : > { %3554 = vst.msk [vmem:[%s4470_s23 + $0xc0] sm:$0xff] %vm464_vm3, %v2346_v36 }
 0x6bb   : > { %3555 = vst.msk [vmem:[%s4470_s23 + $0xc8] sm:$0xff] %vm464_vm3, %v2347_v51  ;;  %v2433_v51 = vmul.f32 %v2432_v2, %v5152_v49 }
 0x6bd   : > { %v2390_v18 = vpop.permute.xlu0 %2389 }
 0x6be   : > { %2394 = vst.msk [vmem:[#allocation2 + $0x9] sm:$0xff] %vm351_vm2, %v2390_v18 }
 0x6c5   : > { %v5136_v56 = vld [vmem:[#allocation2 + $0x8] sm:$0xff] }
 0x6c6   : > { %v5138_v38 = vld [vmem:[#allocation2 + $0x9] sm:$0xff]  ;;  %v2404_v35 = vmul.f32 %v2402_v43, %v5136_v56  ;;  %v2418_v58 = vmul.f32 %v2416_v34, %v5136_v56  ;;  %v2537_v34 = vadd.f32 %v2535_v23, %v2529_v24  ;;  %v2400_v12 = vmul.f32 %v2398_v57, %v5136_v56 }
 0x6c7   : > { %v2440_v62 = vmul.f32 %v2438_v40, %v5138_v38  ;;  %v5154_v31 = vld [vmem:[#allocation2 + $0x2] sm:$0xff]  ;;  %v5177_v19 = vld [vmem:[#allocation2 + $0xa] sm:$0xff]  ;;  %v2454_v10 = vmul.f32 %v2452_v39, %v5138_v38  ;;  %v2434_v33 = vmul.f32 %v2432_v2, %v5138_v38  ;;  %v2668_v23 = vstv %s3602_s26  ;;  %s5318_s26 = sld [smem:[#allocation7 + $0x191]] }
 0x6c8   : > { %2409 = vrot.lane.b32.xlu2 %v2404_v35, %s3911_s21  ;;  %2423 = vrot.lane.b32.xlu1 %v2418_v58, %s3912_s25  ;;  %v2475_v25 = vmul.f32 %v2474_v53, %v5154_v31  ;;  %v2490_v37 = vmul.f32 %v2488_v32, %v5177_v19  ;;  %v2476_v15 = vmul.f32 %v2474_v53, %v5177_v19  ;;  %v2468_v35 = vstv %s3573_s12  ;;  %s5277_s12 = sld [smem:[#allocation7 + $0x190]] }
 0x6c9   : > { %2445 = vrot.lane.b32.xlu0 %v2440_v62, %s3911_s21  ;;  %v2489_v43 = vmul.f32 %v2488_v32, %v5154_v31  ;;  %v2541_v30 = vadd.f32 %v2539_v22, %v2537_v34  ;;  %v2469_v29 = vmul.f32 %v2468_v35, %v5154_v31  ;;  %v2470_v49 = vmul.f32 %v2468_v35, %v5177_v19  ;;  %v5247_v34 = vld [vmem:[%s4047_s6 + $0x10] sm:$0xff] }
 0x6ca   : > { %v2573_v19 = vstv %s3592_s15  ;;  %v2682_v57 = vstv %s5230_s29  ;;  %s5316_s15 = sld [smem:[#allocation7 + $0x111]] }
 0x6cb   : > { %v2684_v2 = vmul.f32 %v5184_v14, %v2682_v57  ;;  %s3599_s29 = sld [smem:[#allocation11 + $0xe]] }
 0x6d0   : > { %2443 = vrot.lane.b32.xlu2 %v2439_v50, %s3911_s21  ;;  %2457 = vrot.lane.b32.xlu1 %v2453_v28, %s3912_s25 }
 0x6d1   : > { %2479 = vrot.lane.b32.xlu0 %v2475_v25, %s3911_s21 }
 0x6d8   : > { %2459 = vrot.lane.b32.xlu2 %v2454_v10, %s3912_s25  ;;  %2481 = vrot.lane.b32.xlu1 %v2476_v15, %s3911_s21 }
 0x6d9   : > { %2495 = vrot.lane.b32.xlu0 %v2490_v37, %s3912_s25 }
 0x6e0   : > { %2493 = vrot.lane.b32.xlu2 %v2489_v43, %s3912_s25  ;;  %2544 = vrot.lane.b32.xlu1 %v2540_v5, %s3909_s9  ;;  %v2674_v5 = vstv %s3605_s30  ;;  %v5244_v43 = vld [vmem:[%s4047_s6] sm:$0xff]  ;;  %s5320_s30 = sld [smem:[#allocation8 + $0x11]] }
 0x6e8   : > { %2546 = vrot.lane.b32.xlu2 %v2541_v30, %s3909_s9 }
 0x722   : > { %v2410_v8 = vpop.permute.xlu2 %2409 }
 0x723   : > { %v2422_v16 = vpop.permute.xlu0 %2421  ;;  %v2408_v27 = vpop.permute.xlu1 %2407  ;;  %v2414_v55 = vadd.f32 %v2410_v8, %v2400_v12  ;;  %v2631_v8 = vstv %s5227_s7  ;;  %s3593_s7 = sld [smem:[#allocation10 + $0x703]] }
 0x724   : > { %v2413_v26 = vadd.f32 %v2408_v27, %v2399_v52  ;;  %v2669_v27 = vmul.f32 %v2668_v23, %v5244_v43  ;;  %v2675_v52 = vmul.f32 %v5247_v34, %v2674_v5 }
 0x726   : > { %v2427_v3 = vadd.f32 %v2422_v16, %v2413_v26  ;;  %v2670_v16 = vmul.f32 %v2668_v23, %v5171_v21  ;;  %v2555_v23 = vstv %s3590_s18  ;;  %s5367_s18 = sld [smem:[#allocation10 + $0x782]] }
 0x728   : > { %v2435_v40 = vadd.f32 %v2433_v51, %v2427_v3  ;;  %v2677_v3 = vadd.f32 %v2675_v52, %v2669_v27  ;;  %v2831_v51 = vstv %s5241_s16  ;;  %s3620_s16 = sld [smem:[#allocation10 + $0x787]] }
 0x72a   : > { %v2444_v61 = vpop.permute.xlu2 %2443 }
 0x72b   : > { %v2449_v6 = vadd.f32 %v2444_v61, %v2435_v40  ;;  %v2609_v61 = vstv %s3595_s22  ;;  %v2645_v40 = vstv %s5252_s17  ;;  %s3596_s22 = sld [smem:[#allocation10 + $0x706]] }
 0x72c   : > { %s3614_s17 = sld [smem:[#allocation10 + $0x781]] }
 0x732   : > { %v2460_v63 = vpop.permute.xlu2 %2459 }
 0x73a   : > { %v2494_v20 = vpop.permute.xlu2 %2493  ;;  %v2424_v0 = vpop.permute.xlu1 %2423 }
 0x73b   : > { %v2446_v44 = vpop.permute.xlu0 %2445  ;;  %v2428_v36 = vadd.f32 %v2424_v0, %v2414_v55  ;;  %v5264_v55 = vld [vmem:[%s4047_s6 + $0x20] sm:$0xff]  ;;  %v2690_v0 = vstv %s5234_s8  ;;  %s5349_s8 = sld [smem:[#allocation10 + $0x784]] }
 0x73d   : > { %v2436_v18 = vadd.f32 %v2434_v33, %v2428_v36  ;;  %v2683_v33 = vmul.f32 %v5264_v55, %v2682_v57  ;;  %v2825_v36 = vstv %s5238_s27  ;;  %s5400_s27 = sld [smem:[#allocation10 + $0x788]] }
 0x73f   : > { %v2450_v62 = vadd.f32 %v2446_v44, %v2436_v18  ;;  %v3609_v18 = vld [vmem:[%s4047_s6 + $0x30] sm:$0xff]  ;;  %s5302_s6 = sld [smem:[#allocation8 + $0x10]] }
 0x741   : > { %v2464_v38 = vadd.f32 %v2460_v63, %v2450_v62  ;;  %v2676_v63 = vmul.f32 %v5174_v59, %v2674_v5  ;;  %v2692_v62 = vmul.f32 %v5194_v48, %v2690_v0 }
 0x742   : > { %v2547_v56 = vpop.permute.xlu2 %2546  ;;  %v2458_v41 = vpop.permute.xlu1 %2457 }
 0x743   : > { %v2480_v58 = vpop.permute.xlu0 %2479  ;;  %2551 = vst.msk [vmem:[#allocation2 + $0x9] sm:$0xff] %vm351_vm2, %v2547_v56  ;;  %v2463_v53 = vadd.f32 %v2458_v41, %v2449_v6  ;;  %v2472_v25 = vadd.f32 %v2470_v49, %v2464_v38  ;;  %v2678_v44 = vadd.f32 %v2676_v63, %v2670_v16  ;;  %v2826_v56 = vmul.f32 %v2825_v36, %v5244_v43 }
 0x744   : > { %v2685_v41 = vadd.f32 %v2683_v33, %v2677_v3  ;;  %v3004_v16 = vstv %s5318_s26  ;;  %s3663_s26 = sld [smem:[#allocation10 + $0x884]] }
 0x745   : > { %v2471_v39 = vadd.f32 %v2469_v29, %v2463_v53  ;;  %v2686_v6 = vadd.f32 %v2684_v2, %v2678_v44  ;;  %v2691_v29 = vmul.f32 %v3609_v18, %v2690_v0  ;;  %v2839_v53 = vstv %s5259_s10  ;;  %s3637_s10 = sld [smem:[#allocation10 + $0x801]] }
 0x746   : > { %v3005_v57 = vmul.f32 %v3609_v18, %v3004_v16  ;;  %v2589_v0 = vstv %s3593_s7  ;;  %s5478_s7 = sld [smem:[#allocation10 + $0x786]] }
 0x747   : > { %v2485_v13 = vadd.f32 %v2480_v58, %v2471_v39  ;;  %v2832_v58 = vmul.f32 %v5247_v34, %v2831_v51  ;;  %v2694_v49 = vadd.f32 %v2692_v62, %v2686_v6 }
 0x749   : > { %v2499_v50 = vadd.f32 %v2494_v20, %v2485_v13 }
 0x74a   : > { %v2482_v11 = vpop.permute.xlu1 %2481  ;;  %v5223_v15 = vld [vmem:[#allocation2 + $0x9] sm:$0xff] }
 0x74b   : > { %v2486_v28 = vadd.f32 %v2482_v11, %v2472_v25  ;;  %v2503_v60 = vadd.f32 %v2502_v9, %v2499_v50  ;;  %v2496_v1 = vpop.permute.xlu0 %2495  ;;  %v2597_v47 = vmul.f32 %v2595_v7, %v5223_v15  ;;  %v2611_v12 = vmul.f32 %v2609_v61, %v5223_v15  ;;  %v5281_v35 = vld [vmem:[#allocation2 + $0xa] sm:$0xff] }
 0x74c   : > { %v2647_v38 = vmul.f32 %v2645_v40, %v5281_v35  ;;  %v2633_v13 = vmul.f32 %v2631_v8, %v5281_v35  ;;  %v2840_v50 = vmul.f32 %v5264_v55, %v2839_v53  ;;  %v2696_v25 = vstv %s5271_s11  ;;  %s5364_s11 = sld [smem:[#allocation10 + $0x785]] }
 0x74d   : > { %v2500_v46 = vadd.f32 %v2496_v1, %v2486_v28  ;;  %3577 = vst.msk [vmem:[%s4470_s23 + $0xd0] sm:$0xff] %vm464_vm3, %v2503_v60  ;;  %v2693_v11 = vadd.f32 %v2691_v29, %v2685_v41  ;;  %v2847_v28 = vstv %s5277_s12  ;;  %v2698_v60 = vadd.f32 %v2696_v25, %v2694_v49  ;;  %s5439_s12 = sld [smem:[#allocation10 + $0x804]] }
 0x74f   : > { %v2504_v32 = vadd.f32 %v2502_v9, %v2500_v46  ;;  %v2834_v9 = vadd.f32 %v2832_v58, %v2826_v56  ;;  %v2848_v46 = vmul.f32 %v3609_v18, %v2847_v28 }
 0x751   : > { %3578 = vst.msk [vmem:[%s4470_s23 + $0xd8] sm:$0xff] %vm464_vm3, %v2504_v32  ;;  %v2842_v1 = vadd.f32 %v2840_v50, %v2834_v9  ;;  %v2697_v32 = vadd.f32 %v2696_v25, %v2693_v11 }
 0x752   : > { %v2545_v31 = vpop.permute.xlu1 %2544 }
 0x753   : > { %2550 = vst.msk [vmem:[#allocation2 + $0x1] sm:$0xff] %vm351_vm2, %v2545_v31  ;;  %v2850_v31 = vadd.f32 %v2848_v46, %v2842_v1 }
 0x75a   : > { %v5213_v54 = vld [vmem:[#allocation2 + $0x8] sm:$0xff]  ;;  %v5215_v17 = vld [vmem:[#allocation2] sm:$0xff] }
 0x75b   : > { %v2561_v4 = vmul.f32 %v2559_v45, %v5213_v54  ;;  %v2574_v10 = vmul.f32 %v2573_v19, %v5215_v17  ;;  %v2560_v37 = vmul.f32 %v2559_v45, %v5215_v17  ;;  %v5225_v42 = vld [vmem:[#allocation2 + $0x1] sm:$0xff]  ;;  %v2575_v24 = vmul.f32 %v2573_v19, %v5213_v54 }
 0x75c   : > { %v2596_v22 = vmul.f32 %v2595_v7, %v5225_v42  ;;  %v5249_v30 = vld [vmem:[#allocation2 + $0x2] sm:$0xff]  ;;  %v2610_v20 = vmul.f32 %v2609_v61, %v5225_v42  ;;  %v2853_v45 = vstv %s5302_s6  ;;  %v2556_v27 = vmul.f32 %v2555_v23, %v5215_v17  ;;  %s3660_s6 = sld [smem:[#allocation10 + $0x881]] }
 0x75d   : > { %2566 = vrot.lane.b32.xlu1 %v2561_v4, %s3911_s21  ;;  %2578 = vrot.lane.b32.xlu2 %v2574_v10, %s3912_s25  ;;  %v2632_v26 = vmul.f32 %v2631_v8, %v5249_v30  ;;  %v2646_v39 = vmul.f32 %v2645_v40, %v5249_v30  ;;  %v2854_v19 = vadd.f32 %v2853_v45, %v2850_v31  ;;  %v2982_v10 = vstv %s5312_s13  ;;  %s3661_s13 = sld [smem:[#allocation10 + $0x882]] }
 0x75e   : > { %2564 = vrot.lane.b32.xlu0 %v2560_v37, %s3911_s21  ;;  %v2988_v37 = vstv %s5314_s14  ;;  %v2983_v7 = vmul.f32 %v2982_v10, %v5244_v43  ;;  %v3010_v43 = vstv %s5320_s30  ;;  %v2590_v18 = vmul.f32 %v2589_v0, %v5225_v42  ;;  %s3613_s14 = sld [smem:[#allocation10 + $0x780]] }
 0x75f   : > { %v2591_v17 = vmul.f32 %v2589_v0, %v5223_v15  ;;  %v2659_v15 = vstv %s3599_s29  ;;  %s5470_s30 = sld [smem:[#allocation10 + $0x805]] }
 0x760   : > { %s5494_s29 = sld [smem:[#allocation11 + $0xf]] }
 0x765   : > { %2600 = vrot.lane.b32.xlu1 %v2596_v22, %s3911_s21  ;;  %2602 = vrot.lane.b32.xlu2 %v2597_v47, %s3911_s21  ;;  %v2989_v47 = vmul.f32 %v5247_v34, %v2988_v37  ;;  %v2557_v34 = vmul.f32 %v2555_v23, %v5213_v54  ;;  %v2625_v54 = vstv %s3596_s22  ;;  %v2752_v23 = vstv %s5349_s8  ;;  %s3664_s22 = sld [smem:[#allocation10 + $0x885]] }
 0x766   : > { %2580 = vrot.lane.b32.xlu0 %v2575_v24, %s3912_s25  ;;  %v2996_v24 = vstv %s5316_s15  ;;  %v2627_v42 = vmul.f32 %v2625_v54, %v5281_v35  ;;  %s3616_s15 = sld [smem:[#allocation10 + $0x783]] }
 0x767   : > { %v2991_v8 = vadd.f32 %v2989_v47, %v2983_v7  ;;  %v2997_v61 = vmul.f32 %v5264_v55, %v2996_v24  ;;  %v2833_v7 = vmul.f32 %v5174_v59, %v2831_v51  ;;  %s3643_s8 = sld [smem:[#allocation10 + $0x807]] }
 0x769   : > { %v2999_v63 = vadd.f32 %v2997_v61, %v2991_v8 }
 0x76b   : > { %v3007_v52 = vadd.f32 %v3005_v57, %v2999_v63  ;;  %v2849_v57 = vmul.f32 %v5194_v48, %v2847_v28 }
 0x76d   : > { %2616 = vrot.lane.b32.xlu1 %v2611_v12, %s3912_s25  ;;  %2636 = vrot.lane.b32.xlu2 %v2632_v26, %s3911_s21 }
 0x76e   : > { %2614 = vrot.lane.b32.xlu0 %v2610_v20, %s3912_s25  ;;  %v3011_v20 = vadd.f32 %v3010_v43, %v3007_v52 }
 0x775   : > { %2650 = vrot.lane.b32.xlu1 %v2646_v39, %s3912_s25  ;;  %2652 = vrot.lane.b32.xlu2 %v2647_v38, %s3912_s25  ;;  %v2626_v39 = vmul.f32 %v2625_v54, %v5249_v30 }
 0x776   : > { %2638 = vrot.lane.b32.xlu0 %v2633_v13, %s3911_s21 }
 0x77d   : > { %2703 = vrot.lane.b32.xlu1 %v2698_v60, %s3909_s9 }
 0x77e   : > { %2701 = vrot.lane.b32.xlu0 %v2697_v32, %s3909_s9 }
 0x785   : > { %2858 = vrot.lane.b32.xlu1 %v2854_v19, %s3909_s9 }
 0x78d   : > { %3015 = vrot.lane.b32.xlu1 %v3011_v20, %s3909_s9  ;;  %v2730_v20 = vstv %s5367_s18  ;;  %s3667_s18 = sld [smem:[#allocation10 + $0x888]] }
 0x7b7   : > { %v2579_v4 = vpop.permute.xlu2 %2578 }
 0x7bf   : > { %v2603_v26 = vpop.permute.xlu2 %2602 }
 0x7c7   : > { %v2637_v58 = vpop.permute.xlu2 %2636 }
 0x7cf   : > { %v2567_v22 = vpop.permute.xlu1 %2566  ;;  %v2653_v46 = vpop.permute.xlu2 %2652 }
 0x7d0   : > { %v2565_v5 = vpop.permute.xlu0 %2564  ;;  %v2571_v44 = vadd.f32 %v2567_v22, %v2557_v34  ;;  %v2841_v22 = vmul.f32 %v5184_v14, %v2839_v53  ;;  %v2984_v53 = vmul.f32 %v2982_v10, %v5171_v21  ;;  %v2998_v10 = vmul.f32 %v5184_v14, %v2996_v24 }
 0x7d1   : > { %v2570_v12 = vadd.f32 %v2565_v5, %v2556_v27  ;;  %v2716_v5 = vstv %s3614_s17  ;;  %v2990_v27 = vmul.f32 %v5174_v59, %v2988_v37  ;;  %v2766_v37 = vstv %s5364_s11  ;;  %s5497_s17 = sld [smem:[#allocation10 + $0x887]] }
 0x7d2   : > { %v2802_v24 = vstv %s5400_s27  ;;  %s3644_s11 = sld [smem:[#allocation10 + $0x808]] }
 0x7d3   : > { %v2584_v55 = vadd.f32 %v2579_v4, %v2570_v12  ;;  %v2827_v4 = vmul.f32 %v2825_v36, %v5171_v21  ;;  %v2992_v28 = vadd.f32 %v2990_v27, %v2984_v53  ;;  %s3636_s27 = sld [smem:[#allocation10 + $0x800]] }
 0x7d5   : > { %v2592_v40 = vadd.f32 %v2590_v18, %v2584_v55  ;;  %v2835_v47 = vadd.f32 %v2833_v7, %v2827_v4  ;;  %v3000_v0 = vadd.f32 %v2998_v10, %v2992_v28  ;;  %v3044_v7 = vstv %s3661_s13 }
 0x7d6   : > { %v3066_v10 = vstv %s3663_s26 }
 0x7d7   : > { %v2601_v2 = vpop.permute.xlu1 %2600  ;;  %v2843_v51 = vadd.f32 %v2841_v22, %v2835_v47  ;;  %v2712_v47 = vstv %s3613_s14 }
 0x7d8   : > { %v2581_v3 = vpop.permute.xlu0 %2580  ;;  %v2606_v62 = vadd.f32 %v2601_v2, %v2592_v40 }
 0x7d9   : > { %v2585_v33 = vadd.f32 %v2581_v3, %v2571_v44  ;;  %v2851_v59 = vadd.f32 %v2849_v57, %v2843_v51  ;;  %v3006_v3 = vmul.f32 %v5194_v48, %v3004_v16 }
 0x7db   : > { %v2593_v6 = vadd.f32 %v2591_v17, %v2585_v33  ;;  %v2855_v2 = vadd.f32 %v2853_v45, %v2851_v59  ;;  %v3008_v14 = vadd.f32 %v3006_v3, %v3000_v0  ;;  %v2788_v17 = vstv %s3620_s16  ;;  %s5532_s16 = sld [smem:[#allocation10 + $0x803]] }
 0x7dd   : > { %v2607_v29 = vadd.f32 %v2603_v26, %v2593_v6  ;;  %v3012_v33 = vadd.f32 %v3010_v43, %v3008_v14 }
 0x7df   : > { %v2617_v56 = vpop.permute.xlu1 %2616 }
 0x7e0   : > { %v2615_v41 = vpop.permute.xlu0 %2614  ;;  %v2621_v13 = vadd.f32 %v2617_v56, %v2607_v29 }
 0x7e1   : > { %v2620_v38 = vadd.f32 %v2615_v41, %v2606_v62  ;;  %v2873_v62 = vstv %s3637_s10  ;;  %s3662_s10 = sld [smem:[#allocation10 + $0x883]] }
 0x7e2   : > { %v2629_v25 = vadd.f32 %v2627_v42, %v2621_v13 }
 0x7e3   : > { %v2628_v49 = vadd.f32 %v2626_v39, %v2620_v38 }
 0x7e5   : > { %v2642_v9 = vadd.f32 %v2637_v58, %v2628_v49 }
 0x7e7   : > { %v2651_v50 = vpop.permute.xlu1 %2650 }
 0x7e8   : > { %v2656_v11 = vadd.f32 %v2651_v50, %v2642_v9  ;;  %v2639_v60 = vpop.permute.xlu0 %2638 }
 0x7e9   : > { %v2643_v1 = vadd.f32 %v2639_v60, %v2629_v25 }
 0x7ea   : > { %v2660_v32 = vadd.f32 %v2659_v15, %v2656_v11 }
 0x7eb   : > { %v2657_v31 = vadd.f32 %v2653_v46, %v2643_v1  ;;  %v3030_v46 = vstv %s3660_s6  ;;  %s3668_s6 = sld [smem:[#allocation11 + $0x11]] }
 0x7ec   : > { %3600 = vst.msk [vmem:[%s4470_s23 + $0xe0] sm:$0xff] %vm464_vm3, %v2660_v32  ;;  %v2909_v32 = vstv %s5439_s12  ;;  %s3645_s12 = sld [smem:[#allocation11 + $0x10]] }
 0x7ed   : > { %v2661_v30 = vadd.f32 %v2659_v15, %v2657_v31 }
 0x7ef   : > { %3601 = vst.msk [vmem:[%s4470_s23 + $0xe8] sm:$0xff] %vm464_vm3, %v2661_v30  ;;  %v2704_v35 = vpop.permute.xlu1 %2703 }
 0x7f0   : > { %2708 = vst.msk [vmem:[#allocation2 + $0x9] sm:$0xff] %vm351_vm2, %v2704_v35  ;;  %v2702_v19 = vpop.permute.xlu0 %2701 }
 0x7f1   : > { %2707 = vst.msk [vmem:[#allocation2 + $0x1] sm:$0xff] %vm351_vm2, %v2702_v19 }
 0x7f7   : > { %v2859_v8 = vpop.permute.xlu1 %2858  ;;  %v5393_v21 = vld [vmem:[#allocation2 + $0x9] sm:$0xff] }
 0x7f8   : > { %v5369_v61 = vld [vmem:[#allocation2 + $0x1] sm:$0xff]  ;;  %v2768_v44 = vmul.f32 %v2766_v37, %v5393_v21  ;;  %v2754_v48 = vmul.f32 %v2752_v23, %v5393_v21  ;;  %v5424_v43 = vld [vmem:[#allocation2 + $0xa] sm:$0xff] }
 0x7f9   : > { %v5371_v36 = vld [vmem:[#allocation2 + $0x8] sm:$0xff]  ;;  %v5373_v63 = vld [vmem:[#allocation2] sm:$0xff]  ;;  %v2753_v52 = vmul.f32 %v2752_v23, %v5369_v61  ;;  %v2767_v16 = vmul.f32 %v2766_v37, %v5369_v61  ;;  %v2790_v40 = vmul.f32 %v2788_v17, %v5424_v43  ;;  %v2804_v58 = vmul.f32 %v2802_v24, %v5424_v43 }
 0x7fa   : > { %v2718_v34 = vmul.f32 %v2716_v5, %v5371_v36  ;;  %v2717_v12 = vmul.f32 %v2716_v5, %v5373_v63  ;;  %v5387_v26 = vld [vmem:[#allocation2 + $0x2] sm:$0xff]  ;;  %v2731_v55 = vmul.f32 %v2730_v20, %v5373_v63  ;;  %v2732_v45 = vmul.f32 %v2730_v20, %v5371_v36 }
 0x7fb   : > { %2864 = vst.msk [vmem:[#allocation2 + $0x1] sm:$0xff] %vm351_vm2, %v2859_v8  ;;  %2757 = vrot.lane.b32.xlu1 %v2753_v52, %s3911_s21  ;;  %v2803_v18 = vmul.f32 %v2802_v24, %v5387_v26  ;;  %v2789_v6 = vmul.f32 %v2788_v17, %v5387_v26  ;;  %v2713_v51 = vmul.f32 %v2712_v47, %v5373_v63 }
 0x7fc   : > { %2723 = vrot.lane.b32.xlu0 %v2718_v34, %s3911_s21  ;;  %2721 = vrot.lane.b32.xlu2 %v2717_v12, %s3911_s21  ;;  %v2714_v27 = vmul.f32 %v2712_v47, %v5371_v36  ;;  %v2746_v34 = vstv %s3616_s15 }
 0x7fd   : > { %v2747_v36 = vmul.f32 %v2746_v34, %v5369_v61  ;;  %v2748_v20 = vmul.f32 %v2746_v34, %v5393_v21  ;;  %v2782_v61 = vstv %s5478_s7 }
 0x7fe   : > { %v2783_v17 = vmul.f32 %v2782_v61, %v5387_v26  ;;  %v2784_v26 = vmul.f32 %v2782_v61, %v5424_v43 }
 0x7ff   : > { %v3016_v49 = vpop.permute.xlu1 %3015 }
 0x802   : > { %v5430_v54 = vld [vmem:[#allocation2] sm:$0xff] }
 0x803   : > { %2773 = vrot.lane.b32.xlu1 %v2768_v44, %s3912_s25  ;;  %v2874_v56 = vmul.f32 %v2873_v62, %v5430_v54  ;;  %v5441_v13 = vld [vmem:[#allocation2 + $0x1] sm:$0xff] }
 0x804   : > { %2735 = vrot.lane.b32.xlu0 %v2731_v55, %s3912_s25  ;;  %2860 = vrot.lane.b32.xlu2 %v2855_v2, %s3909_s9  ;;  %v2910_v35 = vmul.f32 %v2909_v32, %v5441_v13  ;;  %v2923_v2 = vstv %s5470_s30 }
 0x80b   : > { %2807 = vrot.lane.b32.xlu1 %v2803_v18, %s3912_s25 }
 0x80c   : > { %2737 = vrot.lane.b32.xlu0 %v2732_v45, %s3912_s25  ;;  %3017 = vrot.lane.b32.xlu2 %v3012_v33, %s3909_s9  ;;  %s3638_s9 = sld [smem:[#allocation10 + $0x802]]  ;;  %v2924_v33 = vmul.f32 %v2923_v2, %v5441_v13 }
 0x812   : > { %v2887_v41 = vstv %s3638_s9  ;;  %s3665_s9 = sld [smem:[#allocation10 + $0x886]] }
 0x813   : > { %v2888_v29 = vmul.f32 %v2887_v41, %v5430_v54 }
 0x814   : > { %2771 = vrot.lane.b32.xlu0 %v2767_v16, %s3912_s25  ;;  %2759 = vrot.lane.b32.xlu2 %v2754_v48, %s3911_s21  ;;  %v3080_v16 = vstv %s3664_s22 }
 0x81c   : > { %2795 = vrot.lane.b32.xlu0 %v2790_v40, %s3911_s21  ;;  %2793 = vrot.lane.b32.xlu2 %v2789_v6, %s3911_s21 }
 0x824   : > { %2878 = vrot.lane.b32.xlu0 %v2874_v56, %s3911_s21  ;;  %2809 = vrot.lane.b32.xlu2 %v2804_v58, %s3912_s25 }
 0x82c   : > { %2892 = vrot.lane.b32.xlu2 %v2888_v29, %s3912_s25 }
 0x856   : > { %v2722_v39 = vpop.permute.xlu2 %2721 }
 0x857   : > { %v2727_v53 = vadd.f32 %v2722_v39, %v2713_v51 }
 0x85e   : > { %v2861_v38 = vpop.permute.xlu2 %2860 }
 0x85f   : > { %2865 = vst.msk [vmem:[#allocation2 + $0x9] sm:$0xff] %vm351_vm2, %v2861_v38  ;;  %v2816_v38 = vstv %s5494_s29 }
 0x866   : > { %v5443_v42 = vld [vmem:[#allocation2 + $0x9] sm:$0xff]  ;;  %v3018_v50 = vpop.permute.xlu2 %3017 }
 0x867   : > { %v5445_v9 = vld [vmem:[#allocation2 + $0x2] sm:$0xff]  ;;  %v5447_v15 = vld [vmem:[#allocation2 + $0xa] sm:$0xff]  ;;  %v2911_v57 = vmul.f32 %v2909_v32, %v5443_v42 }
 0x868   : > { %v5449_v25 = vld [vmem:[#allocation2 + $0x8] sm:$0xff] }
 0x869   : > { %v2889_v11 = vmul.f32 %v2887_v41, %v5449_v25  ;;  %3021 = vst.msk [vmem:[#allocation2 + $0x1] sm:$0xff] %vm351_vm2, %v3016_v49  ;;  %v2875_v60 = vmul.f32 %v2873_v62, %v5449_v25  ;;  %v2925_v62 = vmul.f32 %v2923_v2, %v5443_v42  ;;  %v2903_v2 = vstv %s5532_s16 }
 0x86a   : > { %3022 = vst.msk [vmem:[#allocation2 + $0x9] sm:$0xff] %vm351_vm2, %v3018_v50 }
 0x86b   : > { %2894 = vrot.lane.b32.xlu0 %v2889_v11, %s3912_s25  ;;  %2880 = vrot.lane.b32.xlu1 %v2875_v60, %s3911_s21 }
 0x86d   : > { %v2758_v8 = vpop.permute.xlu1 %2757 }
 0x86e   : > { %v2724_v1 = vpop.permute.xlu0 %2723  ;;  %v2760_v52 = vpop.permute.xlu2 %2759 }
 0x86f   : > { %v2728_v12 = vadd.f32 %v2724_v1, %v2714_v27  ;;  %v2945_v1 = vstv %s3643_s8 }
 0x870   : > { %v5458_v31 = vld [vmem:[#allocation2] sm:$0xff]  ;;  %v2946_v43 = vmul.f32 %v2945_v1, %v5445_v9 }
 0x871   : > { %v3031_v30 = vmul.f32 %v3030_v46, %v5458_v31  ;;  %v5462_v19 = vld [vmem:[#allocation2 + $0x8] sm:$0xff]  ;;  %v3045_v23 = vmul.f32 %v3044_v7, %v5458_v31 }
 0x872   : > { %v3032_v4 = vmul.f32 %v3030_v46, %v5462_v19  ;;  %v3046_v5 = vmul.f32 %v3044_v7, %v5462_v19  ;;  %v5480_v63 = vld [vmem:[#allocation2 + $0x1] sm:$0xff]  ;;  %v5482_v37 = vld [vmem:[#allocation2 + $0x9] sm:$0xff]  ;;  %v2947_v7 = vmul.f32 %v2945_v1, %v5447_v15 }
 0x873   : > { %3035 = vrot.lane.b32.xlu2 %v3031_v30, %s3911_s21  ;;  %2914 = vrot.lane.b32.xlu1 %v2910_v35, %s3911_s21  ;;  %v3067_v55 = vmul.f32 %v3066_v10, %v5480_v63  ;;  %v3068_v14 = vmul.f32 %v3066_v10, %v5482_v37  ;;  %v3081_v56 = vmul.f32 %v3080_v16, %v5480_v63  ;;  %v5507_v30 = vld [vmem:[#allocation2 + $0x2] sm:$0xff]  ;;  %v3102_v35 = vstv %s5497_s17 }
 0x874   : > { %3037 = vrot.lane.b32.xlu0 %v3032_v4, %s3911_s21  ;;  %v3082_v41 = vmul.f32 %v3080_v16, %v5482_v37  ;;  %v3103_v47 = vmul.f32 %v3102_v35, %v5507_v30 }
 0x875   : > { %v2774_v24 = vpop.permute.xlu1 %2773 }
 0x876   : > { %v2736_v22 = vpop.permute.xlu0 %2735  ;;  %v2794_v45 = vpop.permute.xlu2 %2793 }
 0x877   : > { %v2741_v59 = vadd.f32 %v2736_v22, %v2727_v53  ;;  %v3116_v53 = vstv %s3667_s18 }
 0x878   : > { %v3117_v27 = vmul.f32 %v3116_v53, %v5507_v30 }
 0x879   : > { %v2749_v0 = vadd.f32 %v2747_v36, %v2741_v59 }
 0x87b   : > { %3049 = vrot.lane.b32.xlu1 %v3045_v23, %s3912_s25  ;;  %3051 = vrot.lane.b32.xlu2 %v3046_v5, %s3912_s25  ;;  %v2763_v18 = vadd.f32 %v2758_v8, %v2749_v0  ;;  %v5520_v23 = vld [vmem:[#allocation2 + $0xa] sm:$0xff]  ;;  %v2959_v5 = vstv %s3644_s11 }
 0x87c   : > { %2916 = vrot.lane.b32.xlu0 %v2911_v57, %s3911_s21  ;;  %v3104_v8 = vmul.f32 %v3102_v35, %v5520_v23  ;;  %v2960_v51 = vmul.f32 %v2959_v5, %v5445_v9  ;;  %v2961_v57 = vmul.f32 %v2959_v5, %v5447_v15 }
 0x87d   : > { %v2808_v39 = vpop.permute.xlu1 %2807 }
 0x87e   : > { %v2738_v28 = vpop.permute.xlu0 %2737  ;;  %v2810_v60 = vpop.permute.xlu2 %2809 }
 0x87f   : > { %v2742_v44 = vadd.f32 %v2738_v28, %v2728_v12  ;;  %v2869_v28 = vstv %s3636_s27 }
 0x880   : > { %v2871_v36 = vmul.f32 %v2869_v28, %v5449_v25  ;;  %v2870_v16 = vmul.f32 %v2869_v28, %v5430_v54 }
 0x881   : > { %v2750_v3 = vadd.f32 %v2748_v20, %v2742_v44 }
 0x883   : > { %3071 = vrot.lane.b32.xlu1 %v3067_v55, %s3911_s21  ;;  %3073 = vrot.lane.b32.xlu2 %v3068_v14, %s3911_s21  ;;  %v2764_v21 = vadd.f32 %v2760_v52, %v2750_v3  ;;  %v3118_v52 = vmul.f32 %v3116_v53, %v5520_v23  ;;  %v2905_v55 = vmul.f32 %v2903_v2, %v5443_v42 }
 0x884   : > { %2928 = vrot.lane.b32.xlu0 %v2924_v33, %s3912_s25 }
 0x885   : > { %v2778_v58 = vadd.f32 %v2774_v24, %v2764_v21 }
 0x886   : > { %v2772_v48 = vpop.permute.xlu0 %2771  ;;  %v2893_v34 = vpop.permute.xlu2 %2892 }
 0x887   : > { %v2777_v40 = vadd.f32 %v2772_v48, %v2763_v18  ;;  %v2786_v49 = vadd.f32 %v2784_v26, %v2778_v58  ;;  %v3060_v18 = vstv %s3662_s10 }
 0x889   : > { %v2785_v6 = vadd.f32 %v2783_v17, %v2777_v40  ;;  %v3062_v17 = vmul.f32 %v3060_v18, %v5482_v37 }
 0x88b   : > { %v2799_v29 = vadd.f32 %v2794_v45, %v2785_v6  ;;  %2930 = vrot.lane.b32.xlu1 %v2925_v62, %s3912_s25  ;;  %3085 = vrot.lane.b32.xlu2 %v3081_v56, %s3912_s25 }
 0x88c   : > { %3087 = vrot.lane.b32.xlu0 %v3082_v41, %s3912_s25 }
 0x88d   : > { %v2813_v50 = vadd.f32 %v2808_v39, %v2799_v29  ;;  %v2904_v39 = vmul.f32 %v2903_v2, %v5441_v13  ;;  %v3130_v2 = vstv %s3668_s6 }
 0x88e   : > { %v2796_v11 = vpop.permute.xlu0 %2795 }
 0x88f   : > { %v2800_v46 = vadd.f32 %v2796_v11, %v2786_v49  ;;  %v2817_v32 = vadd.f32 %v2816_v38, %v2813_v50 }
 0x891   : > { %v2814_v4 = vadd.f32 %v2810_v60, %v2800_v46  ;;  %3623 = vst.msk [vmem:[%s4470_s23 + $0xf0] sm:$0xff] %vm464_vm3, %v2817_v32 }
 0x893   : > { %v2818_v22 = vadd.f32 %v2816_v38, %v2814_v4  ;;  %2950 = vrot.lane.b32.xlu1 %v2946_v43, %s3911_s21  ;;  %2952 = vrot.lane.b32.xlu2 %v2947_v7, %s3911_s21 }
 0x894   : > { %3107 = vrot.lane.b32.xlu0 %v3103_v47, %s3911_s21 }
 0x895   : > { %3624 = vst.msk [vmem:[%s4470_s23 + $0xf8] sm:$0xff] %vm464_vm3, %v2818_v22 }
 0x896   : > { %v2879_v59 = vpop.permute.xlu0 %2878 }
 0x897   : > { %v2884_v6 = vadd.f32 %v2879_v59, %v2870_v16 }
 0x899   : > { %v2898_v29 = vadd.f32 %v2893_v34, %v2884_v6 }
 0x89b   : > { %3109 = vrot.lane.b32.xlu1 %v3104_v8, %s3911_s21  ;;  %2964 = vrot.lane.b32.xlu2 %v2960_v51, %s3912_s25  ;;  %s3659_s21 = sld [smem:[#allocation10 + $0x880]]  ;;  %v2906_v38 = vadd.f32 %v2904_v39, %v2898_v29 }
 0x89c   : > { %2966 = vrot.lane.b32.xlu0 %v2961_v57, %s3912_s25 }
 0x8a1   : > { %v3026_v14 = vstv %s3659_s21 }
 0x8a2   : > { %v3028_v61 = vmul.f32 %v3026_v14, %v5462_v19  ;;  %v3027_v40 = vmul.f32 %v3026_v14, %v5458_v31  ;;  %v3061_v19 = vmul.f32 %v3060_v18, %v5480_v63  ;;  %v3096_v31 = vstv %s3665_s9 }
 0x8a3   : > { %3121 = vrot.lane.b32.xlu1 %v3117_v27, %s3912_s25  ;;  %3123 = vrot.lane.b32.xlu2 %v3118_v52, %s3912_s25  ;;  %s3642_s25 = sld [smem:[#allocation10 + $0x806]]  ;;  %v3097_v35 = vmul.f32 %v3096_v31, %v5507_v30  ;;  %v3098_v57 = vmul.f32 %v3096_v31, %v5520_v23 }
 0x8a9   : > { %v2939_v49 = vstv %s3642_s25 }
 0x8aa   : > { %v2940_v46 = vmul.f32 %v2939_v49, %v5445_v9  ;;  %v2941_v22 = vmul.f32 %v2939_v49, %v5447_v15 }
 0x8cd   : > { %v3036_v12 = vpop.permute.xlu2 %3035 }
 0x8ce   : > { %v3041_v56 = vadd.f32 %v3036_v12, %v3027_v40  ;;  %v2973_v12 = vstv %s3645_s12 }
 0x8d5   : > { %v3052_v10 = vpop.permute.xlu2 %3051 }
 0x8dd   : > { %v2895_v20 = vpop.permute.xlu0 %2894  ;;  %v2881_v44 = vpop.permute.xlu1 %2880 }
 0x8de   : > { %v2885_v0 = vadd.f32 %v2881_v44, %v2871_v36  ;;  %v3074_v45 = vpop.permute.xlu2 %3073 }
 0x8e0   : > { %v2899_v3 = vadd.f32 %v2895_v20, %v2885_v0 }
 0x8e2   : > { %v2907_v24 = vadd.f32 %v2905_v55, %v2899_v3 }
 0x8e5   : > { %v2915_v33 = vpop.permute.xlu1 %2914 }
 0x8e6   : > { %v3038_v21 = vpop.permute.xlu0 %3037  ;;  %v3086_v54 = vpop.permute.xlu2 %3085  ;;  %v2920_v37 = vadd.f32 %v2915_v33, %v2906_v38 }
 0x8e7   : > { %v3042_v48 = vadd.f32 %v3038_v21, %v3028_v61 }
 0x8e9   : > { %v3056_v25 = vadd.f32 %v3052_v10, %v3042_v48 }
 0x8eb   : > { %v3064_v62 = vadd.f32 %v3062_v17, %v3056_v25 }
 0x8ed   : > { %v3050_v42 = vpop.permute.xlu1 %3049  ;;  %v3078_v13 = vadd.f32 %v3074_v45, %v3064_v62 }
 0x8ee   : > { %v3055_v58 = vadd.f32 %v3050_v42, %v3041_v56  ;;  %v2917_v41 = vpop.permute.xlu0 %2916  ;;  %v2953_v43 = vpop.permute.xlu2 %2952 }
 0x8ef   : > { %v2921_v7 = vadd.f32 %v2917_v41, %v2907_v24 }
 0x8f0   : > { %v3063_v26 = vadd.f32 %v3061_v19, %v3055_v58 }
 0x8f5   : > { %v3072_v50 = vpop.permute.xlu1 %3071 }
 0x8f6   : > { %v3077_v11 = vadd.f32 %v3072_v50, %v3063_v26  ;;  %v2929_v60 = vpop.permute.xlu0 %2928  ;;  %v2965_v27 = vpop.permute.xlu2 %2964 }
 0x8f7   : > { %v2934_v1 = vadd.f32 %v2929_v60, %v2920_v37 }
 0x8f8   : > { %v3091_v32 = vadd.f32 %v3086_v54, %v3077_v11 }
 0x8f9   : > { %v2942_v4 = vadd.f32 %v2940_v46, %v2934_v1 }
 0x8fa   : > { %v3099_v63 = vadd.f32 %v3097_v35, %v3091_v32 }
 0x8fd   : > { %v2931_v47 = vpop.permute.xlu1 %2930 }
 0x8fe   : > { %v2935_v5 = vadd.f32 %v2931_v47, %v2921_v7  ;;  %v3088_v8 = vpop.permute.xlu0 %3087  ;;  %v3124_v20 = vpop.permute.xlu2 %3123 }
 0x8ff   : > { %v3092_v51 = vadd.f32 %v3088_v8, %v3078_v13 }
 0x900   : > { %v2943_v53 = vadd.f32 %v2941_v22, %v2935_v5 }
 0x901   : > { %v3100_v9 = vadd.f32 %v3098_v57, %v3092_v51 }
 0x902   : > { %v2957_v10 = vadd.f32 %v2953_v43, %v2943_v53 }
 0x905   : > { %v2951_v52 = vpop.permute.xlu1 %2950 }
 0x906   : > { %v2956_v30 = vadd.f32 %v2951_v52, %v2942_v4  ;;  %v3108_v34 = vpop.permute.xlu0 %3107 }
 0x907   : > { %v3113_v14 = vadd.f32 %v3108_v34, %v3099_v63 }
 0x908   : > { %v2970_v59 = vadd.f32 %v2965_v27, %v2956_v30 }
 0x90a   : > { %v2974_v28 = vadd.f32 %v2973_v12, %v2970_v59 }
 0x90c   : > { %3646 = vst.msk [vmem:[%s4470_s23 + $0x100] sm:$0xff] %vm464_vm3, %v2974_v28 }
 0x90d   : > { %v3110_v15 = vpop.permute.xlu1 %3109 }
 0x90e   : > { %v3114_v36 = vadd.f32 %v3110_v15, %v3100_v9  ;;  %v2967_v23 = vpop.permute.xlu0 %2966 }
 0x90f   : > { %v2971_v44 = vadd.f32 %v2967_v23, %v2957_v10 }
 0x910   : > { %v3128_v0 = vadd.f32 %v3124_v20, %v3114_v36 }
 0x911   : > { %v2975_v3 = vadd.f32 %v2973_v12, %v2971_v44 }
 0x912   : > { %v3132_v55 = vadd.f32 %v3130_v2, %v3128_v0 }
 0x913   : > { %3647 = vst.msk [vmem:[%s4470_s23 + $0x108] sm:$0xff] %vm464_vm3, %v2975_v3 }
 0x914   : > { %3670 = vst.msk [vmem:[%s4470_s23 + $0x118] sm:$0xff] %vm464_vm3, %v3132_v55 }
 0x915   : > { %v3122_v24 = vpop.permute.xlu1 %3121 }
 0x916   : > { %v3127_v33 = vadd.f32 %v3122_v24, %v3113_v14 }
 0x918   : > { %v3131_v61 = vadd.f32 %v3130_v2, %v3127_v33 }
 0x91a   : > { %3669 = vst.msk [vmem:[%s4470_s23 + $0x110] sm:$0xff] %vm464_vm3, %v3131_v61 }
 0x91b PF: > { %p18_p4 = scmp.ge.s32.totalorder %s4010_s24, 4   ;;  %s5578_s18 = smov %s3893_s19 }
 0x91c   : > { %s5579_s19 = smov %s3897_s20  ;;  %s5580_s20 = smov %s4019_s28 }
 0x91d   : > { %s5581_s21 = smov %s4010_s24  ;;  %20 = sbr.rel (!%p18_p4) target bundleno = 6 (0x6), region = 118 }
 0x922   :  { %3157 = vsyncpa [#allocation4], 1 }
 0x923   :  { %3159 = vsyncpa [#allocation4 + $0x1], 1 }
 0x924   :  { %3160 = vsyncpa [#allocation5], 1 }
 0x925   :  { %3162 = vsyncpa [#allocation5 + $0x1], 1 }
 0x926   :  { %3163 = vsyncpa [#allocation9], 1 }
 0x927   :  { %3164 = vsyncpa [#allocation6], 1 }
 0x928   :  { %3166 = vsyncpa [#allocation6 + $0x1], 1 }

// kernel: _lambda_.3
= control target key start
LH: loop header
LB: loop body
LE: loop exit
PB: predicated region body
PF: predicated region fallthrough
CT: control target
= control target key end

     0   :  { %s819_s12 = smov 0   ;;  %s821_s13 = smov 0   ;;  %s965_s0 = inlined_call_operand.vmem [shape: f32[4,8,9,256], index: 0, kind: input, shape index: {}]   ;;  %s966_s1 = inlined_call_operand.vmem [shape: f32[2,4,9,256], index: 1, kind: input, shape index: {}]   ;;  %s967_s2 = inlined_call_operand.vmem [shape: f32[2,2,18], index: 2, kind: input, shape index: {}]   ;;  %s968_s3 = inlined_call_operand.vmem [shape: f32[4,2,256], index: 3, kind: output, shape index: {}]  }
   0x1   :  { %s823_s14 = smov 0   ;;  %s825_s15 = smov 0  }
   0x2   :  { %s827_s16 = smov 0  }
   0x3 LB: > { %s28_s17 = sadd.s32 1, %s788_s14  ;;  %s32_s18 = sadd.s32 1, %s792_s15  ;;  %s796_s16 = sphi %s827_s16, %s13_s16   ;;  %s792_s15 = sphi %s825_s15, %s972_s15   ;;  %s788_s14 = sphi %s823_s14, %s971_s14   ;;  %s784_s13 = sphi %s821_s13, %s970_s13   ;;  %s780_s12 = sphi %s819_s12, %s969_s12  }
   0x4   : > { %p30_p0 = scmp.ge.s32.totalorder %s28_s17, 2  ;;  %p654_p1 = scmp.ge.s32.totalorder %s796_s16, 1 }
   0x5   : > { %p203_p2 = scmp.lt.s32.totalorder %s796_s16, 5 }
   0x6   : > { %s974_s17 = smov (%p30_p0, %s28_s17), 0  ;;  %s976_s18 = smov (!%p30_p0, %s32_s18), %s792_s15 }
   0x7   : > { %p204_p3 = pnand %p654_p1, %p203_p2  ;;  %p34_p4 = scmp.ge.s32.totalorder %s976_s18, 2 }
   0x8   : > { %p276_p5 = scmp.lt.s32.totalorder (!%p204_p3), %s780_s12, 1  ;;  %s655_s19 = sshll.u32 (!%p204_p3), %s784_s13, 1 }
   0x9   : > { %s978_s18 = smov (%p34_p4, %s976_s18), 0  ;;  %207 = sbr.rel (%p204_p3) target bundleno = 266 (0x10a), region = 32 }
   0xa   : > { %s253_s21 = sadd.s32 (!%p204_p3), %s780_s12, %s655_s19  ;;  %p267_p6 = scmp.lt.s32.totalorder (!%p204_p3), %s784_s13, 1 }
   0xb   : > { %p255_p7 = scmp.lt.s32.totalorder (!%p204_p3), %s253_s21, 3  ;;  %s798_s26 = smov (!%p204_p3), 119  }
   0xe   : > { %s277_s20 = scalar_select %p276_p5, %s780_s12, 1  ;;  %vm415_vm0 = vcmask 1040384   ;;  %vm412_vm1 = vcmask 72704   ;;  %vm513_vm2 = vcmask 1041408  }
   0xf   : > { %s980_s21 = smov (!%p255_p7, %s253_s21), 3  ;;  %s982_s13 = smov (!%p267_p6, %s784_s13), 1 }
  0x10   : > { %s660_s22 = sshll.u32 %s277_s20, 1  ;;  %s714_s27 = sshll.u32 %s980_s21, 8 }
  0x11   : > { %s279_s25 = scalar_lea.vmem %s967_s2, %s660_s22  ;;  %s861_s30 = scalar_lea.vmem %s965_s0, %s714_s27 }
  0x12   : > { %v852_v0 = vld [vmem:[%s279_s25] sm:$0x3]  ;;  %s715_s4 = sshll.u32 %s982_s13, 7  ;;  %v300_v1 = vld [vmem:[%s861_s30 + $0x10] sm:$0x1]  ;;  %v299_v42 = vld [vmem:[%s861_s30 + $0x8] sm:$0xff] }
  0x13   : > { %410 = vrot.lane.b32.xlu0 %v852_v0, %s798_s26  ;;  %s866_s7 = scalar_lea.vmem %s966_s1, %s715_s4  ;;  %v670_v2 = vld [vmem:[%s861_s30 + $0x30] sm:$0x1]  ;;  %v301_v13 = vld [vmem:[%s861_s30 + $0x18] sm:$0x1]  ;;  %v298_v26 = vld [vmem:[%s861_s30] sm:$0xff]  ;;  %s716_s8 = sshll.u32 %s980_s21, 2 }
  0x14   : > { %v678_v3 = vld [vmem:[%s861_s30 + $0x50] sm:$0x1]  ;;  %v297_v12 = vld [vmem:[%s866_s7 + $0x18] sm:$0x1]  ;;  %v888_v25 = vld [vmem:[%s866_s7] sm:$0xff]  ;;  %s290_s11 = scalar_lea.vmem %s968_s3, %s716_s8 }
  0x15   : > { %v296_v4 = vld [vmem:[%s866_s7 + $0x10] sm:$0x1]  ;;  %v667_v14 = vld [vmem:[%s866_s7 + $0x38] sm:$0x1]  ;;  %v305_v18 = vmul.f32 %v301_v13, %v297_v12  ;;  %v302_v30 = vmul.f32 %v298_v26, %v888_v25  ;;  %v893_v31 = vld [vmem:[%s866_s7 + $0x20] sm:$0xff] }
  0x16   : > { %v666_v5 = vld [vmem:[%s866_s7 + $0x30] sm:$0x1]  ;;  %v304_v7 = vmul.f32 %v300_v1, %v296_v4  ;;  %v671_v15 = vld [vmem:[%s861_s30 + $0x38] sm:$0x1]  ;;  %v668_v32 = vld [vmem:[%s861_s30 + $0x20] sm:$0xff] }
  0x17   : > { %v674_v6 = vld [vmem:[%s866_s7 + $0x50] sm:$0x1]  ;;  %v318_v8 = vmul.f32 %v670_v2, %v666_v5  ;;  %v319_v19 = vmul.f32 %v671_v15, %v667_v14  ;;  %v675_v20 = vld [vmem:[%s866_s7 + $0x58] sm:$0x1]  ;;  %v897_v33 = vld [vmem:[%s866_s7 + $0x40] sm:$0xff]  ;;  %v316_v34 = vmul.f32 %v668_v32, %v893_v31 }
  0x18   : > { %v336_v9 = vmul.f32 %v678_v3, %v674_v6  ;;  %v875_v10 = vld [vmem:[%s866_s7 + $0x70] sm:$0x1]  ;;  %v679_v21 = vld [vmem:[%s861_s30 + $0x58] sm:$0x1]  ;;  %v676_v35 = vld [vmem:[%s861_s30 + $0x40] sm:$0xff] }
  0x19   : > { %v686_v11 = vld [vmem:[%s861_s30 + $0x70] sm:$0x1]  ;;  %v322_v16 = vadd.f32 %v318_v8, %v304_v7  ;;  %v683_v22 = vld [vmem:[%s866_s7 + $0x78] sm:$0x1]  ;;  %v337_v23 = vmul.f32 %v679_v21, %v675_v20  ;;  %v323_v28 = vadd.f32 %v319_v19, %v305_v18  ;;  %v902_v36 = vld [vmem:[%s866_s7 + $0x60] sm:$0xff]  ;;  %v334_v40 = vmul.f32 %v676_v35, %v897_v33 }
  0x1a   : > { %v354_v17 = vmul.f32 %v686_v11, %v875_v10  ;;  %v687_v24 = vld [vmem:[%s861_s30 + $0x78] sm:$0x1]  ;;  %v684_v37 = vld [vmem:[%s861_s30 + $0x60] sm:$0xff]  ;;  %v295_v41 = vld [vmem:[%s866_s7 + $0x8] sm:$0xff]  ;;  %v320_v44 = vadd.f32 %v316_v34, %v302_v30 }
  0x1b   : > { %v340_v27 = vadd.f32 %v336_v9, %v322_v16  ;;  %v355_v29 = vmul.f32 %v687_v24, %v683_v22  ;;  %v341_v39 = vadd.f32 %v337_v23, %v323_v28  ;;  %v665_v43 = vld [vmem:[%s866_s7 + $0x28] sm:$0xff]  ;;  %v352_v45 = vmul.f32 %v684_v37, %v902_v36  ;;  %v690_v55 = vld [vmem:[%s861_s30 + $0x90] sm:$0x1]  ;;  %v691_v2 = vld [vmem:[%s861_s30 + $0x98] sm:$0x1] }
  0x1c   : > { %v303_v46 = vmul.f32 %v299_v42, %v295_v41  ;;  %v669_v47 = vld [vmem:[%s861_s30 + $0x28] sm:$0xff]  ;;  %v338_v56 = vadd.f32 %v334_v40, %v320_v44  ;;  %v368_v57 = vmul.f32 %v690_v55, %v296_v4  ;;  %v694_v58 = vld [vmem:[%s861_s30 + $0xb0] sm:$0x1]  ;;  %v695_v3 = vld [vmem:[%s861_s30 + $0xb8] sm:$0x1]  ;;  %v369_v9 = vmul.f32 %v691_v2, %v297_v12 }
  0x1d   : > { %v358_v38 = vadd.f32 %v354_v17, %v340_v27  ;;  %v673_v48 = vld [vmem:[%s866_s7 + $0x48] sm:$0xff]  ;;  %v359_v50 = vadd.f32 %v355_v29, %v341_v39  ;;  %v317_v51 = vmul.f32 %v669_v47, %v665_v43  ;;  %v698_v59 = vld [vmem:[%s861_s30 + $0xd0] sm:$0x1]  ;;  %v377_v63 = vmul.f32 %v694_v58, %v666_v5  ;;  %v699_v7 = vld [vmem:[%s861_s30 + $0xd8] sm:$0x1] }
  0x1e   : > { %v677_v49 = vld [vmem:[%s861_s30 + $0x48] sm:$0xff]  ;;  %v702_v60 = vld [vmem:[%s861_s30 + $0xf0] sm:$0x1]  ;;  %v390_v1 = vmul.f32 %v698_v59, %v674_v6  ;;  %v356_v8 = vadd.f32 %v352_v45, %v338_v56  ;;  %v378_v11 = vmul.f32 %v695_v3, %v667_v14  ;;  %v391_v13 = vmul.f32 %v699_v7, %v675_v20  ;;  %v703_v15 = vld [vmem:[%s861_s30 + $0xf8] sm:$0x1] }
  0x1f   : > { %708 = vmatpush.msk.msra.mxu2 %vm415_vm0, %v358_v38  ;;  %v335_v52 = vmul.f32 %v677_v49, %v673_v48  ;;  %v681_v53 = vld [vmem:[%s866_s7 + $0x68] sm:$0xff]  ;;  %710 = vmatpush.msk.msra.mxu3 %vm415_vm0, %v359_v50  ;;  %v321_v61 = vadd.f32 %v317_v51, %v303_v46  ;;  %v381_v4 = vadd.f32 %v377_v63, %v368_v57  ;;  %v692_v21 = vld [vmem:[%s861_s30 + $0xa0] sm:$0xff] }
  0x20   : > { %v685_v54 = vld [vmem:[%s861_s30 + $0x68] sm:$0xff]  ;;  %v403_v17 = vmul.f32 %v702_v60, %v875_v10  ;;  %v382_v18 = vadd.f32 %v378_v11, %v369_v9  ;;  %v404_v19 = vmul.f32 %v703_v15, %v683_v22  ;;  %v688_v10 = vld [vmem:[%s861_s30 + $0x80] sm:$0xff]  ;;  %v375_v24 = vmul.f32 %v692_v21, %v893_v31 }
  0x21   : > { %v353_v62 = vmul.f32 %v685_v54, %v681_v53  ;;  %v339_v16 = vadd.f32 %v335_v52, %v321_v61  ;;  %485 = vmatpush.msra.mxu2 %v356_v8  ;;  %v394_v6 = vadd.f32 %v390_v1, %v381_v4  ;;  %v689_v22 = vld [vmem:[%s861_s30 + $0x88] sm:$0xff]  ;;  %v366_v23 = vmul.f32 %v688_v10, %v888_v25  ;;  %v696_v28 = vld [vmem:[%s861_s30 + $0xc0] sm:$0xff] }
  0x22   : > { %709 = vmatmul.msk.f32.vlgmr.msra.gmra.mxu2 %vm412_vm1, %v852_v0  ;;  %v395_v12 = vadd.f32 %v391_v13, %v382_v18  ;;  %v367_v26 = vmul.f32 %v689_v22, %v295_v41  ;;  %v693_v27 = vld [vmem:[%s861_s30 + $0xa8] sm:$0xff]  ;;  %v388_v32 = vmul.f32 %v696_v28, %v897_v33  ;;  %v700_v35 = vld [vmem:[%s861_s30 + $0xe0] sm:$0xff] }
  0x23   : > { %v357_v5 = vadd.f32 %v353_v62, %v339_v16  ;;  %v407_v14 = vadd.f32 %v403_v17, %v394_v6  ;;  %v376_v29 = vmul.f32 %v693_v27, %v665_v43  ;;  %v697_v30 = vld [vmem:[%s861_s30 + $0xc8] sm:$0xff]  ;;  %v401_v40 = vmul.f32 %v700_v35, %v902_v36 }
  0x24   : > { %v408_v20 = vadd.f32 %v404_v19, %v395_v12  ;;  %v389_v34 = vmul.f32 %v697_v30, %v673_v48  ;;  %v701_v38 = vld [vmem:[%s861_s30 + $0xe8] sm:$0xff] }
  0x25   : > { %505 = vmatpush.msra.mxu3 %v357_v5  ;;  %704 = vmatpush.msk.msra.mxu0 %vm415_vm0, %v407_v14  ;;  %v380_v37 = vadd.f32 %v376_v29, %v367_v26  ;;  %v402_v42 = vmul.f32 %v701_v38, %v681_v53 }
  0x26   : > { %711 = vmatmul.msk.f32.vlgmr.msra.gmra.mxu3 %vm412_vm1, %v852_v0  ;;  %706 = vmatpush.msk.msra.mxu1 %vm415_vm0, %v408_v20  ;;  %v379_v0 = vadd.f32 %v375_v24, %v366_v23 }
  0x27   : > { %v393_v25 = vadd.f32 %v389_v34, %v380_v37 }
  0x28   : > { %v392_v39 = vadd.f32 %v388_v32, %v379_v0 }
  0x29   : > { %v406_v31 = vadd.f32 %v402_v42, %v393_v25 }
  0x2a   : > { %v405_v44 = vadd.f32 %v401_v40, %v392_v39 }
  0x2b   : > { %457 = vmatpush.msra.mxu1 %v406_v31 }
  0x2c   : > { %437 = vmatpush.msra.mxu0 %v405_v44 }
  0x85   : > { %v411_v41 = vpop.permute.xlu0 %410 }
  0x86   : > { %705 = vmatmul.msk.f32.vlgmr.msra.gmra.mxu0 %vm412_vm1, %v411_v41  ;;  %707 = vmatmul.msk.f32.vlgmr.msra.gmra.mxu1 %vm412_vm1, %v411_v41 }
  0xa5   : > { %v487_v43 = vpop.f32.mrf.mxu2 }
  0xa9   : > { %v507_v33 = vpop.f32.mrf.mxu3 }
 0x103   : > { %v439_v45 = vpop.f32.mrf.mxu0  ;;  %v459_v46 = vpop.f32.mrf.mxu1 }
 0x104   : > { %v508_v47 = vadd.f32 %v507_v33, %v459_v46  ;;  %v488_v48 = vadd.f32 %v487_v43, %v439_v45 }
 0x106   : > { %v512_v36 = vrot.slane %v508_v47, 6 }
 0x108   : > { %v514_v49 = vsel %vm513_vm2, %v488_v48, %v512_v36 }
 0x109   : > { %516 = vst [vmem:[%s290_s11] sm:$0xf] %v514_v49 }
 0x10a PF: > { %s13_s16 = sadd.s32 1, %s796_s16   ;;  %s969_s12 = smov %s788_s14 }
 0x10b   : > { %p10_p8 = scmp.ge.s32.totalorder %s13_s16, 6   ;;  %s970_s13 = smov %s792_s15 }
 0x10c   : > { %s971_s14 = smov %s974_s17  ;;  %s972_s15 = smov %s978_s18 }
 0x10d   :  { %12 = sbr.rel (!%p10_p8) target bundleno = 3 (0x3), region = 78 }

</bundles_post_ra>
